<compile_context>
chip_gen: v5e
topology: v5e:2x2
jax: 0.10.0
libtpu: 0.0.40
codegen_flags: <defaults>
</compile_context>

<pallas_src>
import functools

import jax
import jax.numpy as jnp
from jax import lax
from jax.experimental import pallas as pl
from jax.experimental.pallas import tpu as pltpu


# --------------------------------- kernel -----------------------------------
def attention_kernel(x_ref, wqkv_ref, wproj_ref, bproj_ref, o_ref, ctx_ref,
                     *, num_heads, head_dim):
    C = num_heads * head_dim
    x = x_ref[0].astype(jnp.bfloat16)                            # (L, C)

    # Fused QKV projection: one (L,C)@(C,3C) MXU matmul, f32 accumulation.
    qkv = jnp.dot(x, wqkv_ref[...],
                  preferred_element_type=jnp.float32)            # (L, 3C)
    qkv = qkv.astype(jnp.bfloat16)

    for h in range(num_heads):                                   # unrolled
        lo = h * head_dim                                        # static, 128-aligned
        q = qkv[:, lo:lo + head_dim]                             # pre-scaled q
        k = qkv[:, C + lo:C + lo + head_dim]
        v = qkv[:, 2 * C + lo:2 * C + lo + head_dim]

        # scores = q @ k^T via dot_general contracting last dims (no .T)
        s = lax.dot_general(q, k, (((1,), (1,)), ((), ())),
                            preferred_element_type=jnp.float32)  # (L, L) f32
        s = s - jnp.max(s, axis=-1, keepdims=True)
        p = jnp.exp(s)                                           # f32 softmax stats
        denom = jnp.sum(p, axis=-1, keepdims=True)               # (L, 1) f32
        ctx = jnp.dot(p.astype(jnp.bfloat16), v,
                      preferred_element_type=jnp.float32)        # (L, hd) f32
        ctx = ctx * pl.reciprocal(denom, approx=True)            # normalize small tile
        ctx_ref[:, lo:lo + head_dim] = ctx.astype(jnp.bfloat16)  # lane-aligned store

    # Single output projection with K = C (fills the MXU contraction), + bias.
    out = jnp.dot(ctx_ref[...], wproj_ref[...],
                  preferred_element_type=jnp.float32)            # (L, C) f32
    o_ref[0] = out + bproj_ref[...]


# -------------------------------- wrapper ------------------------------------
def attention_forward(x, wqkv_k, wproj_k, b_proj, *, num_heads):
    B, L, C = x.shape
    hd = C // num_heads
    kernel = functools.partial(attention_kernel, num_heads=num_heads, head_dim=hd)
    return pl.pallas_call(
        kernel,
        out_shape=jax.ShapeDtypeStruct((B, L, C), jnp.float32),
        grid=(B,),
        in_specs=[
            # activations: one batch row per grid step
            pl.BlockSpec((1, L, C), lambda b: (b, 0, 0)),
            # fused qkv weights (C, 3C) bf16: constant index -> resident in VMEM
            pl.BlockSpec((C, 3 * C), lambda b: (0, 0)),
            # output projection (C, C) bf16: constant index -> resident in VMEM
            pl.BlockSpec((C, C), lambda b: (0, 0)),
            # projection bias (1, C) f32: constant index -> resident
            pl.BlockSpec((1, C), lambda b: (0, 0)),
        ],
        out_specs=pl.BlockSpec((1, L, C), lambda b: (b, 0, 0)),
        scratch_shapes=[pltpu.VMEM((L, C), jnp.bfloat16)],       # ctx (head-concat)
        compiler_params=pltpu.CompilerParams(
            dimension_semantics=("parallel",)),
    )(x, wqkv_k, wproj_k, b_proj)


# -------------------- one-time weight layout preparation ---------------------
def prepare_params(w_qkv, w_proj, num_heads):
    """PyTorch-layout f32 weights -> kernel layout, bf16, scale folded in.

    w_qkv : (3C, C), output rows ordered (K, H, D)  ->  (C, 3C) bf16
            (column j = k*C + h*hd + d, so per-head slices are static & aligned)
    w_proj: (C, C)                                  ->  (C, C) bf16 (transposed)
    """
    three_c, C = w_qkv.shape
    hd = C // num_heads
    scale = 1.0 / jnp.sqrt(jnp.float32(hd))
    w_qkv = w_qkv.at[:C].multiply(scale)            # fold attention scale into q
    wqkv_k = w_qkv.T.astype(jnp.bfloat16)           # (C, 3C)
    wproj_k = w_proj.T.astype(jnp.bfloat16)         # (C, C)
    return wqkv_k, wproj_k


# ------------------------ deterministic parameter init -----------------------
def init_params(key, dim, scale=0.02):
    k1, k2, k3 = jax.random.split(key, 3)
    w_qkv = scale * jax.random.normal(k1, (3 * dim, dim), jnp.float32)  # qkv (no bias)
    w_proj = scale * jax.random.normal(k2, (dim, dim), jnp.float32)     # proj weight
    b_proj = scale * jax.random.normal(k3, (1, dim), jnp.float32)       # proj bias
    return w_qkv, w_proj, b_proj


# ----------------------------- pure-JAX reference ----------------------------
def reference_forward(x, w_qkv, w_proj, b_proj, *, num_heads):
    B, L, C = x.shape
    hd = C // num_heads
    qkv = x @ w_qkv.T                                                   # (B, L, 3C)
    qkv = qkv.reshape(B, L, 3, num_heads, hd).transpose(2, 0, 3, 1, 4)  # (3,B,H,L,hd)
    q, k, v = qkv[0], qkv[1], qkv[2]
    s = jnp.einsum("bhqd,bhkd->bhqk", q, k) / jnp.sqrt(float(hd))
    p = jax.nn.softmax(s, axis=-1)
    ctx = jnp.einsum("bhqk,bhkd->bhqd", p, v)
    out = ctx.transpose(0, 2, 1, 3).reshape(B, L, C)                    # 'B H L D -> B L (H D)'
    return out @ w_proj.T + b_proj


# ----------------------------------- main -------------------------------------
if __name__ == "__main__":
    B, L, C, num_heads = 2, 128, 512, 4        # head_dim = 128 -> lane-dense

    key = jax.random.PRNGKey(0)
    kx, kp = jax.random.split(key)
    x = jax.random.normal(kx, (B, L, C), jnp.float32)
    w_qkv, w_proj, b_proj = init_params(kp, C)

    # one-time layout prep (init-time, not per forward)
    wqkv_k, wproj_k = prepare_params(w_qkv, w_proj, num_heads)

    out = attention_forward(x, wqkv_k, wproj_k, b_proj, num_heads=num_heads)
    out = jax.block_until_ready(out)

    ref = reference_forward(x, w_qkv, w_proj, b_proj, num_heads=num_heads)
    assert out.shape == (B, L, C)
    assert bool(jnp.all(jnp.isfinite(out)))
    max_err = float(jnp.max(jnp.abs(out - ref)))
    # bf16 MXU operands -> looser tolerance than the pure-f32 path
    assert jnp.allclose(out, ref, atol=2e-2, rtol=2e-2), max_err
    print("KERNEL_OK")
</pallas_src>

<mosaic_0001>
module attributes {stable_mosaic.version = 11 : i64} {
  func.func @attention_kernel(%arg0: i32, %arg1: memref<1x128x512xf32, #tpu.memory_space<vmem>>, %arg2: memref<512x1536xbf16, #tpu.memory_space<vmem>>, %arg3: memref<512x512xbf16, #tpu.memory_space<vmem>>, %arg4: memref<1x512xf32, #tpu.memory_space<vmem>>, %arg5: memref<1x128x512xf32, #tpu.memory_space<vmem>>, %arg6: memref<128x512xbf16, #tpu.memory_space<vmem>>) attributes {dimension_semantics = [#tpu.dimension_semantics<parallel>], iteration_bounds = array<i64: 2>, scalar_prefetch = 0 : i64, scratch_operands = 1 : i64, tpu.core_type = #tpu.core_type<tc>, window_params = [{transform_indices = @transform_0, window_bounds = array<i64: 1, 128, 512>}, {pipeline_mode = #tpu.pipeline_mode<synchronous>, transform_indices = @transform_1, window_bounds = array<i64: 512, 1536>}, {pipeline_mode = #tpu.pipeline_mode<synchronous>, transform_indices = @transform_2, window_bounds = array<i64: 512, 512>}, {pipeline_mode = #tpu.pipeline_mode<synchronous>, transform_indices = @transform_3, window_bounds = array<i64: 1, 512>}, {transform_indices = @transform_4, window_bounds = array<i64: 1, 128, 512>}]} {
    %c0 = arith.constant 0 : index
    %c0_0 = arith.constant 0 : index
    %c0_1 = arith.constant 0 : index
    %0 = vector.load %arg1[%c0, %c0_0, %c0_1] : memref<1x128x512xf32, #tpu.memory_space<vmem>>, vector<1x128x512xf32>
    %1 = vector.shape_cast %0 : vector<1x128x512xf32> to vector<128x512xf32>
    %2 = arith.truncf %1 : vector<128x512xf32> to vector<128x512xbf16>
    %c0_2 = arith.constant 0 : index
    %c0_3 = arith.constant 0 : index
    %3 = vector.load %arg2[%c0_2, %c0_3] : memref<512x1536xbf16, #tpu.memory_space<vmem>>, vector<512x1536xbf16>
    %cst = arith.constant dense<0.000000e+00> : vector<128x1536xf32>
    %4 = tpu.matmul %2, %3, %cst {dimension_numbers = #tpu.dot_dimension_numbers<[1], [0], [0], [1], [0, 0, 1, 1], [], []>} : vector<128x512xbf16>, vector<512x1536xbf16>, vector<128x1536xf32> -> vector<128x1536xf32>
    %5 = arith.truncf %4 : vector<128x1536xf32> to vector<128x1536xbf16>
    %6 = vector.extract_strided_slice %5 {offsets = [0, 0], sizes = [128, 128], strides = [1, 1]} : vector<128x1536xbf16> to vector<128x128xbf16>
    %7 = vector.extract_strided_slice %5 {offsets = [0, 512], sizes = [128, 128], strides = [1, 1]} : vector<128x1536xbf16> to vector<128x128xbf16>
    %8 = vector.extract_strided_slice %5 {offsets = [0, 1024], sizes = [128, 128], strides = [1, 1]} : vector<128x1536xbf16> to vector<128x128xbf16>
    %cst_4 = arith.constant dense<0.000000e+00> : vector<128x128xf32>
    %9 = tpu.matmul %6, %7, %cst_4 {dimension_numbers = #tpu.dot_dimension_numbers<[1], [1], [0], [0], [0, 0, 1, 0], [], []>} : vector<128x128xbf16>, vector<128x128xbf16>, vector<128x128xf32> -> vector<128x128xf32>
    %cst_5 = arith.constant dense<0xFF800000> : vector<128xf32>
    %10 = vector.multi_reduction <maximumf>, %9, %cst_5 [1] : vector<128x128xf32> to vector<128xf32>
    %11 = vector.shape_cast %10 : vector<128xf32> to vector<128x1xf32>
    %12 = vector.broadcast %11 : vector<128x1xf32> to vector<128x128xf32>
    %13 = arith.subf %9, %12 : vector<128x128xf32>
    %14 = math.exp %13 : vector<128x128xf32>
    %cst_6 = arith.constant dense<0.000000e+00> : vector<128xf32>
    %15 = vector.multi_reduction <add>, %14, %cst_6 [1] : vector<128x128xf32> to vector<128xf32>
    %16 = vector.shape_cast %15 : vector<128xf32> to vector<128x1xf32>
    %17 = arith.truncf %14 : vector<128x128xf32> to vector<128x128xbf16>
    %cst_7 = arith.constant dense<0.000000e+00> : vector<128x128xf32>
    %18 = tpu.matmul %17, %8, %cst_7 {dimension_numbers = #tpu.dot_dimension_numbers<[1], [0], [0], [1], [0, 0, 1, 1], [], []>} : vector<128x128xbf16>, vector<128x128xbf16>, vector<128x128xf32> -> vector<128x128xf32>
    %19 = tpu.reciprocal %16 {approx = true} : vector<128x1xf32> -> vector<128x1xf32>
    %20 = vector.broadcast %19 : vector<128x1xf32> to vector<128x128xf32>
    %21 = arith.mulf %18, %20 : vector<128x128xf32>
    %22 = arith.truncf %21 : vector<128x128xf32> to vector<128x128xbf16>
    %c0_8 = arith.constant 0 : index
    %c0_9 = arith.constant 0 : index
    %23 = vector.load %arg6[%c0_8, %c0_9] : memref<128x512xbf16, #tpu.memory_space<vmem>>, vector<128x128xbf16>
    tpu.vector_store %arg6[%c0_8, %c0_9], %22 {strides = array<i32>} : memref<128x512xbf16, #tpu.memory_space<vmem>>, vector<128x128xbf16>,
    %24 = vector.extract_strided_slice %5 {offsets = [0, 128], sizes = [128, 128], strides = [1, 1]} : vector<128x1536xbf16> to vector<128x128xbf16>
    %25 = vector.extract_strided_slice %5 {offsets = [0, 640], sizes = [128, 128], strides = [1, 1]} : vector<128x1536xbf16> to vector<128x128xbf16>
    %26 = vector.extract_strided_slice %5 {offsets = [0, 1152], sizes = [128, 128], strides = [1, 1]} : vector<128x1536xbf16> to vector<128x128xbf16>
    %cst_10 = arith.constant dense<0.000000e+00> : vector<128x128xf32>
    %27 = tpu.matmul %24, %25, %cst_10 {dimension_numbers = #tpu.dot_dimension_numbers<[1], [1], [0], [0], [0, 0, 1, 0], [], []>} : vector<128x128xbf16>, vector<128x128xbf16>, vector<128x128xf32> -> vector<128x128xf32>
    %cst_11 = arith.constant dense<0xFF800000> : vector<128xf32>
    %28 = vector.multi_reduction <maximumf>, %27, %cst_11 [1] : vector<128x128xf32> to vector<128xf32>
    %29 = vector.shape_cast %28 : vector<128xf32> to vector<128x1xf32>
    %30 = vector.broadcast %29 : vector<128x1xf32> to vector<128x128xf32>
    %31 = arith.subf %27, %30 : vector<128x128xf32>
    %32 = math.exp %31 : vector<128x128xf32>
    %cst_12 = arith.constant dense<0.000000e+00> : vector<128xf32>
    %33 = vector.multi_reduction <add>, %32, %cst_12 [1] : vector<128x128xf32> to vector<128xf32>
    %34 = vector.shape_cast %33 : vector<128xf32> to vector<128x1xf32>
    %35 = arith.truncf %32 : vector<128x128xf32> to vector<128x128xbf16>
    %cst_13 = arith.constant dense<0.000000e+00> : vector<128x128xf32>
    %36 = tpu.matmul %35, %26, %cst_13 {dimension_numbers = #tpu.dot_dimension_numbers<[1], [0], [0], [1], [0, 0, 1, 1], [], []>} : vector<128x128xbf16>, vector<128x128xbf16>, vector<128x128xf32> -> vector<128x128xf32>
    %37 = tpu.reciprocal %34 {approx = true} : vector<128x1xf32> -> vector<128x1xf32>
    %38 = vector.broadcast %37 : vector<128x1xf32> to vector<128x128xf32>
    %39 = arith.mulf %36, %38 : vector<128x128xf32>
    %40 = arith.truncf %39 : vector<128x128xf32> to vector<128x128xbf16>
    %c0_14 = arith.constant 0 : index
    %c128 = arith.constant 128 : index
    %41 = vector.load %arg6[%c0_14, %c128] : memref<128x512xbf16, #tpu.memory_space<vmem>>, vector<128x128xbf16>
    tpu.vector_store %arg6[%c0_14, %c128], %40 {strides = array<i32>} : memref<128x512xbf16, #tpu.memory_space<vmem>>, vector<128x128xbf16>,
    %42 = vector.extract_strided_slice %5 {offsets = [0, 256], sizes = [128, 128], strides = [1, 1]} : vector<128x1536xbf16> to vector<128x128xbf16>
    %43 = vector.extract_strided_slice %5 {offsets = [0, 768], sizes = [128, 128], strides = [1, 1]} : vector<128x1536xbf16> to vector<128x128xbf16>
    %44 = vector.extract_strided_slice %5 {offsets = [0, 1280], sizes = [128, 128], strides = [1, 1]} : vector<128x1536xbf16> to vector<128x128xbf16>
    %cst_15 = arith.constant dense<0.000000e+00> : vector<128x128xf32>
    %45 = tpu.matmul %42, %43, %cst_15 {dimension_numbers = #tpu.dot_dimension_numbers<[1], [1], [0], [0], [0, 0, 1, 0], [], []>} : vector<128x128xbf16>, vector<128x128xbf16>, vector<128x128xf32> -> vector<128x128xf32>
    %cst_16 = arith.constant dense<0xFF800000> : vector<128xf32>
    %46 = vector.multi_reduction <maximumf>, %45, %cst_16 [1] : vector<128x128xf32> to vector<128xf32>
    %47 = vector.shape_cast %46 : vector<128xf32> to vector<128x1xf32>
    %48 = vector.broadcast %47 : vector<128x1xf32> to vector<128x128xf32>
    %49 = arith.subf %45, %48 : vector<128x128xf32>
    %50 = math.exp %49 : vector<128x128xf32>
    %cst_17 = arith.constant dense<0.000000e+00> : vector<128xf32>
    %51 = vector.multi_reduction <add>, %50, %cst_17 [1] : vector<128x128xf32> to vector<128xf32>
    %52 = vector.shape_cast %51 : vector<128xf32> to vector<128x1xf32>
    %53 = arith.truncf %50 : vector<128x128xf32> to vector<128x128xbf16>
    %cst_18 = arith.constant dense<0.000000e+00> : vector<128x128xf32>
    %54 = tpu.matmul %53, %44, %cst_18 {dimension_numbers = #tpu.dot_dimension_numbers<[1], [0], [0], [1], [0, 0, 1, 1], [], []>} : vector<128x128xbf16>, vector<128x128xbf16>, vector<128x128xf32> -> vector<128x128xf32>
    %55 = tpu.reciprocal %52 {approx = true} : vector<128x1xf32> -> vector<128x1xf32>
    %56 = vector.broadcast %55 : vector<128x1xf32> to vector<128x128xf32>
    %57 = arith.mulf %54, %56 : vector<128x128xf32>
    %58 = arith.truncf %57 : vector<128x128xf32> to vector<128x128xbf16>
    %c0_19 = arith.constant 0 : index
    %c256 = arith.constant 256 : index
    %59 = vector.load %arg6[%c0_19, %c256] : memref<128x512xbf16, #tpu.memory_space<vmem>>, vector<128x128xbf16>
    tpu.vector_store %arg6[%c0_19, %c256], %58 {strides = array<i32>} : memref<128x512xbf16, #tpu.memory_space<vmem>>, vector<128x128xbf16>,
    %60 = vector.extract_strided_slice %5 {offsets = [0, 384], sizes = [128, 128], strides = [1, 1]} : vector<128x1536xbf16> to vector<128x128xbf16>
    %61 = vector.extract_strided_slice %5 {offsets = [0, 896], sizes = [128, 128], strides = [1, 1]} : vector<128x1536xbf16> to vector<128x128xbf16>
    %62 = vector.extract_strided_slice %5 {offsets = [0, 1408], sizes = [128, 128], strides = [1, 1]} : vector<128x1536xbf16> to vector<128x128xbf16>
    %cst_20 = arith.constant dense<0.000000e+00> : vector<128x128xf32>
    %63 = tpu.matmul %60, %61, %cst_20 {dimension_numbers = #tpu.dot_dimension_numbers<[1], [1], [0], [0], [0, 0, 1, 0], [], []>} : vector<128x128xbf16>, vector<128x128xbf16>, vector<128x128xf32> -> vector<128x128xf32>
    %cst_21 = arith.constant dense<0xFF800000> : vector<128xf32>
    %64 = vector.multi_reduction <maximumf>, %63, %cst_21 [1] : vector<128x128xf32> to vector<128xf32>
    %65 = vector.shape_cast %64 : vector<128xf32> to vector<128x1xf32>
    %66 = vector.broadcast %65 : vector<128x1xf32> to vector<128x128xf32>
    %67 = arith.subf %63, %66 : vector<128x128xf32>
    %68 = math.exp %67 : vector<128x128xf32>
    %cst_22 = arith.constant dense<0.000000e+00> : vector<128xf32>
    %69 = vector.multi_reduction <add>, %68, %cst_22 [1] : vector<128x128xf32> to vector<128xf32>
    %70 = vector.shape_cast %69 : vector<128xf32> to vector<128x1xf32>
    %71 = arith.truncf %68 : vector<128x128xf32> to vector<128x128xbf16>
    %cst_23 = arith.constant dense<0.000000e+00> : vector<128x128xf32>
    %72 = tpu.matmul %71, %62, %cst_23 {dimension_numbers = #tpu.dot_dimension_numbers<[1], [0], [0], [1], [0, 0, 1, 1], [], []>} : vector<128x128xbf16>, vector<128x128xbf16>, vector<128x128xf32> -> vector<128x128xf32>
    %73 = tpu.reciprocal %70 {approx = true} : vector<128x1xf32> -> vector<128x1xf32>
    %74 = vector.broadcast %73 : vector<128x1xf32> to vector<128x128xf32>
    %75 = arith.mulf %72, %74 : vector<128x128xf32>
    %76 = arith.truncf %75 : vector<128x128xf32> to vector<128x128xbf16>
    %c0_24 = arith.constant 0 : index
    %c384 = arith.constant 384 : index
    %77 = vector.load %arg6[%c0_24, %c384] : memref<128x512xbf16, #tpu.memory_space<vmem>>, vector<128x128xbf16>
    tpu.vector_store %arg6[%c0_24, %c384], %76 {strides = array<i32>} : memref<128x512xbf16, #tpu.memory_space<vmem>>, vector<128x128xbf16>,
    %c0_25 = arith.constant 0 : index
    %c0_26 = arith.constant 0 : index
    %78 = vector.load %arg6[%c0_25, %c0_26] : memref<128x512xbf16, #tpu.memory_space<vmem>>, vector<128x512xbf16>
    %c0_27 = arith.constant 0 : index
    %c0_28 = arith.constant 0 : index
    %79 = vector.load %arg3[%c0_27, %c0_28] : memref<512x512xbf16, #tpu.memory_space<vmem>>, vector<512x512xbf16>
    %cst_29 = arith.constant dense<0.000000e+00> : vector<128x512xf32>
    %80 = tpu.matmul %78, %79, %cst_29 {dimension_numbers = #tpu.dot_dimension_numbers<[1], [0], [0], [1], [0, 0, 1, 1], [], []>} : vector<128x512xbf16>, vector<512x512xbf16>, vector<128x512xf32> -> vector<128x512xf32>
    %c0_30 = arith.constant 0 : index
    %c0_31 = arith.constant 0 : index
    %81 = vector.load %arg4[%c0_30, %c0_31] : memref<1x512xf32, #tpu.memory_space<vmem>>, vector<1x512xf32>
    %82 = vector.broadcast %81 : vector<1x512xf32> to vector<128x512xf32>
    %83 = arith.addf %80, %82 : vector<128x512xf32>
    %c0_32 = arith.constant 0 : index
    %c0_33 = arith.constant 0 : index
    %c0_34 = arith.constant 0 : index
    %84 = vector.load %arg5[%c0_32, %c0_33, %c0_34] : memref<1x128x512xf32, #tpu.memory_space<vmem>>, vector<1x128x512xf32>
    %85 = vector.shape_cast %84 : vector<1x128x512xf32> to vector<128x512xf32>
    %86 = vector.shape_cast %83 : vector<128x512xf32> to vector<1x128x512xf32>
    tpu.vector_store %arg5[%c0_32, %c0_33, %c0_34], %86 {strides = array<i32>} : memref<1x128x512xf32, #tpu.memory_space<vmem>>, vector<1x128x512xf32>,
    return
  }
  func.func @transform_0(%arg0: i32) -> (i32, i32, i32) {
    %c0_i32 = arith.constant 0 : i32
    %c0_i32_0 = arith.constant 0 : i32
    %c0_i32_1 = arith.constant 0 : i32
    return %arg0, %c0_i32, %c0_i32_0 : i32, i32, i32
  }
  func.func @transform_1(%arg0: i32) -> (i32, i32) {
    %c0_i32 = arith.constant 0 : i32
    %c0_i32_0 = arith.constant 0 : i32
    %c0_i32_1 = arith.constant 0 : i32
    return %c0_i32, %c0_i32_0 : i32, i32
  }
  func.func @transform_2(%arg0: i32) -> (i32, i32) {
    %c0_i32 = arith.constant 0 : i32
    %c0_i32_0 = arith.constant 0 : i32
    %c0_i32_1 = arith.constant 0 : i32
    return %c0_i32, %c0_i32_0 : i32, i32
  }
  func.func @transform_3(%arg0: i32) -> (i32, i32) {
    %c0_i32 = arith.constant 0 : i32
    %c0_i32_0 = arith.constant 0 : i32
    %c0_i32_1 = arith.constant 0 : i32
    return %c0_i32, %c0_i32_0 : i32, i32
  }
  func.func @transform_4(%arg0: i32) -> (i32, i32, i32) {
    %c0_i32 = arith.constant 0 : i32
    %c0_i32_0 = arith.constant 0 : i32
    %c0_i32_1 = arith.constant 0 : i32
    return %arg0, %c0_i32, %c0_i32_0 : i32, i32, i32
  }
}

</mosaic_0001>

<bundles_post_ra>
// kernel: tpu_custom_call.1
= control target key start
LH: loop header
LB: loop body
LE: loop exit
PB: predicated region body
PF: predicated region fallthrough
CT: control target
= control target key end

     0   :  { %9 = vsyncpa [#allocation4], 0  ;;  %s14077_s0 = inlined_call_operand.hbm [shape: f32[2,128,512], index: 0, kind: input, shape index: {}]   ;;  %s14078_s1 = inlined_call_operand.hbm [shape: bf16[512,1536], index: 1, kind: input, shape index: {}]   ;;  %s14079_s2 = inlined_call_operand.hbm [shape: bf16[512,512], index: 2, kind: input, shape index: {}]   ;;  %s14080_s3 = inlined_call_operand.hbm [shape: f32[1,512], index: 3, kind: input, shape index: {}]   ;;  %s14081_s4 = inlined_call_operand.hbm [shape: f32[2,128,512], index: 4, kind: output, shape index: {}]  }
   0x1   :  { %11 = vsyncpa [#allocation4 + $0x1], 0 }
   0x2   :  { %12 = vsyncpa [#allocation7], 0 }
   0x3   :  { %13 = vsyncpa [#allocation10], 0 }
   0x4   :  { %14 = vsyncpa [#allocation5], 0 }
   0x5   :  { %16 = vsyncpa [#allocation5 + $0x1], 0  ;;  %s11974_s15 = smov 0   ;;  %s11976_s16 = smov 0  }
   0x6   :  { %s11978_s17 = smov 0   ;;  %s11980_s18 = smov 0  }
   0x7 LB: > { %s11995_s19 = sadd.s32 4294967295, %s11936_s18   ;;  %s8658_s20 = sadd.s32 4294967294, %s11936_s18   ;;  %s11936_s18 = sphi %s11980_s18, %s14333_s18   ;;  %s11932_s17 = sphi %s11978_s17, %s14332_s17   ;;  %s11928_s16 = sphi %s11976_s16, %s14331_s16   ;;  %s11924_s15 = sphi %s11974_s15, %s14330_s15  }
   0x8   : > { %p42_p0 = scmp.ne.s32.totalorder %s11928_s16, %s11924_s15  ;;  %p43_p1 = scmp.eq.s32.totalorder %s11995_s19, 0 }
   0x9   : > { %p129_p2 = scmp.eq.s32.totalorder %s11995_s19, 1  ;;  %p135_p3 = scmp.eq.s32.totalorder %s8658_s20, 1 }
   0xa   : > { %p12004_p4 = por %p43_p1, %p42_p0  ;;  %p8659_p5 = scmp.ge.s32.totalorder %s11936_s18, 1 }
   0xb   : > { %p12009_p6 = por %p135_p3, %p42_p0  ;;  %p142_p7 = scmp.lt.s32.totalorder %s11936_s18, 3 }
   0xc   : > { %s153_s25 = sshll.u32 %s14078_s1, 4  ;;  %s11938_s27 = smov [#allocation6]   ;;  %s154_s25 = int_to_ptr.hbm [resolvable:$true] %s153_s25 }
   0xd   : > { %p12017_p8 = pnand %p8659_p5, %p142_p7  ;;  %s155_s28 = sshll.u32 %s11938_s27, 4  ;;  %s156_s28 = int_to_ptr.vmem [resolvable:$true] %s155_s28 }
   0xe   : > { %s167_s6 = sshll.u32 %s14079_s2, 4  ;;  %s11939_s7 = smov 768   ;;  %s168_s6 = int_to_ptr.hbm [resolvable:$true] %s167_s6 }
   0xf   : > { %p11416_p9 = pneg %p12017_p8  ;;  %s11940_s8 = smov 48  }
  0x10   : > { %s11941_s9 = smov [#allocation8]   ;;  %s11942_s11 = smov 256  }
  0x11   : > { %p12025_p10 = pnand %p11416_p9, %p43_p1  ;;  %s169_s10 = sshll.u32 %s11941_s9, 4  ;;  %s170_s10 = int_to_ptr.vmem [resolvable:$true] %s169_s10 }
  0x12   : > { %s11943_s12 = smov 16   ;;  %s182_s20 = sshll.u32 %s14080_s3, 4  ;;  %s183_s20 = int_to_ptr.hbm [resolvable:$true] %s182_s20 }
  0x13   : > { %11419 = dma.hbm_to_vmem [thread:$0]  (!%p12025_p10), %s154_s25, 49152, %s156_s28, [#allocation7], %s11939_s7, %s11939_s7, %s11940_s8  }
  0x14   : > { %11422 = dma.hbm_to_vmem [thread:$0]  (!%p12025_p10), %s168_s6, 16384, %s170_s10, [#allocation7], %s11942_s11, %s11942_s11, %s11943_s12  }
  0x15   : > { %s11944_s23 = smov [#allocation9]   ;;  %s12043_s25 = sadd.s32 1, %s11936_s18  }
  0x16   : > { %s184_s24 = sshll.u32 %s11944_s23, 4  ;;  %s26_s27 = ssub.s32 %s11936_s18, %s12043_s25  ;;  %s185_s24 = int_to_ptr.vmem [resolvable:$true] %s184_s24 }
  0x17   : > { %11425 = dma.hbm_to_vmem [thread:$0]  (!%p12025_p10), %s183_s20, 64, %s185_s24, [#allocation10]  }
  0x18   : > { %s29_s28 = sadd.s32 1, %s11932_s17  ;;  %p27_p12 = scmp.eq.s32.totalorder %s26_s27, 0 }
  0x19   : > { %p36_p13 = scmp.ne.s32.totalorder %s11932_s17, %s11928_s16  ;;  %p37_p0 = scmp.eq.s32.totalorder %s11936_s18, 0 }
  0x1a   : > { %p11437_p3 = scmp.lt.s32.totalorder %s11936_s18, 2  ;;  %s195_s29 = sand.u32 1, %s11932_s17  }
  0x1b   : > { %s12053_s30 = scalar_select %p27_p12, %s11932_s17, %s29_s28  }
  0x1c   : > { %p38_p5 = por %p37_p0, %p36_p13  ;;  %p12057_p7 = por %p129_p2, %p36_p13 }
  0x1d   : > { %s10854_s6 = sshll.u32 %s11936_s18, 9  ;;  %s8664_s7 = sshll.u32 %s195_s29, 9 }
  0x1e   : > { %s204_s10 = scalar_lea.hbm %s14077_s0, %s10854_s6  ;;  %s199_s12 = scalar_lea.vmem [#allocation3], %s8664_s7 }
  0x1f   : > { %s205_s11 = sshll.u32 %s204_s10, 4  ;;  %s207_s13 = sshll.u32 %s199_s12, 4  ;;  %s206_s11 = int_to_ptr.hbm [resolvable:$true] %s205_s11  ;;  %s208_s13 = int_to_ptr.vmem [resolvable:$true] %s207_s13 }
  0x20   : > { %p12068_p9 = pnand %p11437_p3, %p38_p5  ;;  %s196_s20 = scalar_lea.sflag [#allocation4], %s195_s29 }
  0x21   : > { %s11832_s23 = sshra.s32 %s206_s11, 4  ;;  %s11839_s6 = scalar_lea.hbm %s14077_s0, 1024  ;;  %s11833_s23 = int_to_ptr.hbm [resolvable:$true] %s11832_s23 }
  0x22   : > { %s11834_s24 = scalar_lea.hbm %s11833_s23, 512  ;;  %p11836_p10 = pneg %p12068_p9 }
  0x23   : > { %p11835_p2 = scmp.ne.s32.totalorder %s11833_s23, %s11834_s24  ;;  %p11840_p0 = scmp.lt.s32.totalorder %s11833_s23, %s14077_s0 }
  0x24   : > { %p11841_p3 = scmp.lt.s32.totalorder %s11839_s6, %s11834_s24 }
  0x25   : > { %p11837_p12 = pnand %p11836_p10, %p11835_p2 }
  0x26   : > { %p11842_p5 = por %p11841_p3, %p11840_p0 }
  0x27   : > { %p11838_p13 = pneg %p11837_p12 }
  0x29   : > { %p11843_p11 = pnand %p11842_p5, %p11838_p13 }
  0x2b   : > { %11846 = shalt.err (!%p11843_p11)
}
  0x2c   : > { %s11945_s29 = smov 512   ;;  %s11946_s9 = smov 32  }
  0x2d   : > { %11429 = dma.hbm_to_vmem [thread:$0]  (!%p12068_p9), %s206_s11, 8192, %s208_s13, %s196_s20, %s11945_s29, %s11945_s29, %s11946_s9  }
  0x2e   : > { %219 = sbr.rel (%p12017_p8) target bundleno = 2833 (0xb11), region = 36 }
  0x33   : > { %s12085_s10 = sand.u32 1, %s11928_s16  }
  0x34   : > { %s8668_s12 = sshll.u32 %s12085_s10, 9  ;;  %s222_s23 = scalar_lea.sflag [#allocation4], %s12085_s10 }
  0x35   : > { %s12091_s24 = scalar_lea.vmem [#allocation3], %s8668_s12 }
  0x36   : > { %11907 = dma.done.wait (%p12004_p4), %s222_s23, 8192  }
  0x37   : > { %11909 = vsyncadd (%p12004_p4), %s222_s23, 4294959104 }
  0x38   : > { %11911 = dma.done.wait (%p43_p1), [#allocation7], 65536  }
  0x39   : > { %11913 = vsyncadd (%p43_p1), [#allocation7], 4294901760 }
  0x3a   : > { %11915 = dma.done.wait (%p43_p1), [#allocation10], 64  }
  0x3b   : > { %11917 = vsyncadd (%p43_p1), [#allocation10], 4294967232  ;;  %v9011_v0 = vld [vmem:[#allocation6 + $0x2a0] sm:$0xf]  ;;  %v10945_v1 = vld [vmem:[#allocation6 + $0x2cc] sm:$0xf0] }
  0x3c   : > { %v9779_v2 = vld [vmem:[#allocation6 + $0x8a0] sm:$0xf]  ;;  %v9012_v3 = vor.u32 %v10945_v1, %v9011_v0  ;;  %v11137_v4 = vld [vmem:[#allocation6 + $0x8cc] sm:$0xf0]  ;;  %s13810_s21 = scalar_lea.vmem [#allocation11], %s8668_s12  ;;  %s11399_s26 = sshll.u32 %s11995_s19, 9 }
  0x3d   : > { %v10163_v5 = vld [vmem:[#allocation6 + $0xba0] sm:$0xf]  ;;  %v11233_v6 = vld [vmem:[#allocation6 + $0xbcc] sm:$0xf0]  ;;  %v9780_v7 = vor.u32 %v11137_v4, %v9779_v2  ;;  %s8552_s14 = scalar_lea.hbm %s14081_s4, %s11399_s26  ;;  %s8553_s20 = sshll.u32 %s13810_s21, 4  ;;  %s8554_s20 = int_to_ptr.vmem [resolvable:$true] %s8553_s20 }
  0x3e   : > { %v10164_v8 = vor.u32 %v11233_v6, %v10163_v5  ;;  %v8963_v9 = vld [vmem:[#allocation6 + $0x240] sm:$0xf]  ;;  %v10933_v10 = vld [vmem:[#allocation6 + $0x26c] sm:$0xf0]  ;;  %2666 = vmatpush.bf16.msra.mxu0 %v9012_v3  ;;  %s8555_s27 = sshll.u32 %s8552_s14, 4  ;;  %s8541_s19 = scalar_lea.sflag [#allocation5], %s12085_s10  ;;  %s8556_s27 = int_to_ptr.hbm [resolvable:$true] %s8555_s27 }
  0x3f   : > { %v9395_v11 = vld [vmem:[#allocation6 + $0x5a0] sm:$0xf]  ;;  %v8964_v12 = vor.u32 %v10933_v10, %v8963_v9  ;;  %v11041_v13 = vld [vmem:[#allocation6 + $0x5cc] sm:$0xf0]  ;;  %2764 = vmatpush.bf16.msra.mxu2 %v9780_v7  ;;  %s11876_s28 = sshra.s32 %s8556_s27, 4  ;;  %s11882_s29 = scalar_lea.hbm %s14081_s4, 1024  ;;  %s11877_s28 = int_to_ptr.hbm [resolvable:$true] %s11876_s28 }
  0x40   : > { %v9731_v14 = vld [vmem:[#allocation6 + $0x840] sm:$0xf]  ;;  %v11125_v15 = vld [vmem:[#allocation6 + $0x86c] sm:$0xf0]  ;;  %2813 = vmatpush.bf16.msra.mxu3 %v10164_v8  ;;  %v9396_v16 = vor.u32 %v11041_v13, %v9395_v11  ;;  %s11878_s6 = scalar_lea.hbm %s11877_s28, 512  ;;  %p11883_p11 = scmp.lt.s32.totalorder %s11877_s28, %s14081_s4 }
  0x41   : > { %v9732_v17 = vor.u32 %v11125_v15, %v9731_v14  ;;  %v10115_v18 = vld [vmem:[#allocation6 + $0xb40] sm:$0xf]  ;;  %v11221_v19 = vld [vmem:[#allocation6 + $0xb6c] sm:$0xf0]  ;;  %p11879_p1 = scmp.ne.s32.totalorder %s11877_s28, %s11878_s6  ;;  %p11884_p9 = scmp.lt.s32.totalorder %s11882_s29, %s11878_s6 }
  0x42   : > { %v8915_v20 = vld [vmem:[#allocation6 + $0x1e0] sm:$0xf]  ;;  %v10116_v21 = vor.u32 %v11221_v19, %v10115_v18  ;;  %v10921_v22 = vld [vmem:[#allocation6 + $0x20c] sm:$0xf0]  ;;  %2715 = vmatpush.bf16.msra.mxu1 %v9396_v16  ;;  %2667 = vmatpush.bf16.msra.mxu0 %v8964_v12 }
  0x43   : > { %v9347_v23 = vld [vmem:[#allocation6 + $0x540] sm:$0xf]  ;;  %v11029_v24 = vld [vmem:[#allocation6 + $0x56c] sm:$0xf0]  ;;  %v8916_v29 = vor.u32 %v10921_v22, %v8915_v20  ;;  %2765 = vmatpush.bf16.msra.mxu2 %v9732_v17  ;;  %p11880_p4 = pnand %p11879_p1, %p12057_p7  ;;  %p11885_p2 = por %p11884_p9, %p11883_p11 }
  0x44   : > { %v9348_v25 = vor.u32 %v11029_v24, %v9347_v23  ;;  %v9683_v26 = vld [vmem:[#allocation6 + $0x7e0] sm:$0xf]  ;;  %v11113_v27 = vld [vmem:[#allocation6 + $0x80c] sm:$0xf0]  ;;  %2814 = vmatpush.bf16.msra.mxu3 %v10116_v21 }
  0x45   : > { %v10067_v28 = vld [vmem:[#allocation6 + $0xae0] sm:$0xf]  ;;  %v11209_v30 = vld [vmem:[#allocation6 + $0xb0c] sm:$0xf0]  ;;  %v9684_v33 = vor.u32 %v11113_v27, %v9683_v26  ;;  %v11131_v27 = vld [vmem:[#allocation6 + $0x8a4] sm:$0xf]  ;;  %p11881_p8 = pneg %p11880_p4 }
  0x46   : > { %v8867_v31 = vld [vmem:[#allocation6 + $0x180] sm:$0xf]  ;;  %v10909_v32 = vld [vmem:[#allocation6 + $0x1ac] sm:$0xf0]  ;;  %v10068_v34 = vor.u32 %v11209_v30, %v10067_v28  ;;  %2716 = vmatpush.bf16.msra.mxu1 %v9348_v25  ;;  %2668 = vmatpush.bf16.msra.mxu0 %v8916_v29  ;;  %v9781_v29 = vld [vmem:[#allocation6 + $0x8d0] sm:$0xf0] }
  0x47   : > { %v9299_v35 = vld [vmem:[#allocation6 + $0x4e0] sm:$0xf]  ;;  %v11017_v36 = vld [vmem:[#allocation6 + $0x50c] sm:$0xf0]  ;;  %v8868_v42 = vor.u32 %v10909_v32, %v8867_v31  ;;  %2766 = vmatpush.bf16.msra.mxu2 %v9684_v33  ;;  %v10939_v30 = vld [vmem:[#allocation6 + $0x2a4] sm:$0xf]  ;;  %p11886_p10 = pnand %p11885_p2, %p11881_p8 }
  0x48   : > { %v9635_v37 = vld [vmem:[#allocation6 + $0x780] sm:$0xf]  ;;  %v11101_v38 = vld [vmem:[#allocation6 + $0x7ac] sm:$0xf0]  ;;  %v9300_v41 = vor.u32 %v11017_v36, %v9299_v35  ;;  %2815 = vmatpush.bf16.msra.mxu3 %v10068_v34  ;;  %v9013_v31 = vld [vmem:[#allocation6 + $0x2d0] sm:$0xf0] }
  0x49   : > { %v10019_v39 = vld [vmem:[#allocation6 + $0xa80] sm:$0xf]  ;;  %v11197_v40 = vld [vmem:[#allocation6 + $0xaac] sm:$0xf0]  ;;  %v9636_v45 = vor.u32 %v11101_v38, %v9635_v37 }
  0x4a   : > { %v9251_v43 = vld [vmem:[#allocation6 + $0x480] sm:$0xf]  ;;  %v11005_v44 = vld [vmem:[#allocation6 + $0x4ac] sm:$0xf0]  ;;  %v10020_v46 = vor.u32 %v11197_v40, %v10019_v39  ;;  %2717 = vmatpush.bf16.msra.mxu1 %v9300_v41  ;;  %2669 = vmatpush.bf16.msra.mxu0 %v8868_v42  ;;  %v269_v39 = vld [vmem:[%s12091_s24 + $0x18] sm:$0xff]  ;;  %v9784_v41 = vor.u32 %v11131_v27, %v9781_v29 }
  0x4b   : > { %v8819_v47 = vld [vmem:[#allocation6 + $0x120] sm:$0xf]  ;;  %v10897_v48 = vld [vmem:[#allocation6 + $0x14c] sm:$0xf0]  ;;  %v9252_v53 = vor.u32 %v11005_v44, %v9251_v43  ;;  %2767 = vmatpush.bf16.msra.mxu2 %v9636_v45  ;;  %v273_v40 = vld [vmem:[%s12091_s24 + $0x38] sm:$0xff]  ;;  %v9016_v43 = vor.u32 %v10939_v30, %v9013_v31 }
  0x4c   : > { %v9587_v49 = vld [vmem:[#allocation6 + $0x720] sm:$0xf]  ;;  %v11089_v50 = vld [vmem:[#allocation6 + $0x74c] sm:$0xf0]  ;;  %v8820_v54 = vor.u32 %v10897_v48, %v8819_v47  ;;  %2816 = vmatpush.bf16.msra.mxu3 %v10020_v46  ;;  %v267_v42 = vld [vmem:[%s12091_s24 + $0x8] sm:$0xff] }
  0x4d   : > { %v9971_v51 = vld [vmem:[#allocation6 + $0xa20] sm:$0xf]  ;;  %v11185_v52 = vld [vmem:[#allocation6 + $0xa4c] sm:$0xf0]  ;;  %v9588_v57 = vor.u32 %v11089_v50, %v9587_v49  ;;  %v271_v46 = vld [vmem:[%s12091_s24 + $0x28] sm:$0xff]  ;;  %v12117_v50 = vpack.c.bf16 %v273_v40, %v269_v39 }
  0x4e   : > { %v9203_v55 = vld [vmem:[#allocation6 + $0x420] sm:$0xf]  ;;  %v10993_v56 = vld [vmem:[#allocation6 + $0x44c] sm:$0xf0]  ;;  %v9972_v58 = vor.u32 %v11185_v52, %v9971_v51  ;;  %2718 = vmatpush.bf16.msra.mxu1 %v9252_v53  ;;  %2670 = vmatpush.bf16.msra.mxu0 %v8820_v54  ;;  %v11119_v47 = vld [vmem:[#allocation6 + $0x844] sm:$0xf]  ;;  %v12119_v53 = vpack.c.bf16 %v271_v46, %v267_v42 }
  0x4f   : > { %v8771_v59 = vld [vmem:[#allocation6 + $0xc0] sm:$0xf]  ;;  %v10885_v60 = vld [vmem:[#allocation6 + $0xec] sm:$0xf0]  ;;  %v9204_v1 = vor.u32 %v10993_v56, %v9203_v55  ;;  %2768 = vmatpush.bf16.msra.mxu2 %v9588_v57  ;;  %v9733_v48 = vld [vmem:[#allocation6 + $0x870] sm:$0xf0] }
  0x50   : > { %v9539_v61 = vld [vmem:[#allocation6 + $0x6c0] sm:$0xf]  ;;  %v11077_v62 = vld [vmem:[#allocation6 + $0x6ec] sm:$0xf0]  ;;  %v8772_v2 = vor.u32 %v10885_v60, %v8771_v59  ;;  %2817 = vmatpush.bf16.msra.mxu3 %v9972_v58  ;;  %14135 = vst [vmem:[#allocation17_spill] sm:$0xff] %v12117_v50  ;;  %v9736_v54 = vor.u32 %v11119_v47, %v9733_v48  ;;  %v297_v39 = vld [vmem:[%s12091_s24 + $0xf8] sm:$0xff] }
  0x51   : > { %v9923_v63 = vld [vmem:[#allocation6 + $0x9c0] sm:$0xf]  ;;  %v11173_v0 = vld [vmem:[#allocation6 + $0x9ec] sm:$0xf0]  ;;  %v9540_v5 = vor.u32 %v11077_v62, %v9539_v61  ;;  %v10927_v51 = vld [vmem:[#allocation6 + $0x244] sm:$0xf] }
  0x52   : > { %v9155_v3 = vld [vmem:[#allocation6 + $0x3c0] sm:$0xf]  ;;  %v10981_v4 = vld [vmem:[#allocation6 + $0x3ec] sm:$0xf0]  ;;  %v9924_v6 = vor.u32 %v11173_v0, %v9923_v63  ;;  %2719 = vmatpush.bf16.msra.mxu1 %v9204_v1  ;;  %2671 = vmatpush.bf16.msra.mxu0 %v8772_v2  ;;  %v8965_v52 = vld [vmem:[#allocation6 + $0x270] sm:$0xf0] }
  0x53   : > { %v8723_v7 = vld [vmem:[#allocation6 + $0x60] sm:$0xf]  ;;  %v10873_v8 = vld [vmem:[#allocation6 + $0x8c] sm:$0xf0]  ;;  %v9156_v13 = vor.u32 %v10981_v4, %v9155_v3  ;;  %2769 = vmatpush.bf16.msra.mxu2 %v9540_v5  ;;  %14136 = vst [vmem:[#allocation18_spill] sm:$0xff] %v12119_v53  ;;  %v8968_v55 = vor.u32 %v10927_v51, %v8965_v52  ;;  %v277_v2 = vld [vmem:[%s12091_s24 + $0x58] sm:$0xff] }
  0x54   : > { %v9491_v9 = vld [vmem:[#allocation6 + $0x660] sm:$0xf]  ;;  %v11065_v10 = vld [vmem:[#allocation6 + $0x68c] sm:$0xf0]  ;;  %v8724_v16 = vor.u32 %v10873_v8, %v8723_v7  ;;  %2818 = vmatpush.bf16.msra.mxu3 %v9924_v6  ;;  %v11107_v56 = vld [vmem:[#allocation6 + $0x7e4] sm:$0xf] }
  0x55   : > { %v9875_v11 = vld [vmem:[#allocation6 + $0x960] sm:$0xf]  ;;  %v11161_v12 = vld [vmem:[#allocation6 + $0x98c] sm:$0xf0]  ;;  %v9492_v20 = vor.u32 %v11065_v10, %v9491_v9  ;;  %v9685_v57 = vld [vmem:[#allocation6 + $0x810] sm:$0xf0] }
  0x56   : > { %v8675_v14 = vld [vmem:[#allocation6] sm:$0xf]  ;;  %v10861_v15 = vld [vmem:[#allocation6 + $0x2c] sm:$0xf0]  ;;  %v9876_v21 = vor.u32 %v11161_v12, %v9875_v11  ;;  %2720 = vmatpush.bf16.msra.mxu1 %v9156_v13  ;;  %2672 = vmatpush.bf16.msra.mxu0 %v8724_v16  ;;  %v9688_v58 = vor.u32 %v11107_v56, %v9685_v57  ;;  %v10915_v59 = vld [vmem:[#allocation6 + $0x1e4] sm:$0xf] }
  0x57   : > { %v9107_v17 = vld [vmem:[#allocation6 + $0x360] sm:$0xf]  ;;  %v10969_v18 = vld [vmem:[#allocation6 + $0x38c] sm:$0xf0]  ;;  %v8676_v32 = vor.u32 %v10861_v15, %v8675_v14  ;;  %2770 = vmatpush.bf16.msra.mxu2 %v9492_v20  ;;  %v8917_v60 = vld [vmem:[#allocation6 + $0x210] sm:$0xf0] }
  0x58   : > { %v9443_v19 = vld [vmem:[#allocation6 + $0x600] sm:$0xf]  ;;  %v11053_v22 = vld [vmem:[#allocation6 + $0x62c] sm:$0xf0]  ;;  %v9108_v28 = vor.u32 %v10969_v18, %v9107_v17  ;;  %2819 = vmatpush.bf16.msra.mxu3 %v9876_v21  ;;  %v8920_v61 = vor.u32 %v10915_v59, %v8917_v60  ;;  %v281_v3 = vld [vmem:[%s12091_s24 + $0x78] sm:$0xff] }
  0x59   : > { %v9827_v23 = vld [vmem:[#allocation6 + $0x900] sm:$0xf]  ;;  %v11149_v24 = vld [vmem:[#allocation6 + $0x92c] sm:$0xf0]  ;;  %v9444_v36 = vor.u32 %v11053_v22, %v9443_v19  ;;  %v275_v5 = vld [vmem:[%s12091_s24 + $0x48] sm:$0xff]  ;;  %v12137_v8 = vpack.c.bf16 %v281_v3, %v277_v2 }
  0x5a   : > { %v266_v25 = vld [vmem:[%s12091_s24] sm:$0xff]  ;;  %v268_v33 = vld [vmem:[%s12091_s24 + $0x10] sm:$0xff]  ;;  %v9828_v37 = vor.u32 %v11149_v24, %v9827_v23  ;;  %2721 = vmatpush.bf16.msra.mxu1 %v9108_v28  ;;  %2673 = vmatpush.bf16.msra.mxu0 %v8676_v32  ;;  %v279_v6 = vld [vmem:[%s12091_s24 + $0x68] sm:$0xff] }
  0x5b   : > { %v270_v26 = vld [vmem:[%s12091_s24 + $0x20] sm:$0xff]  ;;  %v10957_v35 = vld [vmem:[#allocation6 + $0x32c] sm:$0xf0]  ;;  %2771 = vmatpush.bf16.msra.mxu2 %v9444_v36  ;;  %14137 = vst [vmem:[#allocation19_spill] sm:$0xff] %v12137_v8  ;;  %v12139_v9 = vpack.c.bf16 %v279_v6, %v275_v5  ;;  %v9637_v11 = vld [vmem:[#allocation6 + $0x7b0] sm:$0xf0] }
  0x5c   : > { %v9059_v34 = vld [vmem:[#allocation6 + $0x300] sm:$0xf]  ;;  %v272_v38 = vld [vmem:[%s12091_s24 + $0x30] sm:$0xff]  ;;  %v12112_v44 = vpack.c.bf16 %v270_v26, %v266_v25  ;;  %2820 = vmatpush.bf16.msra.mxu3 %v9828_v37  ;;  %v11095_v10 = vld [vmem:[#allocation6 + $0x784] sm:$0xf] }
  0x5d   : > { %v9060_v45 = vor.u32 %v10957_v35, %v9059_v34  ;;  %v12115_v49 = vpack.c.bf16 %v272_v38, %v268_v33  ;;  %v274_v62 = vld [vmem:[%s12091_s24 + $0x40] sm:$0xff]  ;;  %v276_v0 = vld [vmem:[%s12091_s24 + $0x50] sm:$0xff]  ;;  %14138 = vst [vmem:[#allocation20_spill] sm:$0xff] %v12139_v9  ;;  %v9640_v12 = vor.u32 %v11095_v10, %v9637_v11  ;;  %v285_v20 = vld [vmem:[%s12091_s24 + $0x98] sm:$0xff] }
  0x5e   : > { %2862 = vmatpush.bf16.msrb.mxu0 %v9016_v43  ;;  %v278_v63 = vld [vmem:[%s12091_s24 + $0x60] sm:$0xff]  ;;  %v280_v1 = vld [vmem:[%s12091_s24 + $0x70] sm:$0xff]  ;;  %v289_v21 = vld [vmem:[%s12091_s24 + $0xb8] sm:$0xff] }
  0x5f   : > { %14134 = vst [vmem:[#allocation16_spill] sm:$0xff] %v12115_v49  ;;  %2960 = vmatpush.bf16.msrb.mxu2 %v9784_v41  ;;  %2674 = vmatmul.bf16.vlgmr.msra.gmra.mxu0 %v12112_v44  ;;  %v12131_v4 = vpack.c.bf16 %v278_v63, %v274_v62  ;;  %v12135_v7 = vpack.c.bf16 %v280_v1, %v276_v0  ;;  %v10903_v13 = vld [vmem:[#allocation6 + $0x184] sm:$0xf]  ;;  %v8869_v14 = vld [vmem:[#allocation6 + $0x1b0] sm:$0xf0]  ;;  %v283_v23 = vld [vmem:[%s12091_s24 + $0x88] sm:$0xff] }
  0x60   : > { %2722 = vmatpush.bf16.msra.mxu1 %v9060_v45  ;;  %2772 = vmatmul.bf16.vlgmr.msra.gmra.mxu2 %v12115_v49  ;;  %v8872_v15 = vor.u32 %v10903_v13, %v8869_v14  ;;  %v282_v16 = vld [vmem:[%s12091_s24 + $0x80] sm:$0xff]  ;;  %v284_v18 = vld [vmem:[%s12091_s24 + $0x90] sm:$0xff]  ;;  %v287_v24 = vld [vmem:[%s12091_s24 + $0xa8] sm:$0xff]  ;;  %v12157_v26 = vpack.c.bf16 %v289_v21, %v285_v20 }
  0x61   : > { %2821 = vmatmul.bf16.vlgmr.msra.gmra.mxu3 %v12117_v50  ;;  %v286_v17 = vld [vmem:[%s12091_s24 + $0xa0] sm:$0xff]  ;;  %v288_v19 = vld [vmem:[%s12091_s24 + $0xb0] sm:$0xff]  ;;  %v12159_v27 = vpack.c.bf16 %v287_v24, %v283_v23  ;;  %v293_v38 = vld [vmem:[%s12091_s24 + $0xd8] sm:$0xff] }
  0x62   : > { %2863 = vmatpush.bf16.msrb.mxu0 %v8968_v55  ;;  %v12151_v22 = vpack.c.bf16 %v286_v17, %v282_v16  ;;  %v12155_v25 = vpack.c.bf16 %v288_v19, %v284_v18  ;;  %v11083_v28 = vld [vmem:[#allocation6 + $0x724] sm:$0xf]  ;;  %v9589_v29 = vld [vmem:[#allocation6 + $0x750] sm:$0xf0]  ;;  %v291_v41 = vld [vmem:[%s12091_s24 + $0xc8] sm:$0xff]  ;;  %v12177_v45 = vpack.c.bf16 %v297_v39, %v293_v38 }
  0x63   : > { %2723 = vmatmul.bf16.vlgmr.msra.gmra.mxu1 %v12119_v53  ;;  %2961 = vmatpush.bf16.msrb.mxu2 %v9736_v54  ;;  %v9592_v30 = vor.u32 %v11083_v28, %v9589_v29  ;;  %v10891_v31 = vld [vmem:[#allocation6 + $0x124] sm:$0xf]  ;;  %v8821_v32 = vld [vmem:[#allocation6 + $0x150] sm:$0xf0]  ;;  %v295_v42 = vld [vmem:[%s12091_s24 + $0xe8] sm:$0xff] }
  0x64   : > { %v8824_v33 = vor.u32 %v10891_v31, %v8821_v32  ;;  %v290_v34 = vld [vmem:[%s12091_s24 + $0xc0] sm:$0xff]  ;;  %v292_v36 = vld [vmem:[%s12091_s24 + $0xd0] sm:$0xff]  ;;  %v12179_v46 = vpack.c.bf16 %v295_v42, %v291_v41  ;;  %v301_v60 = vld [vmem:[%s12091_s24 + $0x118] sm:$0xff] }
  0x65   : > { %v294_v35 = vld [vmem:[%s12091_s24 + $0xe0] sm:$0xff]  ;;  %v296_v37 = vld [vmem:[%s12091_s24 + $0xf0] sm:$0xff]  ;;  %v299_v63 = vld [vmem:[%s12091_s24 + $0x108] sm:$0xff] }
  0x66   : > { %2864 = vmatpush.bf16.msrb.mxu0 %v8920_v61  ;;  %v12171_v40 = vpack.c.bf16 %v294_v35, %v290_v34  ;;  %v12175_v43 = vpack.c.bf16 %v296_v37, %v292_v36  ;;  %v11071_v47 = vld [vmem:[#allocation6 + $0x6c4] sm:$0xf]  ;;  %v9541_v48 = vld [vmem:[#allocation6 + $0x6f0] sm:$0xf0]  ;;  %v305_v61 = vld [vmem:[%s12091_s24 + $0x138] sm:$0xff] }
  0x67   : > { %2962 = vmatpush.bf16.msrb.mxu2 %v9688_v58  ;;  %v9544_v51 = vor.u32 %v11071_v47, %v9541_v48  ;;  %v10879_v52 = vld [vmem:[#allocation6 + $0xc4] sm:$0xf]  ;;  %v8773_v54 = vld [vmem:[#allocation6 + $0xf0] sm:$0xf0]  ;;  %v303_v0 = vld [vmem:[%s12091_s24 + $0x128] sm:$0xff]  ;;  %v12197_v2 = vpack.c.bf16 %v305_v61, %v301_v60 }
  0x68   : > { %v8776_v55 = vor.u32 %v10879_v52, %v8773_v54  ;;  %v298_v56 = vld [vmem:[%s12091_s24 + $0x100] sm:$0xff]  ;;  %v300_v58 = vld [vmem:[%s12091_s24 + $0x110] sm:$0xff]  ;;  %v12199_v3 = vpack.c.bf16 %v303_v0, %v299_v63  ;;  %v309_v39 = vld [vmem:[%s12091_s24 + $0x158] sm:$0xff] }
  0x69   : > { %v302_v57 = vld [vmem:[%s12091_s24 + $0x120] sm:$0xff]  ;;  %v304_v59 = vld [vmem:[%s12091_s24 + $0x130] sm:$0xff]  ;;  %14139 = vst [vmem:[#allocation21_spill] sm:$0xff] %v12197_v2  ;;  %v313_v41 = vld [vmem:[%s12091_s24 + $0x178] sm:$0xff] }
  0x6a   : > { %2865 = vmatpush.bf16.msrb.mxu0 %v8872_v15  ;;  %v12191_v62 = vpack.c.bf16 %v302_v57, %v298_v56  ;;  %v12195_v1 = vpack.c.bf16 %v304_v59, %v300_v58  ;;  %14140 = vst [vmem:[#allocation22_spill] sm:$0xff] %v12199_v3  ;;  %v11059_v5 = vld [vmem:[#allocation6 + $0x664] sm:$0xf]  ;;  %v9493_v6 = vld [vmem:[#allocation6 + $0x690] sm:$0xf0]  ;;  %v307_v52 = vld [vmem:[%s12091_s24 + $0x148] sm:$0xff]  ;;  %v12217_v56 = vpack.c.bf16 %v313_v41, %v309_v39 }
  0x6b   : > { %2963 = vmatpush.bf16.msrb.mxu2 %v9640_v12  ;;  %v11227_v10 = vld [vmem:[#allocation6 + $0xba4] sm:$0xf]  ;;  %v9496_v11 = vor.u32 %v11059_v5, %v9493_v6  ;;  %v10165_v12 = vld [vmem:[#allocation6 + $0xbd0] sm:$0xf0]  ;;  %v311_v54 = vld [vmem:[%s12091_s24 + $0x168] sm:$0xff] }
  0x6c   : > { %v10168_v13 = vor.u32 %v11227_v10, %v10165_v12  ;;  %v11035_v14 = vld [vmem:[#allocation6 + $0x5a4] sm:$0xf]  ;;  %v9397_v15 = vld [vmem:[#allocation6 + $0x5d0] sm:$0xf0]  ;;  %14143 = vst [vmem:[#allocation25_spill] sm:$0xff] %v12217_v56  ;;  %v12219_v58 = vpack.c.bf16 %v311_v54, %v307_v52  ;;  %v319_v39 = vld [vmem:[%s12091_s24 + $0x1a8] sm:$0xff] }
  0x6d   : > { %v11215_v16 = vld [vmem:[#allocation6 + $0xb44] sm:$0xf]  ;;  %v9400_v17 = vor.u32 %v11035_v14, %v9397_v15  ;;  %v10117_v18 = vld [vmem:[#allocation6 + $0xb70] sm:$0xf0] }
  0x6e   : > { %2866 = vmatpush.bf16.msrb.mxu0 %v8824_v33  ;;  %v11023_v19 = vld [vmem:[#allocation6 + $0x544] sm:$0xf]  ;;  %v9349_v20 = vld [vmem:[#allocation6 + $0x570] sm:$0xf0]  ;;  %3009 = vmatpush.bf16.msrb.mxu3 %v10168_v13  ;;  %v10120_v21 = vor.u32 %v11215_v16, %v10117_v18  ;;  %14144 = vst [vmem:[#allocation26_spill] sm:$0xff] %v12219_v58 }
  0x6f   : > { %2679 = vmatmul.bf16.gmra.mxu0 %v12131_v4  ;;  %2964 = vmatpush.bf16.msrb.mxu2 %v9592_v30  ;;  %v11203_v23 = vld [vmem:[#allocation6 + $0xae4] sm:$0xf]  ;;  %v9352_v24 = vor.u32 %v11023_v19, %v9349_v20  ;;  %v10069_v28 = vld [vmem:[#allocation6 + $0xb10] sm:$0xf0] }
  0x70   : > { %2777 = vmatmul.bf16.gmra.mxu2 %v12135_v7  ;;  %2911 = vmatpush.bf16.msrb.mxu1 %v9400_v17  ;;  %v10867_v29 = vld [vmem:[#allocation6 + $0x64] sm:$0xf]  ;;  %v8725_v30 = vld [vmem:[#allocation6 + $0x90] sm:$0xf0]  ;;  %v10072_v37 = vor.u32 %v11203_v23, %v10069_v28 }
  0x71   : > { %2826 = vmatmul.bf16.gmra.mxu3 %v12137_v8  ;;  %v11011_v31 = vld [vmem:[#allocation6 + $0x4e4] sm:$0xf]  ;;  %v9301_v32 = vld [vmem:[#allocation6 + $0x510] sm:$0xf0]  ;;  %v8728_v33 = vor.u32 %v10867_v29, %v8725_v30 }
  0x72   : > { %2867 = vmatpush.bf16.msrb.mxu0 %v8776_v55  ;;  %v306_v34 = vld [vmem:[%s12091_s24 + $0x140] sm:$0xff]  ;;  %v308_v36 = vld [vmem:[%s12091_s24 + $0x150] sm:$0xff]  ;;  %3010 = vmatpush.bf16.msrb.mxu3 %v10120_v21  ;;  %v9304_v42 = vor.u32 %v11011_v31, %v9301_v32  ;;  %v317_v31 = vld [vmem:[%s12091_s24 + $0x198] sm:$0xff] }
  0x73   : > { %2728 = vmatmul.bf16.gmra.mxu1 %v12139_v9  ;;  %2965 = vmatpush.bf16.msrb.mxu2 %v9544_v51  ;;  %v310_v35 = vld [vmem:[%s12091_s24 + $0x160] sm:$0xff]  ;;  %v312_v38 = vld [vmem:[%s12091_s24 + $0x170] sm:$0xff]  ;;  %v321_v32 = vld [vmem:[%s12091_s24 + $0x1b8] sm:$0xff] }
  0x74   : > { %2912 = vmatpush.bf16.msrb.mxu1 %v9352_v24  ;;  %v11191_v47 = vld [vmem:[#allocation6 + $0xa84] sm:$0xf]  ;;  %v10021_v48 = vld [vmem:[#allocation6 + $0xab0] sm:$0xf0]  ;;  %v12211_v51 = vpack.c.bf16 %v310_v35, %v306_v34  ;;  %v12215_v55 = vpack.c.bf16 %v312_v38, %v308_v36  ;;  %v315_v38 = vld [vmem:[%s12091_s24 + $0x188] sm:$0xff] }
  0x75   : > { %v10024_v57 = vor.u32 %v11191_v47, %v10021_v48  ;;  %v10999_v59 = vld [vmem:[#allocation6 + $0x484] sm:$0xf]  ;;  %v9253_v60 = vld [vmem:[#allocation6 + $0x4b0] sm:$0xf0]  ;;  %v12237_v48 = vpack.c.bf16 %v321_v32, %v317_v31  ;;  %v11126_v31 = vld [vmem:[#allocation6 + $0x874] sm:$0xf0] }
  0x76   : > { %2868 = vmatpush.bf16.msrb.mxu0 %v8728_v33  ;;  %14141 = vst [vmem:[#allocation23_spill] sm:$0xff] %v12211_v51  ;;  %3011 = vmatpush.bf16.msrb.mxu3 %v10072_v37  ;;  %v9256_v61 = vor.u32 %v10999_v59, %v9253_v60  ;;  %v11047_v63 = vld [vmem:[#allocation6 + $0x604] sm:$0xf]  ;;  %v9445_v0 = vld [vmem:[#allocation6 + $0x630] sm:$0xf0]  ;;  %v12239_v60 = vpack.c.bf16 %v319_v39, %v315_v38 }
  0x77   : > { %2966 = vmatpush.bf16.msrb.mxu2 %v9496_v11  ;;  %14142 = vst [vmem:[#allocation24_spill] sm:$0xff] %v12215_v55  ;;  %v11179_v5 = vld [vmem:[#allocation6 + $0xa24] sm:$0xf]  ;;  %v9448_v6 = vor.u32 %v11047_v63, %v9445_v0  ;;  %v9973_v10 = vld [vmem:[#allocation6 + $0xa50] sm:$0xf0] }
  0x78   : > { %2913 = vmatpush.bf16.msrb.mxu1 %v9304_v42  ;;  %v9976_v11 = vor.u32 %v11179_v5, %v9973_v10  ;;  %v10987_v12 = vld [vmem:[#allocation6 + $0x424] sm:$0xf]  ;;  %v9205_v13 = vld [vmem:[#allocation6 + $0x450] sm:$0xf0]  ;;  %v9787_v5 = vld [vmem:[#allocation6 + $0x8a8] sm:$0xf] }
  0x79   : > { %v11167_v14 = vld [vmem:[#allocation6 + $0x9c4] sm:$0xf]  ;;  %v9208_v15 = vor.u32 %v10987_v12, %v9205_v13  ;;  %v9925_v16 = vld [vmem:[#allocation6 + $0x9f0] sm:$0xf0] }
  0x7a   : > { %3012 = vmatpush.bf16.msrb.mxu3 %v10024_v57  ;;  %v10975_v17 = vld [vmem:[#allocation6 + $0x3c4] sm:$0xf]  ;;  %v9157_v18 = vld [vmem:[#allocation6 + $0x3f0] sm:$0xf0]  ;;  %v9928_v19 = vor.u32 %v11167_v14, %v9925_v16  ;;  %v329_v16 = vld [vmem:[%s12091_s24 + $0x1f8] sm:$0xff] }
  0x7b   : > { %2967 = vmatpush.bf16.msrb.mxu2 %v9448_v6  ;;  %v9160_v20 = vor.u32 %v10975_v17, %v9157_v18  ;;  %v11155_v21 = vld [vmem:[#allocation6 + $0x964] sm:$0xf]  ;;  %v9877_v23 = vld [vmem:[#allocation6 + $0x990] sm:$0xf0]  ;;  %v11138_v6 = vld [vmem:[#allocation6 + $0x8d4] sm:$0xf0] }
  0x7c   : > { %2914 = vmatpush.bf16.msrb.mxu1 %v9256_v61  ;;  %v314_v24 = vld [vmem:[%s12091_s24 + $0x180] sm:$0xff]  ;;  %v316_v29 = vld [vmem:[%s12091_s24 + $0x190] sm:$0xff]  ;;  %v9880_v33 = vor.u32 %v11155_v21, %v9877_v23  ;;  %v9788_v10 = vor.u32 %v11138_v6, %v9787_v5  ;;  %v323_v18 = vld [vmem:[%s12091_s24 + $0x1c8] sm:$0xff] }
  0x7d   : > { %v318_v28 = vld [vmem:[%s12091_s24 + $0x1a0] sm:$0xff]  ;;  %v320_v30 = vld [vmem:[%s12091_s24 + $0x1b0] sm:$0xff] }
  0x7e   : > { %3013 = vmatpush.bf16.msrb.mxu3 %v9976_v11  ;;  %v10855_v34 = vld [vmem:[#allocation6 + $0x4] sm:$0xf]  ;;  %v8677_v35 = vld [vmem:[#allocation6 + $0x30] sm:$0xf0]  ;;  %v12231_v37 = vpack.c.bf16 %v318_v28, %v314_v24  ;;  %v12235_v47 = vpack.c.bf16 %v320_v30, %v316_v29  ;;  %v9019_v24 = vld [vmem:[#allocation6 + $0x2a8] sm:$0xf] }
  0x7f   : > { %2684 = vmatmul.bf16.gmra.mxu0 %v12151_v22  ;;  %v10963_v36 = vld [vmem:[#allocation6 + $0x364] sm:$0xf]  ;;  %v8680_v41 = vor.u32 %v10855_v34, %v8677_v35  ;;  %v9109_v42 = vld [vmem:[#allocation6 + $0x390] sm:$0xf0]  ;;  %3156 = vmatpush.bf16.msra.mxu2 %v9788_v10  ;;  %v10946_v28 = vld [vmem:[#allocation6 + $0x2d4] sm:$0xf0] }
  0x80   : > { %2782 = vmatmul.bf16.gmra.mxu2 %v12155_v25  ;;  %2915 = vmatpush.bf16.msrb.mxu1 %v9208_v15  ;;  %v9112_v52 = vor.u32 %v10963_v36, %v9109_v42  ;;  %v11143_v54 = vld [vmem:[#allocation6 + $0x904] sm:$0xf]  ;;  %v9829_v57 = vld [vmem:[#allocation6 + $0x930] sm:$0xf0]  ;;  %v325_v15 = vld [vmem:[%s12091_s24 + $0x1d8] sm:$0xff]  ;;  %v9020_v29 = vor.u32 %v10946_v28, %v9019_v24 }
  0x81   : > { %2831 = vmatmul.bf16.gmra.mxu3 %v12157_v26  ;;  %2869 = vmatpush.bf16.msrb.mxu0 %v8680_v41  ;;  %v9832_v59 = vor.u32 %v11143_v54, %v9829_v57  ;;  %v10951_v61 = vld [vmem:[#allocation6 + $0x304] sm:$0xf]  ;;  %v9061_v63 = vld [vmem:[#allocation6 + $0x330] sm:$0xf0]  ;;  %v12257_v21 = vpack.c.bf16 %v329_v16, %v325_v15  ;;  %v9739_v30 = vld [vmem:[#allocation6 + $0x848] sm:$0xf] }
  0x82   : > { %3014 = vmatpush.bf16.msrb.mxu3 %v9928_v19  ;;  %v9064_v0 = vor.u32 %v10951_v61, %v9061_v63  ;;  %v322_v11 = vld [vmem:[%s12091_s24 + $0x1c0] sm:$0xff]  ;;  %v324_v13 = vld [vmem:[%s12091_s24 + $0x1d0] sm:$0xff]  ;;  %v327_v19 = vld [vmem:[%s12091_s24 + $0x1e8] sm:$0xff]  ;;  %v9740_v32 = vor.u32 %v11126_v31, %v9739_v30 }
  0x83   : > { %2733 = vmatmul.bf16.gmra.mxu1 %v12159_v27  ;;  %v326_v12 = vld [vmem:[%s12091_s24 + $0x1e0] sm:$0xff]  ;;  %v328_v14 = vld [vmem:[%s12091_s24 + $0x1f0] sm:$0xff]  ;;  %v12259_v23 = vpack.c.bf16 %v327_v19, %v323_v18  ;;  %v8971_v34 = vld [vmem:[#allocation6 + $0x248] sm:$0xf] }
  0x84   : > { %2916 = vmatpush.bf16.msrb.mxu1 %v9160_v20  ;;  %v12251_v17 = vpack.c.bf16 %v326_v12, %v322_v11  ;;  %v12255_v20 = vpack.c.bf16 %v328_v14, %v324_v13  ;;  %3157 = vmatpush.bf16.msra.mxu2 %v9740_v32  ;;  %v10934_v35 = vld [vmem:[#allocation6 + $0x274] sm:$0xf0]  ;;  %v9691_v41 = vld [vmem:[#allocation6 + $0x7e8] sm:$0xf] }
  0x85   : > { %3058 = vmatpush.bf16.msra.mxu0 %v9020_v29  ;;  %v8972_v38 = vor.u32 %v10934_v35, %v8971_v34  ;;  %v11114_v42 = vld [vmem:[#allocation6 + $0x814] sm:$0xf0]  ;;  %v8923_v14 = vld [vmem:[#allocation6 + $0x1e8] sm:$0xf] }
  0x86   : > { %3015 = vmatpush.bf16.msrb.mxu3 %v9880_v33  ;;  %v10922_v15 = vld [vmem:[#allocation6 + $0x214] sm:$0xf0]  ;;  %v9643_v24 = vld [vmem:[#allocation6 + $0x788] sm:$0xf] }
  0x87   : > { %v8924_v18 = vor.u32 %v10922_v15, %v8923_v14  ;;  %v11102_v28 = vld [vmem:[#allocation6 + $0x7b4] sm:$0xf0] }
  0x88   : > { %2917 = vmatpush.bf16.msrb.mxu1 %v9112_v52  ;;  %v9692_v52 = vor.u32 %v11114_v42, %v9691_v41  ;;  %v9644_v29 = vor.u32 %v11102_v28, %v9643_v24 }
  0x89   : > { %3059 = vmatpush.bf16.msra.mxu0 %v8972_v38 }
  0x8a   : > { %3016 = vmatpush.bf16.msrb.mxu3 %v9832_v59  ;;  %3158 = vmatpush.bf16.msra.mxu2 %v9692_v52 }
  0x8c   : > { %2918 = vmatpush.bf16.msrb.mxu1 %v9064_v0 }
  0x8d   : > { %3060 = vmatpush.bf16.msra.mxu0 %v8924_v18 }
  0x8e   : > { %3159 = vmatpush.bf16.msra.mxu2 %v9644_v29 }
  0x8f   : > { %2689 = vmatmul.bf16.gmra.mxu0 %v12171_v40 }
  0x90   : > { %2787 = vmatmul.bf16.gmra.mxu2 %v12175_v43 }
  0x91   : > { %2836 = vmatmul.bf16.gmra.mxu3 %v12177_v45 }
  0x93   : > { %2738 = vmatmul.bf16.gmra.mxu1 %v12179_v46 }
  0x9f   : > { %2694 = vmatmul.bf16.gmra.mxu0 %v12191_v62 }
  0xa0   : > { %2792 = vmatmul.bf16.gmra.mxu2 %v12195_v1 }
  0xa1   : > { %2841 = vmatmul.bf16.gmra.mxu3 %v12197_v2 }
  0xa3   : > { %2743 = vmatmul.bf16.gmra.mxu1 %v12199_v3 }
  0xaf   : > { %2699 = vmatmul.bf16.gmra.mxu0 %v12211_v51 }
  0xb0   : > { %2797 = vmatmul.bf16.gmra.mxu2 %v12215_v55 }
  0xb1   : > { %2846 = vmatmul.bf16.gmra.mxu3 %v12217_v56 }
  0xb3   : > { %2748 = vmatmul.bf16.gmra.mxu1 %v12219_v58 }
  0xbf   : > { %2704 = vmatmul.bf16.gmra.mxu0 %v12231_v37 }
  0xc0   : > { %2802 = vmatmul.bf16.gmra.mxu2 %v12235_v47 }
  0xc1   : > { %2851 = vmatmul.bf16.gmra.mxu3 %v12237_v48 }
  0xc3   : > { %2753 = vmatmul.bf16.gmra.mxu1 %v12239_v60 }
  0xcf   : > { %2709 = vmatmul.bf16.gmra.mxu0 %v12251_v17 }
  0xd0   : > { %2807 = vmatmul.bf16.gmra.mxu2 %v12255_v20 }
  0xd1   : > { %2856 = vmatmul.bf16.gmra.mxu3 %v12257_v21 }
  0xd3   : > { %2758 = vmatmul.bf16.gmra.mxu1 %v12259_v23 }
  0xdc   : > { %v2675_v33 = vpop.f32.mrf.mxu0 }
  0xdf   : > { %2870 = vmatmul.bf16.vlgmr.msrb.gmra.mxu0 %v12112_v44 }
  0xe0   : > { %v2724_v36 = vpop.f32.mrf.mxu1  ;;  %2968 = vmatmul.bf16.vlgmr.msrb.gmra.mxu2 %v12115_v49 }
  0xe1   : > { %v2725_v39 = vadd.f32 %v2724_v36, %v2675_v33  ;;  %3017 = vmatmul.bf16.vlgmr.msrb.gmra.mxu3 %v12117_v50 }
  0xe3   : > { %2919 = vmatmul.bf16.vlgmr.msrb.gmra.mxu1 %v12119_v53  ;;  %v2773_v54 = vpop.f32.mrf.mxu2 }
  0xe4   : > { %v2822_v57 = vpop.f32.mrf.mxu3  ;;  %v2774_v59 = vadd.f32 %v2773_v54, %v2725_v39  ;;  %v2677_v61 = vpop.f32.mrf.mxu0  ;;  %v8875_v54 = vld [vmem:[#allocation6 + $0x188] sm:$0xf] }
  0xe6   : > { %v12269_v63 = vadd.f32 %v2822_v57, %v2774_v59  ;;  %v10910_v57 = vld [vmem:[#allocation6 + $0x1b4] sm:$0xf0] }
  0xe8   : > { %v2726_v0 = vpop.f32.mrf.mxu1 }
  0xe9   : > { %v2727_v5 = vadd.f32 %v2726_v0, %v2677_v61  ;;  %v8876_v61 = vor.u32 %v10910_v57, %v8875_v54 }
  0xeb   : > { %v2775_v6 = vpop.f32.mrf.mxu2  ;;  %3061 = vmatpush.bf16.msra.mxu0 %v8876_v61 }
  0xec   : > { %v2824_v10 = vpop.f32.mrf.mxu3  ;;  %v2776_v11 = vadd.f32 %v2775_v6, %v2727_v5  ;;  %v2680_v12 = vpop.f32.mrf.mxu0  ;;  %v9595_v5 = vld [vmem:[#allocation6 + $0x728] sm:$0xf]  ;;  %v11090_v6 = vld [vmem:[#allocation6 + $0x754] sm:$0xf0] }
  0xee   : > { %v12271_v13 = vadd.f32 %v2824_v10, %v2776_v11  ;;  %v9596_v10 = vor.u32 %v11090_v6, %v9595_v5 }
  0xef   : > { %2875 = vmatmul.bf16.gmra.mxu0 %v12131_v4 }
  0xf0   : > { %v2729_v16 = vpop.f32.mrf.mxu1  ;;  %2973 = vmatmul.bf16.gmra.mxu2 %v12135_v7 }
  0xf1   : > { %v2730_v19 = vadd.f32 %v2729_v16, %v2680_v12  ;;  %3022 = vmatmul.bf16.gmra.mxu3 %v12137_v8  ;;  %3160 = vmatpush.bf16.msra.mxu2 %v9596_v10 }
  0xf3   : > { %2924 = vmatmul.bf16.gmra.mxu1 %v12139_v9  ;;  %v2778_v30 = vpop.f32.mrf.mxu2 }
  0xf4   : > { %v2827_v31 = vpop.f32.mrf.mxu3  ;;  %v2779_v32 = vadd.f32 %v2778_v30, %v2730_v19  ;;  %v2682_v33 = vpop.f32.mrf.mxu0 }
  0xf6   : > { %v12277_v34 = vadd.f32 %v2827_v31, %v2779_v32  ;;  %v8827_v32 = vld [vmem:[#allocation6 + $0x128] sm:$0xf] }
  0xf8   : > { %v2731_v35 = vpop.f32.mrf.mxu1 }
  0xf9   : > { %v2732_v36 = vadd.f32 %v2731_v35, %v2682_v33  ;;  %v10898_v33 = vld [vmem:[#allocation6 + $0x154] sm:$0xf0] }
  0xfb   : > { %v2780_v38 = vpop.f32.mrf.mxu2 }
  0xfc   : > { %v2829_v39 = vpop.f32.mrf.mxu3  ;;  %v2781_v41 = vadd.f32 %v2780_v38, %v2732_v36  ;;  %v2685_v42 = vpop.f32.mrf.mxu0  ;;  %v8828_v36 = vor.u32 %v10898_v33, %v8827_v32  ;;  %v11066_v32 = vld [vmem:[#allocation6 + $0x694] sm:$0xf0]  ;;  %v10171_v33 = vld [vmem:[#allocation6 + $0xba8] sm:$0xf] }
  0xfe   : > { %v12279_v52 = vadd.f32 %v2829_v39, %v2781_v41  ;;  %v9547_v39 = vld [vmem:[#allocation6 + $0x6c8] sm:$0xf]  ;;  %v11078_v41 = vld [vmem:[#allocation6 + $0x6f4] sm:$0xf0]  ;;  %3062 = vmatpush.bf16.msra.mxu0 %v8828_v36 }
  0xff   : > { %2880 = vmatmul.bf16.gmra.mxu0 %v12151_v22  ;;  %v11234_v36 = vld [vmem:[#allocation6 + $0xbd4] sm:$0xf0] }
 0x100   : > { %v2734_v59 = vpop.f32.mrf.mxu1  ;;  %2978 = vmatmul.bf16.gmra.mxu2 %v12155_v25 }
 0x101   : > { %v2735_v0 = vadd.f32 %v2734_v59, %v2685_v42  ;;  %3027 = vmatmul.bf16.gmra.mxu3 %v12157_v26  ;;  %v9548_v42 = vor.u32 %v11078_v41, %v9547_v39  ;;  %v9403_v39 = vld [vmem:[#allocation6 + $0x5a8] sm:$0xf]  ;;  %v11042_v41 = vld [vmem:[#allocation6 + $0x5d4] sm:$0xf0] }
 0x103   : > { %2929 = vmatmul.bf16.gmra.mxu1 %v12159_v27  ;;  %v2783_v11 = vpop.f32.mrf.mxu2  ;;  %3161 = vmatpush.bf16.msra.mxu2 %v9548_v42 }
 0x104   : > { %v2832_v12 = vpop.f32.mrf.mxu3  ;;  %v2784_v14 = vadd.f32 %v2783_v11, %v2735_v0  ;;  %v2687_v15 = vpop.f32.mrf.mxu0 }
 0x106   : > { %v12285_v16 = vadd.f32 %v2832_v12, %v2784_v14 }
 0x108   : > { %v2736_v18 = vpop.f32.mrf.mxu1 }
 0x109   : > { %v2737_v19 = vadd.f32 %v2736_v18, %v2687_v15  ;;  %v8779_v18 = vld [vmem:[#allocation6 + $0xc8] sm:$0xf] }
 0x10b   : > { %v2785_v24 = vpop.f32.mrf.mxu2 }
 0x10c   : > { %v2834_v28 = vpop.f32.mrf.mxu3  ;;  %v2786_v29 = vadd.f32 %v2785_v24, %v2737_v19  ;;  %v2690_v30 = vpop.f32.mrf.mxu0  ;;  %v10886_v19 = vld [vmem:[#allocation6 + $0xf4] sm:$0xf0] }
 0x10e   : > { %v12287_v31 = vadd.f32 %v2834_v28, %v2786_v29  ;;  %v8780_v28 = vor.u32 %v10886_v19, %v8779_v18 }
 0x10f   : > { %2885 = vmatmul.bf16.gmra.mxu0 %v12171_v40 }
 0x110   : > { %v2739_v35 = vpop.f32.mrf.mxu1  ;;  %2983 = vmatmul.bf16.gmra.mxu2 %v12175_v43  ;;  %3063 = vmatpush.bf16.msra.mxu0 %v8780_v28  ;;  %v10075_v28 = vld [vmem:[#allocation6 + $0xae8] sm:$0xf] }
 0x111   : > { %v2740_v38 = vadd.f32 %v2739_v35, %v2690_v30  ;;  %3032 = vmatmul.bf16.gmra.mxu3 %v12177_v45  ;;  %v9499_v30 = vld [vmem:[#allocation6 + $0x668] sm:$0xf] }
 0x112   : > { %v9500_v35 = vor.u32 %v11066_v32, %v9499_v30  ;;  %v11210_v30 = vld [vmem:[#allocation6 + $0xb14] sm:$0xf0] }
 0x113   : > { %2934 = vmatmul.bf16.gmra.mxu1 %v12179_v46  ;;  %v2788_v54 = vpop.f32.mrf.mxu2  ;;  %v10076_v32 = vor.u32 %v11210_v30, %v10075_v28  ;;  %v9979_v30 = vld [vmem:[#allocation6 + $0xa28] sm:$0xf] }
 0x114   : > { %v2837_v57 = vpop.f32.mrf.mxu3  ;;  %v2789_v59 = vadd.f32 %v2788_v54, %v2740_v38  ;;  %v2692_v61 = vpop.f32.mrf.mxu0  ;;  %v10172_v38 = vor.u32 %v11234_v36, %v10171_v33  ;;  %3162 = vmatpush.bf16.msra.mxu2 %v9500_v35  ;;  %v9307_v33 = vld [vmem:[#allocation6 + $0x4e8] sm:$0xf] }
 0x116   : > { %v12293_v0 = vadd.f32 %v2837_v57, %v2789_v59  ;;  %v9404_v57 = vor.u32 %v11042_v41, %v9403_v39  ;;  %3205 = vmatpush.bf16.msra.mxu3 %v10172_v38 }
 0x118   : > { %v2741_v5 = vpop.f32.mrf.mxu1  ;;  %3107 = vmatpush.bf16.msra.mxu1 %v9404_v57 }
 0x119   : > { %v2742_v6 = vadd.f32 %v2741_v5, %v2692_v61  ;;  %v10123_v5 = vld [vmem:[#allocation6 + $0xb48] sm:$0xf] }
 0x11b   : > { %v2790_v10 = vpop.f32.mrf.mxu2 }
 0x11c   : > { %v2839_v11 = vpop.f32.mrf.mxu3  ;;  %v2791_v12 = vadd.f32 %v2790_v10, %v2742_v6  ;;  %v2695_v14 = vpop.f32.mrf.mxu0  ;;  %v11222_v6 = vld [vmem:[#allocation6 + $0xb74] sm:$0xf0] }
 0x11d   : > { %v10124_v10 = vor.u32 %v11222_v6, %v10123_v5  ;;  %v10874_v5 = vld [vmem:[#allocation6 + $0x94] sm:$0xf0]  ;;  %v9259_v6 = vld [vmem:[#allocation6 + $0x488] sm:$0xf] }
 0x11e   : > { %v12295_v15 = vadd.f32 %v2839_v11, %v2791_v12  ;;  %v9355_v12 = vld [vmem:[#allocation6 + $0x548] sm:$0xf] }
 0x11f   : > { %2890 = vmatmul.bf16.gmra.mxu0 %v12191_v62  ;;  %3206 = vmatpush.bf16.msra.mxu3 %v10124_v10 }
 0x120   : > { %v2744_v24 = vpop.f32.mrf.mxu1  ;;  %2988 = vmatmul.bf16.gmra.mxu2 %v12195_v1 }
 0x121   : > { %v2745_v29 = vadd.f32 %v2744_v24, %v2695_v14  ;;  %3037 = vmatmul.bf16.gmra.mxu3 %v12197_v2  ;;  %v11030_v14 = vld [vmem:[#allocation6 + $0x574] sm:$0xf0] }
 0x122   : > { %v9356_v19 = vor.u32 %v11030_v14, %v9355_v12  ;;  %v11006_v14 = vld [vmem:[#allocation6 + $0x4b4] sm:$0xf0] }
 0x123   : > { %2939 = vmatmul.bf16.gmra.mxu1 %v12199_v3  ;;  %v2793_v42 = vpop.f32.mrf.mxu2  ;;  %3207 = vmatpush.bf16.msra.mxu3 %v10076_v32  ;;  %v9260_v28 = vor.u32 %v11006_v14, %v9259_v6 }
 0x124   : > { %v2842_v54 = vpop.f32.mrf.mxu3  ;;  %v2794_v59 = vadd.f32 %v2793_v42, %v2745_v29  ;;  %v2697_v61 = vpop.f32.mrf.mxu0  ;;  %3108 = vmatpush.bf16.msra.mxu1 %v9356_v19  ;;  %v11018_v29 = vld [vmem:[#allocation6 + $0x514] sm:$0xf0]  ;;  %v10027_v42 = vld [vmem:[#allocation6 + $0xa88] sm:$0xf] }
 0x125   : > { %v9308_v38 = vor.u32 %v11018_v29, %v9307_v33  ;;  %v9451_v19 = vld [vmem:[#allocation6 + $0x608] sm:$0xf]  ;;  %v11186_v33 = vld [vmem:[#allocation6 + $0xa54] sm:$0xf0] }
 0x126   : > { %v12301_v11 = vadd.f32 %v2842_v54, %v2794_v59  ;;  %v11198_v54 = vld [vmem:[#allocation6 + $0xab4] sm:$0xf0]  ;;  %v9980_v29 = vor.u32 %v11186_v33, %v9979_v30  ;;  %v9883_v30 = vld [vmem:[#allocation6 + $0x968] sm:$0xf] }
 0x127   : > { %v10028_v57 = vor.u32 %v11198_v54, %v10027_v42  ;;  %v11162_v33 = vld [vmem:[#allocation6 + $0x994] sm:$0xf0] }
 0x128   : > { %v2746_v18 = vpop.f32.mrf.mxu1  ;;  %3109 = vmatpush.bf16.msra.mxu1 %v9308_v38 }
 0x129   : > { %v2747_v24 = vadd.f32 %v2746_v18, %v2697_v61  ;;  %v8731_v61 = vld [vmem:[#allocation6 + $0x68] sm:$0xf]  ;;  %3208 = vmatpush.bf16.msra.mxu3 %v10028_v57 }
 0x12a   : > { %v8732_v12 = vor.u32 %v10874_v5, %v8731_v61  ;;  %v9931_v61 = vld [vmem:[#allocation6 + $0x9c8] sm:$0xf]  ;;  %v11174_v5 = vld [vmem:[#allocation6 + $0x9f4] sm:$0xf0] }
 0x12b   : > { %v2795_v35 = vpop.f32.mrf.mxu2  ;;  %v9932_v6 = vor.u32 %v11174_v5, %v9931_v61  ;;  %v9163_v57 = vld [vmem:[#allocation6 + $0x3c8] sm:$0xf]  ;;  %v10970_v61 = vld [vmem:[#allocation6 + $0x394] sm:$0xf0] }
 0x12c   : > { %v2844_v36 = vpop.f32.mrf.mxu3  ;;  %v2796_v39 = vadd.f32 %v2795_v35, %v2747_v24  ;;  %v2700_v41 = vpop.f32.mrf.mxu0  ;;  %v11054_v24 = vld [vmem:[#allocation6 + $0x634] sm:$0xf0]  ;;  %3064 = vmatpush.bf16.msra.mxu0 %v8732_v12  ;;  %v9211_v35 = vld [vmem:[#allocation6 + $0x428] sm:$0xf]  ;;  %3110 = vmatpush.bf16.msra.mxu1 %v9260_v28 }
 0x12d   : > { %v9452_v32 = vor.u32 %v11054_v24, %v9451_v19  ;;  %3209 = vmatpush.bf16.msra.mxu3 %v9980_v29  ;;  %v10982_v12 = vld [vmem:[#allocation6 + $0x3f4] sm:$0xf0]  ;;  %v8683_v28 = vld [vmem:[#allocation6 + $0x8] sm:$0xf] }
 0x12e   : > { %v12303_v59 = vadd.f32 %v2844_v36, %v2796_v39  ;;  %v10994_v36 = vld [vmem:[#allocation6 + $0x454] sm:$0xf0]  ;;  %v9164_v19 = vor.u32 %v10982_v12, %v9163_v57 }
 0x12f   : > { %2895 = vmatmul.bf16.gmra.mxu0 %v12211_v51  ;;  %3163 = vmatpush.bf16.msra.mxu2 %v9452_v32  ;;  %v9884_v32 = vor.u32 %v11162_v33, %v9883_v30  ;;  %v10958_v57 = vld [vmem:[#allocation6 + $0x334] sm:$0xf0]  ;;  %v9789_v30 = vld [vmem:[#allocation6 + $0x8d8] sm:$0xf0] }
 0x130   : > { %v2749_v10 = vpop.f32.mrf.mxu1  ;;  %2993 = vmatmul.bf16.gmra.mxu2 %v12215_v55 }
 0x131   : > { %v2750_v18 = vadd.f32 %v2749_v10, %v2700_v41  ;;  %3042 = vmatmul.bf16.gmra.mxu3 %v12217_v56  ;;  %v9212_v41 = vor.u32 %v10994_v36, %v9211_v35  ;;  %v10862_v35 = vld [vmem:[#allocation6 + $0x34] sm:$0xf0] }
 0x132   : > { %3210 = vmatpush.bf16.msra.mxu3 %v9932_v6  ;;  %v8684_v29 = vor.u32 %v10862_v35, %v8683_v28  ;;  %v9067_v6 = vld [vmem:[#allocation6 + $0x308] sm:$0xf] }
 0x133   : > { %2944 = vmatmul.bf16.gmra.mxu1 %v12219_v58  ;;  %v2798_v38 = vpop.f32.mrf.mxu2  ;;  %v11150_v58 = vld [vmem:[#allocation6 + $0x934] sm:$0xf0] }
 0x134   : > { %v2847_v39 = vpop.f32.mrf.mxu3  ;;  %v2799_v42 = vadd.f32 %v2798_v38, %v2750_v18  ;;  %v2702_v54 = vpop.f32.mrf.mxu0  ;;  %3111 = vmatpush.bf16.msra.mxu1 %v9212_v41  ;;  %v9115_v18 = vld [vmem:[#allocation6 + $0x368] sm:$0xf]  ;;  %3065 = vmatpush.bf16.msra.mxu0 %v8684_v29 }
 0x135   : > { %v9116_v5 = vor.u32 %v10970_v61, %v9115_v18 }
 0x136   : > { %v12309_v10 = vadd.f32 %v2847_v39, %v2799_v42  ;;  %3211 = vmatpush.bf16.msra.mxu3 %v9884_v32 }
 0x138   : > { %14145 = vst [vmem:[#allocation27_spill] sm:$0xff] %v12309_v10  ;;  %v2751_v14 = vpop.f32.mrf.mxu1  ;;  %3112 = vmatpush.bf16.msra.mxu1 %v9164_v19  ;;  %v9835_v10 = vld [vmem:[#allocation6 + $0x908] sm:$0xf] }
 0x139   : > { %v2752_v24 = vadd.f32 %v2751_v14, %v2702_v54  ;;  %v9836_v41 = vor.u32 %v11150_v58, %v9835_v10  ;;  %v9068_v14 = vor.u32 %v10958_v57, %v9067_v6 }
 0x13b   : > { %v2800_v36 = vpop.f32.mrf.mxu2  ;;  %3212 = vmatpush.bf16.msra.mxu3 %v9836_v41 }
 0x13c   : > { %v2849_v38 = vpop.f32.mrf.mxu3  ;;  %v2801_v39 = vadd.f32 %v2800_v36, %v2752_v24  ;;  %v2705_v42 = vpop.f32.mrf.mxu0  ;;  %3113 = vmatpush.bf16.msra.mxu1 %v9116_v5  ;;  %v11132_v24 = vld [vmem:[#allocation6 + $0x8ac] sm:$0xf] }
 0x13d   : > { %v9792_v33 = vor.u32 %v11132_v24, %v9789_v30  ;;  %v9021_v24 = vld [vmem:[#allocation6 + $0x2d8] sm:$0xf0]  ;;  %v11120_v30 = vld [vmem:[#allocation6 + $0x84c] sm:$0xf] }
 0x13e   : > { %v12311_v54 = vadd.f32 %v2849_v38, %v2801_v39 }
 0x13f   : > { %2900 = vmatmul.bf16.gmra.mxu0 %v12231_v37  ;;  %3352 = vmatpush.bf16.msrb.mxu2 %v9792_v33 }
 0x140   : > { %v2754_v12 = vpop.f32.mrf.mxu1  ;;  %2998 = vmatmul.bf16.gmra.mxu2 %v12235_v47  ;;  %3114 = vmatpush.bf16.msra.mxu1 %v9068_v14 }
 0x141   : > { %v2755_v19 = vadd.f32 %v2754_v12, %v2705_v42  ;;  %3047 = vmatmul.bf16.gmra.mxu3 %v12237_v48 }
 0x143   : > { %2949 = vmatmul.bf16.gmra.mxu1 %v12239_v60  ;;  %v2803_v58 = vpop.f32.mrf.mxu2 }
 0x144   : > { %v2852_v10 = vpop.f32.mrf.mxu3  ;;  %v2804_v32 = vadd.f32 %v2803_v58, %v2755_v19  ;;  %v2707_v28 = vpop.f32.mrf.mxu0  ;;  %v10940_v19 = vld [vmem:[#allocation6 + $0x2ac] sm:$0xf]  ;;  %v9741_v58 = vld [vmem:[#allocation6 + $0x878] sm:$0xf0] }
 0x145   : > { %v9024_v33 = vor.u32 %v10940_v19, %v9021_v24 }
 0x146   : > { %v12317_v35 = vadd.f32 %v2852_v10, %v2804_v32  ;;  %v9744_v32 = vor.u32 %v11120_v30, %v9741_v58  ;;  %v9693_v30 = vld [vmem:[#allocation6 + $0x818] sm:$0xf0] }
 0x147   : > { %3254 = vmatpush.bf16.msrb.mxu0 %v9024_v33 }
 0x148   : > { %v2756_v18 = vpop.f32.mrf.mxu1  ;;  %3353 = vmatpush.bf16.msrb.mxu2 %v9744_v32 }
 0x149   : > { %v2757_v36 = vadd.f32 %v2756_v18, %v2707_v28 }
 0x14b   : > { %v2805_v38 = vpop.f32.mrf.mxu2 }
 0x14c   : > { %v2854_v29 = vpop.f32.mrf.mxu3  ;;  %v2806_v61 = vadd.f32 %v2805_v38, %v2757_v36  ;;  %v2710_v39 = vpop.f32.mrf.mxu0 }
 0x14e   : > { %v12319_v42 = vadd.f32 %v2854_v29, %v2806_v61 }
 0x14f   : > { %2905 = vmatmul.bf16.gmra.mxu0 %v12251_v17 }
 0x150   : > { %v2759_v5 = vpop.f32.mrf.mxu1  ;;  %3003 = vmatmul.bf16.gmra.mxu2 %v12255_v20 }
 0x151   : > { %v2760_v41 = vadd.f32 %v2759_v5, %v2710_v39  ;;  %3052 = vmatmul.bf16.gmra.mxu3 %v12257_v21 }
 0x153   : > { %2954 = vmatmul.bf16.gmra.mxu1 %v12259_v23  ;;  %v2808_v6 = vpop.f32.mrf.mxu2 }
 0x154   : > { %v2857_v57 = vpop.f32.mrf.mxu3  ;;  %v2809_v12 = vadd.f32 %v2808_v6, %v2760_v41  ;;  %v2712_v14 = vpop.f32.mrf.mxu0  ;;  %v10928_v6 = vld [vmem:[#allocation6 + $0x24c] sm:$0xf] }
 0x156   : > { %v12325_v10 = vadd.f32 %v2857_v57, %v2809_v12  ;;  %v8973_v57 = vld [vmem:[#allocation6 + $0x278] sm:$0xf0]  ;;  %v11108_v12 = vld [vmem:[#allocation6 + $0x7ec] sm:$0xf] }
 0x157   : > { %v8976_v24 = vor.u32 %v10928_v6, %v8973_v57  ;;  %v9696_v32 = vor.u32 %v11108_v12, %v9693_v30  ;;  %v11096_v30 = vld [vmem:[#allocation6 + $0x78c] sm:$0xf] }
 0x158   : > { %v2761_v28 = vpop.f32.mrf.mxu1 }
 0x159   : > { %v2762_v18 = vadd.f32 %v2761_v28, %v2712_v14  ;;  %3255 = vmatpush.bf16.msrb.mxu0 %v8976_v24  ;;  %3354 = vmatpush.bf16.msrb.mxu2 %v9696_v32  ;;  %v8925_v24 = vld [vmem:[#allocation6 + $0x218] sm:$0xf0] }
 0x15b   : > { %v2810_v36 = vpop.f32.mrf.mxu2 }
 0x15c   : > { %v2859_v38 = vpop.f32.mrf.mxu3  ;;  %v2811_v29 = vadd.f32 %v2810_v36, %v2762_v18  ;;  %v2871_v61 = vpop.f32.mrf.mxu0 }
 0x15e   : > { %v12327_v39 = vadd.f32 %v2859_v38, %v2811_v29 }
 0x15f   : > { %3066 = vmatmul.bf16.vlgmr.msra.gmra.mxu0 %v12112_v44 }
 0x160   : > { %v2920_v5 = vpop.f32.mrf.mxu1  ;;  %3164 = vmatmul.bf16.vlgmr.msra.gmra.mxu2 %v12115_v49 }
 0x161   : > { %v2921_v41 = vadd.f32 %v2920_v5, %v2871_v61  ;;  %3213 = vmatmul.bf16.vlgmr.msra.gmra.mxu3 %v12117_v50 }
 0x163   : > { %3115 = vmatmul.bf16.vlgmr.msra.gmra.mxu1 %v12119_v53  ;;  %v2969_v14 = vpop.f32.mrf.mxu2 }
 0x164   : > { %v3018_v19 = vpop.f32.mrf.mxu3  ;;  %v2970_v33 = vadd.f32 %v2969_v14, %v2921_v41  ;;  %v2873_v58 = vpop.f32.mrf.mxu0 }
 0x166   : > { %v3019_v28 = vadd.f32 %v3018_v19, %v2970_v33  ;;  %v10916_v19 = vld [vmem:[#allocation6 + $0x1ec] sm:$0xf] }
 0x167   : > { %v8928_v32 = vor.u32 %v10916_v19, %v8925_v24 }
 0x168   : > { %v2922_v18 = vpop.f32.mrf.mxu1  ;;  %v5018_v36 = vpack.c.bf16 %v3019_v28, %v12269_v63  ;;  %v9645_v28 = vld [vmem:[#allocation6 + $0x7b8] sm:$0xf0] }
 0x169   : > { %v2923_v38 = vadd.f32 %v2922_v18, %v2873_v58  ;;  %3256 = vmatpush.bf16.msrb.mxu0 %v8928_v32 }
 0x16a   : > { %v5130_v57 = vunpack.c.l.b16 %v5018_v36  ;;  %v5540_v12 = vunpack.c.h.b16 %v5018_v36 }
 0x16b   : > { %v2971_v29 = vpop.f32.mrf.mxu2 }
 0x16c   : > { %v3020_v61 = vpop.f32.mrf.mxu3  ;;  %v2972_v5 = vadd.f32 %v2971_v29, %v2923_v38  ;;  %v2876_v53 = vpop.f32.mrf.mxu0 }
 0x16e   : > { %v3021_v50 = vadd.f32 %v3020_v61, %v2972_v5 }
 0x16f   : > { %3071 = vmatmul.bf16.gmra.mxu0 %v12131_v4 }
 0x170   : > { %v2925_v49 = vpop.f32.mrf.mxu1  ;;  %v5024_v6 = vpack.c.bf16 %v3021_v50, %v12271_v13  ;;  %3169 = vmatmul.bf16.gmra.mxu2 %v12135_v7  ;;  %v9648_v13 = vor.u32 %v11096_v30, %v9645_v28  ;;  %v10904_v30 = vld [vmem:[#allocation6 + $0x18c] sm:$0xf] }
 0x171   : > { %v2926_v41 = vadd.f32 %v2925_v49, %v2876_v53  ;;  %3218 = vmatmul.bf16.gmra.mxu3 %v12137_v8 }
 0x172   : > { %v5131_v14 = vunpack.c.l.b16 %v5024_v6  ;;  %v5541_v63 = vunpack.c.h.b16 %v5024_v6  ;;  %3355 = vmatpush.bf16.msrb.mxu2 %v9648_v13 }
 0x173   : > { %3120 = vmatmul.bf16.gmra.mxu1 %v12139_v9  ;;  %v2974_v33 = vpop.f32.mrf.mxu2 }
 0x174   : > { %v3023_v58 = vpop.f32.mrf.mxu3  ;;  %v12339_v18 = vpack.c.b16 %v5131_v14, %v5130_v57  ;;  %v12341_v50 = vpack.c.b16 %v5541_v63, %v5540_v12  ;;  %v2975_v49 = vadd.f32 %v2974_v33, %v2926_v41  ;;  %v2878_v53 = vpop.f32.mrf.mxu0  ;;  %v8877_v33 = vld [vmem:[#allocation6 + $0x1b8] sm:$0xf0] }
 0x175   : > { %v8880_v28 = vor.u32 %v10904_v30, %v8877_v33 }
 0x176   : > { %14146 = vst [vmem:[#allocation28_spill] sm:$0xff] %v12339_v18  ;;  %v3024_v36 = vadd.f32 %v3023_v58, %v2975_v49  ;;  %v11084_v58 = vld [vmem:[#allocation6 + $0x72c] sm:$0xf]  ;;  %v9597_v49 = vld [vmem:[#allocation6 + $0x758] sm:$0xf0] }
 0x177   : > { %14147 = vst [vmem:[#allocation29_spill] sm:$0xff] %v12341_v50  ;;  %v9600_v13 = vor.u32 %v11084_v58, %v9597_v49  ;;  %3257 = vmatpush.bf16.msrb.mxu0 %v8880_v28  ;;  %v10892_v58 = vld [vmem:[#allocation6 + $0x12c] sm:$0xf]  ;;  %v11175_v50 = vld [vmem:[#allocation6 + $0x9fc] sm:$0xf0] }
 0x178   : > { %v2927_v38 = vpop.f32.mrf.mxu1  ;;  %v5030_v29 = vpack.c.bf16 %v3024_v36, %v12277_v34  ;;  %v11163_v18 = vld [vmem:[#allocation6 + $0x99c] sm:$0xf0] }
 0x179   : > { %v2928_v61 = vadd.f32 %v2927_v38, %v2878_v53  ;;  %3356 = vmatpush.bf16.msrb.mxu2 %v9600_v13 }
 0x17a   : > { %v5132_v14 = vunpack.c.l.b16 %v5030_v29  ;;  %v5542_v63 = vunpack.c.h.b16 %v5030_v29 }
 0x17b   : > { %v2976_v5 = vpop.f32.mrf.mxu2 }
 0x17c   : > { %v3025_v6 = vpop.f32.mrf.mxu3  ;;  %v2977_v9 = vadd.f32 %v2976_v5, %v2928_v61  ;;  %v2881_v8 = vpop.f32.mrf.mxu0 }
 0x17e   : > { %v3026_v19 = vadd.f32 %v3025_v6, %v2977_v9 }
 0x17f   : > { %3076 = vmatmul.bf16.gmra.mxu0 %v12151_v22 }
 0x180   : > { %v2930_v57 = vpop.f32.mrf.mxu1  ;;  %v5036_v12 = vpack.c.bf16 %v3026_v19, %v12279_v52  ;;  %3174 = vmatmul.bf16.gmra.mxu2 %v12155_v25 }
 0x181   : > { %v2931_v41 = vadd.f32 %v2930_v57, %v2881_v8  ;;  %3223 = vmatmul.bf16.gmra.mxu3 %v12157_v26 }
 0x182   : > { %v5133_v24 = vunpack.c.l.b16 %v5036_v12  ;;  %v5543_v34 = vunpack.c.h.b16 %v5036_v12 }
 0x183   : > { %3125 = vmatmul.bf16.gmra.mxu1 %v12159_v27  ;;  %v2979_v9 = vpop.f32.mrf.mxu2 }
 0x184   : > { %v3028_v32 = vpop.f32.mrf.mxu3  ;;  %v2980_v53 = vadd.f32 %v2979_v9, %v2931_v41  ;;  %v2883_v52 = vpop.f32.mrf.mxu0  ;;  %v12349_v36 = vpack.c.b16 %v5133_v24, %v5132_v14  ;;  %v12351_v8 = vpack.c.b16 %v5543_v34, %v5542_v63  ;;  %v8829_v9 = vld [vmem:[#allocation6 + $0x158] sm:$0xf0] }
 0x186   : > { %14148 = vst [vmem:[#allocation30_spill] sm:$0xff] %v12349_v36  ;;  %v3029_v38 = vadd.f32 %v3028_v32, %v2980_v53  ;;  %v11072_v32 = vld [vmem:[#allocation6 + $0x6cc] sm:$0xf]  ;;  %v8832_v53 = vor.u32 %v10892_v58, %v8829_v9 }
 0x187   : > { %14149 = vst [vmem:[#allocation31_spill] sm:$0xff] %v12351_v8  ;;  %v11211_v8 = vld [vmem:[#allocation6 + $0xb1c] sm:$0xf0] }
 0x188   : > { %v2932_v29 = vpop.f32.mrf.mxu1  ;;  %v5042_v61 = vpack.c.bf16 %v3029_v38, %v12285_v16  ;;  %3258 = vmatpush.bf16.msrb.mxu0 %v8832_v53  ;;  %v8781_v53 = vld [vmem:[#allocation6 + $0xf8] sm:$0xf0] }
 0x189   : > { %v2933_v5 = vadd.f32 %v2932_v29, %v2883_v52  ;;  %v9549_v52 = vld [vmem:[#allocation6 + $0x6f8] sm:$0xf0] }
 0x18a   : > { %v5134_v24 = vunpack.c.l.b16 %v5042_v61  ;;  %v5544_v34 = vunpack.c.h.b16 %v5042_v61  ;;  %v9552_v38 = vor.u32 %v11072_v32, %v9549_v52  ;;  %v11060_v52 = vld [vmem:[#allocation6 + $0x66c] sm:$0xf] }
 0x18b   : > { %v2981_v6 = vpop.f32.mrf.mxu2 }
 0x18c   : > { %v3030_v19 = vpop.f32.mrf.mxu3  ;;  %v2982_v57 = vadd.f32 %v2981_v6, %v2933_v5  ;;  %v2886_v12 = vpop.f32.mrf.mxu0  ;;  %3357 = vmatpush.bf16.msrb.mxu2 %v9552_v38 }
 0x18e   : > { %v3031_v30 = vadd.f32 %v3030_v19, %v2982_v57 }
 0x18f   : > { %3081 = vmatmul.bf16.gmra.mxu0 %v12171_v40 }
 0x190   : > { %v2935_v41 = vpop.f32.mrf.mxu1  ;;  %v5048_v14 = vpack.c.bf16 %v3031_v30, %v12287_v31  ;;  %3179 = vmatmul.bf16.gmra.mxu2 %v12175_v43 }
 0x191   : > { %v2936_v63 = vadd.f32 %v2935_v41, %v2886_v12  ;;  %3228 = vmatmul.bf16.gmra.mxu3 %v12177_v45 }
 0x192   : > { %v5135_v33 = vunpack.c.l.b16 %v5048_v14  ;;  %v5545_v16 = vunpack.c.h.b16 %v5048_v14 }
 0x193   : > { %3130 = vmatmul.bf16.gmra.mxu1 %v12179_v46  ;;  %v2984_v28 = vpop.f32.mrf.mxu2 }
 0x194   : > { %v3033_v49 = vpop.f32.mrf.mxu3  ;;  %v2985_v13 = vadd.f32 %v2984_v28, %v2936_v63  ;;  %v2888_v31 = vpop.f32.mrf.mxu0  ;;  %v12359_v29 = vpack.c.b16 %v5135_v33, %v5134_v24  ;;  %v12361_v5 = vpack.c.b16 %v5545_v16, %v5544_v34  ;;  %v11228_v33 = vld [vmem:[#allocation6 + $0xbac] sm:$0xf]  ;;  %v10173_v16 = vld [vmem:[#allocation6 + $0xbd8] sm:$0xf0] }
 0x195   : > { %v10176_v9 = vor.u32 %v11228_v33, %v10173_v16 }
 0x196   : > { %14150 = vst [vmem:[#allocation32_spill] sm:$0xff] %v12359_v29  ;;  %v3034_v61 = vadd.f32 %v3033_v49, %v2985_v13  ;;  %v10880_v49 = vld [vmem:[#allocation6 + $0xcc] sm:$0xf] }
 0x197   : > { %14151 = vst [vmem:[#allocation33_spill] sm:$0xff] %v12361_v5  ;;  %3401 = vmatpush.bf16.msrb.mxu3 %v10176_v9 }
 0x198   : > { %v2937_v6 = vpop.f32.mrf.mxu1  ;;  %v5054_v19 = vpack.c.bf16 %v3034_v61, %v12293_v0  ;;  %v9501_v61 = vld [vmem:[#allocation6 + $0x698] sm:$0xf0] }
 0x199   : > { %v2938_v57 = vadd.f32 %v2937_v6, %v2888_v31  ;;  %v11036_v6 = vld [vmem:[#allocation6 + $0x5ac] sm:$0xf] }
 0x19a   : > { %v5136_v0 = vunpack.c.l.b16 %v5054_v19  ;;  %v5546_v13 = vunpack.c.h.b16 %v5054_v19 }
 0x19b   : > { %v2986_v12 = vpop.f32.mrf.mxu2 }
 0x19c   : > { %v3035_v30 = vpop.f32.mrf.mxu3  ;;  %v2987_v41 = vadd.f32 %v2986_v12, %v2938_v57  ;;  %v2891_v14 = vpop.f32.mrf.mxu0  ;;  %v9405_v57 = vld [vmem:[#allocation6 + $0x5d8] sm:$0xf0] }
 0x19e   : > { %v3036_v58 = vadd.f32 %v3035_v30, %v2987_v41  ;;  %v9504_v41 = vor.u32 %v11060_v52, %v9501_v61  ;;  %v10077_v61 = vld [vmem:[#allocation6 + $0xb18] sm:$0xf0] }
 0x19f   : > { %3086 = vmatmul.bf16.gmra.mxu0 %v12191_v62 }
 0x1a0   : > { %v2940_v63 = vpop.f32.mrf.mxu1  ;;  %v5060_v24 = vpack.c.bf16 %v3036_v58, %v12295_v15  ;;  %3184 = vmatmul.bf16.gmra.mxu2 %v12195_v1  ;;  %v8784_v15 = vor.u32 %v10880_v49, %v8781_v53  ;;  %v11216_v58 = vld [vmem:[#allocation6 + $0xb4c] sm:$0xf]  ;;  %v9357_v53 = vld [vmem:[#allocation6 + $0x578] sm:$0xf0] }
 0x1a1   : > { %v2941_v34 = vadd.f32 %v2940_v63, %v2891_v14  ;;  %3233 = vmatmul.bf16.gmra.mxu3 %v12197_v2  ;;  %v9408_v14 = vor.u32 %v11036_v6, %v9405_v57  ;;  %v10125_v63 = vld [vmem:[#allocation6 + $0xb78] sm:$0xf0]  ;;  %3358 = vmatpush.bf16.msrb.mxu2 %v9504_v41  ;;  %v11024_v49 = vld [vmem:[#allocation6 + $0x54c] sm:$0xf] }
 0x1a2   : > { %v5137_v32 = vunpack.c.l.b16 %v5060_v24  ;;  %v5547_v28 = vunpack.c.h.b16 %v5060_v24  ;;  %3259 = vmatpush.bf16.msrb.mxu0 %v8784_v15  ;;  %v10128_v33 = vor.u32 %v11216_v58, %v10125_v63  ;;  %v9360_v5 = vor.u32 %v11024_v49, %v9357_v53  ;;  %v10029_v41 = vld [vmem:[#allocation6 + $0xab8] sm:$0xf0]  ;;  %v11000_v63 = vld [vmem:[#allocation6 + $0x48c] sm:$0xf] }
 0x1a3   : > { %3135 = vmatmul.bf16.gmra.mxu1 %v12199_v3  ;;  %v2989_v31 = vpop.f32.mrf.mxu2  ;;  %v11180_v49 = vld [vmem:[#allocation6 + $0xa2c] sm:$0xf]  ;;  %v9981_v53 = vld [vmem:[#allocation6 + $0xa58] sm:$0xf0] }
 0x1a4   : > { %v3038_v38 = vpop.f32.mrf.mxu3  ;;  %v2990_v12 = vadd.f32 %v2989_v31, %v2941_v34  ;;  %v2893_v30 = vpop.f32.mrf.mxu0  ;;  %v12369_v24 = vpack.c.b16 %v5137_v32, %v5136_v0  ;;  %v12371_v16 = vpack.c.b16 %v5547_v28, %v5546_v13  ;;  %3303 = vmatpush.bf16.msrb.mxu1 %v9408_v14  ;;  %3402 = vmatpush.bf16.msrb.mxu3 %v10128_v33  ;;  %v11204_v31 = vld [vmem:[#allocation6 + $0xaec] sm:$0xf]  ;;  %v9309_v32 = vld [vmem:[#allocation6 + $0x518] sm:$0xf0] }
 0x1a5   : > { %v10080_v6 = vor.u32 %v11204_v31, %v10077_v61  ;;  %v11012_v0 = vld [vmem:[#allocation6 + $0x4ec] sm:$0xf] }
 0x1a6   : > { %14152 = vst [vmem:[#allocation34_spill] sm:$0xff] %v12369_v24  ;;  %v3039_v19 = vadd.f32 %v3038_v38, %v2990_v12  ;;  %v9312_v13 = vor.u32 %v11012_v0, %v9309_v32  ;;  %v11192_v12 = vld [vmem:[#allocation6 + $0xa8c] sm:$0xf]  ;;  %v8733_v32 = vld [vmem:[#allocation6 + $0x98] sm:$0xf0] }
 0x1a7   : > { %14153 = vst [vmem:[#allocation35_spill] sm:$0xff] %v12371_v16  ;;  %v10032_v14 = vor.u32 %v11192_v12, %v10029_v41  ;;  %v10868_v0 = vld [vmem:[#allocation6 + $0x6c] sm:$0xf]  ;;  %v9453_v12 = vld [vmem:[#allocation6 + $0x638] sm:$0xf0] }
 0x1a8   : > { %v2942_v9 = vpop.f32.mrf.mxu1  ;;  %v5066_v34 = vpack.c.bf16 %v3039_v19, %v12301_v11  ;;  %3304 = vmatpush.bf16.msrb.mxu1 %v9360_v5  ;;  %3403 = vmatpush.bf16.msrb.mxu3 %v10080_v6  ;;  %v9261_v11 = vld [vmem:[#allocation6 + $0x4b8] sm:$0xf0]  ;;  %v14154_v6 = vld [vmem:[#allocation26_spill] sm:$0xff] }
 0x1a9   : > { %v2943_v52 = vadd.f32 %v2942_v9, %v2893_v30  ;;  %v9264_v5 = vor.u32 %v11000_v63, %v9261_v11  ;;  %v9984_v9 = vor.u32 %v11180_v49, %v9981_v53  ;;  %v9213_v41 = vld [vmem:[#allocation6 + $0x458] sm:$0xf0] }
 0x1ab   : > { %v2991_v15 = vpop.f32.mrf.mxu2 }
 0x1ac   : > { %v3040_v28 = vpop.f32.mrf.mxu3  ;;  %v2992_v38 = vadd.f32 %v2991_v15, %v2943_v52  ;;  %v2896_v57 = vpop.f32.mrf.mxu0  ;;  %3305 = vmatpush.bf16.msrb.mxu1 %v9312_v13  ;;  %3404 = vmatpush.bf16.msrb.mxu3 %v10032_v14  ;;  %v5138_v52 = vunpack.c.l.b16 %v5066_v34  ;;  %v11048_v15 = vld [vmem:[#allocation6 + $0x60c] sm:$0xf] }
 0x1ad   : > { %v9456_v63 = vor.u32 %v11048_v15, %v9453_v12  ;;  %v11156_v12 = vld [vmem:[#allocation6 + $0x96c] sm:$0xf] }
 0x1ae   : > { %v3041_v58 = vadd.f32 %v3040_v28, %v2992_v38  ;;  %v5548_v28 = vunpack.c.h.b16 %v5066_v34 }
 0x1af   : > { %3091 = vmatmul.bf16.gmra.mxu0 %v12211_v51  ;;  %3359 = vmatpush.bf16.msrb.mxu2 %v9456_v63 }
 0x1b0   : > { %v2945_v30 = vpop.f32.mrf.mxu1  ;;  %v5072_v33 = vpack.c.bf16 %v3041_v58, %v12303_v59  ;;  %3189 = vmatmul.bf16.gmra.mxu2 %v12215_v55  ;;  %v8736_v59 = vor.u32 %v10868_v0, %v8733_v32  ;;  %3306 = vmatpush.bf16.msrb.mxu1 %v9264_v5  ;;  %v10976_v0 = vld [vmem:[#allocation6 + $0x3cc] sm:$0xf]  ;;  %v9165_v32 = vld [vmem:[#allocation6 + $0x3f8] sm:$0xf0] }
 0x1b1   : > { %v2946_v19 = vadd.f32 %v2945_v30, %v2896_v57  ;;  %3238 = vmatmul.bf16.gmra.mxu3 %v12217_v56  ;;  %v10988_v57 = vld [vmem:[#allocation6 + $0x42c] sm:$0xf] }
 0x1b2   : > { %v5139_v31 = vunpack.c.l.b16 %v5072_v33  ;;  %v5549_v61 = vunpack.c.h.b16 %v5072_v33  ;;  %3405 = vmatpush.bf16.msrb.mxu3 %v9984_v9  ;;  %v9216_v11 = vor.u32 %v10988_v57, %v9213_v41  ;;  %v11168_v30 = vld [vmem:[#allocation6 + $0x9cc] sm:$0xf]  ;;  %v9933_v33 = vld [vmem:[#allocation6 + $0x9f8] sm:$0xf0]  ;;  %3260 = vmatpush.bf16.msrb.mxu0 %v8736_v59  ;;  %v9168_v9 = vor.u32 %v10976_v0, %v9165_v32 }
 0x1b3   : > { %3140 = vmatmul.bf16.gmra.mxu1 %v14154_v6  ;;  %v2994_v13 = vpop.f32.mrf.mxu2  ;;  %v9936_v53 = vor.u32 %v11168_v30, %v9933_v33  ;;  %v9885_v57 = vld [vmem:[#allocation6 + $0x998] sm:$0xf0]  ;;  %v10964_v59 = vld [vmem:[#allocation6 + $0x36c] sm:$0xf] }
 0x1b4   : > { %v3043_v38 = vpop.f32.mrf.mxu3  ;;  %v2995_v14 = vadd.f32 %v2994_v13, %v2946_v19  ;;  %v2898_v58 = vpop.f32.mrf.mxu0  ;;  %v12379_v49 = vpack.c.b16 %v5139_v31, %v5138_v52  ;;  %v12381_v16 = vpack.c.b16 %v5549_v61, %v5548_v28  ;;  %3307 = vmatpush.bf16.msrb.mxu1 %v9216_v11  ;;  %v14157_v19 = vld [vmem:[#allocation27_spill] sm:$0xff]  ;;  %v9888_v41 = vor.u32 %v11156_v12, %v9885_v57  ;;  %v10856_v52 = vld [vmem:[#allocation6 + $0xc] sm:$0xf] }
 0x1b5   : > { %v8685_v31 = vld [vmem:[#allocation6 + $0x38] sm:$0xf0]  ;;  %v11144_v33 = vld [vmem:[#allocation6 + $0x90c] sm:$0xf] }
 0x1b6   : > { %14155 = vst [vmem:[#allocation36_spill] sm:$0xff] %v12379_v49  ;;  %v3044_v34 = vadd.f32 %v3043_v38, %v2995_v14  ;;  %3406 = vmatpush.bf16.msrb.mxu3 %v9936_v53  ;;  %v8688_v28 = vor.u32 %v10856_v52, %v8685_v31  ;;  %v9117_v38 = vld [vmem:[#allocation6 + $0x398] sm:$0xf0]  ;;  %v10952_v0 = vld [vmem:[#allocation6 + $0x30c] sm:$0xf] }
 0x1b7   : > { %14156 = vst [vmem:[#allocation37_spill] sm:$0xff] %v12381_v16  ;;  %v9120_v11 = vor.u32 %v10964_v59, %v9117_v38  ;;  %v9837_v53 = vld [vmem:[#allocation6 + $0x938] sm:$0xf0]  ;;  %v9795_v31 = vld [vmem:[#allocation6 + $0x8b0] sm:$0xf] }
 0x1b8   : > { %v2947_v5 = vpop.f32.mrf.mxu1  ;;  %v5078_v13 = vpack.c.bf16 %v3044_v34, %v14157_v19  ;;  %3308 = vmatpush.bf16.msrb.mxu1 %v9168_v9  ;;  %3261 = vmatpush.bf16.msrb.mxu0 %v8688_v28  ;;  %v9840_v34 = vor.u32 %v11144_v33, %v9837_v53  ;;  %v9069_v32 = vld [vmem:[#allocation6 + $0x338] sm:$0xf0]  ;;  %v11139_v59 = vld [vmem:[#allocation6 + $0x8dc] sm:$0xf0] }
 0x1b9   : > { %v2948_v15 = vadd.f32 %v2947_v5, %v2898_v58  ;;  %v9072_v19 = vor.u32 %v10952_v0, %v9069_v32  ;;  %v9796_v28 = vor.u32 %v11139_v59, %v9795_v31  ;;  %v10947_v31 = vld [vmem:[#allocation6 + $0x2dc] sm:$0xf0] }
 0x1ba   : > { %3407 = vmatpush.bf16.msrb.mxu3 %v9888_v41  ;;  %v5550_v57 = vunpack.c.h.b16 %v5078_v13 }
 0x1bb   : > { %v2996_v30 = vpop.f32.mrf.mxu2  ;;  %3548 = vmatpush.bf16.msra.mxu2 %v9796_v28 }
 0x1bc   : > { %v3045_v61 = vpop.f32.mrf.mxu3  ;;  %v2997_v14 = vadd.f32 %v2996_v30, %v2948_v15  ;;  %v2901_v63 = vpop.f32.mrf.mxu0  ;;  %3309 = vmatpush.bf16.msrb.mxu1 %v9120_v11  ;;  %v5140_v15 = vunpack.c.l.b16 %v5078_v13 }
 0x1be   : > { %v3046_v58 = vadd.f32 %v3045_v61, %v2997_v14  ;;  %3408 = vmatpush.bf16.msrb.mxu3 %v9840_v34 }
 0x1bf   : > { %3096 = vmatmul.bf16.gmra.mxu0 %v12231_v37 }
 0x1c0   : > { %v2950_v5 = vpop.f32.mrf.mxu1  ;;  %v5084_v9 = vpack.c.bf16 %v3046_v58, %v12311_v54  ;;  %3194 = vmatmul.bf16.gmra.mxu2 %v12235_v47  ;;  %3310 = vmatpush.bf16.msrb.mxu1 %v9072_v19 }
 0x1c1   : > { %v2951_v12 = vadd.f32 %v2950_v5, %v2901_v63  ;;  %3243 = vmatmul.bf16.gmra.mxu3 %v12237_v48 }
 0x1c2   : > { %v5141_v41 = vunpack.c.l.b16 %v5084_v9  ;;  %v5551_v52 = vunpack.c.h.b16 %v5084_v9  ;;  %v9027_v9 = vld [vmem:[#allocation6 + $0x2b0] sm:$0xf] }
 0x1c3   : > { %3145 = vmatmul.bf16.gmra.mxu1 %v12239_v60  ;;  %v2999_v30 = vpop.f32.mrf.mxu2 }
 0x1c4   : > { %v3048_v61 = vpop.f32.mrf.mxu3  ;;  %v3000_v38 = vadd.f32 %v2999_v30, %v2951_v12  ;;  %v2903_v54 = vpop.f32.mrf.mxu0  ;;  %v12389_v14 = vpack.c.b16 %v5141_v41, %v5140_v15  ;;  %v12391_v63 = vpack.c.b16 %v5551_v52, %v5550_v57  ;;  %v9028_v12 = vor.u32 %v10947_v31, %v9027_v9  ;;  %v11127_v41 = vld [vmem:[#allocation6 + $0x87c] sm:$0xf0] }
 0x1c6   : > { %14158 = vst [vmem:[#allocation27_spill] sm:$0xff] %v12389_v14  ;;  %v3049_v11 = vadd.f32 %v3048_v61, %v3000_v38  ;;  %3450 = vmatpush.bf16.msra.mxu0 %v9028_v12  ;;  %v8979_v12 = vld [vmem:[#allocation6 + $0x250] sm:$0xf] }
 0x1c7   : > { %14159 = vst [vmem:[#allocation38_spill] sm:$0xff] %v12391_v63  ;;  %v8787_v14 = vld [vmem:[#allocation6 + $0xd0] sm:$0xf] }
 0x1c8   : > { %v2952_v33 = vpop.f32.mrf.mxu1  ;;  %v5090_v13 = vpack.c.bf16 %v3049_v11, %v12317_v35  ;;  %v9747_v35 = vld [vmem:[#allocation6 + $0x850] sm:$0xf] }
 0x1c9   : > { %v2953_v53 = vadd.f32 %v2952_v33, %v2903_v54  ;;  %v9748_v52 = vor.u32 %v11127_v41, %v9747_v35 }
 0x1ca   : > { %v5142_v59 = vunpack.c.l.b16 %v5090_v13  ;;  %v5552_v30 = vunpack.c.h.b16 %v5090_v13 }
 0x1cb   : > { %v3001_v34 = vpop.f32.mrf.mxu2  ;;  %3549 = vmatpush.bf16.msra.mxu2 %v9748_v52  ;;  %v14162_v52 = vld [vmem:[#allocation16_spill] sm:$0xff] }
 0x1cc   : > { %v3050_v58 = vpop.f32.mrf.mxu3  ;;  %v3002_v0 = vadd.f32 %v3001_v34, %v2953_v53  ;;  %v2906_v32 = vpop.f32.mrf.mxu0 }
 0x1ce   : > { %v3051_v5 = vadd.f32 %v3050_v58, %v3002_v0 }
 0x1cf   : > { %3101 = vmatmul.bf16.gmra.mxu0 %v12251_v17 }
 0x1d0   : > { %v2955_v19 = vpop.f32.mrf.mxu1  ;;  %v5096_v15 = vpack.c.bf16 %v3051_v5, %v12319_v42  ;;  %3199 = vmatmul.bf16.gmra.mxu2 %v12255_v20 }
 0x1d1   : > { %v2956_v57 = vadd.f32 %v2955_v19, %v2906_v32  ;;  %3248 = vmatmul.bf16.gmra.mxu3 %v12257_v21 }
 0x1d2   : > { %v5143_v61 = vunpack.c.l.b16 %v5096_v15  ;;  %v5553_v28 = vunpack.c.h.b16 %v5096_v15  ;;  %v10935_v15 = vld [vmem:[#allocation6 + $0x27c] sm:$0xf0] }
 0x1d3   : > { %3150 = vmatmul.bf16.gmra.mxu1 %v12259_v23  ;;  %v3004_v38 = vpop.f32.mrf.mxu2  ;;  %v8980_v35 = vor.u32 %v10935_v15, %v8979_v12 }
 0x1d4   : > { %v3053_v54 = vpop.f32.mrf.mxu3  ;;  %v3005_v11 = vadd.f32 %v3004_v38, %v2956_v57  ;;  %v2908_v42 = vpop.f32.mrf.mxu0  ;;  %v12399_v33 = vpack.c.b16 %v5143_v61, %v5142_v59  ;;  %v12401_v53 = vpack.c.b16 %v5553_v28, %v5552_v30  ;;  %v14163_v30 = vld [vmem:[#allocation17_spill] sm:$0xff]  ;;  %v11115_v61 = vld [vmem:[#allocation6 + $0x81c] sm:$0xf0] }
 0x1d5   : > { %3451 = vmatpush.bf16.msra.mxu0 %v8980_v35 }
 0x1d6   : > { %14160 = vst [vmem:[#allocation39_spill] sm:$0xff] %v12399_v33  ;;  %v3054_v34 = vadd.f32 %v3053_v54, %v3005_v11  ;;  %v8835_v33 = vld [vmem:[#allocation6 + $0x130] sm:$0xf] }
 0x1d7   : > { %14161 = vst [vmem:[#allocation40_spill] sm:$0xff] %v12401_v53 }
 0x1d8   : > { %v2957_v58 = vpop.f32.mrf.mxu1  ;;  %v5102_v0 = vpack.c.bf16 %v3054_v34, %v12325_v10  ;;  %v9699_v10 = vld [vmem:[#allocation6 + $0x7f0] sm:$0xf]  ;;  %v14164_v34 = vld [vmem:[#allocation18_spill] sm:$0xff] }
 0x1d9   : > { %v2958_v32 = vadd.f32 %v2957_v58, %v2908_v42  ;;  %v9700_v28 = vor.u32 %v11115_v61, %v9699_v10  ;;  %v8931_v10 = vld [vmem:[#allocation6 + $0x1f0] sm:$0xf]  ;;  %v10923_v61 = vld [vmem:[#allocation6 + $0x21c] sm:$0xf0] }
 0x1da   : > { %v5144_v38 = vunpack.c.l.b16 %v5102_v0  ;;  %v5554_v54 = vunpack.c.h.b16 %v5102_v0 }
 0x1db   : > { %v3006_v5 = vpop.f32.mrf.mxu2  ;;  %3550 = vmatpush.bf16.msra.mxu2 %v9700_v28  ;;  %v8932_v28 = vor.u32 %v10923_v61, %v8931_v10 }
 0x1dc   : > { %v3055_v13 = vpop.f32.mrf.mxu3  ;;  %v3007_v9 = vadd.f32 %v3006_v5, %v2958_v32  ;;  %v3067_v31 = vpop.f32.mrf.mxu0 }
 0x1dd   : > { %3452 = vmatpush.bf16.msra.mxu0 %v8932_v28  ;;  %v10911_v28 = vld [vmem:[#allocation6 + $0x1bc] sm:$0xf0] }
 0x1de   : > { %v3056_v19 = vadd.f32 %v3055_v13, %v3007_v9 }
 0x1df   : > { %3262 = vmatmul.bf16.vlgmr.msrb.gmra.mxu0 %v12112_v44 }
 0x1e0   : > { %v3116_v57 = vpop.f32.mrf.mxu1  ;;  %v5108_v41 = vpack.c.bf16 %v3056_v19, %v12327_v39  ;;  %3360 = vmatmul.bf16.vlgmr.msrb.gmra.mxu2 %v14162_v52 }
 0x1e1   : > { %v3117_v59 = vadd.f32 %v3116_v57, %v3067_v31  ;;  %3409 = vmatmul.bf16.vlgmr.msrb.gmra.mxu3 %v14163_v30 }
 0x1e2   : > { %v5145_v11 = vunpack.c.l.b16 %v5108_v41  ;;  %v5555_v42 = vunpack.c.h.b16 %v5108_v41 }
 0x1e3   : > { %3311 = vmatmul.bf16.vlgmr.msrb.gmra.mxu1 %v14164_v34  ;;  %v3165_v58 = vpop.f32.mrf.mxu2 }
 0x1e4   : > { %v3214_v32 = vpop.f32.mrf.mxu3  ;;  %v3166_v5 = vadd.f32 %v3165_v58, %v3117_v59  ;;  %v3069_v39 = vpop.f32.mrf.mxu0  ;;  %v12409_v13 = vpack.c.b16 %v5145_v11, %v5144_v38  ;;  %v12411_v9 = vpack.c.b16 %v5555_v42, %v5554_v54  ;;  %v14167_v54 = vld [vmem:[#allocation19_spill] sm:$0xff]  ;;  %v9651_v11 = vld [vmem:[#allocation6 + $0x790] sm:$0xf] }
 0x1e5   : > { %v11103_v42 = vld [vmem:[#allocation6 + $0x7bc] sm:$0xf0] }
 0x1e6   : > { %14165 = vst [vmem:[#allocation41_spill] sm:$0xff] %v12409_v13  ;;  %v12413_v31 = vadd.f32 %v3214_v32, %v3166_v5  ;;  %v9652_v58 = vor.u32 %v11103_v42, %v9651_v11  ;;  %v14168_v32 = vld [vmem:[#allocation20_spill] sm:$0xff]  ;;  %v8883_v13 = vld [vmem:[#allocation6 + $0x190] sm:$0xf] }
 0x1e7   : > { %14166 = vst [vmem:[#allocation42_spill] sm:$0xff] %v12411_v9  ;;  %v8884_v42 = vor.u32 %v10911_v28, %v8883_v13 }
 0x1e8   : > { %v3118_v19 = vpop.f32.mrf.mxu1  ;;  %3551 = vmatpush.bf16.msra.mxu2 %v9652_v58  ;;  %v9603_v58 = vld [vmem:[#allocation6 + $0x730] sm:$0xf] }
 0x1e9   : > { %v3119_v12 = vadd.f32 %v3118_v19, %v3069_v39  ;;  %3453 = vmatpush.bf16.msra.mxu0 %v8884_v42  ;;  %v10899_v42 = vld [vmem:[#allocation6 + $0x15c] sm:$0xf0] }
 0x1eb   : > { %v3167_v15 = vpop.f32.mrf.mxu2 }
 0x1ec   : > { %v3216_v57 = vpop.f32.mrf.mxu3  ;;  %v3168_v0 = vadd.f32 %v3167_v15, %v3119_v12  ;;  %v3072_v35 = vpop.f32.mrf.mxu0 }
 0x1ee   : > { %v12415_v41 = vadd.f32 %v3216_v57, %v3168_v0 }
 0x1ef   : > { %3267 = vmatmul.bf16.gmra.mxu0 %v12131_v4 }
 0x1f0   : > { %v3121_v59 = vpop.f32.mrf.mxu1  ;;  %3365 = vmatmul.bf16.gmra.mxu2 %v12135_v7 }
 0x1f1   : > { %v3122_v38 = vadd.f32 %v3121_v59, %v3072_v35  ;;  %3414 = vmatmul.bf16.gmra.mxu3 %v14167_v54 }
 0x1f3   : > { %3316 = vmatmul.bf16.gmra.mxu1 %v14168_v32  ;;  %v3170_v5 = vpop.f32.mrf.mxu2 }
 0x1f4   : > { %v3219_v39 = vpop.f32.mrf.mxu3  ;;  %v3171_v19 = vadd.f32 %v3170_v5, %v3122_v38  ;;  %v3074_v12 = vpop.f32.mrf.mxu0  ;;  %v11091_v5 = vld [vmem:[#allocation6 + $0x75c] sm:$0xf0] }
 0x1f6   : > { %v12421_v15 = vadd.f32 %v3219_v39, %v3171_v19  ;;  %v9604_v39 = vor.u32 %v11091_v5, %v9603_v58  ;;  %v8836_v5 = vor.u32 %v10899_v42, %v8835_v33 }
 0x1f8   : > { %v3123_v57 = vpop.f32.mrf.mxu1  ;;  %3552 = vmatpush.bf16.msra.mxu2 %v9604_v39  ;;  %v9555_v39 = vld [vmem:[#allocation6 + $0x6d0] sm:$0xf]  ;;  %3454 = vmatpush.bf16.msra.mxu0 %v8836_v5  ;;  %v10887_v5 = vld [vmem:[#allocation6 + $0xfc] sm:$0xf0] }
 0x1f9   : > { %v3124_v0 = vadd.f32 %v3123_v57, %v3074_v12 }
 0x1fb   : > { %v3172_v10 = vpop.f32.mrf.mxu2 }
 0x1fc   : > { %v3221_v61 = vpop.f32.mrf.mxu3  ;;  %v3173_v35 = vadd.f32 %v3172_v10, %v3124_v0  ;;  %v3077_v59 = vpop.f32.mrf.mxu0 }
 0x1fe   : > { %v12423_v9 = vadd.f32 %v3221_v61, %v3173_v35 }
 0x1ff   : > { %3272 = vmatmul.bf16.gmra.mxu0 %v12151_v22 }
 0x200   : > { %v3126_v11 = vpop.f32.mrf.mxu1  ;;  %3370 = vmatmul.bf16.gmra.mxu2 %v12155_v25 }
 0x201   : > { %v3127_v38 = vadd.f32 %v3126_v11, %v3077_v59  ;;  %3419 = vmatmul.bf16.gmra.mxu3 %v12157_v26 }
 0x203   : > { %3321 = vmatmul.bf16.gmra.mxu1 %v12159_v27  ;;  %v3175_v19 = vpop.f32.mrf.mxu2 }
 0x204   : > { %v3224_v12 = vpop.f32.mrf.mxu3  ;;  %v3176_v57 = vadd.f32 %v3175_v19, %v3127_v38  ;;  %v3079_v0 = vpop.f32.mrf.mxu0  ;;  %v11079_v19 = vld [vmem:[#allocation6 + $0x6fc] sm:$0xf0] }
 0x206   : > { %v12429_v10 = vadd.f32 %v3224_v12, %v3176_v57  ;;  %v9556_v12 = vor.u32 %v11079_v19, %v9555_v39  ;;  %v8788_v19 = vor.u32 %v10887_v5, %v8787_v14 }
 0x208   : > { %v3128_v61 = vpop.f32.mrf.mxu1  ;;  %3553 = vmatpush.bf16.msra.mxu2 %v9556_v12  ;;  %v9507_v12 = vld [vmem:[#allocation6 + $0x670] sm:$0xf]  ;;  %3455 = vmatpush.bf16.msra.mxu0 %v8788_v19 }
 0x209   : > { %v3129_v13 = vadd.f32 %v3128_v61, %v3079_v0  ;;  %v9363_v19 = vld [vmem:[#allocation6 + $0x550] sm:$0xf] }
 0x20b   : > { %v3177_v35 = vpop.f32.mrf.mxu2 }
 0x20c   : > { %v3226_v28 = vpop.f32.mrf.mxu3  ;;  %v3178_v59 = vadd.f32 %v3177_v35, %v3129_v13  ;;  %v3082_v11 = vpop.f32.mrf.mxu0 }
 0x20e   : > { %v12431_v53 = vadd.f32 %v3226_v28, %v3178_v59 }
 0x20f   : > { %3277 = vmatmul.bf16.gmra.mxu0 %v12171_v40 }
 0x210   : > { %v3131_v58 = vpop.f32.mrf.mxu1  ;;  %3375 = vmatmul.bf16.gmra.mxu2 %v12175_v43 }
 0x211   : > { %v3132_v38 = vadd.f32 %v3131_v58, %v3082_v11  ;;  %3424 = vmatmul.bf16.gmra.mxu3 %v12177_v45 }
 0x213   : > { %3326 = vmatmul.bf16.gmra.mxu1 %v12179_v46  ;;  %v3180_v57 = vpop.f32.mrf.mxu2 }
 0x214   : > { %v3229_v0 = vpop.f32.mrf.mxu3  ;;  %v3181_v61 = vadd.f32 %v3180_v57, %v3132_v38  ;;  %v3084_v13 = vpop.f32.mrf.mxu0  ;;  %v11067_v57 = vld [vmem:[#allocation6 + $0x69c] sm:$0xf0] }
 0x216   : > { %v12437_v35 = vadd.f32 %v3229_v0, %v3181_v61  ;;  %v10179_v0 = vld [vmem:[#allocation6 + $0xbb0] sm:$0xf]  ;;  %v9508_v61 = vor.u32 %v11067_v57, %v9507_v12  ;;  %v11031_v12 = vld [vmem:[#allocation6 + $0x57c] sm:$0xf0] }
 0x217   : > { %v9364_v29 = vor.u32 %v11031_v12, %v9363_v19  ;;  %v9267_v19 = vld [vmem:[#allocation6 + $0x490] sm:$0xf]  ;;  %v11007_v12 = vld [vmem:[#allocation6 + $0x4bc] sm:$0xf0] }
 0x218   : > { %v3133_v28 = vpop.f32.mrf.mxu1  ;;  %3554 = vmatpush.bf16.msra.mxu2 %v9508_v61 }
 0x219   : > { %v3134_v33 = vadd.f32 %v3133_v28, %v3084_v13  ;;  %v11235_v13 = vld [vmem:[#allocation6 + $0xbdc] sm:$0xf0] }
 0x21a   : > { %v10180_v28 = vor.u32 %v11235_v13, %v10179_v0  ;;  %v10083_v13 = vld [vmem:[#allocation6 + $0xaf0] sm:$0xf] }
 0x21b   : > { %v3182_v59 = vpop.f32.mrf.mxu2  ;;  %v10084_v61 = vor.u32 %v11211_v8, %v10083_v13  ;;  %v11055_v13 = vld [vmem:[#allocation6 + $0x63c] sm:$0xf0] }
 0x21c   : > { %v3231_v42 = vpop.f32.mrf.mxu3  ;;  %v3183_v11 = vadd.f32 %v3182_v59, %v3134_v33  ;;  %v3087_v58 = vpop.f32.mrf.mxu0  ;;  %v9411_v33 = vld [vmem:[#allocation6 + $0x5b0] sm:$0xf]  ;;  %v11043_v59 = vld [vmem:[#allocation6 + $0x5dc] sm:$0xf0]  ;;  %3597 = vmatpush.bf16.msra.mxu3 %v10180_v28 }
 0x21d   : > { %v9412_v14 = vor.u32 %v11043_v59, %v9411_v33  ;;  %v9315_v33 = vld [vmem:[#allocation6 + $0x4f0] sm:$0xf] }
 0x21e   : > { %v12439_v63 = vadd.f32 %v3231_v42, %v3183_v11 }
 0x21f   : > { %3282 = vmatmul.bf16.gmra.mxu0 %v12191_v62  ;;  %3499 = vmatpush.bf16.msra.mxu1 %v9412_v14 }
 0x220   : > { %v3136_v39 = vpop.f32.mrf.mxu1  ;;  %3380 = vmatmul.bf16.gmra.mxu2 %v12195_v1 }
 0x221   : > { %v3137_v38 = vadd.f32 %v3136_v39, %v3087_v58  ;;  %3429 = vmatmul.bf16.gmra.mxu3 %v12197_v2  ;;  %v10131_v58 = vld [vmem:[#allocation6 + $0xb50] sm:$0xf]  ;;  %v11223_v39 = vld [vmem:[#allocation6 + $0xb7c] sm:$0xf0] }
 0x222   : > { %v10132_v49 = vor.u32 %v11223_v39, %v10131_v58 }
 0x223   : > { %3331 = vmatmul.bf16.gmra.mxu1 %v12199_v3  ;;  %v3185_v42 = vpop.f32.mrf.mxu2 }
 0x224   : > { %v3234_v11 = vpop.f32.mrf.mxu3  ;;  %v3186_v5 = vadd.f32 %v3185_v42, %v3137_v38  ;;  %v3089_v16 = vpop.f32.mrf.mxu0  ;;  %3598 = vmatpush.bf16.msra.mxu3 %v10132_v49  ;;  %3500 = vmatpush.bf16.msra.mxu1 %v9364_v29  ;;  %v11019_v38 = vld [vmem:[#allocation6 + $0x51c] sm:$0xf0] }
 0x225   : > { %v9316_v42 = vor.u32 %v11019_v38, %v9315_v33  ;;  %v10875_v49 = vld [vmem:[#allocation6 + $0x9c] sm:$0xf0]  ;;  %v9987_v33 = vld [vmem:[#allocation6 + $0xa30] sm:$0xf] }
 0x226   : > { %v12445_v24 = vadd.f32 %v3234_v11, %v3186_v5  ;;  %v10035_v11 = vld [vmem:[#allocation6 + $0xa90] sm:$0xf]  ;;  %v11199_v5 = vld [vmem:[#allocation6 + $0xabc] sm:$0xf0] }
 0x227   : > { %v10036_v58 = vor.u32 %v11199_v5, %v10035_v11  ;;  %v11187_v38 = vld [vmem:[#allocation6 + $0xa5c] sm:$0xf0] }
 0x228   : > { %v3138_v57 = vpop.f32.mrf.mxu1  ;;  %3599 = vmatpush.bf16.msra.mxu3 %v10084_v61  ;;  %3501 = vmatpush.bf16.msra.mxu1 %v9316_v42  ;;  %v9268_v61 = vor.u32 %v11007_v12, %v9267_v19  ;;  %v10995_v42 = vld [vmem:[#allocation6 + $0x45c] sm:$0xf0] }
 0x229   : > { %v3139_v0 = vadd.f32 %v3138_v57, %v3089_v16  ;;  %v8739_v16 = vld [vmem:[#allocation6 + $0x70] sm:$0xf]  ;;  %v10983_v12 = vld [vmem:[#allocation6 + $0x3fc] sm:$0xf0] }
 0x22a   : > { %v8740_v29 = vor.u32 %v10875_v49, %v8739_v16 }
 0x22b   : > { %v3187_v59 = vpop.f32.mrf.mxu2 }
 0x22c   : > { %v3236_v28 = vpop.f32.mrf.mxu3  ;;  %v3188_v36 = vadd.f32 %v3187_v59, %v3139_v0  ;;  %v3092_v14 = vpop.f32.mrf.mxu0  ;;  %v9459_v0 = vld [vmem:[#allocation6 + $0x610] sm:$0xf]  ;;  %3456 = vmatpush.bf16.msra.mxu0 %v8740_v29  ;;  %3600 = vmatpush.bf16.msra.mxu3 %v10036_v58  ;;  %v9988_v59 = vor.u32 %v11187_v38, %v9987_v33 }
 0x22d   : > { %3502 = vmatpush.bf16.msra.mxu1 %v9268_v61  ;;  %v9171_v58 = vld [vmem:[#allocation6 + $0x3d0] sm:$0xf] }
 0x22e   : > { %v12447_v39 = vadd.f32 %v3236_v28, %v3188_v36  ;;  %v9460_v36 = vor.u32 %v11055_v13, %v9459_v0  ;;  %v9219_v28 = vld [vmem:[#allocation6 + $0x430] sm:$0xf]  ;;  %v9172_v13 = vor.u32 %v10983_v12, %v9171_v58 }
 0x22f   : > { %3287 = vmatmul.bf16.gmra.mxu0 %v12211_v51  ;;  %v9891_v38 = vld [vmem:[#allocation6 + $0x970] sm:$0xf] }
 0x230   : > { %v3141_v8 = vpop.f32.mrf.mxu1  ;;  %3385 = vmatmul.bf16.gmra.mxu2 %v12215_v55  ;;  %3601 = vmatpush.bf16.msra.mxu3 %v9988_v59  ;;  %v8691_v61 = vld [vmem:[#allocation6 + $0x10] sm:$0xf] }
 0x231   : > { %v3142_v57 = vadd.f32 %v3141_v8, %v3092_v14  ;;  %3434 = vmatmul.bf16.gmra.mxu3 %v12217_v56  ;;  %3555 = vmatpush.bf16.msra.mxu2 %v9460_v36  ;;  %v9220_v14 = vor.u32 %v10995_v42, %v9219_v28  ;;  %v9939_v8 = vld [vmem:[#allocation6 + $0x9d0] sm:$0xf]  ;;  %v9892_v36 = vor.u32 %v11163_v18, %v9891_v38  ;;  %v10863_v28 = vld [vmem:[#allocation6 + $0x3c] sm:$0xf0] }
 0x232   : > { %v9940_v19 = vor.u32 %v11175_v50, %v9939_v8  ;;  %v8692_v59 = vor.u32 %v10863_v28, %v8691_v61  ;;  %v10971_v50 = vld [vmem:[#allocation6 + $0x39c] sm:$0xf0] }
 0x233   : > { %3336 = vmatmul.bf16.gmra.mxu1 %v14154_v6  ;;  %v3190_v11 = vpop.f32.mrf.mxu2  ;;  %v11151_v6 = vld [vmem:[#allocation6 + $0x93c] sm:$0xf0] }
 0x234   : > { %v3239_v5 = vpop.f32.mrf.mxu3  ;;  %v3191_v16 = vadd.f32 %v3190_v11, %v3142_v57  ;;  %v3094_v49 = vpop.f32.mrf.mxu0  ;;  %3503 = vmatpush.bf16.msra.mxu1 %v9220_v14  ;;  %3602 = vmatpush.bf16.msra.mxu3 %v9940_v19  ;;  %v9123_v57 = vld [vmem:[#allocation6 + $0x370] sm:$0xf]  ;;  %v10959_v18 = vld [vmem:[#allocation6 + $0x33c] sm:$0xf0] }
 0x235   : > { %v9124_v8 = vor.u32 %v10971_v50, %v9123_v57  ;;  %3457 = vmatpush.bf16.msra.mxu0 %v8692_v59  ;;  %v9075_v19 = vld [vmem:[#allocation6 + $0x310] sm:$0xf] }
 0x236   : > { %v12453_v29 = vadd.f32 %v3239_v5, %v3191_v16  ;;  %v9076_v12 = vor.u32 %v10959_v18, %v9075_v19 }
 0x238   : > { %14169 = vst [vmem:[#allocation43_spill] sm:$0xff] %v12453_v29  ;;  %v3143_v0 = vpop.f32.mrf.mxu1  ;;  %3504 = vmatpush.bf16.msra.mxu1 %v9172_v13  ;;  %v9843_v29 = vld [vmem:[#allocation6 + $0x910] sm:$0xf]  ;;  %3603 = vmatpush.bf16.msra.mxu3 %v9892_v36  ;;  %v11133_v13 = vld [vmem:[#allocation6 + $0x8b4] sm:$0xf] }
 0x239   : > { %v3144_v33 = vadd.f32 %v3143_v0, %v3094_v49  ;;  %v9844_v14 = vor.u32 %v11151_v6, %v9843_v29 }
 0x23b   : > { %v3192_v42 = vpop.f32.mrf.mxu2 }
 0x23c   : > { %v3241_v11 = vpop.f32.mrf.mxu3  ;;  %v3193_v5 = vadd.f32 %v3192_v42, %v3144_v33  ;;  %v3097_v16 = vpop.f32.mrf.mxu0  ;;  %3505 = vmatpush.bf16.msra.mxu1 %v9124_v8  ;;  %v9797_v33 = vld [vmem:[#allocation6 + $0x8e0] sm:$0xf0]  ;;  %3604 = vmatpush.bf16.msra.mxu3 %v9844_v14 }
 0x23d   : > { %v9800_v38 = vor.u32 %v11133_v13, %v9797_v33  ;;  %v9029_v13 = vld [vmem:[#allocation6 + $0x2e0] sm:$0xf0]  ;;  %v11121_v33 = vld [vmem:[#allocation6 + $0x854] sm:$0xf] }
 0x23e   : > { %v12455_v49 = vadd.f32 %v3241_v11, %v3193_v5 }
 0x23f   : > { %3292 = vmatmul.bf16.gmra.mxu0 %v12231_v37  ;;  %3744 = vmatpush.bf16.msrb.mxu2 %v9800_v38 }
 0x240   : > { %v3146_v58 = vpop.f32.mrf.mxu1  ;;  %3390 = vmatmul.bf16.gmra.mxu2 %v12235_v47  ;;  %3506 = vmatpush.bf16.msra.mxu1 %v9076_v12 }
 0x241   : > { %v3147_v0 = vadd.f32 %v3146_v58, %v3097_v16  ;;  %3439 = vmatmul.bf16.gmra.mxu3 %v12237_v48 }
 0x243   : > { %3341 = vmatmul.bf16.gmra.mxu1 %v12239_v60  ;;  %v3195_v6 = vpop.f32.mrf.mxu2 }
 0x244   : > { %v3244_v29 = vpop.f32.mrf.mxu3  ;;  %v3196_v36 = vadd.f32 %v3195_v6, %v3147_v0  ;;  %v3099_v61 = vpop.f32.mrf.mxu0  ;;  %v10941_v0 = vld [vmem:[#allocation6 + $0x2b4] sm:$0xf]  ;;  %v9749_v6 = vld [vmem:[#allocation6 + $0x880] sm:$0xf0] }
 0x245   : > { %v9032_v38 = vor.u32 %v10941_v0, %v9029_v13 }
 0x246   : > { %v12461_v28 = vadd.f32 %v3244_v29, %v3196_v36  ;;  %v9752_v36 = vor.u32 %v11121_v33, %v9749_v6  ;;  %v9701_v33 = vld [vmem:[#allocation6 + $0x820] sm:$0xf0] }
 0x247   : > { %3646 = vmatpush.bf16.msrb.mxu0 %v9032_v38 }
 0x248   : > { %v3148_v57 = vpop.f32.mrf.mxu1  ;;  %3745 = vmatpush.bf16.msrb.mxu2 %v9752_v36 }
 0x249   : > { %v3149_v42 = vadd.f32 %v3148_v57, %v3099_v61 }
 0x24b   : > { %v3197_v11 = vpop.f32.mrf.mxu2 }
 0x24c   : > { %v3246_v59 = vpop.f32.mrf.mxu3  ;;  %v3198_v50 = vadd.f32 %v3197_v11, %v3149_v42  ;;  %v3102_v5 = vpop.f32.mrf.mxu0 }
 0x24e   : > { %v12463_v16 = vadd.f32 %v3246_v59, %v3198_v50 }
 0x24f   : > { %3297 = vmatmul.bf16.gmra.mxu0 %v12251_v17 }
 0x250   : > { %v3151_v8 = vpop.f32.mrf.mxu1  ;;  %3395 = vmatmul.bf16.gmra.mxu2 %v12255_v20 }
 0x251   : > { %v3152_v14 = vadd.f32 %v3151_v8, %v3102_v5  ;;  %3444 = vmatmul.bf16.gmra.mxu3 %v12257_v21 }
 0x253   : > { %3346 = vmatmul.bf16.gmra.mxu1 %v12259_v23  ;;  %v3200_v19 = vpop.f32.mrf.mxu2 }
 0x254   : > { %v3249_v18 = vpop.f32.mrf.mxu3  ;;  %v3201_v58 = vadd.f32 %v3200_v19, %v3152_v14  ;;  %v3104_v12 = vpop.f32.mrf.mxu0  ;;  %v10929_v19 = vld [vmem:[#allocation6 + $0x254] sm:$0xf] }
 0x256   : > { %v12469_v29 = vadd.f32 %v3249_v18, %v3201_v58  ;;  %v8981_v18 = vld [vmem:[#allocation6 + $0x280] sm:$0xf0]  ;;  %v11109_v58 = vld [vmem:[#allocation6 + $0x7f4] sm:$0xf] }
 0x257   : > { %v8984_v13 = vor.u32 %v10929_v19, %v8981_v18  ;;  %v9704_v36 = vor.u32 %v11109_v58, %v9701_v33  ;;  %v11097_v33 = vld [vmem:[#allocation6 + $0x794] sm:$0xf] }
 0x258   : > { %v3153_v61 = vpop.f32.mrf.mxu1 }
 0x259   : > { %v3154_v57 = vadd.f32 %v3153_v61, %v3104_v12  ;;  %3647 = vmatpush.bf16.msrb.mxu0 %v8984_v13  ;;  %3746 = vmatpush.bf16.msrb.mxu2 %v9704_v36  ;;  %v8933_v13 = vld [vmem:[#allocation6 + $0x220] sm:$0xf0] }
 0x25b   : > { %v3202_v42 = vpop.f32.mrf.mxu2 }
 0x25c   : > { %v3251_v11 = vpop.f32.mrf.mxu3  ;;  %v3203_v59 = vadd.f32 %v3202_v42, %v3154_v57  ;;  %v3263_v50 = vpop.f32.mrf.mxu0 }
 0x25e   : > { %v12471_v5 = vadd.f32 %v3251_v11, %v3203_v59 }
 0x25f   : > { %3458 = vmatmul.bf16.vlgmr.msra.gmra.mxu0 %v12112_v44 }
 0x260   : > { %v3312_v8 = vpop.f32.mrf.mxu1  ;;  %3556 = vmatmul.bf16.vlgmr.msra.gmra.mxu2 %v14162_v52 }
 0x261   : > { %v3313_v14 = vadd.f32 %v3312_v8, %v3263_v50  ;;  %3605 = vmatmul.bf16.vlgmr.msra.gmra.mxu3 %v14163_v30 }
 0x263   : > { %3507 = vmatmul.bf16.vlgmr.msra.gmra.mxu1 %v14164_v34  ;;  %v3361_v12 = vpop.f32.mrf.mxu2 }
 0x264   : > { %v3410_v0 = vpop.f32.mrf.mxu3  ;;  %v3362_v38 = vadd.f32 %v3361_v12, %v3313_v14  ;;  %v3265_v6 = vpop.f32.mrf.mxu0 }
 0x266   : > { %v3411_v61 = vadd.f32 %v3410_v0, %v3362_v38  ;;  %v10917_v0 = vld [vmem:[#allocation6 + $0x1f4] sm:$0xf] }
 0x267   : > { %v8936_v36 = vor.u32 %v10917_v0, %v8933_v13 }
 0x268   : > { %v3314_v57 = vpop.f32.mrf.mxu1  ;;  %v5019_v42 = vpack.c.bf16 %v3411_v61, %v12413_v31  ;;  %v9653_v61 = vld [vmem:[#allocation6 + $0x7c0] sm:$0xf0] }
 0x269   : > { %v3315_v11 = vadd.f32 %v3314_v57, %v3265_v6  ;;  %3648 = vmatpush.bf16.msrb.mxu0 %v8936_v36 }
 0x26a   : > { %v5934_v18 = vunpack.c.l.b16 %v5019_v42  ;;  %v6344_v58 = vunpack.c.h.b16 %v5019_v42 }
 0x26b   : > { %v3363_v59 = vpop.f32.mrf.mxu2 }
 0x26c   : > { %v3412_v50 = vpop.f32.mrf.mxu3  ;;  %v3364_v8 = vadd.f32 %v3363_v59, %v3315_v11  ;;  %v3268_v34 = vpop.f32.mrf.mxu0 }
 0x26e   : > { %v3413_v30 = vadd.f32 %v3412_v50, %v3364_v8 }
 0x26f   : > { %3463 = vmatmul.bf16.gmra.mxu0 %v12131_v4 }
 0x270   : > { %v3317_v52 = vpop.f32.mrf.mxu1  ;;  %v5025_v19 = vpack.c.bf16 %v3413_v30, %v12415_v41  ;;  %3561 = vmatmul.bf16.gmra.mxu2 %v12135_v7  ;;  %v9656_v41 = vor.u32 %v11097_v33, %v9653_v61  ;;  %v10905_v33 = vld [vmem:[#allocation6 + $0x194] sm:$0xf] }
 0x271   : > { %v3318_v14 = vadd.f32 %v3317_v52, %v3268_v34  ;;  %3610 = vmatmul.bf16.gmra.mxu3 %v14167_v54 }
 0x272   : > { %v5935_v12 = vunpack.c.l.b16 %v5025_v19  ;;  %v6345_v31 = vunpack.c.h.b16 %v5025_v19  ;;  %3747 = vmatpush.bf16.msrb.mxu2 %v9656_v41 }
 0x273   : > { %3512 = vmatmul.bf16.gmra.mxu1 %v14168_v32  ;;  %v3366_v38 = vpop.f32.mrf.mxu2 }
 0x274   : > { %v3415_v6 = vpop.f32.mrf.mxu3  ;;  %v12483_v57 = vpack.c.b16 %v5935_v12, %v5934_v18  ;;  %v12485_v30 = vpack.c.b16 %v6345_v31, %v6344_v58  ;;  %v3367_v52 = vadd.f32 %v3366_v38, %v3318_v14  ;;  %v3270_v34 = vpop.f32.mrf.mxu0  ;;  %v8885_v38 = vld [vmem:[#allocation6 + $0x1c0] sm:$0xf0] }
 0x275   : > { %v8888_v61 = vor.u32 %v10905_v33, %v8885_v38 }
 0x276   : > { %14170 = vst [vmem:[#allocation44_spill] sm:$0xff] %v12483_v57  ;;  %v3416_v42 = vadd.f32 %v3415_v6, %v3367_v52  ;;  %v11085_v6 = vld [vmem:[#allocation6 + $0x734] sm:$0xf]  ;;  %v9605_v52 = vld [vmem:[#allocation6 + $0x760] sm:$0xf0] }
 0x277   : > { %14171 = vst [vmem:[#allocation45_spill] sm:$0xff] %v12485_v30  ;;  %v9608_v41 = vor.u32 %v11085_v6, %v9605_v52  ;;  %3649 = vmatpush.bf16.msrb.mxu0 %v8888_v61  ;;  %v10893_v6 = vld [vmem:[#allocation6 + $0x134] sm:$0xf]  ;;  %v11176_v30 = vld [vmem:[#allocation6 + $0xa04] sm:$0xf0] }
 0x278   : > { %v3319_v11 = vpop.f32.mrf.mxu1  ;;  %v5031_v59 = vpack.c.bf16 %v3416_v42, %v12421_v15  ;;  %v11164_v57 = vld [vmem:[#allocation6 + $0x9a4] sm:$0xf0] }
 0x279   : > { %v3320_v50 = vadd.f32 %v3319_v11, %v3270_v34  ;;  %3748 = vmatpush.bf16.msrb.mxu2 %v9608_v41 }
 0x27a   : > { %v5936_v12 = vunpack.c.l.b16 %v5031_v59  ;;  %v6346_v31 = vunpack.c.h.b16 %v5031_v59 }
 0x27b   : > { %v3368_v8 = vpop.f32.mrf.mxu2 }
 0x27c   : > { %v3417_v19 = vpop.f32.mrf.mxu3  ;;  %v3369_v32 = vadd.f32 %v3368_v8, %v3320_v50  ;;  %v3273_v54 = vpop.f32.mrf.mxu0 }
 0x27e   : > { %v3418_v0 = vadd.f32 %v3417_v19, %v3369_v32 }
 0x27f   : > { %3468 = vmatmul.bf16.gmra.mxu0 %v12151_v22 }
 0x280   : > { %v3322_v18 = vpop.f32.mrf.mxu1  ;;  %v5037_v58 = vpack.c.bf16 %v3418_v0, %v12423_v9  ;;  %3566 = vmatmul.bf16.gmra.mxu2 %v12155_v25 }
 0x281   : > { %v3323_v14 = vadd.f32 %v3322_v18, %v3273_v54  ;;  %3615 = vmatmul.bf16.gmra.mxu3 %v12157_v26 }
 0x282   : > { %v5937_v13 = vunpack.c.l.b16 %v5037_v58  ;;  %v6347_v15 = vunpack.c.h.b16 %v5037_v58 }
 0x283   : > { %3517 = vmatmul.bf16.gmra.mxu1 %v12159_v27  ;;  %v3371_v32 = vpop.f32.mrf.mxu2 }
 0x284   : > { %v3420_v36 = vpop.f32.mrf.mxu3  ;;  %v3372_v34 = vadd.f32 %v3371_v32, %v3323_v14  ;;  %v3275_v9 = vpop.f32.mrf.mxu0  ;;  %v12493_v42 = vpack.c.b16 %v5937_v13, %v5936_v12  ;;  %v12495_v54 = vpack.c.b16 %v6347_v15, %v6346_v31  ;;  %v8837_v32 = vld [vmem:[#allocation6 + $0x160] sm:$0xf0] }
 0x286   : > { %14172 = vst [vmem:[#allocation46_spill] sm:$0xff] %v12493_v42  ;;  %v3421_v11 = vadd.f32 %v3420_v36, %v3372_v34  ;;  %v11073_v36 = vld [vmem:[#allocation6 + $0x6d4] sm:$0xf]  ;;  %v8840_v34 = vor.u32 %v10893_v6, %v8837_v32 }
 0x287   : > { %14173 = vst [vmem:[#allocation47_spill] sm:$0xff] %v12495_v54  ;;  %v11212_v54 = vld [vmem:[#allocation6 + $0xb24] sm:$0xf0] }
 0x288   : > { %v3324_v59 = vpop.f32.mrf.mxu1  ;;  %v5043_v50 = vpack.c.bf16 %v3421_v11, %v12429_v10  ;;  %3650 = vmatpush.bf16.msrb.mxu0 %v8840_v34  ;;  %v8789_v34 = vld [vmem:[#allocation6 + $0x100] sm:$0xf0] }
 0x289   : > { %v3325_v8 = vadd.f32 %v3324_v59, %v3275_v9  ;;  %v9557_v9 = vld [vmem:[#allocation6 + $0x700] sm:$0xf0] }
 0x28a   : > { %v5938_v13 = vunpack.c.l.b16 %v5043_v50  ;;  %v6348_v15 = vunpack.c.h.b16 %v5043_v50  ;;  %v9560_v11 = vor.u32 %v11073_v36, %v9557_v9  ;;  %v11061_v9 = vld [vmem:[#allocation6 + $0x674] sm:$0xf] }
 0x28b   : > { %v3373_v19 = vpop.f32.mrf.mxu2 }
 0x28c   : > { %v3422_v0 = vpop.f32.mrf.mxu3  ;;  %v3374_v18 = vadd.f32 %v3373_v19, %v3325_v8  ;;  %v3278_v58 = vpop.f32.mrf.mxu0  ;;  %3749 = vmatpush.bf16.msrb.mxu2 %v9560_v11 }
 0x28e   : > { %v3423_v33 = vadd.f32 %v3422_v0, %v3374_v18 }
 0x28f   : > { %3473 = vmatmul.bf16.gmra.mxu0 %v12171_v40 }
 0x290   : > { %v3327_v14 = vpop.f32.mrf.mxu1  ;;  %v5049_v12 = vpack.c.bf16 %v3423_v33, %v12431_v53  ;;  %3571 = vmatmul.bf16.gmra.mxu2 %v12175_v43 }
 0x291   : > { %v3328_v31 = vadd.f32 %v3327_v14, %v3278_v58  ;;  %3620 = vmatmul.bf16.gmra.mxu3 %v12177_v45 }
 0x292   : > { %v5939_v38 = vunpack.c.l.b16 %v5049_v12  ;;  %v6349_v10 = vunpack.c.h.b16 %v5049_v12 }
 0x293   : > { %3522 = vmatmul.bf16.gmra.mxu1 %v12179_v46  ;;  %v3376_v61 = vpop.f32.mrf.mxu2 }
 0x294   : > { %v3425_v52 = vpop.f32.mrf.mxu3  ;;  %v3377_v41 = vadd.f32 %v3376_v61, %v3328_v31  ;;  %v3280_v53 = vpop.f32.mrf.mxu0  ;;  %v12503_v59 = vpack.c.b16 %v5939_v38, %v5938_v13  ;;  %v12505_v8 = vpack.c.b16 %v6349_v10, %v6348_v15  ;;  %v11229_v38 = vld [vmem:[#allocation6 + $0xbb4] sm:$0xf]  ;;  %v10181_v10 = vld [vmem:[#allocation6 + $0xbe0] sm:$0xf0] }
 0x295   : > { %v10184_v32 = vor.u32 %v11229_v38, %v10181_v10 }
 0x296   : > { %14174 = vst [vmem:[#allocation48_spill] sm:$0xff] %v12503_v59  ;;  %v3426_v50 = vadd.f32 %v3425_v52, %v3377_v41  ;;  %v10881_v52 = vld [vmem:[#allocation6 + $0xd4] sm:$0xf] }
 0x297   : > { %14175 = vst [vmem:[#allocation49_spill] sm:$0xff] %v12505_v8  ;;  %3793 = vmatpush.bf16.msrb.mxu3 %v10184_v32 }
 0x298   : > { %v3329_v19 = vpop.f32.mrf.mxu1  ;;  %v5055_v0 = vpack.c.bf16 %v3426_v50, %v12437_v35  ;;  %v9509_v50 = vld [vmem:[#allocation6 + $0x6a0] sm:$0xf0] }
 0x299   : > { %v3330_v18 = vadd.f32 %v3329_v19, %v3280_v53  ;;  %v11037_v19 = vld [vmem:[#allocation6 + $0x5b4] sm:$0xf] }
 0x29a   : > { %v5940_v35 = vunpack.c.l.b16 %v5055_v0  ;;  %v6350_v41 = vunpack.c.h.b16 %v5055_v0 }
 0x29b   : > { %v3378_v58 = vpop.f32.mrf.mxu2 }
 0x29c   : > { %v3427_v33 = vpop.f32.mrf.mxu3  ;;  %v3379_v14 = vadd.f32 %v3378_v58, %v3330_v18  ;;  %v3283_v12 = vpop.f32.mrf.mxu0  ;;  %v9413_v18 = vld [vmem:[#allocation6 + $0x5e0] sm:$0xf0] }
 0x29e   : > { %v3428_v6 = vadd.f32 %v3427_v33, %v3379_v14  ;;  %v9512_v14 = vor.u32 %v11061_v9, %v9509_v50  ;;  %v10085_v50 = vld [vmem:[#allocation6 + $0xb20] sm:$0xf0] }
 0x29f   : > { %3478 = vmatmul.bf16.gmra.mxu0 %v12191_v62 }
 0x2a0   : > { %v3332_v31 = vpop.f32.mrf.mxu1  ;;  %v5061_v13 = vpack.c.bf16 %v3428_v6, %v12439_v63  ;;  %3576 = vmatmul.bf16.gmra.mxu2 %v12195_v1  ;;  %v8792_v63 = vor.u32 %v10881_v52, %v8789_v34  ;;  %v11217_v6 = vld [vmem:[#allocation6 + $0xb54] sm:$0xf]  ;;  %v9365_v34 = vld [vmem:[#allocation6 + $0x580] sm:$0xf0] }
 0x2a1   : > { %v3333_v15 = vadd.f32 %v3332_v31, %v3283_v12  ;;  %3625 = vmatmul.bf16.gmra.mxu3 %v12197_v2  ;;  %v9416_v12 = vor.u32 %v11037_v19, %v9413_v18  ;;  %v10133_v31 = vld [vmem:[#allocation6 + $0xb80] sm:$0xf0]  ;;  %3750 = vmatpush.bf16.msrb.mxu2 %v9512_v14  ;;  %v11025_v52 = vld [vmem:[#allocation6 + $0x554] sm:$0xf] }
 0x2a2   : > { %v5941_v36 = vunpack.c.l.b16 %v5061_v13  ;;  %v6351_v61 = vunpack.c.h.b16 %v5061_v13  ;;  %3651 = vmatpush.bf16.msrb.mxu0 %v8792_v63  ;;  %v10136_v38 = vor.u32 %v11217_v6, %v10133_v31  ;;  %v9368_v8 = vor.u32 %v11025_v52, %v9365_v34  ;;  %v10037_v14 = vld [vmem:[#allocation6 + $0xac0] sm:$0xf0]  ;;  %v11001_v31 = vld [vmem:[#allocation6 + $0x494] sm:$0xf] }
 0x2a3   : > { %3527 = vmatmul.bf16.gmra.mxu1 %v12199_v3  ;;  %v3381_v53 = vpop.f32.mrf.mxu2  ;;  %v11181_v52 = vld [vmem:[#allocation6 + $0xa34] sm:$0xf]  ;;  %v9989_v34 = vld [vmem:[#allocation6 + $0xa60] sm:$0xf0] }
 0x2a4   : > { %v3430_v11 = vpop.f32.mrf.mxu3  ;;  %v3382_v58 = vadd.f32 %v3381_v53, %v3333_v15  ;;  %v3285_v33 = vpop.f32.mrf.mxu0  ;;  %v12513_v13 = vpack.c.b16 %v5941_v36, %v5940_v35  ;;  %v12515_v10 = vpack.c.b16 %v6351_v61, %v6350_v41  ;;  %3695 = vmatpush.bf16.msrb.mxu1 %v9416_v12  ;;  %3794 = vmatpush.bf16.msrb.mxu3 %v10136_v38  ;;  %v11205_v53 = vld [vmem:[#allocation6 + $0xaf4] sm:$0xf]  ;;  %v9317_v36 = vld [vmem:[#allocation6 + $0x520] sm:$0xf0] }
 0x2a5   : > { %v10088_v19 = vor.u32 %v11205_v53, %v10085_v50  ;;  %v11013_v35 = vld [vmem:[#allocation6 + $0x4f4] sm:$0xf] }
 0x2a6   : > { %14176 = vst [vmem:[#allocation50_spill] sm:$0xff] %v12513_v13  ;;  %v3431_v0 = vadd.f32 %v3430_v11, %v3382_v58  ;;  %v9320_v41 = vor.u32 %v11013_v35, %v9317_v36  ;;  %v11193_v58 = vld [vmem:[#allocation6 + $0xa94] sm:$0xf]  ;;  %v8741_v36 = vld [vmem:[#allocation6 + $0xa0] sm:$0xf0] }
 0x2a7   : > { %14177 = vst [vmem:[#allocation51_spill] sm:$0xff] %v12515_v10  ;;  %v10040_v12 = vor.u32 %v11193_v58, %v10037_v14  ;;  %v10869_v35 = vld [vmem:[#allocation6 + $0x74] sm:$0xf]  ;;  %v9461_v58 = vld [vmem:[#allocation6 + $0x640] sm:$0xf0] }
 0x2a8   : > { %v3334_v32 = vpop.f32.mrf.mxu1  ;;  %v5067_v15 = vpack.c.bf16 %v3431_v0, %v12445_v24  ;;  %3696 = vmatpush.bf16.msrb.mxu1 %v9368_v8  ;;  %3795 = vmatpush.bf16.msrb.mxu3 %v10088_v19  ;;  %v9269_v24 = vld [vmem:[#allocation6 + $0x4c0] sm:$0xf0]  ;;  %v14178_v19 = vld [vmem:[#allocation26_spill] sm:$0xff] }
 0x2a9   : > { %v3335_v9 = vadd.f32 %v3334_v32, %v3285_v33  ;;  %v9272_v8 = vor.u32 %v11001_v31, %v9269_v24  ;;  %v9992_v32 = vor.u32 %v11181_v52, %v9989_v34  ;;  %v9221_v14 = vld [vmem:[#allocation6 + $0x460] sm:$0xf0] }
 0x2ab   : > { %v3383_v63 = vpop.f32.mrf.mxu2 }
 0x2ac   : > { %v3432_v61 = vpop.f32.mrf.mxu3  ;;  %v3384_v11 = vadd.f32 %v3383_v63, %v3335_v9  ;;  %v3288_v18 = vpop.f32.mrf.mxu0  ;;  %3697 = vmatpush.bf16.msrb.mxu1 %v9320_v41  ;;  %3796 = vmatpush.bf16.msrb.mxu3 %v10040_v12  ;;  %v5942_v9 = vunpack.c.l.b16 %v5067_v15  ;;  %v11049_v63 = vld [vmem:[#allocation6 + $0x614] sm:$0xf] }
 0x2ad   : > { %v9464_v31 = vor.u32 %v11049_v63, %v9461_v58  ;;  %v11157_v58 = vld [vmem:[#allocation6 + $0x974] sm:$0xf] }
 0x2ae   : > { %v3433_v6 = vadd.f32 %v3432_v61, %v3384_v11  ;;  %v6352_v61 = vunpack.c.h.b16 %v5067_v15 }
 0x2af   : > { %3483 = vmatmul.bf16.gmra.mxu0 %v12211_v51  ;;  %3751 = vmatpush.bf16.msrb.mxu2 %v9464_v31 }
 0x2b0   : > { %v3337_v33 = vpop.f32.mrf.mxu1  ;;  %v5073_v38 = vpack.c.bf16 %v3433_v6, %v12447_v39  ;;  %3581 = vmatmul.bf16.gmra.mxu2 %v12215_v55  ;;  %v8744_v39 = vor.u32 %v10869_v35, %v8741_v36  ;;  %3698 = vmatpush.bf16.msrb.mxu1 %v9272_v8  ;;  %v10977_v35 = vld [vmem:[#allocation6 + $0x3d4] sm:$0xf]  ;;  %v9173_v36 = vld [vmem:[#allocation6 + $0x400] sm:$0xf0] }
 0x2b1   : > { %v3338_v0 = vadd.f32 %v3337_v33, %v3288_v18  ;;  %3630 = vmatmul.bf16.gmra.mxu3 %v12217_v56  ;;  %v10989_v18 = vld [vmem:[#allocation6 + $0x434] sm:$0xf] }
 0x2b2   : > { %v5943_v53 = vunpack.c.l.b16 %v5073_v38  ;;  %v6353_v50 = vunpack.c.h.b16 %v5073_v38  ;;  %3797 = vmatpush.bf16.msrb.mxu3 %v9992_v32  ;;  %v9224_v24 = vor.u32 %v10989_v18, %v9221_v14  ;;  %v11169_v33 = vld [vmem:[#allocation6 + $0x9d4] sm:$0xf]  ;;  %v9941_v38 = vld [vmem:[#allocation6 + $0xa00] sm:$0xf0]  ;;  %3652 = vmatpush.bf16.msrb.mxu0 %v8744_v39  ;;  %v9176_v32 = vor.u32 %v10977_v35, %v9173_v36 }
 0x2b3   : > { %3532 = vmatmul.bf16.gmra.mxu1 %v14178_v19  ;;  %v3386_v41 = vpop.f32.mrf.mxu2  ;;  %v9944_v34 = vor.u32 %v11169_v33, %v9941_v38  ;;  %v9893_v18 = vld [vmem:[#allocation6 + $0x9a0] sm:$0xf0]  ;;  %v10965_v39 = vld [vmem:[#allocation6 + $0x374] sm:$0xf] }
 0x2b4   : > { %v3435_v11 = vpop.f32.mrf.mxu3  ;;  %v3387_v12 = vadd.f32 %v3386_v41, %v3338_v0  ;;  %v3290_v6 = vpop.f32.mrf.mxu0  ;;  %v12523_v52 = vpack.c.b16 %v5943_v53, %v5942_v9  ;;  %v12525_v10 = vpack.c.b16 %v6353_v50, %v6352_v61  ;;  %3699 = vmatpush.bf16.msrb.mxu1 %v9224_v24  ;;  %v14181_v0 = vld [vmem:[#allocation43_spill] sm:$0xff]  ;;  %v9896_v14 = vor.u32 %v11157_v58, %v9893_v18  ;;  %v10857_v9 = vld [vmem:[#allocation6 + $0x14] sm:$0xf]  ;;  %v8693_v53 = vld [vmem:[#allocation6 + $0x40] sm:$0xf0] }
 0x2b5   : > { %v8696_v61 = vor.u32 %v10857_v9, %v8693_v53  ;;  %v11145_v38 = vld [vmem:[#allocation6 + $0x914] sm:$0xf]  ;;  %v9077_v36 = vld [vmem:[#allocation6 + $0x340] sm:$0xf0]  ;;  %v9803_v53 = vld [vmem:[#allocation6 + $0x8b8] sm:$0xf] }
 0x2b6   : > { %14179 = vst [vmem:[#allocation52_spill] sm:$0xff] %v12523_v52  ;;  %v3436_v15 = vadd.f32 %v3435_v11, %v3387_v12  ;;  %3798 = vmatpush.bf16.msrb.mxu3 %v9944_v34  ;;  %v9125_v11 = vld [vmem:[#allocation6 + $0x3a0] sm:$0xf0]  ;;  %v10953_v35 = vld [vmem:[#allocation6 + $0x314] sm:$0xf] }
 0x2b7   : > { %14180 = vst [vmem:[#allocation53_spill] sm:$0xff] %v12525_v10  ;;  %v9128_v24 = vor.u32 %v10965_v39, %v9125_v11  ;;  %v9845_v34 = vld [vmem:[#allocation6 + $0x940] sm:$0xf0]  ;;  %3653 = vmatpush.bf16.msrb.mxu0 %v8696_v61  ;;  %v11140_v39 = vld [vmem:[#allocation6 + $0x8e4] sm:$0xf0] }
 0x2b8   : > { %v3339_v8 = vpop.f32.mrf.mxu1  ;;  %v5079_v41 = vpack.c.bf16 %v3436_v15, %v14181_v0  ;;  %3700 = vmatpush.bf16.msrb.mxu1 %v9176_v32  ;;  %v9848_v15 = vor.u32 %v11145_v38, %v9845_v34  ;;  %v9080_v0 = vor.u32 %v10953_v35, %v9077_v36  ;;  %v9804_v61 = vor.u32 %v11140_v39, %v9803_v53  ;;  %v10948_v53 = vld [vmem:[#allocation6 + $0x2e4] sm:$0xf0] }
 0x2b9   : > { %v3340_v63 = vadd.f32 %v3339_v8, %v3290_v6 }
 0x2ba   : > { %3799 = vmatpush.bf16.msrb.mxu3 %v9896_v14  ;;  %v6354_v18 = vunpack.c.h.b16 %v5079_v41  ;;  %3940 = vmatpush.bf16.msra.mxu2 %v9804_v61 }
 0x2bb   : > { %v3388_v33 = vpop.f32.mrf.mxu2 }
 0x2bc   : > { %v3437_v50 = vpop.f32.mrf.mxu3  ;;  %v3389_v12 = vadd.f32 %v3388_v33, %v3340_v63  ;;  %v3293_v31 = vpop.f32.mrf.mxu0  ;;  %3701 = vmatpush.bf16.msrb.mxu1 %v9128_v24  ;;  %v5944_v63 = vunpack.c.l.b16 %v5079_v41 }
 0x2be   : > { %v3438_v6 = vadd.f32 %v3437_v50, %v3389_v12  ;;  %3800 = vmatpush.bf16.msrb.mxu3 %v9848_v15 }
 0x2bf   : > { %3488 = vmatmul.bf16.gmra.mxu0 %v12231_v37 }
 0x2c0   : > { %v3342_v8 = vpop.f32.mrf.mxu1  ;;  %v5085_v32 = vpack.c.bf16 %v3438_v6, %v12455_v49  ;;  %3586 = vmatmul.bf16.gmra.mxu2 %v12235_v47  ;;  %3702 = vmatpush.bf16.msrb.mxu1 %v9080_v0 }
 0x2c1   : > { %v3343_v58 = vadd.f32 %v3342_v8, %v3293_v31  ;;  %3635 = vmatmul.bf16.gmra.mxu3 %v12237_v48 }
 0x2c2   : > { %v5945_v14 = vunpack.c.l.b16 %v5085_v32  ;;  %v6355_v9 = vunpack.c.h.b16 %v5085_v32  ;;  %v9035_v32 = vld [vmem:[#allocation6 + $0x2b8] sm:$0xf] }
 0x2c3   : > { %3537 = vmatmul.bf16.gmra.mxu1 %v12239_v60  ;;  %v3391_v33 = vpop.f32.mrf.mxu2 }
 0x2c4   : > { %v3440_v50 = vpop.f32.mrf.mxu3  ;;  %v3392_v11 = vadd.f32 %v3391_v33, %v3343_v58  ;;  %v3295_v49 = vpop.f32.mrf.mxu0  ;;  %v12533_v12 = vpack.c.b16 %v5945_v14, %v5944_v63  ;;  %v12535_v31 = vpack.c.b16 %v6355_v9, %v6354_v18  ;;  %v9036_v58 = vor.u32 %v10948_v53, %v9035_v32  ;;  %v11128_v14 = vld [vmem:[#allocation6 + $0x884] sm:$0xf0] }
 0x2c6   : > { %14182 = vst [vmem:[#allocation43_spill] sm:$0xff] %v12533_v12  ;;  %v3441_v24 = vadd.f32 %v3440_v50, %v3392_v11  ;;  %3842 = vmatpush.bf16.msra.mxu0 %v9036_v58  ;;  %v8987_v58 = vld [vmem:[#allocation6 + $0x258] sm:$0xf] }
 0x2c7   : > { %14183 = vst [vmem:[#allocation54_spill] sm:$0xff] %v12535_v31  ;;  %v8795_v12 = vld [vmem:[#allocation6 + $0xd8] sm:$0xf] }
 0x2c8   : > { %v3344_v38 = vpop.f32.mrf.mxu1  ;;  %v5091_v41 = vpack.c.bf16 %v3441_v24, %v12461_v28  ;;  %v9755_v28 = vld [vmem:[#allocation6 + $0x858] sm:$0xf] }
 0x2c9   : > { %v3345_v34 = vadd.f32 %v3344_v38, %v3295_v49  ;;  %v9756_v9 = vor.u32 %v11128_v14, %v9755_v28 }
 0x2ca   : > { %v5946_v39 = vunpack.c.l.b16 %v5091_v41  ;;  %v6356_v33 = vunpack.c.h.b16 %v5091_v41 }
 0x2cb   : > { %v3393_v15 = vpop.f32.mrf.mxu2  ;;  %3941 = vmatpush.bf16.msra.mxu2 %v9756_v9  ;;  %v14186_v9 = vld [vmem:[#allocation16_spill] sm:$0xff] }
 0x2cc   : > { %v3442_v6 = vpop.f32.mrf.mxu3  ;;  %v3394_v35 = vadd.f32 %v3393_v15, %v3345_v34  ;;  %v3298_v36 = vpop.f32.mrf.mxu0 }
 0x2ce   : > { %v3443_v8 = vadd.f32 %v3442_v6, %v3394_v35 }
 0x2cf   : > { %3493 = vmatmul.bf16.gmra.mxu0 %v12251_v17 }
 0x2d0   : > { %v3347_v0 = vpop.f32.mrf.mxu1  ;;  %v5097_v63 = vpack.c.bf16 %v3443_v8, %v12463_v16  ;;  %3591 = vmatmul.bf16.gmra.mxu2 %v12255_v20 }
 0x2d1   : > { %v3348_v18 = vadd.f32 %v3347_v0, %v3298_v36  ;;  %3640 = vmatmul.bf16.gmra.mxu3 %v12257_v21 }
 0x2d2   : > { %v5947_v50 = vunpack.c.l.b16 %v5097_v63  ;;  %v6357_v61 = vunpack.c.h.b16 %v5097_v63  ;;  %v10936_v63 = vld [vmem:[#allocation6 + $0x284] sm:$0xf0] }
 0x2d3   : > { %3542 = vmatmul.bf16.gmra.mxu1 %v12259_v23  ;;  %v3396_v11 = vpop.f32.mrf.mxu2  ;;  %v8988_v28 = vor.u32 %v10936_v63, %v8987_v58 }
 0x2d4   : > { %v3445_v49 = vpop.f32.mrf.mxu3  ;;  %v3397_v24 = vadd.f32 %v3396_v11, %v3348_v18  ;;  %v3300_v16 = vpop.f32.mrf.mxu0  ;;  %v12543_v38 = vpack.c.b16 %v5947_v50, %v5946_v39  ;;  %v12545_v34 = vpack.c.b16 %v6357_v61, %v6356_v33  ;;  %v14187_v33 = vld [vmem:[#allocation17_spill] sm:$0xff]  ;;  %v11116_v50 = vld [vmem:[#allocation6 + $0x824] sm:$0xf0] }
 0x2d5   : > { %3843 = vmatpush.bf16.msra.mxu0 %v8988_v28 }
 0x2d6   : > { %14184 = vst [vmem:[#allocation55_spill] sm:$0xff] %v12543_v38  ;;  %v3446_v15 = vadd.f32 %v3445_v49, %v3397_v24  ;;  %v8843_v38 = vld [vmem:[#allocation6 + $0x138] sm:$0xf] }
 0x2d7   : > { %14185 = vst [vmem:[#allocation56_spill] sm:$0xff] %v12545_v34 }
 0x2d8   : > { %v3349_v6 = vpop.f32.mrf.mxu1  ;;  %v5103_v35 = vpack.c.bf16 %v3446_v15, %v12469_v29  ;;  %v9707_v29 = vld [vmem:[#allocation6 + $0x7f8] sm:$0xf] }
 0x2d9   : > { %v3350_v36 = vadd.f32 %v3349_v6, %v3300_v16  ;;  %v9708_v61 = vor.u32 %v11116_v50, %v9707_v29  ;;  %v14188_v15 = vld [vmem:[#allocation18_spill] sm:$0xff]  ;;  %v10924_v50 = vld [vmem:[#allocation6 + $0x224] sm:$0xf0] }
 0x2da   : > { %v5948_v11 = vunpack.c.l.b16 %v5103_v35  ;;  %v6358_v49 = vunpack.c.h.b16 %v5103_v35  ;;  %v8939_v29 = vld [vmem:[#allocation6 + $0x1f8] sm:$0xf] }
 0x2db   : > { %v3398_v8 = vpop.f32.mrf.mxu2  ;;  %3942 = vmatpush.bf16.msra.mxu2 %v9708_v61  ;;  %v8940_v61 = vor.u32 %v10924_v50, %v8939_v29 }
 0x2dc   : > { %v3447_v41 = vpop.f32.mrf.mxu3  ;;  %v3399_v32 = vadd.f32 %v3398_v8, %v3350_v36  ;;  %v3459_v53 = vpop.f32.mrf.mxu0 }
 0x2dd   : > { %3844 = vmatpush.bf16.msra.mxu0 %v8940_v61  ;;  %v10912_v61 = vld [vmem:[#allocation6 + $0x1c4] sm:$0xf0] }
 0x2de   : > { %v3448_v0 = vadd.f32 %v3447_v41, %v3399_v32 }
 0x2df   : > { %3654 = vmatmul.bf16.vlgmr.msrb.gmra.mxu0 %v12112_v44 }
 0x2e0   : > { %v3508_v18 = vpop.f32.mrf.mxu1  ;;  %v5109_v14 = vpack.c.bf16 %v3448_v0, %v12471_v5  ;;  %3752 = vmatmul.bf16.vlgmr.msrb.gmra.mxu2 %v14186_v9 }
 0x2e1   : > { %v3509_v39 = vadd.f32 %v3508_v18, %v3459_v53  ;;  %3801 = vmatmul.bf16.vlgmr.msrb.gmra.mxu3 %v14187_v33 }
 0x2e2   : > { %v5949_v24 = vunpack.c.l.b16 %v5109_v14  ;;  %v6359_v16 = vunpack.c.h.b16 %v5109_v14 }
 0x2e3   : > { %3703 = vmatmul.bf16.vlgmr.msrb.gmra.mxu1 %v14188_v15  ;;  %v3557_v6 = vpop.f32.mrf.mxu2 }
 0x2e4   : > { %v3606_v36 = vpop.f32.mrf.mxu3  ;;  %v3558_v8 = vadd.f32 %v3557_v6, %v3509_v39  ;;  %v3461_v5 = vpop.f32.mrf.mxu0  ;;  %v12553_v41 = vpack.c.b16 %v5949_v24, %v5948_v11  ;;  %v12555_v32 = vpack.c.b16 %v6359_v16, %v6358_v49  ;;  %v14191_v49 = vld [vmem:[#allocation19_spill] sm:$0xff]  ;;  %v9659_v24 = vld [vmem:[#allocation6 + $0x798] sm:$0xf]  ;;  %v11104_v16 = vld [vmem:[#allocation6 + $0x7c4] sm:$0xf0] }
 0x2e5   : > { %v9660_v6 = vor.u32 %v11104_v16, %v9659_v24 }
 0x2e6   : > { %14189 = vst [vmem:[#allocation57_spill] sm:$0xff] %v12553_v41  ;;  %v12557_v53 = vadd.f32 %v3606_v36, %v3558_v8  ;;  %v14192_v36 = vld [vmem:[#allocation20_spill] sm:$0xff]  ;;  %v8891_v41 = vld [vmem:[#allocation6 + $0x198] sm:$0xf] }
 0x2e7   : > { %14190 = vst [vmem:[#allocation58_spill] sm:$0xff] %v12555_v32  ;;  %3943 = vmatpush.bf16.msra.mxu2 %v9660_v6  ;;  %v8892_v16 = vor.u32 %v10912_v61, %v8891_v41  ;;  %v9611_v6 = vld [vmem:[#allocation6 + $0x738] sm:$0xf] }
 0x2e8   : > { %v3510_v0 = vpop.f32.mrf.mxu1 }
 0x2e9   : > { %v3511_v58 = vadd.f32 %v3510_v0, %v3461_v5  ;;  %3845 = vmatpush.bf16.msra.mxu0 %v8892_v16  ;;  %v10900_v16 = vld [vmem:[#allocation6 + $0x164] sm:$0xf0] }
 0x2eb   : > { %v3559_v63 = vpop.f32.mrf.mxu2 }
 0x2ec   : > { %v3608_v18 = vpop.f32.mrf.mxu3  ;;  %v3560_v35 = vadd.f32 %v3559_v63, %v3511_v58  ;;  %v3464_v28 = vpop.f32.mrf.mxu0 }
 0x2ee   : > { %v12559_v14 = vadd.f32 %v3608_v18, %v3560_v35 }
 0x2ef   : > { %3659 = vmatmul.bf16.gmra.mxu0 %v12131_v4 }
 0x2f0   : > { %v3513_v39 = vpop.f32.mrf.mxu1  ;;  %3757 = vmatmul.bf16.gmra.mxu2 %v12135_v7 }
 0x2f1   : > { %v3514_v11 = vadd.f32 %v3513_v39, %v3464_v28  ;;  %3806 = vmatmul.bf16.gmra.mxu3 %v14191_v49 }
 0x2f3   : > { %3708 = vmatmul.bf16.gmra.mxu1 %v14192_v36  ;;  %v3562_v8 = vpop.f32.mrf.mxu2 }
 0x2f4   : > { %v3611_v5 = vpop.f32.mrf.mxu3  ;;  %v3563_v0 = vadd.f32 %v3562_v8, %v3514_v11  ;;  %v3466_v58 = vpop.f32.mrf.mxu0  ;;  %v11092_v8 = vld [vmem:[#allocation6 + $0x764] sm:$0xf0] }
 0x2f6   : > { %v12565_v63 = vadd.f32 %v3611_v5, %v3563_v0  ;;  %v9612_v5 = vor.u32 %v11092_v8, %v9611_v6  ;;  %v8844_v8 = vor.u32 %v10900_v16, %v8843_v38 }
 0x2f8   : > { %v3515_v18 = vpop.f32.mrf.mxu1  ;;  %3944 = vmatpush.bf16.msra.mxu2 %v9612_v5  ;;  %v9563_v5 = vld [vmem:[#allocation6 + $0x6d8] sm:$0xf]  ;;  %3846 = vmatpush.bf16.msra.mxu0 %v8844_v8  ;;  %v10888_v8 = vld [vmem:[#allocation6 + $0x104] sm:$0xf0] }
 0x2f9   : > { %v3516_v35 = vadd.f32 %v3515_v18, %v3466_v58 }
 0x2fb   : > { %v3564_v29 = vpop.f32.mrf.mxu2 }
 0x2fc   : > { %v3613_v50 = vpop.f32.mrf.mxu3  ;;  %v3565_v28 = vadd.f32 %v3564_v29, %v3516_v35  ;;  %v3469_v39 = vpop.f32.mrf.mxu0 }
 0x2fe   : > { %v12567_v32 = vadd.f32 %v3613_v50, %v3565_v28 }
 0x2ff   : > { %3664 = vmatmul.bf16.gmra.mxu0 %v12151_v22 }
 0x300   : > { %v3518_v24 = vpop.f32.mrf.mxu1  ;;  %3762 = vmatmul.bf16.gmra.mxu2 %v12155_v25 }
 0x301   : > { %v3519_v11 = vadd.f32 %v3518_v24, %v3469_v39  ;;  %3811 = vmatmul.bf16.gmra.mxu3 %v12157_v26 }
 0x303   : > { %3713 = vmatmul.bf16.gmra.mxu1 %v12159_v27  ;;  %v3567_v0 = vpop.f32.mrf.mxu2 }
 0x304   : > { %v3616_v58 = vpop.f32.mrf.mxu3  ;;  %v3568_v18 = vadd.f32 %v3567_v0, %v3519_v11  ;;  %v3471_v35 = vpop.f32.mrf.mxu0  ;;  %v11080_v0 = vld [vmem:[#allocation6 + $0x704] sm:$0xf0] }
 0x306   : > { %v12573_v29 = vadd.f32 %v3616_v58, %v3568_v18  ;;  %v9564_v58 = vor.u32 %v11080_v0, %v9563_v5  ;;  %v8796_v0 = vor.u32 %v10888_v8, %v8795_v12 }
 0x308   : > { %v3520_v50 = vpop.f32.mrf.mxu1  ;;  %3945 = vmatpush.bf16.msra.mxu2 %v9564_v58  ;;  %v9515_v58 = vld [vmem:[#allocation6 + $0x678] sm:$0xf]  ;;  %3847 = vmatpush.bf16.msra.mxu0 %v8796_v0 }
 0x309   : > { %v3521_v41 = vadd.f32 %v3520_v50, %v3471_v35  ;;  %v9371_v0 = vld [vmem:[#allocation6 + $0x558] sm:$0xf] }
 0x30b   : > { %v3569_v28 = vpop.f32.mrf.mxu2 }
 0x30c   : > { %v3618_v61 = vpop.f32.mrf.mxu3  ;;  %v3570_v39 = vadd.f32 %v3569_v28, %v3521_v41  ;;  %v3474_v24 = vpop.f32.mrf.mxu0 }
 0x30e   : > { %v12575_v34 = vadd.f32 %v3618_v61, %v3570_v39 }
 0x30f   : > { %3669 = vmatmul.bf16.gmra.mxu0 %v12171_v40 }
 0x310   : > { %v3523_v6 = vpop.f32.mrf.mxu1  ;;  %3767 = vmatmul.bf16.gmra.mxu2 %v12175_v43 }
 0x311   : > { %v3524_v11 = vadd.f32 %v3523_v6, %v3474_v24  ;;  %3816 = vmatmul.bf16.gmra.mxu3 %v12177_v45 }
 0x313   : > { %3718 = vmatmul.bf16.gmra.mxu1 %v12179_v46  ;;  %v3572_v18 = vpop.f32.mrf.mxu2 }
 0x314   : > { %v3621_v35 = vpop.f32.mrf.mxu3  ;;  %v3573_v50 = vadd.f32 %v3572_v18, %v3524_v11  ;;  %v3476_v41 = vpop.f32.mrf.mxu0  ;;  %v11068_v18 = vld [vmem:[#allocation6 + $0x6a4] sm:$0xf0] }
 0x316   : > { %v12581_v28 = vadd.f32 %v3621_v35, %v3573_v50  ;;  %v10187_v35 = vld [vmem:[#allocation6 + $0xbb8] sm:$0xf]  ;;  %v9516_v50 = vor.u32 %v11068_v18, %v9515_v58  ;;  %v11032_v58 = vld [vmem:[#allocation6 + $0x584] sm:$0xf0] }
 0x317   : > { %v9372_v59 = vor.u32 %v11032_v58, %v9371_v0  ;;  %v9275_v0 = vld [vmem:[#allocation6 + $0x498] sm:$0xf]  ;;  %v11008_v58 = vld [vmem:[#allocation6 + $0x4c4] sm:$0xf0] }
 0x318   : > { %v3525_v61 = vpop.f32.mrf.mxu1  ;;  %3946 = vmatpush.bf16.msra.mxu2 %v9516_v50 }
 0x319   : > { %v3526_v38 = vadd.f32 %v3525_v61, %v3476_v41  ;;  %v11236_v41 = vld [vmem:[#allocation6 + $0xbe4] sm:$0xf0] }
 0x31a   : > { %v10188_v61 = vor.u32 %v11236_v41, %v10187_v35  ;;  %v10091_v41 = vld [vmem:[#allocation6 + $0xaf8] sm:$0xf] }
 0x31b   : > { %v3574_v39 = vpop.f32.mrf.mxu2  ;;  %v10092_v50 = vor.u32 %v11212_v54, %v10091_v41  ;;  %v11056_v41 = vld [vmem:[#allocation6 + $0x644] sm:$0xf0] }
 0x31c   : > { %v3623_v16 = vpop.f32.mrf.mxu3  ;;  %v3575_v24 = vadd.f32 %v3574_v39, %v3526_v38  ;;  %v3479_v6 = vpop.f32.mrf.mxu0  ;;  %v9419_v38 = vld [vmem:[#allocation6 + $0x5b8] sm:$0xf]  ;;  %v11044_v39 = vld [vmem:[#allocation6 + $0x5e4] sm:$0xf0]  ;;  %3989 = vmatpush.bf16.msra.mxu3 %v10188_v61 }
 0x31d   : > { %v9420_v12 = vor.u32 %v11044_v39, %v9419_v38  ;;  %v9323_v38 = vld [vmem:[#allocation6 + $0x4f8] sm:$0xf] }
 0x31e   : > { %v12583_v31 = vadd.f32 %v3623_v16, %v3575_v24 }
 0x31f   : > { %3674 = vmatmul.bf16.gmra.mxu0 %v12191_v62  ;;  %3891 = vmatpush.bf16.msra.mxu1 %v9420_v12 }
 0x320   : > { %v3528_v5 = vpop.f32.mrf.mxu1  ;;  %3772 = vmatmul.bf16.gmra.mxu2 %v12195_v1 }
 0x321   : > { %v3529_v11 = vadd.f32 %v3528_v5, %v3479_v6  ;;  %3821 = vmatmul.bf16.gmra.mxu3 %v12197_v2  ;;  %v10139_v6 = vld [vmem:[#allocation6 + $0xb58] sm:$0xf]  ;;  %v11224_v5 = vld [vmem:[#allocation6 + $0xb84] sm:$0xf0] }
 0x322   : > { %v10140_v52 = vor.u32 %v11224_v5, %v10139_v6 }
 0x323   : > { %3723 = vmatmul.bf16.gmra.mxu1 %v12199_v3  ;;  %v3577_v16 = vpop.f32.mrf.mxu2 }
 0x324   : > { %v3626_v24 = vpop.f32.mrf.mxu3  ;;  %v3578_v8 = vadd.f32 %v3577_v16, %v3529_v11  ;;  %v3481_v10 = vpop.f32.mrf.mxu0  ;;  %3990 = vmatpush.bf16.msra.mxu3 %v10140_v52  ;;  %3892 = vmatpush.bf16.msra.mxu1 %v9372_v59  ;;  %v11020_v11 = vld [vmem:[#allocation6 + $0x524] sm:$0xf0] }
 0x325   : > { %v9324_v16 = vor.u32 %v11020_v11, %v9323_v38  ;;  %v10876_v52 = vld [vmem:[#allocation6 + $0xa4] sm:$0xf0]  ;;  %v9995_v38 = vld [vmem:[#allocation6 + $0xa38] sm:$0xf] }
 0x326   : > { %v12589_v13 = vadd.f32 %v3626_v24, %v3578_v8  ;;  %v10043_v24 = vld [vmem:[#allocation6 + $0xa98] sm:$0xf]  ;;  %v11200_v8 = vld [vmem:[#allocation6 + $0xac4] sm:$0xf0] }
 0x327   : > { %v10044_v6 = vor.u32 %v11200_v8, %v10043_v24  ;;  %v11188_v11 = vld [vmem:[#allocation6 + $0xa64] sm:$0xf0] }
 0x328   : > { %v3530_v18 = vpop.f32.mrf.mxu1  ;;  %3991 = vmatpush.bf16.msra.mxu3 %v10092_v50  ;;  %3893 = vmatpush.bf16.msra.mxu1 %v9324_v16  ;;  %v9276_v50 = vor.u32 %v11008_v58, %v9275_v0  ;;  %v10996_v16 = vld [vmem:[#allocation6 + $0x464] sm:$0xf0] }
 0x329   : > { %v3531_v35 = vadd.f32 %v3530_v18, %v3481_v10  ;;  %v8747_v10 = vld [vmem:[#allocation6 + $0x78] sm:$0xf]  ;;  %v10984_v58 = vld [vmem:[#allocation6 + $0x404] sm:$0xf0] }
 0x32a   : > { %v8748_v59 = vor.u32 %v10876_v52, %v8747_v10 }
 0x32b   : > { %v3579_v39 = vpop.f32.mrf.mxu2 }
 0x32c   : > { %v3628_v61 = vpop.f32.mrf.mxu3  ;;  %v3580_v42 = vadd.f32 %v3579_v39, %v3531_v35  ;;  %v3484_v12 = vpop.f32.mrf.mxu0  ;;  %v9467_v35 = vld [vmem:[#allocation6 + $0x618] sm:$0xf]  ;;  %3848 = vmatpush.bf16.msra.mxu0 %v8748_v59  ;;  %3992 = vmatpush.bf16.msra.mxu3 %v10044_v6  ;;  %v9996_v39 = vor.u32 %v11188_v11, %v9995_v38 }
 0x32d   : > { %3894 = vmatpush.bf16.msra.mxu1 %v9276_v50  ;;  %v9179_v6 = vld [vmem:[#allocation6 + $0x3d8] sm:$0xf] }
 0x32e   : > { %v12591_v5 = vadd.f32 %v3628_v61, %v3580_v42  ;;  %v9468_v42 = vor.u32 %v11056_v41, %v9467_v35  ;;  %v9227_v61 = vld [vmem:[#allocation6 + $0x438] sm:$0xf]  ;;  %v9180_v41 = vor.u32 %v10984_v58, %v9179_v6 }
 0x32f   : > { %3679 = vmatmul.bf16.gmra.mxu0 %v12211_v51  ;;  %v9899_v11 = vld [vmem:[#allocation6 + $0x978] sm:$0xf] }
 0x330   : > { %v3533_v54 = vpop.f32.mrf.mxu1  ;;  %3777 = vmatmul.bf16.gmra.mxu2 %v12215_v55  ;;  %3993 = vmatpush.bf16.msra.mxu3 %v9996_v39  ;;  %v8699_v50 = vld [vmem:[#allocation6 + $0x18] sm:$0xf] }
 0x331   : > { %v3534_v18 = vadd.f32 %v3533_v54, %v3484_v12  ;;  %3826 = vmatmul.bf16.gmra.mxu3 %v12217_v56  ;;  %3947 = vmatpush.bf16.msra.mxu2 %v9468_v42  ;;  %v9228_v12 = vor.u32 %v10996_v16, %v9227_v61  ;;  %v9947_v54 = vld [vmem:[#allocation6 + $0x9d8] sm:$0xf]  ;;  %v9900_v42 = vor.u32 %v11164_v57, %v9899_v11  ;;  %v10864_v61 = vld [vmem:[#allocation6 + $0x44] sm:$0xf0] }
 0x332   : > { %v9948_v0 = vor.u32 %v11176_v30, %v9947_v54  ;;  %v8700_v39 = vor.u32 %v10864_v61, %v8699_v50  ;;  %v10972_v30 = vld [vmem:[#allocation6 + $0x3a4] sm:$0xf0] }
 0x333   : > { %3728 = vmatmul.bf16.gmra.mxu1 %v14178_v19  ;;  %v3582_v24 = vpop.f32.mrf.mxu2  ;;  %v11152_v19 = vld [vmem:[#allocation6 + $0x944] sm:$0xf0] }
 0x334   : > { %v3631_v8 = vpop.f32.mrf.mxu3  ;;  %v3583_v10 = vadd.f32 %v3582_v24, %v3534_v18  ;;  %v3486_v52 = vpop.f32.mrf.mxu0  ;;  %3895 = vmatpush.bf16.msra.mxu1 %v9228_v12  ;;  %3994 = vmatpush.bf16.msra.mxu3 %v9948_v0  ;;  %v9131_v18 = vld [vmem:[#allocation6 + $0x378] sm:$0xf]  ;;  %v10960_v57 = vld [vmem:[#allocation6 + $0x344] sm:$0xf0] }
 0x335   : > { %v9132_v54 = vor.u32 %v10972_v30, %v9131_v18  ;;  %3849 = vmatpush.bf16.msra.mxu0 %v8700_v39  ;;  %v9083_v0 = vld [vmem:[#allocation6 + $0x318] sm:$0xf] }
 0x336   : > { %v12597_v59 = vadd.f32 %v3631_v8, %v3583_v10  ;;  %v9084_v58 = vor.u32 %v10960_v57, %v9083_v0  ;;  %v10942_v0 = vld [vmem:[#allocation6 + $0x2bc] sm:$0xf]  ;;  %v9037_v57 = vld [vmem:[#allocation6 + $0x2e8] sm:$0xf0] }
 0x338   : > { %14193 = vst [vmem:[#allocation59_spill] sm:$0xff] %v12597_v59  ;;  %v3535_v35 = vpop.f32.mrf.mxu1  ;;  %3896 = vmatpush.bf16.msra.mxu1 %v9180_v41  ;;  %v9851_v59 = vld [vmem:[#allocation6 + $0x918] sm:$0xf]  ;;  %3995 = vmatpush.bf16.msra.mxu3 %v9900_v42  ;;  %v11134_v41 = vld [vmem:[#allocation6 + $0x8bc] sm:$0xf] }
 0x339   : > { %v3536_v38 = vadd.f32 %v3535_v35, %v3486_v52  ;;  %v9852_v12 = vor.u32 %v11152_v19, %v9851_v59 }
 0x33b   : > { %v3584_v16 = vpop.f32.mrf.mxu2 }
 0x33c   : > { %v3633_v24 = vpop.f32.mrf.mxu3  ;;  %v3585_v8 = vadd.f32 %v3584_v16, %v3536_v38  ;;  %v3489_v10 = vpop.f32.mrf.mxu0  ;;  %3897 = vmatpush.bf16.msra.mxu1 %v9132_v54  ;;  %v9805_v38 = vld [vmem:[#allocation6 + $0x8e8] sm:$0xf0]  ;;  %3996 = vmatpush.bf16.msra.mxu3 %v9852_v12 }
 0x33d   : > { %v9808_v11 = vor.u32 %v11134_v41, %v9805_v38  ;;  %v9040_v41 = vor.u32 %v10942_v0, %v9037_v57  ;;  %v9757_v38 = vld [vmem:[#allocation6 + $0x888] sm:$0xf0]  ;;  %v10930_v0 = vld [vmem:[#allocation6 + $0x25c] sm:$0xf] }
 0x33e   : > { %v12599_v52 = vadd.f32 %v3633_v24, %v3585_v8  ;;  %v8989_v57 = vld [vmem:[#allocation6 + $0x288] sm:$0xf0] }
 0x33f   : > { %3684 = vmatmul.bf16.gmra.mxu0 %v12231_v37  ;;  %4136 = vmatpush.bf16.msrb.mxu2 %v9808_v11 }
 0x340   : > { %v3538_v6 = vpop.f32.mrf.mxu1  ;;  %3782 = vmatmul.bf16.gmra.mxu2 %v12235_v47  ;;  %3898 = vmatpush.bf16.msra.mxu1 %v9084_v58 }
 0x341   : > { %v3539_v35 = vadd.f32 %v3538_v6, %v3489_v10  ;;  %3831 = vmatmul.bf16.gmra.mxu3 %v12237_v48  ;;  %v11122_v6 = vld [vmem:[#allocation6 + $0x85c] sm:$0xf]  ;;  %4038 = vmatpush.bf16.msrb.mxu0 %v9040_v41  ;;  %v8992_v41 = vor.u32 %v10930_v0, %v8989_v57 }
 0x343   : > { %3733 = vmatmul.bf16.gmra.mxu1 %v12239_v60  ;;  %v3587_v19 = vpop.f32.mrf.mxu2 }
 0x344   : > { %v3636_v59 = vpop.f32.mrf.mxu3  ;;  %v3588_v42 = vadd.f32 %v3587_v19, %v3539_v35  ;;  %v3491_v50 = vpop.f32.mrf.mxu0 }
 0x345   : > { %4039 = vmatpush.bf16.msrb.mxu0 %v8992_v41  ;;  %v8941_v41 = vld [vmem:[#allocation6 + $0x228] sm:$0xf0] }
 0x346   : > { %v12605_v61 = vadd.f32 %v3636_v59, %v3588_v42  ;;  %v9760_v59 = vor.u32 %v11122_v6, %v9757_v38  ;;  %v11110_v6 = vld [vmem:[#allocation6 + $0x7fc] sm:$0xf]  ;;  %v9709_v38 = vld [vmem:[#allocation6 + $0x828] sm:$0xf0] }
 0x348   : > { %v3540_v18 = vpop.f32.mrf.mxu1  ;;  %4137 = vmatpush.bf16.msrb.mxu2 %v9760_v59  ;;  %v9712_v59 = vor.u32 %v11110_v6, %v9709_v38  ;;  %v11098_v38 = vld [vmem:[#allocation6 + $0x79c] sm:$0xf] }
 0x349   : > { %v3541_v16 = vadd.f32 %v3540_v18, %v3491_v50 }
 0x34b   : > { %v3589_v24 = vpop.f32.mrf.mxu2 }
 0x34c   : > { %v3638_v39 = vpop.f32.mrf.mxu3  ;;  %v3590_v30 = vadd.f32 %v3589_v24, %v3541_v16  ;;  %v3494_v8 = vpop.f32.mrf.mxu0  ;;  %4138 = vmatpush.bf16.msrb.mxu2 %v9712_v59 }
 0x34e   : > { %v12607_v10 = vadd.f32 %v3638_v39, %v3590_v30 }
 0x34f   : > { %3689 = vmatmul.bf16.gmra.mxu0 %v12251_v17 }
 0x350   : > { %v3543_v54 = vpop.f32.mrf.mxu1  ;;  %3787 = vmatmul.bf16.gmra.mxu2 %v12255_v20 }
 0x351   : > { %v3544_v12 = vadd.f32 %v3543_v54, %v3494_v8  ;;  %3836 = vmatmul.bf16.gmra.mxu3 %v12257_v21 }
 0x353   : > { %3738 = vmatmul.bf16.gmra.mxu1 %v12259_v23  ;;  %v3592_v58 = vpop.f32.mrf.mxu2 }
 0x354   : > { %v3641_v35 = vpop.f32.mrf.mxu3  ;;  %v3593_v11 = vadd.f32 %v3592_v58, %v3544_v12  ;;  %v3496_v19 = vpop.f32.mrf.mxu0 }
 0x356   : > { %v12613_v42 = vadd.f32 %v3641_v35, %v3593_v11 }
 0x358   : > { %v3545_v50 = vpop.f32.mrf.mxu1 }
 0x359   : > { %v3546_v18 = vadd.f32 %v3545_v50, %v3496_v19 }
 0x35b   : > { %v3594_v16 = vpop.f32.mrf.mxu2 }
 0x35c   : > { %v3643_v24 = vpop.f32.mrf.mxu3  ;;  %v3595_v39 = vadd.f32 %v3594_v16, %v3546_v18  ;;  %v3655_v30 = vpop.f32.mrf.mxu0 }
 0x35e   : > { %v12615_v8 = vadd.f32 %v3643_v24, %v3595_v39 }
 0x35f   : > { %3850 = vmatmul.bf16.vlgmr.msra.gmra.mxu0 %v12112_v44 }
 0x360   : > { %v3704_v54 = vpop.f32.mrf.mxu1  ;;  %3948 = vmatmul.bf16.vlgmr.msra.gmra.mxu2 %v14186_v9 }
 0x361   : > { %v3705_v12 = vadd.f32 %v3704_v54, %v3655_v30  ;;  %3997 = vmatmul.bf16.vlgmr.msra.gmra.mxu3 %v14187_v33 }
 0x363   : > { %3899 = vmatmul.bf16.vlgmr.msra.gmra.mxu1 %v14188_v15  ;;  %v3753_v58 = vpop.f32.mrf.mxu2 }
 0x364   : > { %v3802_v35 = vpop.f32.mrf.mxu3  ;;  %v3754_v11 = vadd.f32 %v3753_v58, %v3705_v12  ;;  %v3657_v19 = vpop.f32.mrf.mxu0 }
 0x366   : > { %v3803_v50 = vadd.f32 %v3802_v35, %v3754_v11  ;;  %v10918_v35 = vld [vmem:[#allocation6 + $0x1fc] sm:$0xf] }
 0x367   : > { %v8944_v59 = vor.u32 %v10918_v35, %v8941_v41 }
 0x368   : > { %v3706_v18 = vpop.f32.mrf.mxu1  ;;  %v5020_v16 = vpack.c.bf16 %v3803_v50, %v12557_v53  ;;  %v9661_v50 = vld [vmem:[#allocation6 + $0x7c8] sm:$0xf0] }
 0x369   : > { %v3707_v24 = vadd.f32 %v3706_v18, %v3657_v19  ;;  %4040 = vmatpush.bf16.msrb.mxu0 %v8944_v59 }
 0x36a   : > { %v5178_v57 = vunpack.c.l.b16 %v5020_v16  ;;  %v5572_v6 = vunpack.c.h.b16 %v5020_v16 }
 0x36b   : > { %v3755_v39 = vpop.f32.mrf.mxu2 }
 0x36c   : > { %v3804_v30 = vpop.f32.mrf.mxu3  ;;  %v3756_v54 = vadd.f32 %v3755_v39, %v3707_v24  ;;  %v3660_v15 = vpop.f32.mrf.mxu0 }
 0x36e   : > { %v3805_v33 = vadd.f32 %v3804_v30, %v3756_v54 }
 0x36f   : > { %3855 = vmatmul.bf16.gmra.mxu0 %v12131_v4 }
 0x370   : > { %v3709_v9 = vpop.f32.mrf.mxu1  ;;  %v5026_v0 = vpack.c.bf16 %v3805_v33, %v12559_v14  ;;  %3953 = vmatmul.bf16.gmra.mxu2 %v12135_v7  ;;  %v9664_v14 = vor.u32 %v11098_v38, %v9661_v50  ;;  %v10906_v38 = vld [vmem:[#allocation6 + $0x19c] sm:$0xf] }
 0x371   : > { %v3710_v12 = vadd.f32 %v3709_v9, %v3660_v15  ;;  %4002 = vmatmul.bf16.gmra.mxu3 %v14191_v49 }
 0x372   : > { %v5179_v58 = vunpack.c.l.b16 %v5026_v0  ;;  %v5573_v53 = vunpack.c.h.b16 %v5026_v0  ;;  %4139 = vmatpush.bf16.msrb.mxu2 %v9664_v14 }
 0x373   : > { %3904 = vmatmul.bf16.gmra.mxu1 %v14192_v36  ;;  %v3758_v11 = vpop.f32.mrf.mxu2 }
 0x374   : > { %v3807_v19 = vpop.f32.mrf.mxu3  ;;  %v3759_v18 = vadd.f32 %v3758_v11, %v3710_v12  ;;  %v3662_v33 = vpop.f32.mrf.mxu0  ;;  %v12627_v24 = vpack.c.b16 %v5179_v58, %v5178_v57  ;;  %v12629_v9 = vpack.c.b16 %v5573_v53, %v5572_v6  ;;  %v8893_v11 = vld [vmem:[#allocation6 + $0x1c8] sm:$0xf0] }
 0x375   : > { %v8896_v50 = vor.u32 %v10906_v38, %v8893_v11 }
 0x376   : > { %14194 = vst [vmem:[#allocation60_spill] sm:$0xff] %v12627_v24  ;;  %v3808_v15 = vadd.f32 %v3807_v19, %v3759_v18  ;;  %v11086_v19 = vld [vmem:[#allocation6 + $0x73c] sm:$0xf]  ;;  %v9613_v18 = vld [vmem:[#allocation6 + $0x768] sm:$0xf0] }
 0x377   : > { %14195 = vst [vmem:[#allocation61_spill] sm:$0xff] %v12629_v9  ;;  %v9616_v14 = vor.u32 %v11086_v19, %v9613_v18  ;;  %4041 = vmatpush.bf16.msrb.mxu0 %v8896_v50  ;;  %v10894_v19 = vld [vmem:[#allocation6 + $0x13c] sm:$0xf] }
 0x378   : > { %v3711_v16 = vpop.f32.mrf.mxu1  ;;  %v5032_v39 = vpack.c.bf16 %v3808_v15, %v12565_v63 }
 0x379   : > { %v3712_v30 = vadd.f32 %v3711_v16, %v3662_v33  ;;  %4140 = vmatpush.bf16.msrb.mxu2 %v9616_v14 }
 0x37a   : > { %v5180_v58 = vunpack.c.l.b16 %v5032_v39  ;;  %v5574_v53 = vunpack.c.h.b16 %v5032_v39 }
 0x37b   : > { %v3760_v54 = vpop.f32.mrf.mxu2 }
 0x37c   : > { %v3809_v0 = vpop.f32.mrf.mxu3  ;;  %v3761_v36 = vadd.f32 %v3760_v54, %v3712_v30  ;;  %v3665_v49 = vpop.f32.mrf.mxu0 }
 0x37e   : > { %v3810_v35 = vadd.f32 %v3809_v0, %v3761_v36 }
 0x37f   : > { %3860 = vmatmul.bf16.gmra.mxu0 %v12151_v22 }
 0x380   : > { %v3714_v12 = vpop.f32.mrf.mxu1  ;;  %v5038_v57 = vpack.c.bf16 %v3810_v35, %v12567_v32  ;;  %3958 = vmatmul.bf16.gmra.mxu2 %v12155_v25 }
 0x381   : > { %v3715_v6 = vadd.f32 %v3714_v12, %v3665_v49  ;;  %4007 = vmatmul.bf16.gmra.mxu3 %v12157_v26 }
 0x382   : > { %v5181_v41 = vunpack.c.l.b16 %v5038_v57  ;;  %v5575_v63 = vunpack.c.h.b16 %v5038_v57 }
 0x383   : > { %3909 = vmatmul.bf16.gmra.mxu1 %v12159_v27  ;;  %v3763_v36 = vpop.f32.mrf.mxu2 }
 0x384   : > { %v3812_v59 = vpop.f32.mrf.mxu3  ;;  %v3764_v33 = vadd.f32 %v3763_v36, %v3715_v6  ;;  %v3667_v32 = vpop.f32.mrf.mxu0  ;;  %v12637_v15 = vpack.c.b16 %v5181_v41, %v5180_v58  ;;  %v12639_v49 = vpack.c.b16 %v5575_v63, %v5574_v53  ;;  %v8845_v36 = vld [vmem:[#allocation6 + $0x168] sm:$0xf0] }
 0x386   : > { %14196 = vst [vmem:[#allocation62_spill] sm:$0xff] %v12637_v15  ;;  %v3813_v16 = vadd.f32 %v3812_v59, %v3764_v33  ;;  %v11074_v59 = vld [vmem:[#allocation6 + $0x6dc] sm:$0xf]  ;;  %v8848_v33 = vor.u32 %v10894_v19, %v8845_v36  ;;  %v8899_v15 = vld [vmem:[#allocation6 + $0x1a0] sm:$0xf] }
 0x387   : > { %14197 = vst [vmem:[#allocation63_spill] sm:$0xff] %v12639_v49 }
 0x388   : > { %v3716_v39 = vpop.f32.mrf.mxu1  ;;  %v5044_v30 = vpack.c.bf16 %v3813_v16, %v12573_v29  ;;  %4042 = vmatpush.bf16.msrb.mxu0 %v8848_v33  ;;  %v8797_v33 = vld [vmem:[#allocation6 + $0x108] sm:$0xf0] }
 0x389   : > { %v3717_v54 = vadd.f32 %v3716_v39, %v3667_v32  ;;  %v9565_v32 = vld [vmem:[#allocation6 + $0x708] sm:$0xf0] }
 0x38a   : > { %v5182_v41 = vunpack.c.l.b16 %v5044_v30  ;;  %v5576_v63 = vunpack.c.h.b16 %v5044_v30  ;;  %v9568_v16 = vor.u32 %v11074_v59, %v9565_v32  ;;  %v11062_v32 = vld [vmem:[#allocation6 + $0x67c] sm:$0xf] }
 0x38b   : > { %v3765_v0 = vpop.f32.mrf.mxu2 }
 0x38c   : > { %v3814_v35 = vpop.f32.mrf.mxu3  ;;  %v3766_v12 = vadd.f32 %v3765_v0, %v3717_v54  ;;  %v3670_v57 = vpop.f32.mrf.mxu0  ;;  %4141 = vmatpush.bf16.msrb.mxu2 %v9568_v16 }
 0x38e   : > { %v3815_v38 = vadd.f32 %v3814_v35, %v3766_v12 }
 0x38f   : > { %3865 = vmatmul.bf16.gmra.mxu0 %v12171_v40 }
 0x390   : > { %v3719_v6 = vpop.f32.mrf.mxu1  ;;  %v5050_v58 = vpack.c.bf16 %v3815_v38, %v12575_v34  ;;  %3963 = vmatmul.bf16.gmra.mxu2 %v12175_v43 }
 0x391   : > { %v3720_v53 = vadd.f32 %v3719_v6, %v3670_v57  ;;  %4012 = vmatmul.bf16.gmra.mxu3 %v12177_v45 }
 0x392   : > { %v5183_v11 = vunpack.c.l.b16 %v5050_v58  ;;  %v5577_v29 = vunpack.c.h.b16 %v5050_v58 }
 0x393   : > { %3914 = vmatmul.bf16.gmra.mxu1 %v12179_v46  ;;  %v3768_v50 = vpop.f32.mrf.mxu2 }
 0x394   : > { %v3817_v18 = vpop.f32.mrf.mxu3  ;;  %v3769_v14 = vadd.f32 %v3768_v50, %v3720_v53  ;;  %v3672_v34 = vpop.f32.mrf.mxu0  ;;  %v12647_v39 = vpack.c.b16 %v5183_v11, %v5182_v41  ;;  %v12649_v54 = vpack.c.b16 %v5577_v29, %v5576_v63  ;;  %v11230_v11 = vld [vmem:[#allocation6 + $0xbbc] sm:$0xf]  ;;  %v10189_v29 = vld [vmem:[#allocation6 + $0xbe8] sm:$0xf0] }
 0x395   : > { %v10192_v36 = vor.u32 %v11230_v11, %v10189_v29 }
 0x396   : > { %14198 = vst [vmem:[#allocation64_spill] sm:$0xff] %v12647_v39  ;;  %v3818_v30 = vadd.f32 %v3817_v18, %v3769_v14  ;;  %v10882_v18 = vld [vmem:[#allocation6 + $0xdc] sm:$0xf]  ;;  %v8851_v39 = vld [vmem:[#allocation6 + $0x140] sm:$0xf] }
 0x397   : > { %14199 = vst [vmem:[#allocation65_spill] sm:$0xff] %v12649_v54  ;;  %4185 = vmatpush.bf16.msrb.mxu3 %v10192_v36 }
 0x398   : > { %v3721_v0 = vpop.f32.mrf.mxu1  ;;  %v5056_v35 = vpack.c.bf16 %v3818_v30, %v12581_v28  ;;  %v9517_v30 = vld [vmem:[#allocation6 + $0x6a8] sm:$0xf0] }
 0x399   : > { %v3722_v12 = vadd.f32 %v3721_v0, %v3672_v34  ;;  %v11038_v0 = vld [vmem:[#allocation6 + $0x5bc] sm:$0xf] }
 0x39a   : > { %v5184_v28 = vunpack.c.l.b16 %v5056_v35  ;;  %v5578_v14 = vunpack.c.h.b16 %v5056_v35 }
 0x39b   : > { %v3770_v57 = vpop.f32.mrf.mxu2 }
 0x39c   : > { %v3819_v38 = vpop.f32.mrf.mxu3  ;;  %v3771_v6 = vadd.f32 %v3770_v57, %v3722_v12  ;;  %v3675_v58 = vpop.f32.mrf.mxu0  ;;  %v9421_v12 = vld [vmem:[#allocation6 + $0x5e8] sm:$0xf0] }
 0x39e   : > { %v3820_v19 = vadd.f32 %v3819_v38, %v3771_v6  ;;  %v9520_v6 = vor.u32 %v11062_v32, %v9517_v30  ;;  %v10093_v30 = vld [vmem:[#allocation6 + $0xb28] sm:$0xf0] }
 0x39f   : > { %3870 = vmatmul.bf16.gmra.mxu0 %v12191_v62 }
 0x3a0   : > { %v3724_v53 = vpop.f32.mrf.mxu1  ;;  %v5062_v41 = vpack.c.bf16 %v3820_v19, %v12583_v31  ;;  %3968 = vmatmul.bf16.gmra.mxu2 %v12195_v1  ;;  %v8800_v31 = vor.u32 %v10882_v18, %v8797_v33  ;;  %v11218_v19 = vld [vmem:[#allocation6 + $0xb5c] sm:$0xf]  ;;  %v9373_v33 = vld [vmem:[#allocation6 + $0x588] sm:$0xf0] }
 0x3a1   : > { %v3725_v63 = vadd.f32 %v3724_v53, %v3675_v58  ;;  %4017 = vmatmul.bf16.gmra.mxu3 %v12197_v2  ;;  %v9424_v58 = vor.u32 %v11038_v0, %v9421_v12  ;;  %v10141_v53 = vld [vmem:[#allocation6 + $0xb88] sm:$0xf0]  ;;  %4142 = vmatpush.bf16.msrb.mxu2 %v9520_v6  ;;  %v11026_v18 = vld [vmem:[#allocation6 + $0x55c] sm:$0xf] }
 0x3a2   : > { %v5185_v59 = vunpack.c.l.b16 %v5062_v41  ;;  %v5579_v50 = vunpack.c.h.b16 %v5062_v41  ;;  %4043 = vmatpush.bf16.msrb.mxu0 %v8800_v31  ;;  %v10144_v11 = vor.u32 %v11218_v19, %v10141_v53  ;;  %v9376_v9 = vor.u32 %v11026_v18, %v9373_v33  ;;  %v10045_v6 = vld [vmem:[#allocation6 + $0xac8] sm:$0xf0]  ;;  %v11002_v53 = vld [vmem:[#allocation6 + $0x49c] sm:$0xf] }
 0x3a3   : > { %3919 = vmatmul.bf16.gmra.mxu1 %v12199_v3  ;;  %v3773_v34 = vpop.f32.mrf.mxu2  ;;  %v11182_v18 = vld [vmem:[#allocation6 + $0xa3c] sm:$0xf]  ;;  %v9997_v33 = vld [vmem:[#allocation6 + $0xa68] sm:$0xf0] }
 0x3a4   : > { %v3822_v16 = vpop.f32.mrf.mxu3  ;;  %v3774_v57 = vadd.f32 %v3773_v34, %v3725_v63  ;;  %v3677_v38 = vpop.f32.mrf.mxu0  ;;  %v12657_v41 = vpack.c.b16 %v5185_v59, %v5184_v28  ;;  %v12659_v29 = vpack.c.b16 %v5579_v50, %v5578_v14  ;;  %4087 = vmatpush.bf16.msrb.mxu1 %v9424_v58  ;;  %4186 = vmatpush.bf16.msrb.mxu3 %v10144_v11  ;;  %v11206_v34 = vld [vmem:[#allocation6 + $0xafc] sm:$0xf]  ;;  %v9325_v59 = vld [vmem:[#allocation6 + $0x528] sm:$0xf0] }
 0x3a5   : > { %v10096_v0 = vor.u32 %v11206_v34, %v10093_v30  ;;  %v11014_v28 = vld [vmem:[#allocation6 + $0x4fc] sm:$0xf] }
 0x3a6   : > { %14200 = vst [vmem:[#allocation66_spill] sm:$0xff] %v12657_v41  ;;  %v3823_v35 = vadd.f32 %v3822_v16, %v3774_v57  ;;  %v9328_v14 = vor.u32 %v11014_v28, %v9325_v59  ;;  %v11194_v57 = vld [vmem:[#allocation6 + $0xa9c] sm:$0xf]  ;;  %v8749_v59 = vld [vmem:[#allocation6 + $0xa8] sm:$0xf0] }
 0x3a7   : > { %14201 = vst [vmem:[#allocation67_spill] sm:$0xff] %v12659_v29  ;;  %v10048_v58 = vor.u32 %v11194_v57, %v10045_v6  ;;  %v10870_v28 = vld [vmem:[#allocation6 + $0x7c] sm:$0xf]  ;;  %v9469_v57 = vld [vmem:[#allocation6 + $0x648] sm:$0xf0] }
 0x3a8   : > { %v3726_v36 = vpop.f32.mrf.mxu1  ;;  %v5068_v63 = vpack.c.bf16 %v3823_v35, %v12589_v13  ;;  %4088 = vmatpush.bf16.msrb.mxu1 %v9376_v9  ;;  %4187 = vmatpush.bf16.msrb.mxu3 %v10096_v0  ;;  %v9277_v13 = vld [vmem:[#allocation6 + $0x4c8] sm:$0xf0]  ;;  %v14202_v0 = vld [vmem:[#allocation26_spill] sm:$0xff]  ;;  %v8803_v41 = vld [vmem:[#allocation6 + $0xe0] sm:$0xf] }
 0x3a9   : > { %v3727_v32 = vadd.f32 %v3726_v36, %v3677_v38  ;;  %v9280_v9 = vor.u32 %v11002_v53, %v9277_v13  ;;  %v10000_v36 = vor.u32 %v11182_v18, %v9997_v33  ;;  %v9229_v6 = vld [vmem:[#allocation6 + $0x468] sm:$0xf0] }
 0x3ab   : > { %v3775_v31 = vpop.f32.mrf.mxu2 }
 0x3ac   : > { %v3824_v50 = vpop.f32.mrf.mxu3  ;;  %v3776_v16 = vadd.f32 %v3775_v31, %v3727_v32  ;;  %v3680_v12 = vpop.f32.mrf.mxu0  ;;  %4089 = vmatpush.bf16.msrb.mxu1 %v9328_v14  ;;  %4188 = vmatpush.bf16.msrb.mxu3 %v10048_v58  ;;  %v5186_v32 = vunpack.c.l.b16 %v5068_v63  ;;  %v11050_v31 = vld [vmem:[#allocation6 + $0x61c] sm:$0xf] }
 0x3ad   : > { %v9472_v53 = vor.u32 %v11050_v31, %v9469_v57  ;;  %v11158_v57 = vld [vmem:[#allocation6 + $0x97c] sm:$0xf] }
 0x3ae   : > { %v3825_v19 = vadd.f32 %v3824_v50, %v3776_v16  ;;  %v5580_v50 = vunpack.c.h.b16 %v5068_v63 }
 0x3af   : > { %3875 = vmatmul.bf16.gmra.mxu0 %v12211_v51  ;;  %4143 = vmatpush.bf16.msrb.mxu2 %v9472_v53 }
 0x3b0   : > { %v3729_v38 = vpop.f32.mrf.mxu1  ;;  %v5074_v11 = vpack.c.bf16 %v3825_v19, %v12591_v5  ;;  %3973 = vmatmul.bf16.gmra.mxu2 %v12215_v55  ;;  %v8752_v5 = vor.u32 %v10870_v28, %v8749_v59  ;;  %4090 = vmatpush.bf16.msrb.mxu1 %v9280_v9  ;;  %v10978_v28 = vld [vmem:[#allocation6 + $0x3dc] sm:$0xf]  ;;  %v9181_v59 = vld [vmem:[#allocation6 + $0x408] sm:$0xf0] }
 0x3b1   : > { %v3730_v35 = vadd.f32 %v3729_v38, %v3680_v12  ;;  %4022 = vmatmul.bf16.gmra.mxu3 %v12217_v56  ;;  %v10990_v12 = vld [vmem:[#allocation6 + $0x43c] sm:$0xf] }
 0x3b2   : > { %v5187_v34 = vunpack.c.l.b16 %v5074_v11  ;;  %v5581_v30 = vunpack.c.h.b16 %v5074_v11  ;;  %4189 = vmatpush.bf16.msrb.mxu3 %v10000_v36  ;;  %v9232_v13 = vor.u32 %v10990_v12, %v9229_v6  ;;  %v11170_v38 = vld [vmem:[#allocation6 + $0x9dc] sm:$0xf]  ;;  %v9949_v11 = vld [vmem:[#allocation6 + $0xa08] sm:$0xf0]  ;;  %4044 = vmatpush.bf16.msrb.mxu0 %v8752_v5  ;;  %v9184_v36 = vor.u32 %v10978_v28, %v9181_v59 }
 0x3b3   : > { %3924 = vmatmul.bf16.gmra.mxu1 %v14202_v0  ;;  %v3778_v14 = vpop.f32.mrf.mxu2  ;;  %v9952_v33 = vor.u32 %v11170_v38, %v9949_v11  ;;  %v9901_v12 = vld [vmem:[#allocation6 + $0x9a8] sm:$0xf0]  ;;  %v10966_v5 = vld [vmem:[#allocation6 + $0x37c] sm:$0xf] }
 0x3b4   : > { %v3827_v16 = vpop.f32.mrf.mxu3  ;;  %v3779_v58 = vadd.f32 %v3778_v14, %v3730_v35  ;;  %v3682_v19 = vpop.f32.mrf.mxu0  ;;  %v12667_v18 = vpack.c.b16 %v5187_v34, %v5186_v32  ;;  %v12669_v24 = vpack.c.b16 %v5581_v30, %v5580_v50  ;;  %4091 = vmatpush.bf16.msrb.mxu1 %v9232_v13  ;;  %v14205_v35 = vld [vmem:[#allocation59_spill] sm:$0xff]  ;;  %v9904_v6 = vor.u32 %v11158_v57, %v9901_v12  ;;  %v8701_v34 = vld [vmem:[#allocation6 + $0x48] sm:$0xf0] }
 0x3b5   : > { %v10858_v32 = vld [vmem:[#allocation6 + $0x1c] sm:$0xf]  ;;  %v9085_v59 = vld [vmem:[#allocation6 + $0x348] sm:$0xf0] }
 0x3b6   : > { %14203 = vst [vmem:[#allocation68_spill] sm:$0xff] %v12667_v18  ;;  %v3828_v63 = vadd.f32 %v3827_v16, %v3779_v58  ;;  %4190 = vmatpush.bf16.msrb.mxu3 %v9952_v33  ;;  %v8704_v50 = vor.u32 %v10858_v32, %v8701_v34  ;;  %v9133_v16 = vld [vmem:[#allocation6 + $0x3a8] sm:$0xf0]  ;;  %v11146_v11 = vld [vmem:[#allocation6 + $0x91c] sm:$0xf] }
 0x3b7   : > { %14204 = vst [vmem:[#allocation69_spill] sm:$0xff] %v12669_v24  ;;  %v9136_v13 = vor.u32 %v10966_v5, %v9133_v16  ;;  %v9853_v33 = vld [vmem:[#allocation6 + $0x948] sm:$0xf0]  ;;  %v10954_v28 = vld [vmem:[#allocation6 + $0x31c] sm:$0xf] }
 0x3b8   : > { %v3731_v9 = vpop.f32.mrf.mxu1  ;;  %v5080_v14 = vpack.c.bf16 %v3828_v63, %v14205_v35  ;;  %4092 = vmatpush.bf16.msrb.mxu1 %v9184_v36  ;;  %4045 = vmatpush.bf16.msrb.mxu0 %v8704_v50  ;;  %v9856_v63 = vor.u32 %v11146_v11, %v9853_v33  ;;  %v9088_v35 = vor.u32 %v10954_v28, %v9085_v59  ;;  %v9811_v34 = vld [vmem:[#allocation6 + $0x8c0] sm:$0xf]  ;;  %v11141_v5 = vld [vmem:[#allocation6 + $0x8ec] sm:$0xf0] }
 0x3b9   : > { %v3732_v31 = vadd.f32 %v3731_v9, %v3682_v19  ;;  %v9812_v50 = vor.u32 %v11141_v5, %v9811_v34  ;;  %v10949_v34 = vld [vmem:[#allocation6 + $0x2ec] sm:$0xf0] }
 0x3ba   : > { %4191 = vmatpush.bf16.msrb.mxu3 %v9904_v6  ;;  %v5582_v12 = vunpack.c.h.b16 %v5080_v14 }
 0x3bb   : > { %v3780_v38 = vpop.f32.mrf.mxu2  ;;  %4332 = vmatpush.bf16.msra.mxu2 %v9812_v50 }
 0x3bc   : > { %v3829_v30 = vpop.f32.mrf.mxu3  ;;  %v3781_v58 = vadd.f32 %v3780_v38, %v3732_v31  ;;  %v3685_v53 = vpop.f32.mrf.mxu0  ;;  %4093 = vmatpush.bf16.msrb.mxu1 %v9136_v13  ;;  %v5188_v31 = vunpack.c.l.b16 %v5080_v14 }
 0x3be   : > { %v3830_v19 = vadd.f32 %v3829_v30, %v3781_v58  ;;  %4192 = vmatpush.bf16.msrb.mxu3 %v9856_v63 }
 0x3bf   : > { %3880 = vmatmul.bf16.gmra.mxu0 %v12231_v37 }
 0x3c0   : > { %v3734_v9 = vpop.f32.mrf.mxu1  ;;  %v5086_v36 = vpack.c.bf16 %v3830_v19, %v12599_v52  ;;  %3978 = vmatmul.bf16.gmra.mxu2 %v12235_v47  ;;  %4094 = vmatpush.bf16.msrb.mxu1 %v9088_v35 }
 0x3c1   : > { %v3735_v57 = vadd.f32 %v3734_v9, %v3685_v53  ;;  %4027 = vmatmul.bf16.gmra.mxu3 %v12237_v48 }
 0x3c2   : > { %v5189_v6 = vunpack.c.l.b16 %v5086_v36  ;;  %v5583_v32 = vunpack.c.h.b16 %v5086_v36  ;;  %v9043_v36 = vld [vmem:[#allocation6 + $0x2c0] sm:$0xf] }
 0x3c3   : > { %3929 = vmatmul.bf16.gmra.mxu1 %v12239_v60  ;;  %v3783_v38 = vpop.f32.mrf.mxu2 }
 0x3c4   : > { %v3832_v30 = vpop.f32.mrf.mxu3  ;;  %v3784_v16 = vadd.f32 %v3783_v38, %v3735_v57  ;;  %v3687_v52 = vpop.f32.mrf.mxu0  ;;  %v12677_v58 = vpack.c.b16 %v5189_v6, %v5188_v31  ;;  %v12679_v53 = vpack.c.b16 %v5583_v32, %v5582_v12  ;;  %v9044_v57 = vor.u32 %v10949_v34, %v9043_v36  ;;  %v11129_v6 = vld [vmem:[#allocation6 + $0x88c] sm:$0xf0] }
 0x3c6   : > { %14206 = vst [vmem:[#allocation59_spill] sm:$0xff] %v12677_v58  ;;  %v3833_v13 = vadd.f32 %v3832_v30, %v3784_v16  ;;  %4234 = vmatpush.bf16.msra.mxu0 %v9044_v57  ;;  %v8995_v57 = vld [vmem:[#allocation6 + $0x260] sm:$0xf] }
 0x3c7   : > { %14207 = vst [vmem:[#allocation70_spill] sm:$0xff] %v12679_v53 }
 0x3c8   : > { %v3736_v11 = vpop.f32.mrf.mxu1  ;;  %v5092_v14 = vpack.c.bf16 %v3833_v13, %v12605_v61  ;;  %v9763_v61 = vld [vmem:[#allocation6 + $0x860] sm:$0xf] }
 0x3c9   : > { %v3737_v33 = vadd.f32 %v3736_v11, %v3687_v52  ;;  %v9764_v32 = vor.u32 %v11129_v6, %v9763_v61 }
 0x3ca   : > { %v5190_v5 = vunpack.c.l.b16 %v5092_v14  ;;  %v5584_v38 = vunpack.c.h.b16 %v5092_v14 }
 0x3cb   : > { %v3785_v63 = vpop.f32.mrf.mxu2  ;;  %4333 = vmatpush.bf16.msra.mxu2 %v9764_v32  ;;  %v14210_v32 = vld [vmem:[#allocation16_spill] sm:$0xff] }
 0x3cc   : > { %v3834_v19 = vpop.f32.mrf.mxu3  ;;  %v3786_v28 = vadd.f32 %v3785_v63, %v3737_v33  ;;  %v3690_v59 = vpop.f32.mrf.mxu0 }
 0x3ce   : > { %v3835_v9 = vadd.f32 %v3834_v19, %v3786_v28 }
 0x3cf   : > { %3885 = vmatmul.bf16.gmra.mxu0 %v12251_v17 }
 0x3d0   : > { %v3739_v35 = vpop.f32.mrf.mxu1  ;;  %v5098_v31 = vpack.c.bf16 %v3835_v9, %v12607_v10  ;;  %3983 = vmatmul.bf16.gmra.mxu2 %v12255_v20 }
 0x3d1   : > { %v3740_v12 = vadd.f32 %v3739_v35, %v3690_v59  ;;  %4032 = vmatmul.bf16.gmra.mxu3 %v12257_v21 }
 0x3d2   : > { %v5191_v30 = vunpack.c.l.b16 %v5098_v31  ;;  %v5585_v50 = vunpack.c.h.b16 %v5098_v31  ;;  %v10937_v31 = vld [vmem:[#allocation6 + $0x28c] sm:$0xf0] }
 0x3d3   : > { %3934 = vmatmul.bf16.gmra.mxu1 %v12259_v23  ;;  %v3788_v16 = vpop.f32.mrf.mxu2  ;;  %v8996_v61 = vor.u32 %v10937_v31, %v8995_v57 }
 0x3d4   : > { %v3837_v52 = vpop.f32.mrf.mxu3  ;;  %v3789_v13 = vadd.f32 %v3788_v16, %v3740_v12  ;;  %v3692_v10 = vpop.f32.mrf.mxu0  ;;  %v12687_v11 = vpack.c.b16 %v5191_v30, %v5190_v5  ;;  %v12689_v33 = vpack.c.b16 %v5585_v50, %v5584_v38  ;;  %v14211_v38 = vld [vmem:[#allocation17_spill] sm:$0xff] }
 0x3d5   : > { %v11117_v30 = vld [vmem:[#allocation6 + $0x82c] sm:$0xf0]  ;;  %4235 = vmatpush.bf16.msra.mxu0 %v8996_v61 }
 0x3d6   : > { %14208 = vst [vmem:[#allocation71_spill] sm:$0xff] %v12687_v11  ;;  %v3838_v63 = vadd.f32 %v3837_v52, %v3789_v13 }
 0x3d7   : > { %14209 = vst [vmem:[#allocation72_spill] sm:$0xff] %v12689_v33  ;;  %v11213_v33 = vld [vmem:[#allocation6 + $0xb2c] sm:$0xf0] }
 0x3d8   : > { %v3741_v19 = vpop.f32.mrf.mxu1  ;;  %v5104_v28 = vpack.c.bf16 %v3838_v63, %v12613_v42  ;;  %v9715_v42 = vld [vmem:[#allocation6 + $0x800] sm:$0xf]  ;;  %v14212_v63 = vld [vmem:[#allocation18_spill] sm:$0xff] }
 0x3d9   : > { %v3742_v59 = vadd.f32 %v3741_v19, %v3692_v10  ;;  %v9716_v50 = vor.u32 %v11117_v30, %v9715_v42  ;;  %v8947_v42 = vld [vmem:[#allocation6 + $0x200] sm:$0xf]  ;;  %v10925_v30 = vld [vmem:[#allocation6 + $0x22c] sm:$0xf0] }
 0x3da   : > { %v5192_v16 = vunpack.c.l.b16 %v5104_v28  ;;  %v5586_v52 = vunpack.c.h.b16 %v5104_v28 }
 0x3db   : > { %v3790_v9 = vpop.f32.mrf.mxu2  ;;  %4334 = vmatpush.bf16.msra.mxu2 %v9716_v50  ;;  %v8948_v50 = vor.u32 %v10925_v30, %v8947_v42 }
 0x3dc   : > { %v3839_v14 = vpop.f32.mrf.mxu3  ;;  %v3791_v36 = vadd.f32 %v3790_v9, %v3742_v59  ;;  %v3851_v34 = vpop.f32.mrf.mxu0 }
 0x3dd   : > { %4236 = vmatpush.bf16.msra.mxu0 %v8948_v50  ;;  %v10913_v50 = vld [vmem:[#allocation6 + $0x1cc] sm:$0xf0] }
 0x3de   : > { %v3840_v35 = vadd.f32 %v3839_v14, %v3791_v36 }
 0x3df   : > { %4046 = vmatmul.bf16.vlgmr.msrb.gmra.mxu0 %v12112_v44 }
 0x3e0   : > { %v3900_v12 = vpop.f32.mrf.mxu1  ;;  %v5110_v6 = vpack.c.bf16 %v3840_v35, %v12615_v8  ;;  %4144 = vmatmul.bf16.vlgmr.msrb.gmra.mxu2 %v14210_v32 }
 0x3e1   : > { %v3901_v5 = vadd.f32 %v3900_v12, %v3851_v34  ;;  %4193 = vmatmul.bf16.vlgmr.msrb.gmra.mxu3 %v14211_v38 }
 0x3e2   : > { %v5193_v13 = vunpack.c.l.b16 %v5110_v6  ;;  %v5587_v10 = vunpack.c.h.b16 %v5110_v6 }
 0x3e3   : > { %4095 = vmatmul.bf16.vlgmr.msrb.gmra.mxu1 %v14212_v63  ;;  %v3949_v19 = vpop.f32.mrf.mxu2 }
 0x3e4   : > { %v3998_v59 = vpop.f32.mrf.mxu3  ;;  %v3950_v9 = vadd.f32 %v3949_v19, %v3901_v5  ;;  %v3853_v8 = vpop.f32.mrf.mxu0  ;;  %v12697_v14 = vpack.c.b16 %v5193_v13, %v5192_v16  ;;  %v12699_v36 = vpack.c.b16 %v5587_v10, %v5586_v52  ;;  %v14215_v52 = vld [vmem:[#allocation19_spill] sm:$0xff]  ;;  %v11105_v10 = vld [vmem:[#allocation6 + $0x7cc] sm:$0xf0] }
 0x3e5   : > { %v9667_v13 = vld [vmem:[#allocation6 + $0x7a0] sm:$0xf] }
 0x3e6   : > { %14213 = vst [vmem:[#allocation73_spill] sm:$0xff] %v12697_v14  ;;  %v12701_v34 = vadd.f32 %v3998_v59, %v3950_v9  ;;  %v9668_v19 = vor.u32 %v11105_v10, %v9667_v13  ;;  %v14216_v59 = vld [vmem:[#allocation20_spill] sm:$0xff]  ;;  %v8900_v10 = vor.u32 %v10913_v50, %v8899_v15  ;;  %v11165_v14 = vld [vmem:[#allocation6 + $0x9ac] sm:$0xf0] }
 0x3e7   : > { %14214 = vst [vmem:[#allocation74_spill] sm:$0xff] %v12699_v36  ;;  %v11177_v36 = vld [vmem:[#allocation6 + $0xa0c] sm:$0xf0] }
 0x3e8   : > { %v3902_v35 = vpop.f32.mrf.mxu1  ;;  %4335 = vmatpush.bf16.msra.mxu2 %v9668_v19  ;;  %v9619_v19 = vld [vmem:[#allocation6 + $0x740] sm:$0xf]  ;;  %4237 = vmatpush.bf16.msra.mxu0 %v8900_v10  ;;  %v10901_v10 = vld [vmem:[#allocation6 + $0x16c] sm:$0xf0] }
 0x3e9   : > { %v3903_v57 = vadd.f32 %v3902_v35, %v3853_v8 }
 0x3eb   : > { %v3951_v31 = vpop.f32.mrf.mxu2 }
 0x3ec   : > { %v4000_v12 = vpop.f32.mrf.mxu3  ;;  %v3952_v28 = vadd.f32 %v3951_v31, %v3903_v57  ;;  %v3856_v61 = vpop.f32.mrf.mxu0 }
 0x3ee   : > { %v12703_v6 = vadd.f32 %v4000_v12, %v3952_v28 }
 0x3ef   : > { %4051 = vmatmul.bf16.gmra.mxu0 %v12131_v4 }
 0x3f0   : > { %v3905_v5 = vpop.f32.mrf.mxu1  ;;  %4149 = vmatmul.bf16.gmra.mxu2 %v12135_v7 }
 0x3f1   : > { %v3906_v16 = vadd.f32 %v3905_v5, %v3856_v61  ;;  %4198 = vmatmul.bf16.gmra.mxu3 %v14215_v52 }
 0x3f3   : > { %4100 = vmatmul.bf16.gmra.mxu1 %v14216_v59  ;;  %v3954_v9 = vpop.f32.mrf.mxu2 }
 0x3f4   : > { %v4003_v8 = vpop.f32.mrf.mxu3  ;;  %v3955_v35 = vadd.f32 %v3954_v9, %v3906_v16  ;;  %v3858_v57 = vpop.f32.mrf.mxu0  ;;  %v11093_v9 = vld [vmem:[#allocation6 + $0x76c] sm:$0xf0] }
 0x3f6   : > { %v12709_v31 = vadd.f32 %v4003_v8, %v3955_v35  ;;  %v9620_v8 = vor.u32 %v11093_v9, %v9619_v19  ;;  %v8852_v9 = vor.u32 %v10901_v10, %v8851_v39 }
 0x3f8   : > { %v3907_v12 = vpop.f32.mrf.mxu1  ;;  %4336 = vmatpush.bf16.msra.mxu2 %v9620_v8  ;;  %v9571_v8 = vld [vmem:[#allocation6 + $0x6e0] sm:$0xf]  ;;  %4238 = vmatpush.bf16.msra.mxu0 %v8852_v9  ;;  %v10889_v9 = vld [vmem:[#allocation6 + $0x10c] sm:$0xf0] }
 0x3f9   : > { %v3908_v28 = vadd.f32 %v3907_v12, %v3858_v57 }
 0x3fb   : > { %v3956_v42 = vpop.f32.mrf.mxu2 }
 0x3fc   : > { %v4005_v30 = vpop.f32.mrf.mxu3  ;;  %v3957_v61 = vadd.f32 %v3956_v42, %v3908_v28  ;;  %v3861_v5 = vpop.f32.mrf.mxu0 }
 0x3fe   : > { %v12711_v49 = vadd.f32 %v4005_v30, %v3957_v61 }
 0x3ff   : > { %4056 = vmatmul.bf16.gmra.mxu0 %v12151_v22 }
 0x400   : > { %v3910_v13 = vpop.f32.mrf.mxu1  ;;  %4154 = vmatmul.bf16.gmra.mxu2 %v12155_v25 }
 0x401   : > { %v3911_v16 = vadd.f32 %v3910_v13, %v3861_v5  ;;  %4203 = vmatmul.bf16.gmra.mxu3 %v12157_v26 }
 0x403   : > { %4105 = vmatmul.bf16.gmra.mxu1 %v12159_v27  ;;  %v3959_v35 = vpop.f32.mrf.mxu2 }
 0x404   : > { %v4008_v57 = vpop.f32.mrf.mxu3  ;;  %v3960_v12 = vadd.f32 %v3959_v35, %v3911_v16  ;;  %v3863_v28 = vpop.f32.mrf.mxu0  ;;  %v11081_v35 = vld [vmem:[#allocation6 + $0x70c] sm:$0xf0] }
 0x406   : > { %v12717_v42 = vadd.f32 %v4008_v57, %v3960_v12  ;;  %v9572_v57 = vor.u32 %v11081_v35, %v9571_v8  ;;  %v8804_v35 = vor.u32 %v10889_v9, %v8803_v41 }
 0x408   : > { %v3912_v30 = vpop.f32.mrf.mxu1  ;;  %4337 = vmatpush.bf16.msra.mxu2 %v9572_v57  ;;  %v9523_v57 = vld [vmem:[#allocation6 + $0x680] sm:$0xf]  ;;  %4239 = vmatpush.bf16.msra.mxu0 %v8804_v35 }
 0x409   : > { %v3913_v15 = vadd.f32 %v3912_v30, %v3863_v28  ;;  %v9379_v35 = vld [vmem:[#allocation6 + $0x560] sm:$0xf] }
 0x40b   : > { %v3961_v61 = vpop.f32.mrf.mxu2 }
 0x40c   : > { %v4010_v50 = vpop.f32.mrf.mxu3  ;;  %v3962_v5 = vadd.f32 %v3961_v61, %v3913_v15  ;;  %v3866_v13 = vpop.f32.mrf.mxu0 }
 0x40e   : > { %v12719_v54 = vadd.f32 %v4010_v50, %v3962_v5 }
 0x40f   : > { %4061 = vmatmul.bf16.gmra.mxu0 %v12171_v40 }
 0x410   : > { %v3915_v19 = vpop.f32.mrf.mxu1  ;;  %4159 = vmatmul.bf16.gmra.mxu2 %v12175_v43 }
 0x411   : > { %v3916_v16 = vadd.f32 %v3915_v19, %v3866_v13  ;;  %4208 = vmatmul.bf16.gmra.mxu3 %v12177_v45 }
 0x413   : > { %4110 = vmatmul.bf16.gmra.mxu1 %v12179_v46  ;;  %v3964_v12 = vpop.f32.mrf.mxu2 }
 0x414   : > { %v4013_v28 = vpop.f32.mrf.mxu3  ;;  %v3965_v30 = vadd.f32 %v3964_v12, %v3916_v16  ;;  %v3868_v15 = vpop.f32.mrf.mxu0  ;;  %v11069_v12 = vld [vmem:[#allocation6 + $0x6ac] sm:$0xf0] }
 0x416   : > { %v12725_v61 = vadd.f32 %v4013_v28, %v3965_v30  ;;  %v10195_v28 = vld [vmem:[#allocation6 + $0xbc0] sm:$0xf]  ;;  %v9524_v30 = vor.u32 %v11069_v12, %v9523_v57  ;;  %v11033_v57 = vld [vmem:[#allocation6 + $0x58c] sm:$0xf0] }
 0x417   : > { %v9380_v58 = vor.u32 %v11033_v57, %v9379_v35  ;;  %v9283_v35 = vld [vmem:[#allocation6 + $0x4a0] sm:$0xf]  ;;  %v11009_v57 = vld [vmem:[#allocation6 + $0x4cc] sm:$0xf0] }
 0x418   : > { %v3917_v50 = vpop.f32.mrf.mxu1  ;;  %4338 = vmatpush.bf16.msra.mxu2 %v9524_v30 }
 0x419   : > { %v3918_v39 = vadd.f32 %v3917_v50, %v3868_v15  ;;  %v11237_v15 = vld [vmem:[#allocation6 + $0xbec] sm:$0xf0] }
 0x41a   : > { %v10196_v50 = vor.u32 %v11237_v15, %v10195_v28  ;;  %v10099_v15 = vld [vmem:[#allocation6 + $0xb00] sm:$0xf] }
 0x41b   : > { %v3966_v5 = vpop.f32.mrf.mxu2  ;;  %v10100_v30 = vor.u32 %v11213_v33, %v10099_v15  ;;  %v11057_v15 = vld [vmem:[#allocation6 + $0x64c] sm:$0xf0] }
 0x41c   : > { %v4015_v10 = vpop.f32.mrf.mxu3  ;;  %v3967_v13 = vadd.f32 %v3966_v5, %v3918_v39  ;;  %v3871_v19 = vpop.f32.mrf.mxu0  ;;  %v9427_v39 = vld [vmem:[#allocation6 + $0x5c0] sm:$0xf]  ;;  %v11045_v5 = vld [vmem:[#allocation6 + $0x5ec] sm:$0xf0]  ;;  %4381 = vmatpush.bf16.msra.mxu3 %v10196_v50 }
 0x41d   : > { %v9428_v41 = vor.u32 %v11045_v5, %v9427_v39  ;;  %v9331_v39 = vld [vmem:[#allocation6 + $0x500] sm:$0xf] }
 0x41e   : > { %v12727_v29 = vadd.f32 %v4015_v10, %v3967_v13 }
 0x41f   : > { %4066 = vmatmul.bf16.gmra.mxu0 %v12191_v62  ;;  %4283 = vmatpush.bf16.msra.mxu1 %v9428_v41 }
 0x420   : > { %v3920_v8 = vpop.f32.mrf.mxu1  ;;  %4164 = vmatmul.bf16.gmra.mxu2 %v12195_v1 }
 0x421   : > { %v3921_v16 = vadd.f32 %v3920_v8, %v3871_v19  ;;  %4213 = vmatmul.bf16.gmra.mxu3 %v12197_v2  ;;  %v10147_v19 = vld [vmem:[#allocation6 + $0xb60] sm:$0xf]  ;;  %v11225_v8 = vld [vmem:[#allocation6 + $0xb8c] sm:$0xf0] }
 0x422   : > { %v10148_v18 = vor.u32 %v11225_v8, %v10147_v19 }
 0x423   : > { %4115 = vmatmul.bf16.gmra.mxu1 %v12199_v3  ;;  %v3969_v10 = vpop.f32.mrf.mxu2 }
 0x424   : > { %v4018_v13 = vpop.f32.mrf.mxu3  ;;  %v3970_v9 = vadd.f32 %v3969_v10, %v3921_v16  ;;  %v3873_v24 = vpop.f32.mrf.mxu0  ;;  %4382 = vmatpush.bf16.msra.mxu3 %v10148_v18  ;;  %4284 = vmatpush.bf16.msra.mxu1 %v9380_v58  ;;  %v11021_v16 = vld [vmem:[#allocation6 + $0x52c] sm:$0xf0] }
 0x425   : > { %v9332_v10 = vor.u32 %v11021_v16, %v9331_v39  ;;  %v10877_v18 = vld [vmem:[#allocation6 + $0xac] sm:$0xf0]  ;;  %v10003_v39 = vld [vmem:[#allocation6 + $0xa40] sm:$0xf] }
 0x426   : > { %v12733_v53 = vadd.f32 %v4018_v13, %v3970_v9  ;;  %v10051_v13 = vld [vmem:[#allocation6 + $0xaa0] sm:$0xf]  ;;  %v11201_v9 = vld [vmem:[#allocation6 + $0xacc] sm:$0xf0] }
 0x427   : > { %v10052_v19 = vor.u32 %v11201_v9, %v10051_v13  ;;  %v11189_v16 = vld [vmem:[#allocation6 + $0xa6c] sm:$0xf0] }
 0x428   : > { %v3922_v12 = vpop.f32.mrf.mxu1  ;;  %4383 = vmatpush.bf16.msra.mxu3 %v10100_v30  ;;  %4285 = vmatpush.bf16.msra.mxu1 %v9332_v10  ;;  %v9284_v30 = vor.u32 %v11009_v57, %v9283_v35  ;;  %v10997_v10 = vld [vmem:[#allocation6 + $0x46c] sm:$0xf0] }
 0x429   : > { %v3923_v28 = vadd.f32 %v3922_v12, %v3873_v24  ;;  %v8755_v24 = vld [vmem:[#allocation6 + $0x80] sm:$0xf]  ;;  %v10985_v57 = vld [vmem:[#allocation6 + $0x40c] sm:$0xf0] }
 0x42a   : > { %v8756_v33 = vor.u32 %v10877_v18, %v8755_v24 }
 0x42b   : > { %v3971_v5 = vpop.f32.mrf.mxu2 }
 0x42c   : > { %v4020_v50 = vpop.f32.mrf.mxu3  ;;  %v3972_v11 = vadd.f32 %v3971_v5, %v3923_v28  ;;  %v3876_v41 = vpop.f32.mrf.mxu0  ;;  %v9475_v28 = vld [vmem:[#allocation6 + $0x620] sm:$0xf]  ;;  %4240 = vmatpush.bf16.msra.mxu0 %v8756_v33  ;;  %4384 = vmatpush.bf16.msra.mxu3 %v10052_v19  ;;  %v10004_v5 = vor.u32 %v11189_v16, %v10003_v39 }
 0x42d   : > { %4286 = vmatpush.bf16.msra.mxu1 %v9284_v30  ;;  %v9187_v19 = vld [vmem:[#allocation6 + $0x3e0] sm:$0xf] }
 0x42e   : > { %v12735_v8 = vadd.f32 %v4020_v50, %v3972_v11  ;;  %v9476_v11 = vor.u32 %v11057_v15, %v9475_v28  ;;  %v9235_v50 = vld [vmem:[#allocation6 + $0x440] sm:$0xf]  ;;  %v9188_v15 = vor.u32 %v10985_v57, %v9187_v19 }
 0x42f   : > { %4071 = vmatmul.bf16.gmra.mxu0 %v12211_v51  ;;  %v9907_v16 = vld [vmem:[#allocation6 + $0x980] sm:$0xf] }
 0x430   : > { %v3925_v58 = vpop.f32.mrf.mxu1  ;;  %4169 = vmatmul.bf16.gmra.mxu2 %v12215_v55  ;;  %4385 = vmatpush.bf16.msra.mxu3 %v10004_v5  ;;  %v8707_v30 = vld [vmem:[#allocation6 + $0x20] sm:$0xf] }
 0x431   : > { %v3926_v12 = vadd.f32 %v3925_v58, %v3876_v41  ;;  %4218 = vmatmul.bf16.gmra.mxu3 %v12217_v56  ;;  %4339 = vmatpush.bf16.msra.mxu2 %v9476_v11  ;;  %v9236_v41 = vor.u32 %v10997_v10, %v9235_v50  ;;  %v9955_v58 = vld [vmem:[#allocation6 + $0x9e0] sm:$0xf]  ;;  %v9908_v11 = vor.u32 %v11165_v14, %v9907_v16  ;;  %v10865_v50 = vld [vmem:[#allocation6 + $0x4c] sm:$0xf0] }
 0x432   : > { %v9956_v35 = vor.u32 %v11177_v36, %v9955_v58  ;;  %v8708_v5 = vor.u32 %v10865_v50, %v8707_v30  ;;  %v10973_v36 = vld [vmem:[#allocation6 + $0x3ac] sm:$0xf0] }
 0x433   : > { %4120 = vmatmul.bf16.gmra.mxu1 %v14202_v0  ;;  %v3974_v13 = vpop.f32.mrf.mxu2  ;;  %v11153_v0 = vld [vmem:[#allocation6 + $0x94c] sm:$0xf0] }
 0x434   : > { %v4023_v9 = vpop.f32.mrf.mxu3  ;;  %v3975_v24 = vadd.f32 %v3974_v13, %v3926_v12  ;;  %v3878_v18 = vpop.f32.mrf.mxu0  ;;  %4287 = vmatpush.bf16.msra.mxu1 %v9236_v41  ;;  %4386 = vmatpush.bf16.msra.mxu3 %v9956_v35  ;;  %v9139_v12 = vld [vmem:[#allocation6 + $0x380] sm:$0xf]  ;;  %v10961_v14 = vld [vmem:[#allocation6 + $0x34c] sm:$0xf0] }
 0x435   : > { %v9140_v58 = vor.u32 %v10973_v36, %v9139_v12  ;;  %4241 = vmatpush.bf16.msra.mxu0 %v8708_v5  ;;  %v9091_v35 = vld [vmem:[#allocation6 + $0x320] sm:$0xf] }
 0x436   : > { %v12741_v33 = vadd.f32 %v4023_v9, %v3975_v24  ;;  %v9092_v57 = vor.u32 %v10961_v14, %v9091_v35  ;;  %v10943_v35 = vld [vmem:[#allocation6 + $0x2c4] sm:$0xf]  ;;  %v9045_v14 = vld [vmem:[#allocation6 + $0x2f0] sm:$0xf0] }
 0x438   : > { %14217 = vst [vmem:[#allocation75_spill] sm:$0xff] %v12741_v33  ;;  %v3927_v28 = vpop.f32.mrf.mxu1  ;;  %4288 = vmatpush.bf16.msra.mxu1 %v9188_v15  ;;  %v9859_v33 = vld [vmem:[#allocation6 + $0x920] sm:$0xf]  ;;  %4387 = vmatpush.bf16.msra.mxu3 %v9908_v11  ;;  %v11135_v15 = vld [vmem:[#allocation6 + $0x8c4] sm:$0xf] }
 0x439   : > { %v3928_v39 = vadd.f32 %v3927_v28, %v3878_v18  ;;  %v9860_v41 = vor.u32 %v11153_v0, %v9859_v33 }
 0x43b   : > { %v3976_v10 = vpop.f32.mrf.mxu2 }
 0x43c   : > { %v4025_v13 = vpop.f32.mrf.mxu3  ;;  %v3977_v9 = vadd.f32 %v3976_v10, %v3928_v39  ;;  %v3881_v24 = vpop.f32.mrf.mxu0  ;;  %4289 = vmatpush.bf16.msra.mxu1 %v9140_v58  ;;  %v9813_v39 = vld [vmem:[#allocation6 + $0x8f0] sm:$0xf0]  ;;  %4388 = vmatpush.bf16.msra.mxu3 %v9860_v41 }
 0x43d   : > { %v9816_v16 = vor.u32 %v11135_v15, %v9813_v39  ;;  %v9048_v15 = vor.u32 %v10943_v35, %v9045_v14  ;;  %v9765_v39 = vld [vmem:[#allocation6 + $0x890] sm:$0xf0]  ;;  %v10931_v35 = vld [vmem:[#allocation6 + $0x264] sm:$0xf] }
 0x43e   : > { %v12743_v18 = vadd.f32 %v4025_v13, %v3977_v9  ;;  %v8997_v14 = vld [vmem:[#allocation6 + $0x290] sm:$0xf0] }
 0x43f   : > { %4076 = vmatmul.bf16.gmra.mxu0 %v12231_v37  ;;  %4528 = vmatpush.bf16.msrb.mxu2 %v9816_v16 }
 0x440   : > { %v3930_v19 = vpop.f32.mrf.mxu1  ;;  %4174 = vmatmul.bf16.gmra.mxu2 %v12235_v47  ;;  %4290 = vmatpush.bf16.msra.mxu1 %v9092_v57 }
 0x441   : > { %v3931_v28 = vadd.f32 %v3930_v19, %v3881_v24  ;;  %4223 = vmatmul.bf16.gmra.mxu3 %v12237_v48  ;;  %v11123_v19 = vld [vmem:[#allocation6 + $0x864] sm:$0xf]  ;;  %4430 = vmatpush.bf16.msrb.mxu0 %v9048_v15  ;;  %v9000_v15 = vor.u32 %v10931_v35, %v8997_v14 }
 0x443   : > { %4125 = vmatmul.bf16.gmra.mxu1 %v12239_v60  ;;  %v3979_v0 = vpop.f32.mrf.mxu2 }
 0x444   : > { %v4028_v33 = vpop.f32.mrf.mxu3  ;;  %v3980_v11 = vadd.f32 %v3979_v0, %v3931_v28  ;;  %v3883_v30 = vpop.f32.mrf.mxu0 }
 0x445   : > { %4431 = vmatpush.bf16.msrb.mxu0 %v9000_v15  ;;  %v8949_v15 = vld [vmem:[#allocation6 + $0x230] sm:$0xf0] }
 0x446   : > { %v12749_v50 = vadd.f32 %v4028_v33, %v3980_v11  ;;  %v9768_v33 = vor.u32 %v11123_v19, %v9765_v39  ;;  %v11111_v19 = vld [vmem:[#allocation6 + $0x804] sm:$0xf]  ;;  %v9717_v39 = vld [vmem:[#allocation6 + $0x830] sm:$0xf0] }
 0x448   : > { %v3932_v12 = vpop.f32.mrf.mxu1  ;;  %4529 = vmatpush.bf16.msrb.mxu2 %v9768_v33  ;;  %v9720_v33 = vor.u32 %v11111_v19, %v9717_v39  ;;  %v11099_v39 = vld [vmem:[#allocation6 + $0x7a4] sm:$0xf] }
 0x449   : > { %v3933_v10 = vadd.f32 %v3932_v12, %v3883_v30 }
 0x44b   : > { %v3981_v13 = vpop.f32.mrf.mxu2 }
 0x44c   : > { %v4030_v5 = vpop.f32.mrf.mxu3  ;;  %v3982_v36 = vadd.f32 %v3981_v13, %v3933_v10  ;;  %v3886_v9 = vpop.f32.mrf.mxu0  ;;  %4530 = vmatpush.bf16.msrb.mxu2 %v9720_v33 }
 0x44e   : > { %v12751_v24 = vadd.f32 %v4030_v5, %v3982_v36 }
 0x44f   : > { %4081 = vmatmul.bf16.gmra.mxu0 %v12251_v17 }
 0x450   : > { %v3935_v58 = vpop.f32.mrf.mxu1  ;;  %4179 = vmatmul.bf16.gmra.mxu2 %v12255_v20 }
 0x451   : > { %v3936_v41 = vadd.f32 %v3935_v58, %v3886_v9  ;;  %4228 = vmatmul.bf16.gmra.mxu3 %v12257_v21 }
 0x453   : > { %4130 = vmatmul.bf16.gmra.mxu1 %v12259_v23  ;;  %v3984_v57 = vpop.f32.mrf.mxu2 }
 0x454   : > { %v4033_v28 = vpop.f32.mrf.mxu3  ;;  %v3985_v16 = vadd.f32 %v3984_v57, %v3936_v41  ;;  %v3888_v0 = vpop.f32.mrf.mxu0 }
 0x456   : > { %v12757_v11 = vadd.f32 %v4033_v28, %v3985_v16 }
 0x458   : > { %v3937_v30 = vpop.f32.mrf.mxu1 }
 0x459   : > { %v3938_v12 = vadd.f32 %v3937_v30, %v3888_v0 }
 0x45b   : > { %v3986_v10 = vpop.f32.mrf.mxu2 }
 0x45c   : > { %v4035_v13 = vpop.f32.mrf.mxu3  ;;  %v3987_v5 = vadd.f32 %v3986_v10, %v3938_v12  ;;  %v4047_v36 = vpop.f32.mrf.mxu0 }
 0x45e   : > { %v12759_v9 = vadd.f32 %v4035_v13, %v3987_v5 }
 0x45f   : > { %4242 = vmatmul.bf16.vlgmr.msra.gmra.mxu0 %v12112_v44 }
 0x460   : > { %v4096_v58 = vpop.f32.mrf.mxu1  ;;  %4340 = vmatmul.bf16.vlgmr.msra.gmra.mxu2 %v14210_v32 }
 0x461   : > { %v4097_v41 = vadd.f32 %v4096_v58, %v4047_v36  ;;  %4389 = vmatmul.bf16.vlgmr.msra.gmra.mxu3 %v14211_v38 }
 0x463   : > { %4291 = vmatmul.bf16.vlgmr.msra.gmra.mxu1 %v14212_v63  ;;  %v4145_v57 = vpop.f32.mrf.mxu2 }
 0x464   : > { %v4194_v28 = vpop.f32.mrf.mxu3  ;;  %v4146_v16 = vadd.f32 %v4145_v57, %v4097_v41  ;;  %v4049_v0 = vpop.f32.mrf.mxu0 }
 0x466   : > { %v4195_v30 = vadd.f32 %v4194_v28, %v4146_v16  ;;  %v10919_v28 = vld [vmem:[#allocation6 + $0x204] sm:$0xf] }
 0x467   : > { %v8952_v33 = vor.u32 %v10919_v28, %v8949_v15 }
 0x468   : > { %v4098_v12 = vpop.f32.mrf.mxu1  ;;  %v5021_v10 = vpack.c.bf16 %v4195_v30, %v12701_v34  ;;  %v9669_v30 = vld [vmem:[#allocation6 + $0x7d0] sm:$0xf0] }
 0x469   : > { %v4099_v13 = vadd.f32 %v4098_v12, %v4049_v0  ;;  %4432 = vmatpush.bf16.msrb.mxu0 %v8952_v33 }
 0x46a   : > { %v5982_v14 = vunpack.c.l.b16 %v5021_v10  ;;  %v6376_v19 = vunpack.c.h.b16 %v5021_v10 }
 0x46b   : > { %v4147_v5 = vpop.f32.mrf.mxu2 }
 0x46c   : > { %v4196_v36 = vpop.f32.mrf.mxu3  ;;  %v4148_v58 = vadd.f32 %v4147_v5, %v4099_v13  ;;  %v4052_v63 = vpop.f32.mrf.mxu0 }
 0x46e   : > { %v4197_v38 = vadd.f32 %v4196_v36, %v4148_v58 }
 0x46f   : > { %4247 = vmatmul.bf16.gmra.mxu0 %v12131_v4 }
 0x470   : > { %v4101_v32 = vpop.f32.mrf.mxu1  ;;  %v5027_v35 = vpack.c.bf16 %v4197_v38, %v12703_v6  ;;  %4345 = vmatmul.bf16.gmra.mxu2 %v12135_v7  ;;  %v9672_v6 = vor.u32 %v11099_v39, %v9669_v30  ;;  %v10907_v39 = vld [vmem:[#allocation6 + $0x1a4] sm:$0xf] }
 0x471   : > { %v4102_v41 = vadd.f32 %v4101_v32, %v4052_v63  ;;  %4394 = vmatmul.bf16.gmra.mxu3 %v14215_v52 }
 0x472   : > { %v5983_v57 = vunpack.c.l.b16 %v5027_v35  ;;  %v6377_v34 = vunpack.c.h.b16 %v5027_v35  ;;  %4531 = vmatpush.bf16.msrb.mxu2 %v9672_v6 }
 0x473   : > { %4296 = vmatmul.bf16.gmra.mxu1 %v14216_v59  ;;  %v4150_v16 = vpop.f32.mrf.mxu2 }
 0x474   : > { %v4199_v0 = vpop.f32.mrf.mxu3  ;;  %v4151_v12 = vadd.f32 %v4150_v16, %v4102_v41  ;;  %v4054_v38 = vpop.f32.mrf.mxu0  ;;  %v12771_v13 = vpack.c.b16 %v5983_v57, %v5982_v14  ;;  %v12773_v32 = vpack.c.b16 %v6377_v34, %v6376_v19  ;;  %v8901_v16 = vld [vmem:[#allocation6 + $0x1d0] sm:$0xf0] }
 0x475   : > { %v8904_v30 = vor.u32 %v10907_v39, %v8901_v16 }
 0x476   : > { %14218 = vst [vmem:[#allocation76_spill] sm:$0xff] %v12771_v13  ;;  %v4200_v63 = vadd.f32 %v4199_v0, %v4151_v12  ;;  %v11087_v0 = vld [vmem:[#allocation6 + $0x744] sm:$0xf]  ;;  %v9621_v12 = vld [vmem:[#allocation6 + $0x770] sm:$0xf0] }
 0x477   : > { %14219 = vst [vmem:[#allocation77_spill] sm:$0xff] %v12773_v32  ;;  %v9624_v6 = vor.u32 %v11087_v0, %v9621_v12  ;;  %4433 = vmatpush.bf16.msrb.mxu0 %v8904_v30  ;;  %v10895_v0 = vld [vmem:[#allocation6 + $0x144] sm:$0xf] }
 0x478   : > { %v4103_v10 = vpop.f32.mrf.mxu1  ;;  %v5033_v5 = vpack.c.bf16 %v4200_v63, %v12709_v31 }
 0x479   : > { %v4104_v36 = vadd.f32 %v4103_v10, %v4054_v38  ;;  %4532 = vmatpush.bf16.msrb.mxu2 %v9624_v6 }
 0x47a   : > { %v5984_v57 = vunpack.c.l.b16 %v5033_v5  ;;  %v6378_v34 = vunpack.c.h.b16 %v5033_v5 }
 0x47b   : > { %v4152_v58 = vpop.f32.mrf.mxu2 }
 0x47c   : > { %v4201_v35 = vpop.f32.mrf.mxu3  ;;  %v4153_v59 = vadd.f32 %v4152_v58, %v4104_v36  ;;  %v4057_v52 = vpop.f32.mrf.mxu0 }
 0x47e   : > { %v4202_v28 = vadd.f32 %v4201_v35, %v4153_v59 }
 0x47f   : > { %4252 = vmatmul.bf16.gmra.mxu0 %v12151_v22 }
 0x480   : > { %v4106_v41 = vpop.f32.mrf.mxu1  ;;  %v5039_v14 = vpack.c.bf16 %v4202_v28, %v12711_v49  ;;  %4350 = vmatmul.bf16.gmra.mxu2 %v12155_v25 }
 0x481   : > { %v4107_v19 = vadd.f32 %v4106_v41, %v4057_v52  ;;  %4399 = vmatmul.bf16.gmra.mxu3 %v12157_v26 }
 0x482   : > { %v5985_v15 = vunpack.c.l.b16 %v5039_v14  ;;  %v6379_v31 = vunpack.c.h.b16 %v5039_v14 }
 0x483   : > { %4301 = vmatmul.bf16.gmra.mxu1 %v12159_v27  ;;  %v4155_v59 = vpop.f32.mrf.mxu2 }
 0x484   : > { %v4204_v33 = vpop.f32.mrf.mxu3  ;;  %v4156_v38 = vadd.f32 %v4155_v59, %v4107_v19  ;;  %v4059_v49 = vpop.f32.mrf.mxu0  ;;  %v12781_v63 = vpack.c.b16 %v5985_v15, %v5984_v57  ;;  %v12783_v52 = vpack.c.b16 %v6379_v31, %v6378_v34  ;;  %v8853_v59 = vld [vmem:[#allocation6 + $0x170] sm:$0xf0] }
 0x486   : > { %14220 = vst [vmem:[#allocation78_spill] sm:$0xff] %v12781_v63  ;;  %v4205_v10 = vadd.f32 %v4204_v33, %v4156_v38  ;;  %v11075_v33 = vld [vmem:[#allocation6 + $0x6e4] sm:$0xf]  ;;  %v8856_v38 = vor.u32 %v10895_v0, %v8853_v59  ;;  %v8907_v63 = vld [vmem:[#allocation6 + $0x1a8] sm:$0xf] }
 0x487   : > { %14221 = vst [vmem:[#allocation79_spill] sm:$0xff] %v12783_v52 }
 0x488   : > { %v4108_v5 = vpop.f32.mrf.mxu1  ;;  %v5045_v36 = vpack.c.bf16 %v4205_v10, %v12717_v42  ;;  %4434 = vmatpush.bf16.msrb.mxu0 %v8856_v38  ;;  %v8805_v38 = vld [vmem:[#allocation6 + $0x110] sm:$0xf0] }
 0x489   : > { %v4109_v58 = vadd.f32 %v4108_v5, %v4059_v49  ;;  %v9573_v49 = vld [vmem:[#allocation6 + $0x710] sm:$0xf0] }
 0x48a   : > { %v5986_v15 = vunpack.c.l.b16 %v5045_v36  ;;  %v6380_v31 = vunpack.c.h.b16 %v5045_v36  ;;  %v9576_v10 = vor.u32 %v11075_v33, %v9573_v49  ;;  %v11063_v49 = vld [vmem:[#allocation6 + $0x684] sm:$0xf] }
 0x48b   : > { %v4157_v35 = vpop.f32.mrf.mxu2 }
 0x48c   : > { %v4206_v28 = vpop.f32.mrf.mxu3  ;;  %v4158_v41 = vadd.f32 %v4157_v35, %v4109_v58  ;;  %v4062_v14 = vpop.f32.mrf.mxu0  ;;  %4533 = vmatpush.bf16.msrb.mxu2 %v9576_v10 }
 0x48e   : > { %v4207_v39 = vadd.f32 %v4206_v28, %v4158_v41 }
 0x48f   : > { %4257 = vmatmul.bf16.gmra.mxu0 %v12171_v40 }
 0x490   : > { %v4111_v19 = vpop.f32.mrf.mxu1  ;;  %v5051_v57 = vpack.c.bf16 %v4207_v39, %v12719_v54  ;;  %4355 = vmatmul.bf16.gmra.mxu2 %v12175_v43 }
 0x491   : > { %v4112_v34 = vadd.f32 %v4111_v19, %v4062_v14  ;;  %4404 = vmatmul.bf16.gmra.mxu3 %v12177_v45 }
 0x492   : > { %v5987_v16 = vunpack.c.l.b16 %v5051_v57  ;;  %v6381_v42 = vunpack.c.h.b16 %v5051_v57 }
 0x493   : > { %4306 = vmatmul.bf16.gmra.mxu1 %v12179_v46  ;;  %v4160_v30 = vpop.f32.mrf.mxu2 }
 0x494   : > { %v4209_v12 = vpop.f32.mrf.mxu3  ;;  %v4161_v6 = vadd.f32 %v4160_v30, %v4112_v34  ;;  %v4064_v54 = vpop.f32.mrf.mxu0  ;;  %v12791_v5 = vpack.c.b16 %v5987_v16, %v5986_v15  ;;  %v12793_v58 = vpack.c.b16 %v6381_v42, %v6380_v31  ;;  %v11231_v16 = vld [vmem:[#allocation6 + $0xbc4] sm:$0xf]  ;;  %v10197_v42 = vld [vmem:[#allocation6 + $0xbf0] sm:$0xf0] }
 0x495   : > { %v10200_v59 = vor.u32 %v11231_v16, %v10197_v42 }
 0x496   : > { %14222 = vst [vmem:[#allocation80_spill] sm:$0xff] %v12791_v5  ;;  %v4210_v36 = vadd.f32 %v4209_v12, %v4161_v6  ;;  %v10883_v12 = vld [vmem:[#allocation6 + $0xe4] sm:$0xf]  ;;  %v8859_v5 = vld [vmem:[#allocation6 + $0x148] sm:$0xf] }
 0x497   : > { %14223 = vst [vmem:[#allocation81_spill] sm:$0xff] %v12793_v58  ;;  %4577 = vmatpush.bf16.msrb.mxu3 %v10200_v59 }
 0x498   : > { %v4113_v35 = vpop.f32.mrf.mxu1  ;;  %v5057_v28 = vpack.c.bf16 %v4210_v36, %v12725_v61  ;;  %v9525_v36 = vld [vmem:[#allocation6 + $0x6b0] sm:$0xf0] }
 0x499   : > { %v4114_v41 = vadd.f32 %v4113_v35, %v4064_v54  ;;  %v11039_v35 = vld [vmem:[#allocation6 + $0x5c4] sm:$0xf] }
 0x49a   : > { %v5988_v61 = vunpack.c.l.b16 %v5057_v28  ;;  %v6382_v6 = vunpack.c.h.b16 %v5057_v28 }
 0x49b   : > { %v4162_v14 = vpop.f32.mrf.mxu2 }
 0x49c   : > { %v4211_v39 = vpop.f32.mrf.mxu3  ;;  %v4163_v19 = vadd.f32 %v4162_v14, %v4114_v41  ;;  %v4067_v57 = vpop.f32.mrf.mxu0  ;;  %v9429_v41 = vld [vmem:[#allocation6 + $0x5f0] sm:$0xf0] }
 0x49e   : > { %v4212_v0 = vadd.f32 %v4211_v39, %v4163_v19  ;;  %v9528_v19 = vor.u32 %v11063_v49, %v9525_v36  ;;  %v10101_v36 = vld [vmem:[#allocation6 + $0xb30] sm:$0xf0] }
 0x49f   : > { %4262 = vmatmul.bf16.gmra.mxu0 %v12191_v62 }
 0x4a0   : > { %v4116_v34 = vpop.f32.mrf.mxu1  ;;  %v5063_v15 = vpack.c.bf16 %v4212_v0, %v12727_v29  ;;  %4360 = vmatmul.bf16.gmra.mxu2 %v12195_v1  ;;  %v8808_v29 = vor.u32 %v10883_v12, %v8805_v38  ;;  %v11219_v0 = vld [vmem:[#allocation6 + $0xb64] sm:$0xf]  ;;  %v9381_v38 = vld [vmem:[#allocation6 + $0x590] sm:$0xf0] }
 0x4a1   : > { %v4117_v31 = vadd.f32 %v4116_v34, %v4067_v57  ;;  %4409 = vmatmul.bf16.gmra.mxu3 %v12197_v2  ;;  %v9432_v57 = vor.u32 %v11039_v35, %v9429_v41  ;;  %v10149_v34 = vld [vmem:[#allocation6 + $0xb90] sm:$0xf0]  ;;  %4534 = vmatpush.bf16.msrb.mxu2 %v9528_v19  ;;  %v11027_v12 = vld [vmem:[#allocation6 + $0x564] sm:$0xf] }
 0x4a2   : > { %v5989_v33 = vunpack.c.l.b16 %v5063_v15  ;;  %v6383_v30 = vunpack.c.h.b16 %v5063_v15  ;;  %4435 = vmatpush.bf16.msrb.mxu0 %v8808_v29  ;;  %v10152_v16 = vor.u32 %v11219_v0, %v10149_v34  ;;  %v9384_v32 = vor.u32 %v11027_v12, %v9381_v38  ;;  %v10053_v19 = vld [vmem:[#allocation6 + $0xad0] sm:$0xf0]  ;;  %v11003_v34 = vld [vmem:[#allocation6 + $0x4a4] sm:$0xf] }
 0x4a3   : > { %4311 = vmatmul.bf16.gmra.mxu1 %v12199_v3  ;;  %v4165_v54 = vpop.f32.mrf.mxu2  ;;  %v11183_v12 = vld [vmem:[#allocation6 + $0xa44] sm:$0xf]  ;;  %v10005_v38 = vld [vmem:[#allocation6 + $0xa70] sm:$0xf0] }
 0x4a4   : > { %v4214_v10 = vpop.f32.mrf.mxu3  ;;  %v4166_v14 = vadd.f32 %v4165_v54, %v4117_v31  ;;  %v4069_v39 = vpop.f32.mrf.mxu0  ;;  %v12801_v15 = vpack.c.b16 %v5989_v33, %v5988_v61  ;;  %v12803_v42 = vpack.c.b16 %v6383_v30, %v6382_v6  ;;  %4479 = vmatpush.bf16.msrb.mxu1 %v9432_v57  ;;  %4578 = vmatpush.bf16.msrb.mxu3 %v10152_v16  ;;  %v11207_v54 = vld [vmem:[#allocation6 + $0xb04] sm:$0xf]  ;;  %v9333_v33 = vld [vmem:[#allocation6 + $0x530] sm:$0xf0] }
 0x4a5   : > { %v10104_v35 = vor.u32 %v11207_v54, %v10101_v36  ;;  %v11015_v61 = vld [vmem:[#allocation6 + $0x504] sm:$0xf] }
 0x4a6   : > { %14224 = vst [vmem:[#allocation82_spill] sm:$0xff] %v12801_v15  ;;  %v4215_v28 = vadd.f32 %v4214_v10, %v4166_v14  ;;  %v9336_v6 = vor.u32 %v11015_v61, %v9333_v33  ;;  %v11195_v14 = vld [vmem:[#allocation6 + $0xaa4] sm:$0xf]  ;;  %v8757_v33 = vld [vmem:[#allocation6 + $0xb0] sm:$0xf0] }
 0x4a7   : > { %14225 = vst [vmem:[#allocation83_spill] sm:$0xff] %v12803_v42  ;;  %v10056_v57 = vor.u32 %v11195_v14, %v10053_v19  ;;  %v10871_v61 = vld [vmem:[#allocation6 + $0x84] sm:$0xf]  ;;  %v9477_v14 = vld [vmem:[#allocation6 + $0x650] sm:$0xf0] }
 0x4a8   : > { %v4118_v59 = vpop.f32.mrf.mxu1  ;;  %v5069_v31 = vpack.c.bf16 %v4215_v28, %v12733_v53  ;;  %4480 = vmatpush.bf16.msrb.mxu1 %v9384_v32  ;;  %4579 = vmatpush.bf16.msrb.mxu3 %v10104_v35  ;;  %v9285_v53 = vld [vmem:[#allocation6 + $0x4d0] sm:$0xf0]  ;;  %v8763_v15 = vld [vmem:[#allocation6 + $0x88] sm:$0xf] }
 0x4a9   : > { %v4119_v49 = vadd.f32 %v4118_v59, %v4069_v39  ;;  %v9288_v32 = vor.u32 %v11003_v34, %v9285_v53  ;;  %v10008_v59 = vor.u32 %v11183_v12, %v10005_v38  ;;  %v14226_v35 = vld [vmem:[#allocation26_spill] sm:$0xff] }
 0x4aa   : > { %v9237_v19 = vld [vmem:[#allocation6 + $0x470] sm:$0xf0] }
 0x4ab   : > { %v4167_v29 = vpop.f32.mrf.mxu2 }
 0x4ac   : > { %v4216_v30 = vpop.f32.mrf.mxu3  ;;  %v4168_v10 = vadd.f32 %v4167_v29, %v4119_v49  ;;  %v4072_v41 = vpop.f32.mrf.mxu0  ;;  %4481 = vmatpush.bf16.msrb.mxu1 %v9336_v6  ;;  %4580 = vmatpush.bf16.msrb.mxu3 %v10056_v57  ;;  %v5990_v49 = vunpack.c.l.b16 %v5069_v31  ;;  %v11051_v29 = vld [vmem:[#allocation6 + $0x624] sm:$0xf] }
 0x4ad   : > { %v9480_v34 = vor.u32 %v11051_v29, %v9477_v14  ;;  %v11159_v14 = vld [vmem:[#allocation6 + $0x984] sm:$0xf] }
 0x4ae   : > { %v4217_v0 = vadd.f32 %v4216_v30, %v4168_v10  ;;  %v6384_v30 = vunpack.c.h.b16 %v5069_v31 }
 0x4af   : > { %4267 = vmatmul.bf16.gmra.mxu0 %v12211_v51  ;;  %4535 = vmatpush.bf16.msrb.mxu2 %v9480_v34 }
 0x4b0   : > { %v4121_v39 = vpop.f32.mrf.mxu1  ;;  %v5075_v16 = vpack.c.bf16 %v4217_v0, %v12735_v8  ;;  %4365 = vmatmul.bf16.gmra.mxu2 %v12215_v55  ;;  %v8760_v8 = vor.u32 %v10871_v61, %v8757_v33  ;;  %4482 = vmatpush.bf16.msrb.mxu1 %v9288_v32  ;;  %v10979_v61 = vld [vmem:[#allocation6 + $0x3e4] sm:$0xf]  ;;  %v9189_v33 = vld [vmem:[#allocation6 + $0x410] sm:$0xf0] }
 0x4b1   : > { %v4122_v28 = vadd.f32 %v4121_v39, %v4072_v41  ;;  %4414 = vmatmul.bf16.gmra.mxu3 %v12217_v56  ;;  %v10991_v41 = vld [vmem:[#allocation6 + $0x444] sm:$0xf] }
 0x4b2   : > { %v5991_v54 = vunpack.c.l.b16 %v5075_v16  ;;  %v6385_v36 = vunpack.c.h.b16 %v5075_v16  ;;  %4581 = vmatpush.bf16.msrb.mxu3 %v10008_v59  ;;  %v9240_v53 = vor.u32 %v10991_v41, %v9237_v19  ;;  %v11171_v39 = vld [vmem:[#allocation6 + $0x9e4] sm:$0xf]  ;;  %v9957_v16 = vld [vmem:[#allocation6 + $0xa10] sm:$0xf0]  ;;  %4436 = vmatpush.bf16.msrb.mxu0 %v8760_v8  ;;  %v9192_v59 = vor.u32 %v10979_v61, %v9189_v33 }
 0x4b3   : > { %4316 = vmatmul.bf16.gmra.mxu1 %v14226_v35  ;;  %v4170_v6 = vpop.f32.mrf.mxu2  ;;  %v9960_v38 = vor.u32 %v11171_v39, %v9957_v16  ;;  %v9909_v41 = vld [vmem:[#allocation6 + $0x9b0] sm:$0xf0]  ;;  %v10967_v8 = vld [vmem:[#allocation6 + $0x384] sm:$0xf] }
 0x4b4   : > { %v4219_v10 = vpop.f32.mrf.mxu3  ;;  %v4171_v57 = vadd.f32 %v4170_v6, %v4122_v28  ;;  %v4074_v0 = vpop.f32.mrf.mxu0  ;;  %v12811_v12 = vpack.c.b16 %v5991_v54, %v5990_v49  ;;  %v12813_v13 = vpack.c.b16 %v6385_v36, %v6384_v30  ;;  %4483 = vmatpush.bf16.msrb.mxu1 %v9240_v53  ;;  %v14229_v28 = vld [vmem:[#allocation75_spill] sm:$0xff]  ;;  %v9912_v19 = vor.u32 %v11159_v14, %v9909_v41  ;;  %v10859_v49 = vld [vmem:[#allocation6 + $0x24] sm:$0xf]  ;;  %v8709_v54 = vld [vmem:[#allocation6 + $0x50] sm:$0xf0] }
 0x4b5   : > { %v8712_v30 = vor.u32 %v10859_v49, %v8709_v54  ;;  %v11147_v16 = vld [vmem:[#allocation6 + $0x924] sm:$0xf]  ;;  %v9093_v33 = vld [vmem:[#allocation6 + $0x350] sm:$0xf0]  ;;  %v9819_v54 = vld [vmem:[#allocation6 + $0x8c8] sm:$0xf] }
 0x4b6   : > { %14227 = vst [vmem:[#allocation84_spill] sm:$0xff] %v12811_v12  ;;  %v4220_v31 = vadd.f32 %v4219_v10, %v4171_v57  ;;  %4582 = vmatpush.bf16.msrb.mxu3 %v9960_v38  ;;  %v9141_v10 = vld [vmem:[#allocation6 + $0x3b0] sm:$0xf0]  ;;  %v10955_v61 = vld [vmem:[#allocation6 + $0x324] sm:$0xf] }
 0x4b7   : > { %14228 = vst [vmem:[#allocation85_spill] sm:$0xff] %v12813_v13  ;;  %v9144_v53 = vor.u32 %v10967_v8, %v9141_v10  ;;  %v9861_v38 = vld [vmem:[#allocation6 + $0x950] sm:$0xf0]  ;;  %4437 = vmatpush.bf16.msrb.mxu0 %v8712_v30  ;;  %v11142_v8 = vld [vmem:[#allocation6 + $0x8f4] sm:$0xf0] }
 0x4b8   : > { %v4123_v32 = vpop.f32.mrf.mxu1  ;;  %v5081_v6 = vpack.c.bf16 %v4220_v31, %v14229_v28  ;;  %4484 = vmatpush.bf16.msrb.mxu1 %v9192_v59  ;;  %v9864_v31 = vor.u32 %v11147_v16, %v9861_v38  ;;  %v9096_v28 = vor.u32 %v10955_v61, %v9093_v33  ;;  %v9820_v30 = vor.u32 %v11142_v8, %v9819_v54  ;;  %v10950_v54 = vld [vmem:[#allocation6 + $0x2f4] sm:$0xf0] }
 0x4b9   : > { %v4124_v29 = vadd.f32 %v4123_v32, %v4074_v0 }
 0x4ba   : > { %4583 = vmatpush.bf16.msrb.mxu3 %v9912_v19  ;;  %v6386_v41 = vunpack.c.h.b16 %v5081_v6  ;;  %4724 = vmatpush.bf16.msra.mxu2 %v9820_v30 }
 0x4bb   : > { %v4172_v39 = vpop.f32.mrf.mxu2 }
 0x4bc   : > { %v4221_v36 = vpop.f32.mrf.mxu3  ;;  %v4173_v57 = vadd.f32 %v4172_v39, %v4124_v29  ;;  %v4077_v34 = vpop.f32.mrf.mxu0  ;;  %4485 = vmatpush.bf16.msrb.mxu1 %v9144_v53  ;;  %v5992_v29 = vunpack.c.l.b16 %v5081_v6 }
 0x4be   : > { %v4222_v0 = vadd.f32 %v4221_v36, %v4173_v57  ;;  %4584 = vmatpush.bf16.msrb.mxu3 %v9864_v31 }
 0x4bf   : > { %4272 = vmatmul.bf16.gmra.mxu0 %v12231_v37 }
 0x4c0   : > { %v4126_v32 = vpop.f32.mrf.mxu1  ;;  %v5087_v59 = vpack.c.bf16 %v4222_v0, %v12743_v18  ;;  %4370 = vmatmul.bf16.gmra.mxu2 %v12235_v47  ;;  %4486 = vmatpush.bf16.msrb.mxu1 %v9096_v28 }
 0x4c1   : > { %v4127_v14 = vadd.f32 %v4126_v32, %v4077_v34  ;;  %4419 = vmatmul.bf16.gmra.mxu3 %v12237_v48 }
 0x4c2   : > { %v5993_v19 = vunpack.c.l.b16 %v5087_v59  ;;  %v6387_v49 = vunpack.c.h.b16 %v5087_v59  ;;  %v9051_v59 = vld [vmem:[#allocation6 + $0x2c8] sm:$0xf] }
 0x4c3   : > { %4321 = vmatmul.bf16.gmra.mxu1 %v12239_v60  ;;  %v4175_v39 = vpop.f32.mrf.mxu2 }
 0x4c4   : > { %v4224_v36 = vpop.f32.mrf.mxu3  ;;  %v4176_v10 = vadd.f32 %v4175_v39, %v4127_v14  ;;  %v4079_v18 = vpop.f32.mrf.mxu0  ;;  %v12821_v57 = vpack.c.b16 %v5993_v19, %v5992_v29  ;;  %v12823_v34 = vpack.c.b16 %v6387_v49, %v6386_v41  ;;  %v9052_v14 = vor.u32 %v10950_v54, %v9051_v59  ;;  %v11130_v19 = vld [vmem:[#allocation6 + $0x894] sm:$0xf0] }
 0x4c6   : > { %14230 = vst [vmem:[#allocation75_spill] sm:$0xff] %v12821_v57  ;;  %v4225_v53 = vadd.f32 %v4224_v36, %v4176_v10  ;;  %4626 = vmatpush.bf16.msra.mxu0 %v9052_v14  ;;  %v9003_v14 = vld [vmem:[#allocation6 + $0x268] sm:$0xf] }
 0x4c7   : > { %14231 = vst [vmem:[#allocation86_spill] sm:$0xff] %v12823_v34  ;;  %v11070_v34 = vld [vmem:[#allocation6 + $0x6b4] sm:$0xf0] }
 0x4c8   : > { %v4128_v16 = vpop.f32.mrf.mxu1  ;;  %v5093_v6 = vpack.c.bf16 %v4225_v53, %v12749_v50  ;;  %v9771_v50 = vld [vmem:[#allocation6 + $0x868] sm:$0xf] }
 0x4c9   : > { %v4129_v38 = vadd.f32 %v4128_v16, %v4079_v18  ;;  %v9772_v49 = vor.u32 %v11130_v19, %v9771_v50 }
 0x4ca   : > { %v5994_v8 = vunpack.c.l.b16 %v5093_v6  ;;  %v6388_v39 = vunpack.c.h.b16 %v5093_v6 }
 0x4cb   : > { %v4177_v31 = vpop.f32.mrf.mxu2  ;;  %4725 = vmatpush.bf16.msra.mxu2 %v9772_v49  ;;  %v14234_v49 = vld [vmem:[#allocation16_spill] sm:$0xff] }
 0x4cc   : > { %v4226_v0 = vpop.f32.mrf.mxu3  ;;  %v4178_v61 = vadd.f32 %v4177_v31, %v4129_v38  ;;  %v4082_v33 = vpop.f32.mrf.mxu0 }
 0x4ce   : > { %v4227_v32 = vadd.f32 %v4226_v0, %v4178_v61 }
 0x4cf   : > { %4277 = vmatmul.bf16.gmra.mxu0 %v12251_v17 }
 0x4d0   : > { %v4131_v28 = vpop.f32.mrf.mxu1  ;;  %v5099_v29 = vpack.c.bf16 %v4227_v32, %v12751_v24  ;;  %4375 = vmatmul.bf16.gmra.mxu2 %v12255_v20 }
 0x4d1   : > { %v4132_v41 = vadd.f32 %v4131_v28, %v4082_v33  ;;  %4424 = vmatmul.bf16.gmra.mxu3 %v12257_v21 }
 0x4d2   : > { %v5995_v36 = vunpack.c.l.b16 %v5099_v29  ;;  %v6389_v30 = vunpack.c.h.b16 %v5099_v29  ;;  %v10938_v29 = vld [vmem:[#allocation6 + $0x294] sm:$0xf0] }
 0x4d3   : > { %4326 = vmatmul.bf16.gmra.mxu1 %v12259_v23  ;;  %v4180_v10 = vpop.f32.mrf.mxu2  ;;  %v9004_v50 = vor.u32 %v10938_v29, %v9003_v14 }
 0x4d4   : > { %v4229_v18 = vpop.f32.mrf.mxu3  ;;  %v4181_v53 = vadd.f32 %v4180_v10, %v4132_v41  ;;  %v4084_v24 = vpop.f32.mrf.mxu0  ;;  %v12831_v16 = vpack.c.b16 %v5995_v36, %v5994_v8  ;;  %v12833_v38 = vpack.c.b16 %v6389_v30, %v6388_v39  ;;  %v14235_v39 = vld [vmem:[#allocation17_spill] sm:$0xff]  ;;  %v11118_v36 = vld [vmem:[#allocation6 + $0x834] sm:$0xf0] }
 0x4d5   : > { %4627 = vmatpush.bf16.msra.mxu0 %v9004_v50 }
 0x4d6   : > { %14232 = vst [vmem:[#allocation87_spill] sm:$0xff] %v12831_v16  ;;  %v4230_v31 = vadd.f32 %v4229_v18, %v4181_v53 }
 0x4d7   : > { %14233 = vst [vmem:[#allocation88_spill] sm:$0xff] %v12833_v38 }
 0x4d8   : > { %v4133_v0 = vpop.f32.mrf.mxu1  ;;  %v5105_v61 = vpack.c.bf16 %v4230_v31, %v12757_v11  ;;  %v9723_v11 = vld [vmem:[#allocation6 + $0x808] sm:$0xf]  ;;  %v14236_v31 = vld [vmem:[#allocation18_spill] sm:$0xff] }
 0x4d9   : > { %v4134_v33 = vadd.f32 %v4133_v0, %v4084_v24  ;;  %v9724_v30 = vor.u32 %v11118_v36, %v9723_v11  ;;  %v8955_v11 = vld [vmem:[#allocation6 + $0x208] sm:$0xf]  ;;  %v10926_v36 = vld [vmem:[#allocation6 + $0x234] sm:$0xf0] }
 0x4da   : > { %v5996_v10 = vunpack.c.l.b16 %v5105_v61  ;;  %v6390_v18 = vunpack.c.h.b16 %v5105_v61 }
 0x4db   : > { %v4182_v32 = vpop.f32.mrf.mxu2  ;;  %4726 = vmatpush.bf16.msra.mxu2 %v9724_v30  ;;  %v8956_v30 = vor.u32 %v10926_v36, %v8955_v11 }
 0x4dc   : > { %v4231_v6 = vpop.f32.mrf.mxu3  ;;  %v4183_v59 = vadd.f32 %v4182_v32, %v4134_v33  ;;  %v4243_v54 = vpop.f32.mrf.mxu0 }
 0x4dd   : > { %4628 = vmatpush.bf16.msra.mxu0 %v8956_v30  ;;  %v10914_v30 = vld [vmem:[#allocation6 + $0x1d4] sm:$0xf0] }
 0x4de   : > { %v4232_v28 = vadd.f32 %v4231_v6, %v4183_v59 }
 0x4df   : > { %4438 = vmatmul.bf16.vlgmr.msrb.gmra.mxu0 %v12112_v44 }
 0x4e0   : > { %v4292_v41 = vpop.f32.mrf.mxu1  ;;  %v5111_v19 = vpack.c.bf16 %v4232_v28, %v12759_v9  ;;  %4536 = vmatmul.bf16.vlgmr.msrb.gmra.mxu2 %v14234_v49 }
 0x4e1   : > { %v4293_v8 = vadd.f32 %v4292_v41, %v4243_v54  ;;  %4585 = vmatmul.bf16.vlgmr.msrb.gmra.mxu3 %v14235_v39 }
 0x4e2   : > { %v5997_v53 = vunpack.c.l.b16 %v5111_v19  ;;  %v6391_v24 = vunpack.c.h.b16 %v5111_v19 }
 0x4e3   : > { %4487 = vmatmul.bf16.vlgmr.msrb.gmra.mxu1 %v14236_v31  ;;  %v4341_v0 = vpop.f32.mrf.mxu2 }
 0x4e4   : > { %v4390_v33 = vpop.f32.mrf.mxu3  ;;  %v4342_v32 = vadd.f32 %v4341_v0, %v4293_v8  ;;  %v4245_v9 = vpop.f32.mrf.mxu0  ;;  %v12841_v6 = vpack.c.b16 %v5997_v53, %v5996_v10  ;;  %v12843_v59 = vpack.c.b16 %v6391_v24, %v6390_v18  ;;  %v14239_v18 = vld [vmem:[#allocation19_spill] sm:$0xff]  ;;  %v9675_v53 = vld [vmem:[#allocation6 + $0x7a8] sm:$0xf]  ;;  %v11106_v24 = vld [vmem:[#allocation6 + $0x7d4] sm:$0xf0] }
 0x4e5   : > { %v9676_v0 = vor.u32 %v11106_v24, %v9675_v53  ;;  %v8908_v24 = vor.u32 %v10914_v30, %v8907_v63 }
 0x4e6   : > { %14237 = vst [vmem:[#allocation16_spill] sm:$0xff] %v12841_v6  ;;  %v12845_v54 = vadd.f32 %v4390_v33, %v4342_v32  ;;  %v14240_v33 = vld [vmem:[#allocation20_spill] sm:$0xff] }
 0x4e7   : > { %14238 = vst [vmem:[#allocation17_spill] sm:$0xff] %v12843_v59  ;;  %4727 = vmatpush.bf16.msra.mxu2 %v9676_v0  ;;  %v9627_v0 = vld [vmem:[#allocation6 + $0x748] sm:$0xf]  ;;  %4629 = vmatpush.bf16.msra.mxu0 %v8908_v24  ;;  %v10902_v24 = vld [vmem:[#allocation6 + $0x174] sm:$0xf0] }
 0x4e8   : > { %v4294_v28 = vpop.f32.mrf.mxu1 }
 0x4e9   : > { %v4295_v14 = vadd.f32 %v4294_v28, %v4245_v9 }
 0x4eb   : > { %v4343_v29 = vpop.f32.mrf.mxu2 }
 0x4ec   : > { %v4392_v41 = vpop.f32.mrf.mxu3  ;;  %v4344_v61 = vadd.f32 %v4343_v29, %v4295_v14  ;;  %v4248_v50 = vpop.f32.mrf.mxu0 }
 0x4ee   : > { %v12847_v19 = vadd.f32 %v4392_v41, %v4344_v61 }
 0x4ef   : > { %4443 = vmatmul.bf16.gmra.mxu0 %v12131_v4 }
 0x4f0   : > { %v4297_v8 = vpop.f32.mrf.mxu1  ;;  %4541 = vmatmul.bf16.gmra.mxu2 %v12135_v7 }
 0x4f1   : > { %v4298_v10 = vadd.f32 %v4297_v8, %v4248_v50  ;;  %4590 = vmatmul.bf16.gmra.mxu3 %v14239_v18 }
 0x4f3   : > { %4492 = vmatmul.bf16.gmra.mxu1 %v14240_v33  ;;  %v4346_v32 = vpop.f32.mrf.mxu2 }
 0x4f4   : > { %v4395_v9 = vpop.f32.mrf.mxu3  ;;  %v4347_v28 = vadd.f32 %v4346_v32, %v4298_v10  ;;  %v4250_v14 = vpop.f32.mrf.mxu0  ;;  %v11094_v32 = vld [vmem:[#allocation6 + $0x774] sm:$0xf0] }
 0x4f6   : > { %v12853_v29 = vadd.f32 %v4395_v9, %v4347_v28  ;;  %v9628_v9 = vor.u32 %v11094_v32, %v9627_v0  ;;  %v8860_v32 = vor.u32 %v10902_v24, %v8859_v5  ;;  %v8811_v5 = vld [vmem:[#allocation6 + $0xe8] sm:$0xf] }
 0x4f8   : > { %v4299_v41 = vpop.f32.mrf.mxu1  ;;  %4728 = vmatpush.bf16.msra.mxu2 %v9628_v9  ;;  %v9579_v9 = vld [vmem:[#allocation6 + $0x6e8] sm:$0xf]  ;;  %4630 = vmatpush.bf16.msra.mxu0 %v8860_v32  ;;  %v10878_v32 = vld [vmem:[#allocation6 + $0xb4] sm:$0xf0] }
 0x4f9   : > { %v4300_v61 = vadd.f32 %v4299_v41, %v4250_v14  ;;  %v8764_v12 = vor.u32 %v10878_v32, %v8763_v15  ;;  %v10203_v15 = vld [vmem:[#allocation6 + $0xbc8] sm:$0xf] }
 0x4fb   : > { %v4348_v11 = vpop.f32.mrf.mxu2 }
 0x4fc   : > { %v4397_v36 = vpop.f32.mrf.mxu3  ;;  %v4349_v50 = vadd.f32 %v4348_v11, %v4300_v61  ;;  %v4253_v8 = vpop.f32.mrf.mxu0 }
 0x4fe   : > { %v12855_v52 = vadd.f32 %v4397_v36, %v4349_v50 }
 0x4ff   : > { %4448 = vmatmul.bf16.gmra.mxu0 %v12151_v22 }
 0x500   : > { %v4302_v53 = vpop.f32.mrf.mxu1  ;;  %4546 = vmatmul.bf16.gmra.mxu2 %v12155_v25 }
 0x501   : > { %v4303_v10 = vadd.f32 %v4302_v53, %v4253_v8  ;;  %4595 = vmatmul.bf16.gmra.mxu3 %v12157_v26 }
 0x503   : > { %4497 = vmatmul.bf16.gmra.mxu1 %v12159_v27  ;;  %v4351_v28 = vpop.f32.mrf.mxu2 }
 0x504   : > { %v4400_v14 = vpop.f32.mrf.mxu3  ;;  %v4352_v41 = vadd.f32 %v4351_v28, %v4303_v10  ;;  %v4255_v61 = vpop.f32.mrf.mxu0  ;;  %v11082_v28 = vld [vmem:[#allocation6 + $0x714] sm:$0xf0] }
 0x506   : > { %v12861_v11 = vadd.f32 %v4400_v14, %v4352_v41  ;;  %v9580_v14 = vor.u32 %v11082_v28, %v9579_v9  ;;  %v9531_v9 = vld [vmem:[#allocation6 + $0x688] sm:$0xf] }
 0x508   : > { %v4304_v36 = vpop.f32.mrf.mxu1  ;;  %4729 = vmatpush.bf16.msra.mxu2 %v9580_v14  ;;  %v9532_v14 = vor.u32 %v11070_v34, %v9531_v9  ;;  %v9821_v9 = vld [vmem:[#allocation6 + $0x8f8] sm:$0xf0] }
 0x509   : > { %v4305_v63 = vadd.f32 %v4304_v36, %v4255_v61 }
 0x50b   : > { %v4353_v50 = vpop.f32.mrf.mxu2 }
 0x50c   : > { %v4402_v30 = vpop.f32.mrf.mxu3  ;;  %v4354_v8 = vadd.f32 %v4353_v50, %v4305_v63  ;;  %v4258_v53 = vpop.f32.mrf.mxu0  ;;  %4730 = vmatpush.bf16.msra.mxu2 %v9532_v14  ;;  %v11046_v14 = vld [vmem:[#allocation6 + $0x5f4] sm:$0xf0] }
 0x50e   : > { %v12863_v58 = vadd.f32 %v4402_v30, %v4354_v8  ;;  %v10890_v8 = vld [vmem:[#allocation6 + $0x114] sm:$0xf0] }
 0x50f   : > { %4453 = vmatmul.bf16.gmra.mxu0 %v12171_v40 }
 0x510   : > { %v4307_v0 = vpop.f32.mrf.mxu1  ;;  %4551 = vmatmul.bf16.gmra.mxu2 %v12175_v43 }
 0x511   : > { %v4308_v10 = vadd.f32 %v4307_v0, %v4258_v53  ;;  %4600 = vmatmul.bf16.gmra.mxu3 %v12177_v45  ;;  %v8812_v53 = vor.u32 %v10890_v8, %v8811_v5  ;;  %v11058_v8 = vld [vmem:[#allocation6 + $0x654] sm:$0xf0] }
 0x513   : > { %4502 = vmatmul.bf16.gmra.mxu1 %v12179_v46  ;;  %v4356_v41 = vpop.f32.mrf.mxu2  ;;  %4631 = vmatpush.bf16.msra.mxu0 %v8812_v53  ;;  %v10944_v53 = vld [vmem:[#allocation6 + $0x2cc] sm:$0xf] }
 0x514   : > { %v4405_v61 = vpop.f32.mrf.mxu3  ;;  %v4357_v36 = vadd.f32 %v4356_v41, %v4308_v10  ;;  %v4260_v63 = vpop.f32.mrf.mxu0 }
 0x516   : > { %v12869_v50 = vadd.f32 %v4405_v61, %v4357_v36  ;;  %v8715_v61 = vld [vmem:[#allocation6 + $0x28] sm:$0xf]  ;;  %v10866_v36 = vld [vmem:[#allocation6 + $0x54] sm:$0xf0] }
 0x517   : > { %4632 = vmatpush.bf16.msra.mxu0 %v8764_v12  ;;  %v8716_v5 = vor.u32 %v10866_v36, %v8715_v61  ;;  %v9053_v12 = vld [vmem:[#allocation6 + $0x2f8] sm:$0xf0] }
 0x518   : > { %v4309_v30 = vpop.f32.mrf.mxu1  ;;  %v9056_v32 = vor.u32 %v10944_v53, %v9053_v12  ;;  %v11124_v53 = vld [vmem:[#allocation6 + $0x86c] sm:$0xf]  ;;  %v9773_v12 = vld [vmem:[#allocation6 + $0x898] sm:$0xf0] }
 0x519   : > { %v4310_v24 = vadd.f32 %v4309_v30, %v4260_v63  ;;  %v9483_v63 = vld [vmem:[#allocation6 + $0x628] sm:$0xf]  ;;  %v9776_v6 = vor.u32 %v11124_v53, %v9773_v12 }
 0x51a   : > { %v9484_v34 = vor.u32 %v11058_v8, %v9483_v63  ;;  %v10155_v63 = vld [vmem:[#allocation6 + $0xb68] sm:$0xf]  ;;  %v11226_v8 = vld [vmem:[#allocation6 + $0xb94] sm:$0xf0] }
 0x51b   : > { %v4358_v0 = vpop.f32.mrf.mxu2  ;;  %4633 = vmatpush.bf16.msra.mxu0 %v8716_v5  ;;  %v9005_v5 = vld [vmem:[#allocation6 + $0x298] sm:$0xf0] }
 0x51c   : > { %v4407_v42 = vpop.f32.mrf.mxu3  ;;  %v4359_v28 = vadd.f32 %v4358_v0, %v4310_v24  ;;  %v4263_v13 = vpop.f32.mrf.mxu0  ;;  %v11238_v24 = vld [vmem:[#allocation6 + $0xbf4] sm:$0xf0]  ;;  %v11136_v0 = vld [vmem:[#allocation6 + $0x8cc] sm:$0xf]  ;;  %4731 = vmatpush.bf16.msra.mxu2 %v9484_v34  ;;  %v9387_v34 = vld [vmem:[#allocation6 + $0x568] sm:$0xf] }
 0x51e   : > { %v12871_v10 = vadd.f32 %v4407_v42, %v4359_v28  ;;  %v10204_v42 = vor.u32 %v11238_v24, %v10203_v15  ;;  %v9435_v28 = vld [vmem:[#allocation6 + $0x5c8] sm:$0xf]  ;;  %v10932_v15 = vld [vmem:[#allocation6 + $0x26c] sm:$0xf]  ;;  %v10156_v24 = vor.u32 %v11226_v8, %v10155_v63  ;;  %v9725_v63 = vld [vmem:[#allocation6 + $0x838] sm:$0xf0] }
 0x51f   : > { %4458 = vmatmul.bf16.gmra.mxu0 %v12191_v62  ;;  %v9436_v61 = vor.u32 %v11046_v14, %v9435_v28  ;;  %v9008_v59 = vor.u32 %v10932_v15, %v9005_v5  ;;  %v10920_v28 = vld [vmem:[#allocation6 + $0x20c] sm:$0xf]  ;;  %v9339_v8 = vld [vmem:[#allocation6 + $0x508] sm:$0xf]  ;;  %v11022_v15 = vld [vmem:[#allocation6 + $0x534] sm:$0xf0] }
 0x520   : > { %v4312_v41 = vpop.f32.mrf.mxu1  ;;  %4556 = vmatmul.bf16.gmra.mxu2 %v12195_v1  ;;  %4773 = vmatpush.bf16.msra.mxu3 %v10204_v42  ;;  %v11034_v42 = vld [vmem:[#allocation6 + $0x594] sm:$0xf0] }
 0x521   : > { %v4313_v30 = vadd.f32 %v4312_v41, %v4263_v13  ;;  %4605 = vmatmul.bf16.gmra.mxu3 %v12197_v2  ;;  %v9824_v41 = vor.u32 %v11136_v0, %v9821_v9  ;;  %4822 = vmatpush.bf16.msrb.mxu0 %v9056_v32  ;;  %v10107_v32 = vld [vmem:[#allocation6 + $0xb08] sm:$0xf]  ;;  %v11214_v9 = vld [vmem:[#allocation6 + $0xb34] sm:$0xf0] }
 0x522   : > { %4675 = vmatpush.bf16.msra.mxu1 %v9436_v61  ;;  %v10108_v14 = vor.u32 %v11214_v9, %v10107_v32  ;;  %v11112_v61 = vld [vmem:[#allocation6 + $0x80c] sm:$0xf]  ;;  %v9677_v32 = vld [vmem:[#allocation6 + $0x7d8] sm:$0xf0] }
 0x523   : > { %4507 = vmatmul.bf16.gmra.mxu1 %v12199_v3  ;;  %v4361_v57 = vpop.f32.mrf.mxu2  ;;  %4920 = vmatpush.bf16.msrb.mxu2 %v9824_v41  ;;  %v8957_v41 = vld [vmem:[#allocation6 + $0x238] sm:$0xf0] }
 0x524   : > { %v4410_v13 = vpop.f32.mrf.mxu3  ;;  %v4362_v36 = vadd.f32 %v4361_v57, %v4313_v30  ;;  %v4265_v38 = vpop.f32.mrf.mxu0  ;;  %4774 = vmatpush.bf16.msra.mxu3 %v10156_v24  ;;  %v9388_v57 = vor.u32 %v11034_v42, %v9387_v34  ;;  %v9340_v24 = vor.u32 %v11022_v15, %v9339_v8  ;;  %v11202_v34 = vld [vmem:[#allocation6 + $0xad4] sm:$0xf0]  ;;  %v10908_v42 = vld [vmem:[#allocation6 + $0x1ac] sm:$0xf] }
 0x525   : > { %4823 = vmatpush.bf16.msrb.mxu0 %v9008_v59  ;;  %v10059_v59 = vld [vmem:[#allocation6 + $0xaa8] sm:$0xf]  ;;  %v11190_v8 = vld [vmem:[#allocation6 + $0xa74] sm:$0xf0]  ;;  %v10896_v15 = vld [vmem:[#allocation6 + $0x14c] sm:$0xf] }
 0x526   : > { %v12877_v16 = vadd.f32 %v4410_v13, %v4362_v36  ;;  %4676 = vmatpush.bf16.msra.mxu1 %v9388_v57  ;;  %v8960_v13 = vor.u32 %v10920_v28, %v8957_v41  ;;  %v9728_v36 = vor.u32 %v11112_v61, %v9725_v63  ;;  %v11100_v57 = vld [vmem:[#allocation6 + $0x7ac] sm:$0xf]  ;;  %v9291_v61 = vld [vmem:[#allocation6 + $0x4a8] sm:$0xf]  ;;  %v11010_v63 = vld [vmem:[#allocation6 + $0x4d4] sm:$0xf0] }
 0x527   : > { %4921 = vmatpush.bf16.msrb.mxu2 %v9776_v6  ;;  %v10060_v6 = vor.u32 %v11202_v34, %v10059_v59  ;;  %v9680_v41 = vor.u32 %v11100_v57, %v9677_v32 }
 0x528   : > { %v4314_v0 = vpop.f32.mrf.mxu1  ;;  %4775 = vmatpush.bf16.msra.mxu3 %v10108_v14  ;;  %v9292_v14 = vor.u32 %v11010_v63, %v9291_v61  ;;  %v9963_v63 = vld [vmem:[#allocation6 + $0x9e8] sm:$0xf] }
 0x529   : > { %v4315_v30 = vadd.f32 %v4314_v0, %v4265_v38  ;;  %4824 = vmatpush.bf16.msrb.mxu0 %v8960_v13  ;;  %v8909_v0 = vld [vmem:[#allocation6 + $0x1d8] sm:$0xf0] }
 0x52a   : > { %4677 = vmatpush.bf16.msra.mxu1 %v9340_v24  ;;  %v8912_v28 = vor.u32 %v10908_v42, %v8909_v0  ;;  %v11088_v24 = vld [vmem:[#allocation6 + $0x74c] sm:$0xf]  ;;  %v9243_v42 = vld [vmem:[#allocation6 + $0x448] sm:$0xf] }
 0x52b   : > { %v4363_v5 = vpop.f32.mrf.mxu2  ;;  %4922 = vmatpush.bf16.msrb.mxu2 %v9728_v36  ;;  %v10011_v36 = vld [vmem:[#allocation6 + $0xa48] sm:$0xf] }
 0x52c   : > { %v4412_v53 = vpop.f32.mrf.mxu3  ;;  %v4364_v12 = vadd.f32 %v4363_v5, %v4315_v30  ;;  %v4268_v38 = vpop.f32.mrf.mxu0  ;;  %4776 = vmatpush.bf16.msra.mxu3 %v10060_v6  ;;  %v10012_v5 = vor.u32 %v11190_v8, %v10011_v36  ;;  %v10998_v6 = vld [vmem:[#allocation6 + $0x474] sm:$0xf0]  ;;  %v8813_v36 = vld [vmem:[#allocation6 + $0x118] sm:$0xf0]  ;;  %v11076_v8 = vld [vmem:[#allocation6 + $0x6ec] sm:$0xf] }
 0x52d   : > { %4825 = vmatpush.bf16.msrb.mxu0 %v8912_v28  ;;  %v11178_v28 = vld [vmem:[#allocation6 + $0xa14] sm:$0xf0] }
 0x52e   : > { %v12879_v9 = vadd.f32 %v4412_v53, %v4364_v12  ;;  %v8861_v53 = vld [vmem:[#allocation6 + $0x178] sm:$0xf0]  ;;  %4678 = vmatpush.bf16.msra.mxu1 %v9292_v14 }
 0x52f   : > { %4463 = vmatmul.bf16.gmra.mxu0 %v12211_v51  ;;  %4923 = vmatpush.bf16.msrb.mxu2 %v9680_v41  ;;  %v9629_v12 = vld [vmem:[#allocation6 + $0x778] sm:$0xf0]  ;;  %v8864_v59 = vor.u32 %v10896_v15, %v8861_v53  ;;  %v10884_v41 = vld [vmem:[#allocation6 + $0xec] sm:$0xf] }
 0x530   : > { %v4317_v30 = vpop.f32.mrf.mxu1  ;;  %4561 = vmatmul.bf16.gmra.mxu2 %v12215_v55  ;;  %v9632_v34 = vor.u32 %v11088_v24, %v9629_v12  ;;  %4777 = vmatpush.bf16.msra.mxu3 %v10012_v5  ;;  %v8816_v53 = vor.u32 %v10884_v41, %v8813_v36  ;;  %v9195_v12 = vld [vmem:[#allocation6 + $0x3e8] sm:$0xf] }
 0x531   : > { %v4318_v13 = vadd.f32 %v4317_v30, %v4268_v38  ;;  %4610 = vmatmul.bf16.gmra.mxu3 %v12217_v56  ;;  %v9244_v38 = vor.u32 %v10998_v6, %v9243_v42  ;;  %4826 = vmatpush.bf16.msrb.mxu0 %v8864_v59  ;;  %v9964_v30 = vor.u32 %v11178_v28, %v9963_v63  ;;  %v10986_v56 = vld [vmem:[#allocation6 + $0x414] sm:$0xf0]  ;;  %v9915_v42 = vld [vmem:[#allocation6 + $0x988] sm:$0xf]  ;;  %v11064_v63 = vld [vmem:[#allocation6 + $0x68c] sm:$0xf] }
 0x532   : > { %v11166_v6 = vld [vmem:[#allocation6 + $0x9b4] sm:$0xf0]  ;;  %v9533_v28 = vld [vmem:[#allocation6 + $0x6b8] sm:$0xf0]  ;;  %v9147_v41 = vld [vmem:[#allocation6 + $0x388] sm:$0xf] }
 0x533   : > { %4512 = vmatmul.bf16.gmra.mxu1 %v14226_v35  ;;  %v4366_v0 = vpop.f32.mrf.mxu2  ;;  %4924 = vmatpush.bf16.msrb.mxu2 %v9632_v34  ;;  %v9581_v35 = vld [vmem:[#allocation6 + $0x718] sm:$0xf0]  ;;  %v9916_v59 = vor.u32 %v11166_v6, %v9915_v42  ;;  %v11052_v42 = vld [vmem:[#allocation6 + $0x62c] sm:$0xf] }
 0x534   : > { %v4415_v57 = vpop.f32.mrf.mxu3  ;;  %v4367_v32 = vadd.f32 %v4366_v0, %v4318_v13  ;;  %v4270_v61 = vpop.f32.mrf.mxu0  ;;  %v9584_v24 = vor.u32 %v11076_v8, %v9581_v35  ;;  %4679 = vmatpush.bf16.msra.mxu1 %v9244_v38  ;;  %4778 = vmatpush.bf16.msra.mxu3 %v9964_v30  ;;  %v9196_v13 = vor.u32 %v10986_v56, %v9195_v12  ;;  %v10872_v0 = vld [vmem:[#allocation6 + $0x8c] sm:$0xf]  ;;  %v8765_v34 = vld [vmem:[#allocation6 + $0xb8] sm:$0xf0]  ;;  %v10974_v35 = vld [vmem:[#allocation6 + $0x3b4] sm:$0xf0] }
 0x535   : > { %4827 = vmatpush.bf16.msrb.mxu0 %v8816_v53  ;;  %v9148_v38 = vor.u32 %v10974_v35, %v9147_v41  ;;  %v9867_v30 = vld [vmem:[#allocation6 + $0x928] sm:$0xf]  ;;  %v11154_v12 = vld [vmem:[#allocation6 + $0x954] sm:$0xf0]  ;;  %v9485_v6 = vld [vmem:[#allocation6 + $0x658] sm:$0xf0] }
 0x536   : > { %v12885_v15 = vadd.f32 %v4415_v57, %v4367_v32  ;;  %v8768_v57 = vor.u32 %v10872_v0, %v8765_v34  ;;  %v9536_v32 = vor.u32 %v11064_v63, %v9533_v28  ;;  %v9868_v53 = vor.u32 %v11154_v12, %v9867_v30 }
 0x537   : > { %4925 = vmatpush.bf16.msrb.mxu2 %v9584_v24  ;;  %v8717_v24 = vld [vmem:[#allocation6 + $0x58] sm:$0xf0]  ;;  %v9488_v63 = vor.u32 %v11052_v42, %v9485_v6 }
 0x538   : > { %v4319_v14 = vpop.f32.mrf.mxu1  ;;  %4680 = vmatpush.bf16.msra.mxu1 %v9196_v13  ;;  %4779 = vmatpush.bf16.msra.mxu3 %v9916_v59  ;;  %v9099_v59 = vld [vmem:[#allocation6 + $0x328] sm:$0xf] }
 0x539   : > { %v4320_v5 = vadd.f32 %v4319_v14, %v4270_v61  ;;  %v10860_v14 = vld [vmem:[#allocation6 + $0x2c] sm:$0xf]  ;;  %4828 = vmatpush.bf16.msrb.mxu0 %v8768_v57 }
 0x53a   : > { %v8720_v34 = vor.u32 %v10860_v14, %v8717_v24 }
 0x53b   : > { %v4368_v36 = vpop.f32.mrf.mxu2  ;;  %4926 = vmatpush.bf16.msrb.mxu2 %v9536_v32 }
 0x53c   : > { %v4417_v8 = vpop.f32.mrf.mxu3  ;;  %v4369_v56 = vadd.f32 %v4368_v36, %v4320_v5  ;;  %v4273_v61 = vpop.f32.mrf.mxu0  ;;  %4681 = vmatpush.bf16.msra.mxu1 %v9148_v38  ;;  %v10962_v5 = vld [vmem:[#allocation6 + $0x354] sm:$0xf0]  ;;  %4780 = vmatpush.bf16.msra.mxu3 %v9868_v53 }
 0x53d   : > { %v9100_v57 = vor.u32 %v10962_v5, %v9099_v59  ;;  %4829 = vmatpush.bf16.msrb.mxu0 %v8720_v34 }
 0x53e   : > { %v12887_v0 = vadd.f32 %v4417_v8, %v4369_v56 }
 0x53f   : > { %4468 = vmatmul.bf16.gmra.mxu0 %v12231_v37  ;;  %4927 = vmatpush.bf16.msrb.mxu2 %v9488_v63 }
 0x540   : > { %v4322_v13 = vpop.f32.mrf.mxu1  ;;  %4566 = vmatmul.bf16.gmra.mxu2 %v12235_v47  ;;  %4682 = vmatpush.bf16.msra.mxu1 %v9100_v57 }
 0x541   : > { %v4323_v28 = vadd.f32 %v4322_v13, %v4273_v61  ;;  %4615 = vmatmul.bf16.gmra.mxu3 %v12237_v48 }
 0x543   : > { %4517 = vmatmul.bf16.gmra.mxu1 %v12239_v60  ;;  %v4371_v32 = vpop.f32.mrf.mxu2 }
 0x544   : > { %v4420_v41 = vpop.f32.mrf.mxu3  ;;  %v4372_v35 = vadd.f32 %v4371_v32, %v4323_v28  ;;  %v4275_v36 = vpop.f32.mrf.mxu0 }
 0x546   : > { %v12893_v8 = vadd.f32 %v4420_v41, %v4372_v35 }
 0x548   : > { %v4324_v38 = vpop.f32.mrf.mxu1 }
 0x549   : > { %v4325_v56 = vadd.f32 %v4324_v38, %v4275_v36 }
 0x54b   : > { %v4373_v30 = vpop.f32.mrf.mxu2 }
 0x54c   : > { %v4422_v12 = vpop.f32.mrf.mxu3  ;;  %v4374_v61 = vadd.f32 %v4373_v30, %v4325_v56  ;;  %v4278_v14 = vpop.f32.mrf.mxu0  ;;  %v14241_v56 = vld [vmem:[#allocation73_spill] sm:$0xff] }
 0x54e   : > { %v12895_v24 = vadd.f32 %v4422_v12, %v4374_v61  ;;  %v14242_v12 = vld [vmem:[#allocation74_spill] sm:$0xff] }
 0x54f   : > { %4473 = vmatmul.bf16.gmra.mxu0 %v12251_v17 }
 0x550   : > { %v4327_v53 = vpop.f32.mrf.mxu1  ;;  %4571 = vmatmul.bf16.gmra.mxu2 %v12255_v20 }
 0x551   : > { %v4328_v42 = vadd.f32 %v4327_v53, %v4278_v14  ;;  %4620 = vmatmul.bf16.gmra.mxu3 %v12257_v21 }
 0x553   : > { %4522 = vmatmul.bf16.gmra.mxu1 %v12259_v23  ;;  %v4376_v6 = vpop.f32.mrf.mxu2 }
 0x554   : > { %v4425_v34 = vpop.f32.mrf.mxu3  ;;  %v4377_v63 = vadd.f32 %v4376_v6, %v4328_v42  ;;  %v4280_v13 = vpop.f32.mrf.mxu0 }
 0x556   : > { %v12901_v59 = vadd.f32 %v4425_v34, %v4377_v63 }
 0x558   : > { %v4329_v5 = vpop.f32.mrf.mxu1 }
 0x559   : > { %v4330_v28 = vadd.f32 %v4329_v5, %v4280_v13  ;;  %v14243_v13 = vld [vmem:[#allocation71_spill] sm:$0xff] }
 0x55b   : > { %v4378_v57 = vpop.f32.mrf.mxu2 }
 0x55c   : > { %v4427_v32 = vpop.f32.mrf.mxu3  ;;  %v4379_v41 = vadd.f32 %v4378_v57, %v4330_v28  ;;  %v4439_v35 = vpop.f32.mrf.mxu0  ;;  %v14244_v28 = vld [vmem:[#allocation72_spill] sm:$0xff] }
 0x55e   : > { %v12903_v36 = vadd.f32 %v4427_v32, %v4379_v41 }
 0x55f   : > { %4634 = vmatmul.bf16.vlgmr.msra.gmra.mxu0 %v12112_v44 }
 0x560   : > { %v4488_v38 = vpop.f32.mrf.mxu1  ;;  %4732 = vmatmul.bf16.vlgmr.msra.gmra.mxu2 %v14234_v49  ;;  %5210 = vmatpush.bf16.xpose.msra.mxu0 %v14241_v56 }
 0x561   : > { %v4489_v30 = vadd.f32 %v4488_v38, %v4439_v35  ;;  %5604 = vmatpush.bf16.xpose.msra.mxu2 %v14242_v12  ;;  %4781 = vmatmul.bf16.vlgmr.msra.gmra.mxu3 %v14235_v39  ;;  %v14245_v12 = vld [vmem:[#allocation59_spill] sm:$0xff] }
 0x563   : > { %4683 = vmatmul.bf16.vlgmr.msra.gmra.mxu1 %v14236_v31  ;;  %v4537_v61 = vpop.f32.mrf.mxu2 }
 0x564   : > { %v4586_v14 = vpop.f32.mrf.mxu3  ;;  %v4538_v53 = vadd.f32 %v4537_v61, %v4489_v30  ;;  %v4441_v42 = vpop.f32.mrf.mxu0  ;;  %v14246_v61 = vld [vmem:[#allocation70_spill] sm:$0xff] }
 0x566   : > { %v4587_v6 = vadd.f32 %v4586_v14, %v4538_v53 }
 0x568   : > { %v4490_v34 = vpop.f32.mrf.mxu1  ;;  %v5022_v63 = vpack.c.bf16 %v4587_v6, %v12845_v54  ;;  %5211 = vmatpush.bf16.xpose.msra.mxu0 %v14243_v13 }
 0x569   : > { %v4491_v5 = vadd.f32 %v4490_v34, %v4441_v42  ;;  %5605 = vmatpush.bf16.xpose.msra.mxu2 %v14244_v28 }
 0x56a   : > { %v5395_v14 = vunpack.c.l.b16 %v5022_v63  ;;  %v5773_v53 = vunpack.c.h.b16 %v5022_v63  ;;  %v14248_v63 = vld [vmem:[#allocation69_spill] sm:$0xff] }
 0x56b   : > { %v4539_v57 = vpop.f32.mrf.mxu2 }
 0x56c   : > { %v4588_v32 = vpop.f32.mrf.mxu3  ;;  %v4540_v41 = vadd.f32 %v4539_v57, %v4491_v5  ;;  %v4444_v35 = vpop.f32.mrf.mxu0 }
 0x56e   : > { %v4589_v38 = vadd.f32 %v4588_v32, %v4540_v41 }
 0x56f   : > { %4639 = vmatmul.bf16.gmra.mxu0 %v12131_v4 }
 0x570   : > { %v4493_v56 = vpop.f32.mrf.mxu1  ;;  %v5028_v30 = vpack.c.bf16 %v4589_v38, %v12847_v19  ;;  %4737 = vmatmul.bf16.gmra.mxu2 %v12135_v7  ;;  %5212 = vmatpush.bf16.xpose.msra.mxu0 %v14245_v12  ;;  %v14247_v38 = vld [vmem:[#allocation68_spill] sm:$0xff] }
 0x571   : > { %v4494_v54 = vadd.f32 %v4493_v56, %v4444_v35  ;;  %5606 = vmatpush.bf16.xpose.msra.mxu2 %v14246_v61  ;;  %4786 = vmatmul.bf16.gmra.mxu3 %v14239_v18 }
 0x572   : > { %v5396_v42 = vunpack.c.l.b16 %v5028_v30  ;;  %v5774_v6 = vunpack.c.h.b16 %v5028_v30 }
 0x573   : > { %4688 = vmatmul.bf16.gmra.mxu1 %v14240_v33  ;;  %v4542_v34 = vpop.f32.mrf.mxu2 }
 0x574   : > { %v4591_v13 = vpop.f32.mrf.mxu3  ;;  %v4543_v5 = vadd.f32 %v4542_v34, %v4494_v54  ;;  %v4446_v28 = vpop.f32.mrf.mxu0  ;;  %v12921_v19 = vpack.c.b16 %v5396_v42, %v5395_v14  ;;  %v12923_v57 = vpack.c.b16 %v5774_v6, %v5773_v53  ;;  %v14249_v53 = vld [vmem:[#allocation66_spill] sm:$0xff]  ;;  %v14250_v42 = vld [vmem:[#allocation67_spill] sm:$0xff] }
 0x576   : > { %v4592_v32 = vadd.f32 %v4591_v13, %v4543_v5 }
 0x578   : > { %v4495_v41 = vpop.f32.mrf.mxu1  ;;  %v5034_v35 = vpack.c.bf16 %v4592_v32, %v12853_v29  ;;  %5213 = vmatpush.bf16.xpose.msra.mxu0 %v14247_v38 }
 0x579   : > { %v4496_v56 = vadd.f32 %v4495_v41, %v4446_v28  ;;  %5607 = vmatpush.bf16.xpose.msra.mxu2 %v14248_v63 }
 0x57a   : > { %v5397_v6 = vunpack.c.l.b16 %v5034_v35  ;;  %v5775_v34 = vunpack.c.h.b16 %v5034_v35  ;;  %v14252_v35 = vld [vmem:[#allocation65_spill] sm:$0xff] }
 0x57b   : > { %v4544_v30 = vpop.f32.mrf.mxu2 }
 0x57c   : > { %v4593_v12 = vpop.f32.mrf.mxu3  ;;  %v4545_v61 = vadd.f32 %v4544_v30, %v4496_v56  ;;  %v4449_v33 = vpop.f32.mrf.mxu0  ;;  %v14251_v30 = vld [vmem:[#allocation64_spill] sm:$0xff] }
 0x57e   : > { %v4594_v18 = vadd.f32 %v4593_v12, %v4545_v61 }
 0x57f   : > { %4644 = vmatmul.bf16.gmra.mxu0 %v12151_v22 }
 0x580   : > { %v4498_v54 = vpop.f32.mrf.mxu1  ;;  %v5040_v14 = vpack.c.bf16 %v4594_v18, %v12855_v52  ;;  %4742 = vmatmul.bf16.gmra.mxu2 %v12155_v25  ;;  %5214 = vmatpush.bf16.xpose.msra.mxu0 %v14249_v53 }
 0x581   : > { %v4499_v29 = vadd.f32 %v4498_v54, %v4449_v33  ;;  %5608 = vmatpush.bf16.xpose.msra.mxu2 %v14250_v42  ;;  %4791 = vmatmul.bf16.gmra.mxu3 %v12157_v26 }
 0x582   : > { %v5398_v13 = vunpack.c.l.b16 %v5040_v14  ;;  %v5776_v5 = vunpack.c.h.b16 %v5040_v14 }
 0x583   : > { %4693 = vmatmul.bf16.gmra.mxu1 %v12159_v27  ;;  %v4547_v28 = vpop.f32.mrf.mxu2 }
 0x584   : > { %v4596_v32 = vpop.f32.mrf.mxu3  ;;  %v4548_v41 = vadd.f32 %v4547_v28, %v4499_v29  ;;  %v4451_v38 = vpop.f32.mrf.mxu0  ;;  %v12935_v52 = vpack.c.b16 %v5398_v13, %v5397_v6  ;;  %v12937_v18 = vpack.c.b16 %v5776_v5, %v5775_v34  ;;  %v14253_v34 = vld [vmem:[#allocation62_spill] sm:$0xff]  ;;  %v14254_v13 = vld [vmem:[#allocation63_spill] sm:$0xff] }
 0x586   : > { %v4597_v56 = vadd.f32 %v4596_v32, %v4548_v41 }
 0x588   : > { %v4500_v33 = vpop.f32.mrf.mxu1  ;;  %v5046_v63 = vpack.c.bf16 %v4597_v56, %v12861_v11  ;;  %5215 = vmatpush.bf16.xpose.msra.mxu0 %v14251_v30 }
 0x589   : > { %v4501_v12 = vadd.f32 %v4500_v33, %v4451_v38  ;;  %5609 = vmatpush.bf16.xpose.msra.mxu2 %v14252_v35 }
 0x58a   : > { %v5399_v5 = vunpack.c.l.b16 %v5046_v63  ;;  %v5777_v28 = vunpack.c.h.b16 %v5046_v63  ;;  %v14256_v63 = vld [vmem:[#allocation61_spill] sm:$0xff] }
 0x58b   : > { %v4549_v61 = vpop.f32.mrf.mxu2 }
 0x58c   : > { %v4598_v54 = vpop.f32.mrf.mxu3  ;;  %v4550_v14 = vadd.f32 %v4549_v61, %v4501_v12  ;;  %v4454_v53 = vpop.f32.mrf.mxu0 }
 0x58e   : > { %v4599_v42 = vadd.f32 %v4598_v54, %v4550_v14  ;;  %v14255_v14 = vld [vmem:[#allocation60_spill] sm:$0xff] }
 0x58f   : > { %4649 = vmatmul.bf16.gmra.mxu0 %v12171_v40 }
 0x590   : > { %v4503_v29 = vpop.f32.mrf.mxu1  ;;  %v5052_v6 = vpack.c.bf16 %v4599_v42, %v12863_v58  ;;  %4747 = vmatmul.bf16.gmra.mxu2 %v12175_v43  ;;  %5216 = vmatpush.bf16.xpose.msra.mxu0 %v14253_v34 }
 0x591   : > { %v4504_v11 = vadd.f32 %v4503_v29, %v4454_v53  ;;  %5610 = vmatpush.bf16.xpose.msra.mxu2 %v14254_v13  ;;  %4796 = vmatmul.bf16.gmra.mxu3 %v12177_v45 }
 0x592   : > { %v5400_v32 = vunpack.c.l.b16 %v5052_v6  ;;  %v5778_v41 = vunpack.c.h.b16 %v5052_v6 }
 0x593   : > { %4698 = vmatmul.bf16.gmra.mxu1 %v12179_v46  ;;  %v4552_v38 = vpop.f32.mrf.mxu2 }
 0x594   : > { %v4601_v56 = vpop.f32.mrf.mxu3  ;;  %v4553_v33 = vadd.f32 %v4552_v38, %v4504_v11  ;;  %v4456_v30 = vpop.f32.mrf.mxu0  ;;  %v12949_v58 = vpack.c.b16 %v5400_v32, %v5399_v5  ;;  %v12951_v12 = vpack.c.b16 %v5778_v41, %v5777_v28  ;;  %v10205_v41 = vld [vmem:[#allocation6 + $0xbf8] sm:$0xf0] }
 0x596   : > { %v4602_v35 = vadd.f32 %v4601_v56, %v4553_v33 }
 0x598   : > { %v4505_v61 = vpop.f32.mrf.mxu1  ;;  %v5058_v54 = vpack.c.bf16 %v4602_v35, %v12869_v50  ;;  %5217 = vmatpush.bf16.xpose.msra.mxu0 %v14255_v14  ;;  %v11232_v50 = vld [vmem:[#allocation6 + $0xbcc] sm:$0xf] }
 0x599   : > { %v4506_v53 = vadd.f32 %v4505_v61, %v4456_v30  ;;  %5611 = vmatpush.bf16.xpose.msra.mxu2 %v14256_v63  ;;  %v10208_v30 = vor.u32 %v11232_v50, %v10205_v41  ;;  %v11040_v14 = vld [vmem:[#allocation6 + $0x5cc] sm:$0xf]  ;;  %v9389_v50 = vld [vmem:[#allocation6 + $0x598] sm:$0xf0] }
 0x59a   : > { %v5401_v32 = vunpack.c.l.b16 %v5058_v54  ;;  %v5779_v38 = vunpack.c.h.b16 %v5058_v54 }
 0x59b   : > { %v4554_v42 = vpop.f32.mrf.mxu2  ;;  %4969 = vmatpush.bf16.msrb.mxu3 %v10208_v30  ;;  %v10109_v30 = vld [vmem:[#allocation6 + $0xb38] sm:$0xf0] }
 0x59c   : > { %v4603_v29 = vpop.f32.mrf.mxu3  ;;  %v4555_v6 = vadd.f32 %v4554_v42, %v4506_v53  ;;  %v4459_v34 = vpop.f32.mrf.mxu0  ;;  %v9437_v53 = vld [vmem:[#allocation6 + $0x5f8] sm:$0xf0] }
 0x59d   : > { %v9440_v42 = vor.u32 %v11040_v14, %v9437_v53  ;;  %v9341_v14 = vld [vmem:[#allocation6 + $0x538] sm:$0xf0] }
 0x59e   : > { %v4604_v13 = vadd.f32 %v4603_v29, %v4555_v6 }
 0x59f   : > { %4654 = vmatmul.bf16.gmra.mxu0 %v12191_v62  ;;  %4871 = vmatpush.bf16.msrb.mxu1 %v9440_v42  ;;  %v11196_v42 = vld [vmem:[#allocation6 + $0xaac] sm:$0xf] }
 0x5a0   : > { %v4508_v11 = vpop.f32.mrf.mxu1  ;;  %v5064_v5 = vpack.c.bf16 %v4604_v13, %v12871_v10  ;;  %4752 = vmatmul.bf16.gmra.mxu2 %v12195_v1  ;;  %v10157_v13 = vld [vmem:[#allocation6 + $0xb98] sm:$0xf0] }
 0x5a1   : > { %v4509_v28 = vadd.f32 %v4508_v11, %v4459_v34  ;;  %4801 = vmatmul.bf16.gmra.mxu3 %v12197_v2  ;;  %v11220_v34 = vld [vmem:[#allocation6 + $0xb6c] sm:$0xf] }
 0x5a2   : > { %v5402_v56 = vunpack.c.l.b16 %v5064_v5  ;;  %v5780_v33 = vunpack.c.h.b16 %v5064_v5  ;;  %v10160_v11 = vor.u32 %v11220_v34, %v10157_v13  ;;  %v10061_v34 = vld [vmem:[#allocation6 + $0xad8] sm:$0xf0] }
 0x5a3   : > { %4703 = vmatmul.bf16.gmra.mxu1 %v12199_v3  ;;  %v4557_v35 = vpop.f32.mrf.mxu2  ;;  %v11028_v3 = vld [vmem:[#allocation6 + $0x56c] sm:$0xf] }
 0x5a4   : > { %v4606_v61 = vpop.f32.mrf.mxu3  ;;  %v4558_v63 = vadd.f32 %v4557_v35, %v4509_v28  ;;  %v4461_v10 = vpop.f32.mrf.mxu0  ;;  %v12961_v29 = vpack.c.b16 %v5402_v56, %v5401_v32  ;;  %v12963_v6 = vpack.c.b16 %v5780_v33, %v5779_v38  ;;  %4970 = vmatpush.bf16.msrb.mxu3 %v10160_v11  ;;  %v9392_v28 = vor.u32 %v11028_v3, %v9389_v50  ;;  %v11208_v35 = vld [vmem:[#allocation6 + $0xb0c] sm:$0xf] }
 0x5a5   : > { %v10112_v32 = vor.u32 %v11208_v35, %v10109_v30  ;;  %v11016_v33 = vld [vmem:[#allocation6 + $0x50c] sm:$0xf]  ;;  %v10013_v30 = vld [vmem:[#allocation6 + $0xa78] sm:$0xf0] }
 0x5a6   : > { %v4607_v54 = vadd.f32 %v4606_v61, %v4558_v63  ;;  %4872 = vmatpush.bf16.msrb.mxu1 %v9392_v28  ;;  %v9344_v63 = vor.u32 %v11016_v33, %v9341_v14  ;;  %v14257_v28 = vld [vmem:[#allocation25_spill] sm:$0xff]  ;;  %v14258_v33 = vld [vmem:[#allocation26_spill] sm:$0xff] }
 0x5a7   : > { %v11184_v35 = vld [vmem:[#allocation6 + $0xa4c] sm:$0xf] }
 0x5a8   : > { %v4510_v5 = vpop.f32.mrf.mxu1  ;;  %v5070_v41 = vpack.c.bf16 %v4607_v54, %v12877_v16  ;;  %4971 = vmatpush.bf16.msrb.mxu3 %v10112_v32  ;;  %v10064_v16 = vor.u32 %v11196_v42, %v10061_v34  ;;  %v9293_v54 = vld [vmem:[#allocation6 + $0x4d8] sm:$0xf0]  ;;  %v10016_v14 = vor.u32 %v11184_v35, %v10013_v30 }
 0x5a9   : > { %v4511_v2 = vadd.f32 %v4510_v5, %v4461_v10  ;;  %v11004_v10 = vld [vmem:[#allocation6 + $0x4ac] sm:$0xf]  ;;  %v9245_v42 = vld [vmem:[#allocation6 + $0x478] sm:$0xf0] }
 0x5aa   : > { %4873 = vmatpush.bf16.msrb.mxu1 %v9344_v63  ;;  %v9296_v5 = vor.u32 %v11004_v10, %v9293_v54  ;;  %v5781_v50 = vunpack.c.h.b16 %v5070_v41  ;;  %v11172_v10 = vld [vmem:[#allocation6 + $0x9ec] sm:$0xf]  ;;  %v9965_v54 = vld [vmem:[#allocation6 + $0xa18] sm:$0xf0] }
 0x5ab   : > { %v4559_v56 = vpop.f32.mrf.mxu2  ;;  %v9197_v35 = vld [vmem:[#allocation6 + $0x418] sm:$0xf0] }
 0x5ac   : > { %v4608_v38 = vpop.f32.mrf.mxu3  ;;  %v4560_v53 = vadd.f32 %v4559_v56, %v4511_v2  ;;  %v4464_v61 = vpop.f32.mrf.mxu0  ;;  %4972 = vmatpush.bf16.msrb.mxu3 %v10064_v16  ;;  %v5403_v2 = vunpack.c.l.b16 %v5070_v41 }
 0x5ae   : > { %v4609_v13 = vadd.f32 %v4608_v38, %v4560_v53  ;;  %4874 = vmatpush.bf16.msrb.mxu1 %v9296_v5 }
 0x5af   : > { %4659 = vmatmul.bf16.gmra.mxu0 %v12211_v51 }
 0x5b0   : > { %v4513_v3 = vpop.f32.mrf.mxu1  ;;  %v5076_v11 = vpack.c.bf16 %v4609_v13, %v12879_v9  ;;  %4757 = vmatmul.bf16.gmra.mxu2 %v12215_v55  ;;  %v10992_v9 = vld [vmem:[#allocation6 + $0x44c] sm:$0xf]  ;;  %4973 = vmatpush.bf16.msrb.mxu3 %v10016_v14  ;;  %v9917_v55 = vld [vmem:[#allocation6 + $0x9b8] sm:$0xf0] }
 0x5b1   : > { %4806 = vmatmul.bf16.gmra.mxu3 %v14257_v28  ;;  %v4514_v38 = vadd.f32 %v4513_v3, %v4464_v61  ;;  %v9248_v13 = vor.u32 %v10992_v9, %v9245_v42  ;;  %v10980_v3 = vld [vmem:[#allocation6 + $0x3ec] sm:$0xf] }
 0x5b2   : > { %v5404_v32 = vunpack.c.l.b16 %v5076_v11  ;;  %v5782_v56 = vunpack.c.h.b16 %v5076_v11  ;;  %v9968_v11 = vor.u32 %v11172_v10, %v9965_v54  ;;  %v9200_v5 = vor.u32 %v10980_v3, %v9197_v35 }
 0x5b3   : > { %4708 = vmatmul.bf16.gmra.mxu1 %v14258_v33  ;;  %v4562_v53 = vpop.f32.mrf.mxu2  ;;  %v11160_v33 = vld [vmem:[#allocation6 + $0x98c] sm:$0xf] }
 0x5b4   : > { %v4611_v63 = vpop.f32.mrf.mxu3  ;;  %v4466_v34 = vpop.f32.mrf.mxu0  ;;  %v12971_v16 = vpack.c.b16 %v5404_v32, %v5403_v2  ;;  %v12973_v41 = vpack.c.b16 %v5782_v56, %v5781_v50  ;;  %v4563_v28 = vadd.f32 %v4562_v53, %v4514_v38  ;;  %4875 = vmatpush.bf16.msrb.mxu1 %v9248_v13  ;;  %4974 = vmatpush.bf16.msrb.mxu3 %v9968_v11  ;;  %v10968_v50 = vld [vmem:[#allocation6 + $0x38c] sm:$0xf]  ;;  %v9149_v32 = vld [vmem:[#allocation6 + $0x3b8] sm:$0xf0] }
 0x5b5   : > { %v9920_v14 = vor.u32 %v11160_v33, %v9917_v55  ;;  %v9152_v38 = vor.u32 %v10968_v50, %v9149_v32  ;;  %v11148_v53 = vld [vmem:[#allocation6 + $0x92c] sm:$0xf]  ;;  %v9869_v13 = vld [vmem:[#allocation6 + $0x958] sm:$0xf0] }
 0x5b6   : > { %v4612_v51 = vadd.f32 %v4611_v63, %v4563_v28  ;;  %v9872_v54 = vor.u32 %v11148_v53, %v9869_v13  ;;  %v10956_v55 = vld [vmem:[#allocation6 + $0x32c] sm:$0xf]  ;;  %v9101_v28 = vld [vmem:[#allocation6 + $0x358] sm:$0xf0] }
 0x5b7   : > { %v9104_v63 = vor.u32 %v10956_v55, %v9101_v28 }
 0x5b8   : > { %v4515_v61 = vpop.f32.mrf.mxu1  ;;  %4876 = vmatpush.bf16.msrb.mxu1 %v9200_v5  ;;  %4975 = vmatpush.bf16.msrb.mxu3 %v9920_v14  ;;  %v5082_v10 = vpack.c.bf16 %v4612_v51, %v12885_v15 }
 0x5b9   : > { %v4516_v30 = vadd.f32 %v4515_v61, %v4466_v34 }
 0x5ba   : > { %v5405_v3 = vunpack.c.l.b16 %v5082_v10  ;;  %v5783_v35 = vunpack.c.h.b16 %v5082_v10 }
 0x5bb   : > { %v4564_v9 = vpop.f32.mrf.mxu2 }
 0x5bc   : > { %v4613_v2 = vpop.f32.mrf.mxu3  ;;  %v4565_v56 = vadd.f32 %v4564_v9, %v4516_v30  ;;  %v4469_v42 = vpop.f32.mrf.mxu0  ;;  %4877 = vmatpush.bf16.msrb.mxu1 %v9152_v38  ;;  %4976 = vmatpush.bf16.msrb.mxu3 %v9872_v54 }
 0x5be   : > { %v4614_v34 = vadd.f32 %v4613_v2, %v4565_v56 }
 0x5bf   : > { %4664 = vmatmul.bf16.gmra.mxu0 %v12231_v37 }
 0x5c0   : > { %v4518_v11 = vpop.f32.mrf.mxu1  ;;  %v5088_v33 = vpack.c.bf16 %v4614_v34, %v12887_v0  ;;  %4762 = vmatmul.bf16.gmra.mxu2 %v12235_v47  ;;  %4878 = vmatpush.bf16.msrb.mxu1 %v9104_v63 }
 0x5c1   : > { %v4519_v61 = vadd.f32 %v4518_v11, %v4469_v42  ;;  %4811 = vmatmul.bf16.gmra.mxu3 %v12237_v48 }
 0x5c2   : > { %v5406_v51 = vunpack.c.l.b16 %v5088_v33  ;;  %v5784_v15 = vunpack.c.h.b16 %v5088_v33 }
 0x5c3   : > { %4713 = vmatmul.bf16.gmra.mxu1 %v12239_v60  ;;  %v4567_v30 = vpop.f32.mrf.mxu2 }
 0x5c4   : > { %v4616_v5 = vpop.f32.mrf.mxu3  ;;  %v4471_v14 = vpop.f32.mrf.mxu0  ;;  %v12981_v9 = vpack.c.b16 %v5406_v51, %v5405_v3  ;;  %v12983_v0 = vpack.c.b16 %v5784_v15, %v5783_v35  ;;  %v4568_v2 = vadd.f32 %v4567_v30, %v4519_v61 }
 0x5c6   : > { %v4617_v56 = vadd.f32 %v4616_v5, %v4568_v2 }
 0x5c8   : > { %v4520_v50 = vpop.f32.mrf.mxu1  ;;  %v5094_v10 = vpack.c.bf16 %v4617_v56, %v12893_v8 }
 0x5c9   : > { %v4521_v32 = vadd.f32 %v4520_v50, %v4471_v14 }
 0x5ca   : > { %v5407_v55 = vunpack.c.l.b16 %v5094_v10  ;;  %v5785_v28 = vunpack.c.h.b16 %v5094_v10  ;;  %v14259_v10 = vld [vmem:[#allocation16_spill] sm:$0xff] }
 0x5cb   : > { %v4569_v42 = vpop.f32.mrf.mxu2 }
 0x5cc   : > { %v4618_v38 = vpop.f32.mrf.mxu3  ;;  %v4570_v53 = vadd.f32 %v4569_v42, %v4521_v32  ;;  %v4474_v13 = vpop.f32.mrf.mxu0 }
 0x5ce   : > { %v4619_v34 = vadd.f32 %v4618_v38, %v4570_v53 }
 0x5cf   : > { %4669 = vmatmul.bf16.gmra.mxu0 %v12251_v17 }
 0x5d0   : > { %v4523_v54 = vpop.f32.mrf.mxu1  ;;  %v5100_v11 = vpack.c.bf16 %v4619_v34, %v12895_v24  ;;  %4767 = vmatmul.bf16.gmra.mxu2 %v12255_v20 }
 0x5d1   : > { %4816 = vmatmul.bf16.gmra.mxu3 %v12257_v21  ;;  %v4524_v61 = vadd.f32 %v4523_v54, %v4474_v13  ;;  %v14260_v54 = vld [vmem:[#allocation17_spill] sm:$0xff] }
 0x5d2   : > { %v5408_v33 = vunpack.c.l.b16 %v5100_v11  ;;  %v5786_v63 = vunpack.c.h.b16 %v5100_v11 }
 0x5d3   : > { %4718 = vmatmul.bf16.gmra.mxu1 %v12259_v23  ;;  %v4572_v3 = vpop.f32.mrf.mxu2 }
 0x5d4   : > { %v4621_v35 = vpop.f32.mrf.mxu3  ;;  %v4476_v8 = vpop.f32.mrf.mxu0  ;;  %v5417_v51 = vpack.c.b16 %v5408_v33, %v5407_v55  ;;  %v5795_v15 = vpack.c.b16 %v5786_v63, %v5785_v28  ;;  %v4573_v30 = vadd.f32 %v4572_v3, %v4524_v61 }
 0x5d6   : > { %v4622_v24 = vadd.f32 %v4621_v35, %v4573_v30  ;;  %v14262_v30 = vld [vmem:[#allocation88_spill] sm:$0xff] }
 0x5d8   : > { %v4525_v5 = vpop.f32.mrf.mxu1  ;;  %v5106_v42 = vpack.c.bf16 %v4622_v24, %v12901_v59 }
 0x5d9   : > { %v4526_v14 = vadd.f32 %v4525_v5, %v4476_v8  ;;  %v14261_v8 = vld [vmem:[#allocation87_spill] sm:$0xff] }
 0x5da   : > { %v5409_v11 = vunpack.c.l.b16 %v5106_v42  ;;  %v5787_v55 = vunpack.c.h.b16 %v5106_v42 }
 0x5db   : > { %v4574_v2 = vpop.f32.mrf.mxu2 }
 0x5dc   : > { %v4623_v50 = vpop.f32.mrf.mxu3  ;;  %v4575_v32 = vadd.f32 %v4574_v2, %v4526_v14  ;;  %v4635_v56 = vpop.f32.mrf.mxu0 }
 0x5de   : > { %v4624_v38 = vadd.f32 %v4623_v50, %v4575_v32  ;;  %v14263_v32 = vld [vmem:[#allocation75_spill] sm:$0xff] }
 0x5df   : > { %4830 = vmatmul.bf16.vlgmr.msrb.gmra.mxu0 %v12112_v44 }
 0x5e0   : > { %v4684_v53 = vpop.f32.mrf.mxu1  ;;  %v5112_v13 = vpack.c.bf16 %v4624_v38, %v12903_v36  ;;  %4928 = vmatmul.bf16.vlgmr.msrb.gmra.mxu2 %v14234_v49  ;;  %6014 = vmatpush.bf16.xpose.msrb.mxu0 %v14259_v10 }
 0x5e1   : > { %v4685_v34 = vadd.f32 %v4684_v53, %v4635_v56  ;;  %6408 = vmatpush.bf16.xpose.msrb.mxu2 %v14260_v54  ;;  %4977 = vmatmul.bf16.vlgmr.msrb.gmra.mxu3 %v14235_v39 }
 0x5e2   : > { %v5410_v28 = vunpack.c.l.b16 %v5112_v13  ;;  %v5788_v33 = vunpack.c.h.b16 %v5112_v13  ;;  %v14267_v13 = vld [vmem:[#allocation84_spill] sm:$0xff] }
 0x5e3   : > { %4879 = vmatmul.bf16.vlgmr.msrb.gmra.mxu1 %v14236_v31  ;;  %v4733_v59 = vpop.f32.mrf.mxu2 }
 0x5e4   : > { %v4734_v44 = vadd.f32 %v4733_v59, %v4685_v34  ;;  %v4637_v63 = vpop.f32.mrf.mxu0  ;;  %v4782_v61 = vpop.f32.mrf.mxu3  ;;  %v5418_v36 = vpack.c.b16 %v5410_v28, %v5409_v11  ;;  %v5796_v3 = vpack.c.b16 %v5788_v33, %v5787_v55  ;;  %v14268_v34 = vld [vmem:[#allocation85_spill] sm:$0xff]  ;;  %v14270_v28 = vld [vmem:[#allocation83_spill] sm:$0xff]  ;;  %v14271_v59 = vld [vmem:[#allocation80_spill] sm:$0xff] }
 0x5e6   : > { %v12999_v49 = vadd.f32 %v4782_v61, %v4734_v44  ;;  %5427 = vmatpush.bf16.msra.mxu1 %v5418_v36  ;;  %5805 = vmatpush.bf16.msra.mxu3 %v5796_v3 }
 0x5e8   : > { %v4686_v35 = vpop.f32.mrf.mxu1  ;;  %6015 = vmatpush.bf16.xpose.msrb.mxu0 %v14261_v8  ;;  %v14274_v8 = vld [vmem:[#allocation79_spill] sm:$0xff] }
 0x5e9   : > { %v4687_v39 = vadd.f32 %v4686_v35, %v4637_v63  ;;  %6409 = vmatpush.bf16.xpose.msrb.mxu2 %v14262_v30  ;;  %v14272_v63 = vld [vmem:[#allocation81_spill] sm:$0xff] }
 0x5ea   : > { %5428 = vmatpush.bf16.msra.mxu1 %v5417_v51  ;;  %5806 = vmatpush.bf16.msra.mxu3 %v5795_v15  ;;  %v14264_v51 = vld [vmem:[#allocation86_spill] sm:$0xff]  ;;  %v14265_v15 = vld [vmem:[#allocation19_spill] sm:$0xff] }
 0x5eb   : > { %v4735_v5 = vpop.f32.mrf.mxu2 }
 0x5ec   : > { %v4736_v31 = vadd.f32 %v4735_v5, %v4687_v39  ;;  %v4640_v14 = vpop.f32.mrf.mxu0  ;;  %v4784_v24 = vpop.f32.mrf.mxu3 }
 0x5ee   : > { %v13003_v2 = vadd.f32 %v4784_v24, %v4736_v31  ;;  %5429 = vmatpush.bf16.msra.mxu1 %v12981_v9  ;;  %5807 = vmatpush.bf16.msra.mxu3 %v12983_v0  ;;  %v14266_v9 = vld [vmem:[#allocation20_spill] sm:$0xff] }
 0x5ef   : > { %4835 = vmatmul.bf16.gmra.mxu0 %v12131_v4 }
 0x5f0   : > { %v4689_v50 = vpop.f32.mrf.mxu1  ;;  %4933 = vmatmul.bf16.gmra.mxu2 %v12135_v7  ;;  %6016 = vmatpush.bf16.xpose.msrb.mxu0 %v14263_v32 }
 0x5f1   : > { %v4690_v56 = vadd.f32 %v4689_v50, %v4640_v14  ;;  %6410 = vmatpush.bf16.xpose.msrb.mxu2 %v14264_v51  ;;  %4982 = vmatmul.bf16.gmra.mxu3 %v14265_v15 }
 0x5f2   : > { %5430 = vmatpush.bf16.msra.mxu1 %v12971_v16  ;;  %5808 = vmatpush.bf16.msra.mxu3 %v12973_v41 }
 0x5f3   : > { %v4738_v42 = vpop.f32.mrf.mxu2  ;;  %4884 = vmatmul.bf16.gmra.mxu1 %v14266_v9  ;;  %v14277_v9 = vld [vmem:[#allocation21_spill] sm:$0xff] }
 0x5f4   : > { %v4739_v0 = vadd.f32 %v4738_v42, %v4690_v56  ;;  %v4642_v38 = vpop.f32.mrf.mxu0  ;;  %v4787_v4 = vpop.f32.mrf.mxu3 }
 0x5f6   : > { %v13015_v53 = vadd.f32 %v4787_v4, %v4739_v0  ;;  %5431 = vmatpush.bf16.msra.mxu1 %v12961_v29  ;;  %5809 = vmatpush.bf16.msra.mxu3 %v12963_v6  ;;  %v14269_v6 = vld [vmem:[#allocation82_spill] sm:$0xff] }
 0x5f8   : > { %v4691_v7 = vpop.f32.mrf.mxu1  ;;  %6017 = vmatpush.bf16.xpose.msrb.mxu0 %v14267_v13 }
 0x5f9   : > { %v4692_v10 = vadd.f32 %v4691_v7, %v4642_v38  ;;  %6411 = vmatpush.bf16.xpose.msrb.mxu2 %v14268_v34  ;;  %v14278_v38 = vld [vmem:[#allocation22_spill] sm:$0xff] }
 0x5fa   : > { %5432 = vmatpush.bf16.msra.mxu1 %v12949_v58  ;;  %5810 = vmatpush.bf16.msra.mxu3 %v12951_v12 }
 0x5fb   : > { %v4740_v16 = vpop.f32.mrf.mxu2 }
 0x5fc   : > { %v4741_v41 = vadd.f32 %v4740_v16, %v4692_v10  ;;  %v4645_v54 = vpop.f32.mrf.mxu0  ;;  %v4789_v11 = vpop.f32.mrf.mxu3 }
 0x5fe   : > { %v13023_v55 = vadd.f32 %v4789_v11, %v4741_v41  ;;  %5433 = vmatpush.bf16.msra.mxu1 %v12935_v52  ;;  %5811 = vmatpush.bf16.msra.mxu3 %v12937_v18 }
 0x5ff   : > { %4840 = vmatmul.bf16.gmra.mxu0 %v12151_v22 }
 0x600   : > { %v4694_v29 = vpop.f32.mrf.mxu1  ;;  %4938 = vmatmul.bf16.gmra.mxu2 %v12155_v25  ;;  %6018 = vmatpush.bf16.xpose.msrb.mxu0 %v14269_v6  ;;  %v14280_v6 = vld [vmem:[#allocation24_spill] sm:$0xff] }
 0x601   : > { %v4695_v58 = vadd.f32 %v4694_v29, %v4645_v54  ;;  %6412 = vmatpush.bf16.xpose.msrb.mxu2 %v14270_v28  ;;  %4987 = vmatmul.bf16.gmra.mxu3 %v12157_v26  ;;  %v14281_v28 = vld [vmem:[#allocation25_spill] sm:$0xff] }
 0x602   : > { %5434 = vmatpush.bf16.msra.mxu1 %v12921_v19  ;;  %5812 = vmatpush.bf16.msra.mxu3 %v12923_v57  ;;  %v14273_v57 = vld [vmem:[#allocation78_spill] sm:$0xff] }
 0x603   : > { %v4743_v12 = vpop.f32.mrf.mxu2  ;;  %4889 = vmatmul.bf16.gmra.mxu1 %v12159_v27 }
 0x604   : > { %v4744_v52 = vadd.f32 %v4743_v12, %v4695_v58  ;;  %v4647_v18 = vpop.f32.mrf.mxu0  ;;  %v4792_v22 = vpop.f32.mrf.mxu3 }
 0x606   : > { %v13035_v33 = vadd.f32 %v4792_v22, %v4744_v52  ;;  %v14282_v52 = vld [vmem:[#allocation26_spill] sm:$0xff] }
 0x608   : > { %v4696_v25 = vpop.f32.mrf.mxu1  ;;  %6019 = vmatpush.bf16.xpose.msrb.mxu0 %v14271_v59 }
 0x609   : > { %v4697_v44 = vadd.f32 %v4696_v25, %v4647_v18  ;;  %6413 = vmatpush.bf16.xpose.msrb.mxu2 %v14272_v63 }
 0x60b   : > { %v4745_v61 = vpop.f32.mrf.mxu2 }
 0x60c   : > { %v4746_v26 = vadd.f32 %v4745_v61, %v4697_v44  ;;  %v4650_v36 = vpop.f32.mrf.mxu0  ;;  %v4794_v19 = vpop.f32.mrf.mxu3 }
 0x60e   : > { %v13039_v3 = vadd.f32 %v4794_v19, %v4746_v26 }
 0x60f   : > { %4845 = vmatmul.bf16.gmra.mxu0 %v12171_v40  ;;  %v14275_v40 = vld [vmem:[#allocation76_spill] sm:$0xff] }
 0x610   : > { %v4699_v27 = vpop.f32.mrf.mxu1  ;;  %4943 = vmatmul.bf16.gmra.mxu2 %v12175_v43  ;;  %6020 = vmatpush.bf16.xpose.msrb.mxu0 %v14273_v57  ;;  %v14276_v43 = vld [vmem:[#allocation77_spill] sm:$0xff] }
 0x611   : > { %v4700_v35 = vadd.f32 %v4699_v27, %v4650_v36  ;;  %6414 = vmatpush.bf16.xpose.msrb.mxu2 %v14274_v8  ;;  %4992 = vmatmul.bf16.gmra.mxu3 %v12177_v45 }
 0x613   : > { %v4748_v39 = vpop.f32.mrf.mxu2  ;;  %4894 = vmatmul.bf16.gmra.mxu1 %v12179_v46 }
 0x614   : > { %v4749_v30 = vadd.f32 %v4748_v39, %v4700_v35  ;;  %v4652_v5 = vpop.f32.mrf.mxu0  ;;  %v4797_v31 = vpop.f32.mrf.mxu3 }
 0x616   : > { %v13047_v14 = vadd.f32 %v4797_v31, %v4749_v30 }
 0x618   : > { %v4701_v24 = vpop.f32.mrf.mxu1  ;;  %6021 = vmatpush.bf16.xpose.msrb.mxu0 %v14275_v40 }
 0x619   : > { %v4702_v50 = vadd.f32 %v4701_v24, %v4652_v5  ;;  %6415 = vmatpush.bf16.xpose.msrb.mxu2 %v14276_v43 }
 0x61b   : > { %v4750_v32 = vpop.f32.mrf.mxu2 }
 0x61c   : > { %v4751_v56 = vadd.f32 %v4750_v32, %v4702_v50  ;;  %v4655_v51 = vpop.f32.mrf.mxu0  ;;  %v4799_v15 = vpop.f32.mrf.mxu3 }
 0x61e   : > { %v13051_v42 = vadd.f32 %v4799_v15, %v4751_v56 }
 0x61f   : > { %4850 = vmatmul.bf16.gmra.mxu0 %v12191_v62 }
 0x620   : > { %v4704_v45 = vpop.f32.mrf.mxu1  ;;  %4948 = vmatmul.bf16.gmra.mxu2 %v12195_v1  ;;  %v14279_v1 = vld [vmem:[#allocation23_spill] sm:$0xff] }
 0x621   : > { %v4705_v46 = vadd.f32 %v4704_v45, %v4655_v51  ;;  %4997 = vmatmul.bf16.gmra.mxu3 %v14277_v9 }
 0x623   : > { %v4753_v0 = vpop.f32.mrf.mxu2  ;;  %4899 = vmatmul.bf16.gmra.mxu1 %v14278_v38 }
 0x624   : > { %v4754_v4 = vadd.f32 %v4753_v0, %v4705_v46  ;;  %v4657_v7 = vpop.f32.mrf.mxu0  ;;  %v4802_v13 = vpop.f32.mrf.mxu3 }
 0x626   : > { %v13057_v10 = vadd.f32 %v4802_v13, %v4754_v4 }
 0x628   : > { %v4706_v34 = vpop.f32.mrf.mxu1 }
 0x629   : > { %v4707_v16 = vadd.f32 %v4706_v34, %v4657_v7 }
 0x62b   : > { %v4755_v41 = vpop.f32.mrf.mxu2 }
 0x62c   : > { %v13059_v54 = vadd.f32 %v4755_v41, %v4707_v16  ;;  %v4660_v62 = vpop.f32.mrf.mxu0  ;;  %v13061_v11 = vpop.f32.mrf.mxu3 }
 0x62f   : > { %4855 = vmatmul.bf16.gmra.mxu0 %v14279_v1 }
 0x630   : > { %v4709_v29 = vpop.f32.mrf.mxu1  ;;  %4953 = vmatmul.bf16.gmra.mxu2 %v14280_v6 }
 0x631   : > { %v4710_v58 = vadd.f32 %v4709_v29, %v4660_v62  ;;  %5002 = vmatmul.bf16.gmra.mxu3 %v14281_v28 }
 0x633   : > { %v4758_v12 = vpop.f32.mrf.mxu2  ;;  %4904 = vmatmul.bf16.gmra.mxu1 %v14282_v52 }
 0x634   : > { %v4759_v18 = vadd.f32 %v4758_v12, %v4710_v58  ;;  %v4662_v22 = vpop.f32.mrf.mxu0  ;;  %v4807_v25 = vpop.f32.mrf.mxu3 }
 0x636   : > { %v13067_v59 = vadd.f32 %v4807_v25, %v4759_v18  ;;  %v14285_v18 = vld [vmem:[#allocation30_spill] sm:$0xff]  ;;  %v14286_v25 = vld [vmem:[#allocation31_spill] sm:$0xff] }
 0x638   : > { %v4711_v44 = vpop.f32.mrf.mxu1 }
 0x639   : > { %v4712_v63 = vadd.f32 %v4711_v44, %v4662_v22 }
 0x63b   : > { %v4760_v61 = vpop.f32.mrf.mxu2 }
 0x63c   : > { %v13069_v26 = vadd.f32 %v4760_v61, %v4712_v63  ;;  %v4665_v36 = vpop.f32.mrf.mxu0  ;;  %v13071_v19 = vpop.f32.mrf.mxu3 }
 0x63f   : > { %4860 = vmatmul.bf16.gmra.mxu0 %v12231_v37 }
 0x640   : > { %v4714_v27 = vpop.f32.mrf.mxu1  ;;  %4958 = vmatmul.bf16.gmra.mxu2 %v12235_v47 }
 0x641   : > { %v4715_v57 = vadd.f32 %v4714_v27, %v4665_v36  ;;  %5007 = vmatmul.bf16.gmra.mxu3 %v12237_v48 }
 0x643   : > { %v4763_v35 = vpop.f32.mrf.mxu2  ;;  %4909 = vmatmul.bf16.gmra.mxu1 %v12239_v60 }
 0x644   : > { %v4764_v8 = vadd.f32 %v4763_v35, %v4715_v57  ;;  %v4667_v39 = vpop.f32.mrf.mxu0  ;;  %v4812_v30 = vpop.f32.mrf.mxu3 }
 0x646   : > { %v13077_v5 = vadd.f32 %v4812_v30, %v4764_v8 }
 0x648   : > { %v4716_v31 = vpop.f32.mrf.mxu1 }
 0x649   : > { %v4717_v24 = vadd.f32 %v4716_v31, %v4667_v39 }
 0x64b   : > { %v4765_v40 = vpop.f32.mrf.mxu2 }
 0x64c   : > { %v13079_v50 = vadd.f32 %v4765_v40, %v4717_v24  ;;  %v4670_v37 = vpop.f32.mrf.mxu0  ;;  %v13081_v43 = vpop.f32.mrf.mxu3 }
 0x64f   : > { %4865 = vmatmul.bf16.gmra.mxu0 %v12251_v17 }
 0x650   : > { %v4719_v47 = vpop.f32.mrf.mxu1  ;;  %4963 = vmatmul.bf16.gmra.mxu2 %v12255_v20  ;;  %v14283_v20 = vld [vmem:[#allocation28_spill] sm:$0xff] }
 0x651   : > { %v4720_v48 = vadd.f32 %v4719_v47, %v4670_v37  ;;  %5012 = vmatmul.bf16.gmra.mxu3 %v12257_v21  ;;  %v14284_v21 = vld [vmem:[#allocation29_spill] sm:$0xff] }
 0x653   : > { %v4768_v60 = vpop.f32.mrf.mxu2  ;;  %4914 = vmatmul.bf16.gmra.mxu1 %v12259_v23 }
 0x654   : > { %v4769_v32 = vadd.f32 %v4768_v60, %v4720_v48  ;;  %v4672_v56 = vpop.f32.mrf.mxu0  ;;  %v4817_v51 = vpop.f32.mrf.mxu3 }
 0x656   : > { %v13087_v15 = vadd.f32 %v4817_v51, %v4769_v32  ;;  %v14287_v51 = vld [vmem:[#allocation32_spill] sm:$0xff] }
 0x658   : > { %v4721_v45 = vpop.f32.mrf.mxu1 }
 0x659   : > { %v4722_v46 = vadd.f32 %v4721_v45, %v4672_v56 }
 0x65b   : > { %v4770_v9 = vpop.f32.mrf.mxu2 }
 0x65c   : > { %v13089_v0 = vadd.f32 %v4770_v9, %v4722_v46  ;;  %v13091_v17 = vpop.f32.mrf.mxu3  ;;  %v4831_v38 = vpop.f32.mrf.mxu0  ;;  %v14288_v46 = vld [vmem:[#allocation33_spill] sm:$0xff] }
 0x65f   : > { %5218 = vmatmul.bf16.vlgmr.msra.gmra.mxu0 %v14283_v20 }
 0x660   : > { %v4880_v4 = vpop.f32.mrf.mxu1  ;;  %5612 = vmatmul.bf16.vlgmr.msra.gmra.mxu2 %v14284_v21 }
 0x661   : > { %v4881_v7 = vadd.f32 %v4880_v4, %v4831_v38 }
 0x663   : > { %v4929_v23 = vpop.f32.mrf.mxu2 }
 0x664   : > { %v4930_v13 = vadd.f32 %v4929_v23, %v4881_v7  ;;  %v4833_v34 = vpop.f32.mrf.mxu0  ;;  %v4978_v16 = vpop.f32.mrf.mxu3 }
 0x666   : > { %v4979_v41 = vadd.f32 %v4978_v16, %v4930_v13 }
 0x668   : > { %v4882_v62 = vpop.f32.mrf.mxu1  ;;  %v5023_v1 = vpack.c.bf16 %v4979_v41, %v12999_v49 }
 0x669   : > { %v4883_v29 = vadd.f32 %v4882_v62, %v4833_v34 }
 0x66a   : > { %v6199_v61 = vunpack.c.l.b16 %v5023_v1  ;;  %v6577_v36 = vunpack.c.h.b16 %v5023_v1 }
 0x66b   : > { %v4931_v6 = vpop.f32.mrf.mxu2 }
 0x66c   : > { %v4932_v58 = vadd.f32 %v4931_v6, %v4883_v29  ;;  %v4836_v28 = vpop.f32.mrf.mxu0  ;;  %v4980_v12 = vpop.f32.mrf.mxu3 }
 0x66e   : > { %v4981_v52 = vadd.f32 %v4980_v12, %v4932_v58 }
 0x66f   : > { %5223 = vmatmul.bf16.gmra.mxu0 %v14285_v18  ;;  %v14289_v18 = vld [vmem:[#allocation34_spill] sm:$0xff] }
 0x670   : > { %v5029_v22 = vpack.c.bf16 %v4981_v52, %v13003_v2  ;;  %5617 = vmatmul.bf16.gmra.mxu2 %v14286_v25  ;;  %v4885_v44 = vpop.f32.mrf.mxu1  ;;  %v14290_v25 = vld [vmem:[#allocation35_spill] sm:$0xff] }
 0x671   : > { %v4886_v63 = vadd.f32 %v4885_v44, %v4836_v28 }
 0x672   : > { %v6200_v27 = vunpack.c.l.b16 %v5029_v22  ;;  %v6578_v57 = vunpack.c.h.b16 %v5029_v22 }
 0x673   : > { %v4934_v35 = vpop.f32.mrf.mxu2 }
 0x674   : > { %v4935_v49 = vadd.f32 %v4934_v35, %v4886_v63  ;;  %v4838_v8 = vpop.f32.mrf.mxu0  ;;  %v4983_v39 = vpop.f32.mrf.mxu3  ;;  %v13099_v30 = vpack.c.b16 %v6200_v27, %v6199_v61  ;;  %v13101_v31 = vpack.c.b16 %v6578_v57, %v6577_v36 }
 0x676   : > { %v4984_v24 = vadd.f32 %v4983_v39, %v4935_v49 }
 0x678   : > { %v5035_v40 = vpack.c.bf16 %v4984_v24, %v13015_v53  ;;  %v4887_v2 = vpop.f32.mrf.mxu1 }
 0x679   : > { %v4888_v37 = vadd.f32 %v4887_v2, %v4838_v8 }
 0x67a   : > { %v6201_v20 = vunpack.c.l.b16 %v5035_v40  ;;  %v6579_v4 = vunpack.c.h.b16 %v5035_v40 }
 0x67b   : > { %v4936_v47 = vpop.f32.mrf.mxu2 }
 0x67c   : > { %v4937_v48 = vadd.f32 %v4936_v47, %v4888_v37  ;;  %v4841_v60 = vpop.f32.mrf.mxu0  ;;  %v4985_v32 = vpop.f32.mrf.mxu3 }
 0x67e   : > { %v4986_v56 = vadd.f32 %v4985_v32, %v4937_v48 }
 0x67f   : > { %5228 = vmatmul.bf16.gmra.mxu0 %v14287_v51  ;;  %v14291_v51 = vld [vmem:[#allocation36_spill] sm:$0xff] }
 0x680   : > { %v5041_v45 = vpack.c.bf16 %v4986_v56, %v13023_v55  ;;  %5622 = vmatmul.bf16.gmra.mxu2 %v14288_v46  ;;  %v4890_v9 = vpop.f32.mrf.mxu1  ;;  %v14292_v46 = vld [vmem:[#allocation37_spill] sm:$0xff] }
 0x681   : > { %v4891_v38 = vadd.f32 %v4890_v9, %v4841_v60 }
 0x682   : > { %v6202_v21 = vunpack.c.l.b16 %v5041_v45  ;;  %v6580_v7 = vunpack.c.h.b16 %v5041_v45 }
 0x683   : > { %v4939_v53 = vpop.f32.mrf.mxu2 }
 0x684   : > { %v4940_v23 = vadd.f32 %v4939_v53, %v4891_v38  ;;  %v4843_v13 = vpop.f32.mrf.mxu0  ;;  %v4988_v34 = vpop.f32.mrf.mxu3  ;;  %v13107_v16 = vpack.c.b16 %v6202_v21, %v6201_v20  ;;  %v13109_v41 = vpack.c.b16 %v6580_v7, %v6579_v4 }
 0x686   : > { %v4989_v62 = vadd.f32 %v4988_v34, %v4940_v23 }
 0x688   : > { %v5047_v1 = vpack.c.bf16 %v4989_v62, %v13035_v33  ;;  %v4892_v55 = vpop.f32.mrf.mxu1 }
 0x689   : > { %v4893_v29 = vadd.f32 %v4892_v55, %v4843_v13 }
 0x68a   : > { %v6203_v61 = vunpack.c.l.b16 %v5047_v1  ;;  %v6581_v36 = vunpack.c.h.b16 %v5047_v1 }
 0x68b   : > { %v4941_v6 = vpop.f32.mrf.mxu2 }
 0x68c   : > { %v4942_v58 = vadd.f32 %v4941_v6, %v4893_v29  ;;  %v4846_v28 = vpop.f32.mrf.mxu0  ;;  %v4990_v12 = vpop.f32.mrf.mxu3 }
 0x68e   : > { %v4991_v52 = vadd.f32 %v4990_v12, %v4942_v58 }
 0x68f   : > { %5233 = vmatmul.bf16.gmra.mxu0 %v14289_v18 }
 0x690   : > { %v5053_v22 = vpack.c.bf16 %v4991_v52, %v13039_v3  ;;  %5627 = vmatmul.bf16.gmra.mxu2 %v14290_v25  ;;  %v4895_v44 = vpop.f32.mrf.mxu1  ;;  %v4805_v52 = vadd.f32 %v13061_v11, %v13059_v54 }
 0x691   : > { %v4896_v63 = vadd.f32 %v4895_v44, %v4846_v28  ;;  %v14294_v44 = vld [vmem:[#allocation38_spill] sm:$0xff] }
 0x692   : > { %v6204_v27 = vunpack.c.l.b16 %v5053_v22  ;;  %v6582_v57 = vunpack.c.h.b16 %v5053_v22  ;;  %v14293_v22 = vld [vmem:[#allocation27_spill] sm:$0xff] }
 0x693   : > { %v4944_v33 = vpop.f32.mrf.mxu2 }
 0x694   : > { %v4945_v35 = vadd.f32 %v4944_v33, %v4896_v63  ;;  %v4848_v49 = vpop.f32.mrf.mxu0  ;;  %v4993_v8 = vpop.f32.mrf.mxu3  ;;  %v13115_v39 = vpack.c.b16 %v6204_v27, %v6203_v61  ;;  %v13117_v24 = vpack.c.b16 %v6582_v57, %v6581_v36 }
 0x696   : > { %v4994_v40 = vadd.f32 %v4993_v8, %v4945_v35 }
 0x698   : > { %v5059_v2 = vpack.c.bf16 %v4994_v40, %v13047_v14  ;;  %v4897_v3 = vpop.f32.mrf.mxu1 }
 0x699   : > { %v4898_v37 = vadd.f32 %v4897_v3, %v4848_v49 }
 0x69a   : > { %v6205_v20 = vunpack.c.l.b16 %v5059_v2  ;;  %v6583_v4 = vunpack.c.h.b16 %v5059_v2 }
 0x69b   : > { %v4946_v47 = vpop.f32.mrf.mxu2 }
 0x69c   : > { %v4947_v48 = vadd.f32 %v4946_v47, %v4898_v37  ;;  %v4851_v60 = vpop.f32.mrf.mxu0  ;;  %v4995_v32 = vpop.f32.mrf.mxu3 }
 0x69e   : > { %v4996_v56 = vadd.f32 %v4995_v32, %v4947_v48  ;;  %v4810_v32 = vadd.f32 %v13071_v19, %v13069_v26 }
 0x69f   : > { %5238 = vmatmul.bf16.gmra.mxu0 %v14291_v51 }
 0x6a0   : > { %v5065_v45 = vpack.c.bf16 %v4996_v56, %v13051_v42  ;;  %5632 = vmatmul.bf16.gmra.mxu2 %v14292_v46  ;;  %v4900_v9 = vpop.f32.mrf.mxu1 }
 0x6a1   : > { %v4901_v38 = vadd.f32 %v4900_v9, %v4851_v60  ;;  %v14296_v9 = vld [vmem:[#allocation40_spill] sm:$0xff] }
 0x6a2   : > { %v6206_v21 = vunpack.c.l.b16 %v5065_v45  ;;  %v6584_v7 = vunpack.c.h.b16 %v5065_v45  ;;  %v14295_v45 = vld [vmem:[#allocation39_spill] sm:$0xff] }
 0x6a3   : > { %v4949_v14 = vpop.f32.mrf.mxu2 }
 0x6a4   : > { %v4950_v53 = vadd.f32 %v4949_v14, %v4901_v38  ;;  %v4853_v23 = vpop.f32.mrf.mxu0  ;;  %v4998_v13 = vpop.f32.mrf.mxu3  ;;  %v13123_v34 = vpack.c.b16 %v6206_v21, %v6205_v20  ;;  %v13125_v62 = vpack.c.b16 %v6584_v7, %v6583_v4 }
 0x6a6   : > { %v4999_v1 = vadd.f32 %v4998_v13, %v4950_v53 }
 0x6a8   : > { %v5071_v55 = vpack.c.bf16 %v4999_v1, %v13057_v10  ;;  %v4902_v42 = vpop.f32.mrf.mxu1 }
 0x6a9   : > { %v4903_v29 = vadd.f32 %v4902_v42, %v4853_v23 }
 0x6aa   : > { %v6207_v61 = vunpack.c.l.b16 %v5071_v55  ;;  %v6585_v36 = vunpack.c.h.b16 %v5071_v55 }
 0x6ab   : > { %v4951_v6 = vpop.f32.mrf.mxu2 }
 0x6ac   : > { %v4952_v58 = vadd.f32 %v4951_v6, %v4903_v29  ;;  %v4856_v28 = vpop.f32.mrf.mxu0  ;;  %v5000_v12 = vpop.f32.mrf.mxu3 }
 0x6ae   : > { %v5001_v18 = vadd.f32 %v5000_v12, %v4952_v58 }
 0x6af   : > { %5243 = vmatmul.bf16.gmra.mxu0 %v14293_v22  ;;  %v14297_v22 = vld [vmem:[#allocation41_spill] sm:$0xff] }
 0x6b0   : > { %v5077_v25 = vpack.c.bf16 %v5001_v18, %v4805_v52  ;;  %5637 = vmatmul.bf16.gmra.mxu2 %v14294_v44  ;;  %v4905_v63 = vpop.f32.mrf.mxu1  ;;  %v4815_v52 = vadd.f32 %v13081_v43, %v13079_v50  ;;  %v14298_v44 = vld [vmem:[#allocation42_spill] sm:$0xff] }
 0x6b1   : > { %v4906_v57 = vadd.f32 %v4905_v63, %v4856_v28 }
 0x6b2   : > { %v6208_v27 = vunpack.c.l.b16 %v5077_v25  ;;  %v6586_v10 = vunpack.c.h.b16 %v5077_v25 }
 0x6b3   : > { %v4954_v33 = vpop.f32.mrf.mxu2 }
 0x6b4   : > { %v4858_v35 = vpop.f32.mrf.mxu0  ;;  %v5003_v49 = vpop.f32.mrf.mxu3  ;;  %v13132_v8 = vpack.c.b16 %v6208_v27, %v6207_v61  ;;  %v13134_v40 = vpack.c.b16 %v6586_v10, %v6585_v36  ;;  %v4955_v54 = vadd.f32 %v4954_v33, %v4906_v57 }
 0x6b6   : > { %v5004_v3 = vadd.f32 %v5003_v49, %v4955_v54 }
 0x6b8   : > { %v4907_v11 = vpop.f32.mrf.mxu1  ;;  %v5083_v56 = vpack.c.bf16 %v5004_v3, %v13067_v59 }
 0x6b9   : > { %v4908_v2 = vadd.f32 %v4907_v11, %v4858_v35 }
 0x6ba   : > { %v6209_v4 = vunpack.c.l.b16 %v5083_v56  ;;  %v6587_v21 = vunpack.c.h.b16 %v5083_v56 }
 0x6bb   : > { %v4956_v37 = vpop.f32.mrf.mxu2 }
 0x6bc   : > { %v4957_v47 = vadd.f32 %v4956_v37, %v4908_v2  ;;  %v4861_v48 = vpop.f32.mrf.mxu0  ;;  %v5005_v60 = vpop.f32.mrf.mxu3 }
 0x6be   : > { %v5006_v51 = vadd.f32 %v5005_v60, %v4957_v47  ;;  %v4820_v60 = vadd.f32 %v13091_v17, %v13089_v0 }
 0x6bf   : > { %5248 = vmatmul.bf16.gmra.mxu0 %v14295_v45 }
 0x6c0   : > { %v5089_v46 = vpack.c.bf16 %v5006_v51, %v4810_v32  ;;  %5642 = vmatmul.bf16.gmra.mxu2 %v14296_v9  ;;  %v4910_v38 = vpop.f32.mrf.mxu1  ;;  %v14299_v51 = vld [vmem:[#allocation44_spill] sm:$0xff] }
 0x6c1   : > { %v4911_v20 = vadd.f32 %v4910_v38, %v4861_v48 }
 0x6c2   : > { %v6210_v7 = vunpack.c.l.b16 %v5089_v46  ;;  %v6588_v14 = vunpack.c.h.b16 %v5089_v46  ;;  %v14300_v46 = vld [vmem:[#allocation45_spill] sm:$0xff] }
 0x6c3   : > { %v4959_v53 = vpop.f32.mrf.mxu2 }
 0x6c4   : > { %v4863_v23 = vpop.f32.mrf.mxu0  ;;  %v5008_v13 = vpop.f32.mrf.mxu3  ;;  %v6220_v1 = vpack.c.b16 %v6210_v7, %v6209_v4  ;;  %v6598_v55 = vpack.c.b16 %v6588_v14, %v6587_v21  ;;  %v4960_v26 = vadd.f32 %v4959_v53, %v4911_v20  ;;  %v14301_v53 = vld [vmem:[#allocation46_spill] sm:$0xff] }
 0x6c6   : > { %v5009_v59 = vadd.f32 %v5008_v13, %v4960_v26 }
 0x6c8   : > { %v4912_v19 = vpop.f32.mrf.mxu1  ;;  %v5095_v12 = vpack.c.bf16 %v5009_v59, %v13077_v5 }
 0x6c9   : > { %v4913_v42 = vadd.f32 %v4912_v19, %v4863_v23  ;;  %v14302_v23 = vld [vmem:[#allocation47_spill] sm:$0xff] }
 0x6ca   : > { %v6211_v61 = vunpack.c.l.b16 %v5095_v12  ;;  %v6589_v36 = vunpack.c.h.b16 %v5095_v12 }
 0x6cb   : > { %v4961_v29 = vpop.f32.mrf.mxu2 }
 0x6cc   : > { %v4962_v6 = vadd.f32 %v4961_v29, %v4913_v42  ;;  %v4866_v58 = vpop.f32.mrf.mxu0  ;;  %v5010_v28 = vpop.f32.mrf.mxu3  ;;  %v14307_v42 = vld [vmem:[#allocation52_spill] sm:$0xff]  ;;  %v14308_v29 = vld [vmem:[#allocation53_spill] sm:$0xff] }
 0x6ce   : > { %v5011_v18 = vadd.f32 %v5010_v28, %v4962_v6 }
 0x6cf   : > { %5253 = vmatmul.bf16.gmra.mxu0 %v14297_v22 }
 0x6d0   : > { %v5101_v25 = vpack.c.bf16 %v5011_v18, %v4815_v52  ;;  %5647 = vmatmul.bf16.gmra.mxu2 %v14298_v44  ;;  %v4915_v63 = vpop.f32.mrf.mxu1  ;;  %v14309_v52 = vld [vmem:[#allocation43_spill] sm:$0xff]  ;;  %v14310_v18 = vld [vmem:[#allocation54_spill] sm:$0xff] }
 0x6d1   : > { %v4916_v57 = vadd.f32 %v4915_v63, %v4866_v58 }
 0x6d2   : > { %v6212_v27 = vunpack.c.l.b16 %v5101_v25  ;;  %v6590_v10 = vunpack.c.h.b16 %v5101_v25 }
 0x6d3   : > { %v4964_v33 = vpop.f32.mrf.mxu2 }
 0x6d4   : > { %v4868_v35 = vpop.f32.mrf.mxu0  ;;  %v5013_v49 = vpop.f32.mrf.mxu3  ;;  %v6221_v54 = vpack.c.b16 %v6212_v27, %v6211_v61  ;;  %v6599_v5 = vpack.c.b16 %v6590_v10, %v6589_v36  ;;  %v4965_v11 = vadd.f32 %v4964_v33, %v4916_v57  ;;  %v14311_v61 = vld [vmem:[#allocation55_spill] sm:$0xff]  ;;  %v14312_v36 = vld [vmem:[#allocation56_spill] sm:$0xff] }
 0x6d6   : > { %v5014_v43 = vadd.f32 %v5013_v49, %v4965_v11  ;;  %v14314_v49 = vld [vmem:[#allocation58_spill] sm:$0xff] }
 0x6d8   : > { %v4917_v2 = vpop.f32.mrf.mxu1  ;;  %v5107_v32 = vpack.c.bf16 %v5014_v43, %v13087_v15 }
 0x6d9   : > { %v4918_v50 = vadd.f32 %v4917_v2, %v4868_v35  ;;  %v14313_v35 = vld [vmem:[#allocation57_spill] sm:$0xff] }
 0x6da   : > { %v6213_v9 = vunpack.c.l.b16 %v5107_v32  ;;  %v6591_v38 = vunpack.c.h.b16 %v5107_v32 }
 0x6db   : > { %v4966_v3 = vpop.f32.mrf.mxu2 }
 0x6dc   : > { %v4967_v37 = vadd.f32 %v4966_v3, %v4918_v50  ;;  %v5015_v47 = vpop.f32.mrf.mxu3  ;;  %v13146_v48 = vpop.f32.mrf.mxu0 }
 0x6dd   : > { %5259 = vmax.xlane.f32.xlu1 %v13146_v48 }
 0x6de   : > { %v5016_v56 = vadd.f32 %v5015_v47, %v4967_v37 }
 0x6df   : > { %6022 = vmatmul.bf16.vlgmr.msrb.gmra.mxu0 %v14299_v51 }
 0x6e0   : > { %v5113_v45 = vpack.c.bf16 %v5016_v56, %v4820_v60  ;;  %6416 = vmatmul.bf16.vlgmr.msrb.gmra.mxu2 %v14300_v46 }
 0x6e2   : > { %v6214_v20 = vunpack.c.l.b16 %v5113_v45  ;;  %v6592_v4 = vunpack.c.h.b16 %v5113_v45 }
 0x6e3   : > { %v13154_v21 = vpop.f32.mrf.mxu2 }
 0x6e4   : > { %5653 = vmax.xlane.f32.xlu0 %v13154_v21  ;;  %v13157_v7 = vpop.f32.mrf.mxu0  ;;  %v6222_v14 = vpack.c.b16 %v6214_v20, %v6213_v9  ;;  %v6600_v0 = vpack.c.b16 %v6592_v4, %v6591_v38 }
 0x6e5   : > { %5261 = vmax.xlane.f32.xlu1 %v13157_v7 }
 0x6e6   : > { %6231 = vmatpush.bf16.msrb.mxu1 %v6222_v14  ;;  %6609 = vmatpush.bf16.msrb.mxu3 %v6600_v0 }
 0x6ea   : > { %6232 = vmatpush.bf16.msrb.mxu1 %v6221_v54  ;;  %6610 = vmatpush.bf16.msrb.mxu3 %v6599_v5 }
 0x6eb   : > { %v13160_v15 = vpop.f32.mrf.mxu2 }
 0x6ec   : > { %5655 = vmax.xlane.f32.xlu0 %v13160_v15  ;;  %v13163_v17 = vpop.f32.mrf.mxu0 }
 0x6ee   : > { %6233 = vmatpush.bf16.msrb.mxu1 %v6220_v1  ;;  %6611 = vmatpush.bf16.msrb.mxu3 %v6598_v55  ;;  %v14303_v1 = vld [vmem:[#allocation48_spill] sm:$0xff]  ;;  %v14306_v55 = vld [vmem:[#allocation51_spill] sm:$0xff] }
 0x6ef   : > { %6027 = vmatmul.bf16.gmra.mxu0 %v14301_v53 }
 0x6f0   : > { %6421 = vmatmul.bf16.gmra.mxu2 %v14302_v23 }
 0x6f2   : > { %6234 = vmatpush.bf16.msrb.mxu1 %v13132_v8  ;;  %6612 = vmatpush.bf16.msrb.mxu3 %v13134_v40 }
 0x6f3   : > { %v13169_v13 = vpop.f32.mrf.mxu2 }
 0x6f4   : > { %5657 = vmax.xlane.f32.xlu2 %v13169_v13  ;;  %5263 = vmax.xlane.f32.xlu0 %v13163_v17  ;;  %v13173_v26 = vpop.f32.mrf.mxu0 }
 0x6f5   : > { %5265 = vmax.xlane.f32.xlu1 %v13173_v26 }
 0x6f6   : > { %6235 = vmatpush.bf16.msrb.mxu1 %v13123_v34  ;;  %6613 = vmatpush.bf16.msrb.mxu3 %v13125_v62  ;;  %v14304_v34 = vld [vmem:[#allocation49_spill] sm:$0xff] }
 0x6fa   : > { %6236 = vmatpush.bf16.msrb.mxu1 %v13115_v39  ;;  %6614 = vmatpush.bf16.msrb.mxu3 %v13117_v24 }
 0x6fb   : > { %v13180_v8 = vpop.f32.mrf.mxu2 }
 0x6fc   : > { %5659 = vmax.xlane.f32.xlu2 %v13180_v8  ;;  %v13183_v40 = vpop.f32.mrf.mxu0 }
 0x6fd   : > { %5267 = vmax.xlane.f32.xlu1 %v13183_v40 }
 0x6fe   : > { %6237 = vmatpush.bf16.msrb.mxu1 %v13107_v16  ;;  %6615 = vmatpush.bf16.msrb.mxu3 %v13109_v41  ;;  %v14305_v41 = vld [vmem:[#allocation50_spill] sm:$0xff] }
 0x6ff   : > { %6032 = vmatmul.bf16.gmra.mxu0 %v14303_v1 }
 0x700   : > { %6426 = vmatmul.bf16.gmra.mxu2 %v14304_v34 }
 0x702   : > { %6238 = vmatpush.bf16.msrb.mxu1 %v13099_v30  ;;  %6616 = vmatpush.bf16.msrb.mxu3 %v13101_v31 }
 0x703   : > { %v13192_v39 = vpop.f32.mrf.mxu2 }
 0x704   : > { %5661 = vmax.xlane.f32.xlu2 %v13192_v39  ;;  %v13195_v24 = vpop.f32.mrf.mxu0 }
 0x70b   : > { %v13197_v62 = vpop.f32.mrf.mxu2 }
 0x70c   : > { %5663 = vmax.xlane.f32.xlu0 %v13197_v62  ;;  %5269 = vmax.xlane.f32.xlu2 %v13195_v24  ;;  %v13201_v16 = vpop.f32.mrf.mxu0 }
 0x70f   : > { %6037 = vmatmul.bf16.gmra.mxu0 %v14305_v41 }
 0x710   : > { %6431 = vmatmul.bf16.gmra.mxu2 %v14306_v55 }
 0x713   : > { %v13205_v30 = vpop.f32.mrf.mxu2 }
 0x714   : > { %5665 = vmax.xlane.f32.xlu0 %v13205_v30  ;;  %5271 = vmax.xlane.f32.xlu2 %v13201_v16  ;;  %v13209_v31 = vpop.f32.mrf.mxu0 }
 0x71b   : > { %v13211_v19 = vpop.f32.mrf.mxu2 }
 0x71c   : > { %5667 = vmax.xlane.f32.xlu1 %v13211_v19  ;;  %5273 = vmax.xlane.f32.xlu0 %v13209_v31  ;;  %v13215_v59 = vpop.f32.mrf.mxu0 }
 0x71f   : > { %6042 = vmatmul.bf16.gmra.mxu0 %v14307_v42 }
 0x720   : > { %6436 = vmatmul.bf16.gmra.mxu2 %v14308_v29 }
 0x723   : > { %v13219_v6 = vpop.f32.mrf.mxu2 }
 0x724   : > { %5669 = vmax.xlane.f32.xlu1 %v13219_v6  ;;  %5275 = vmax.xlane.f32.xlu0 %v13215_v59  ;;  %v13223_v58 = vpop.f32.mrf.mxu0 }
 0x72b   : > { %v13225_v28 = vpop.f32.mrf.mxu2 }
 0x72c   : > { %5671 = vmax.xlane.f32.xlu2 %v13225_v28  ;;  %5277 = vmax.xlane.f32.xlu1 %v13223_v58  ;;  %v13229_v12 = vpop.f32.mrf.mxu0 }
 0x72f   : > { %6047 = vmatmul.bf16.gmra.mxu0 %v14309_v52 }
 0x730   : > { %6441 = vmatmul.bf16.gmra.mxu2 %v14310_v18 }
 0x733   : > { %v13233_v22 = vpop.f32.mrf.mxu2 }
 0x734   : > { %5673 = vmax.xlane.f32.xlu2 %v13233_v22  ;;  %5279 = vmax.xlane.f32.xlu1 %v13229_v12  ;;  %v13237_v25 = vpop.f32.mrf.mxu0 }
 0x73b   : > { %v13239_v44 = vpop.f32.mrf.mxu2 }
 0x73c   : > { %5675 = vmax.xlane.f32.xlu0 %v13239_v44  ;;  %5281 = vmax.xlane.f32.xlu2 %v13237_v25  ;;  %v13243_v63 = vpop.f32.mrf.mxu0 }
 0x73f   : > { %6052 = vmatmul.bf16.gmra.mxu0 %v14311_v61 }
 0x740   : > { %6446 = vmatmul.bf16.gmra.mxu2 %v14312_v36 }
 0x743   : > { %v13247_v27 = vpop.f32.mrf.mxu2 }
 0x744   : > { %5677 = vmax.xlane.f32.xlu0 %v13247_v27  ;;  %5283 = vmax.xlane.f32.xlu2 %v13243_v63  ;;  %v13251_v10 = vpop.f32.mrf.mxu0 }
 0x74b   : > { %v13253_v57 = vpop.f32.mrf.mxu2 }
 0x74c   : > { %5679 = vmax.xlane.f32.xlu1 %v13253_v57  ;;  %5285 = vmax.xlane.f32.xlu0 %v13251_v10  ;;  %v13257_v33 = vpop.f32.mrf.mxu0 }
 0x74f   : > { %6057 = vmatmul.bf16.gmra.mxu0 %v14313_v35 }
 0x750   : > { %6451 = vmatmul.bf16.gmra.mxu2 %v14314_v49  ;;  %v5260_v54 = vpop.xlane.xlu1 %5259 }
 0x751   : > { %v5291_v11 = vsub.f32 %v13146_v48, %v5260_v54 }
 0x753   : > { %v13261_v5 = vpop.f32.mrf.mxu2  ;;  %v5307_v43 = vmul.f32 1.442695, %v5291_v11 }
 0x754   : > { %5681 = vmax.xlane.f32.xlu1 %v13261_v5  ;;  %5287 = vmax.xlane.f32.xlu0 %v13257_v33  ;;  %v13266_v2 = vpop.f32.mrf.mxu0 }
 0x755   : > { %11485 = vpow2.f32 %v5307_v43 }
 0x757   : > { %v5654_v50 = vpop.xlane.xlu0 %5653 }
 0x758   : > { %v5262_v3 = vpop.xlane.xlu1 %5261  ;;  %v5685_v47 = vsub.f32 %v13154_v21, %v5654_v50 }
 0x759   : > { %v5292_v37 = vsub.f32 %v13157_v7, %v5262_v3 }
 0x75a   : > { %v5701_v56 = vmul.f32 1.442695, %v5685_v47 }
 0x75b   : > { %v5309_v60 = vmul.f32 1.442695, %v5292_v37  ;;  %v13270_v32 = vpop.f32.mrf.mxu2  ;;  %v13277_v46 = vpop.eup %11485 }
 0x75c   : > { %5683 = vmax.xlane.f32.xlu2 %v13270_v32  ;;  %5289 = vmax.xlane.f32.xlu1 %v13266_v2  ;;  %v13274_v48 = vpop.f32.mrf.mxu0 }
 0x75d   : > { %11487 = vpow2.f32 %v5309_v60 }
 0x75e   : > { %11489 = vpow2.f32 %v5701_v56 }
 0x75f   : > { %v5656_v51 = vpop.xlane.xlu0 %5655 }
 0x760   : > { %v5686_v45 = vsub.f32 %v13160_v15, %v5656_v51 }
 0x762   : > { %v5703_v9 = vmul.f32 1.442695, %v5686_v45 }
 0x763   : > { %v13279_v38 = vpop.eup %11487  ;;  %v13281_v20 = vpop.f32.mrf.mxu2 }
 0x764   : > { %v5371_v4 = vpack.c.bf16 %v13279_v38, %v13277_v46  ;;  %11491 = vpow2.f32 %v5703_v9  ;;  %6457 = vmax.xlane.f32.xlu2 %v13281_v20  ;;  %6063 = vmax.xlane.f32.xlu1 %v13274_v48  ;;  %v13287_v21 = vpop.f32.mrf.mxu0  ;;  %v13290_v53 = vpop.eup %11489 }
 0x766   : > { %5435 = vmatmul.bf16.vlgmr.msra.gmra.mxu1 %v5371_v4 }
 0x767   : > { %v5658_v7 = vpop.xlane.xlu2 %5657  ;;  %v5264_v14 = vpop.xlane.xlu0 %5263 }
 0x768   : > { %v5293_v0 = vsub.f32 %v13163_v17, %v5264_v14  ;;  %v5266_v15 = vpop.xlane.xlu1 %5265  ;;  %v5687_v55 = vsub.f32 %v13169_v13, %v5658_v7 }
 0x769   : > { %v5294_v23 = vsub.f32 %v13173_v26, %v5266_v15 }
 0x76a   : > { %v13293_v1 = vpop.eup %11491  ;;  %v5311_v34 = vmul.f32 1.442695, %v5293_v0  ;;  %v5705_v26 = vmul.f32 1.442695, %v5687_v55 }
 0x76b   : > { %v5765_v41 = vpack.c.bf16 %v13293_v1, %v13290_v53  ;;  %v5313_v42 = vmul.f32 1.442695, %v5294_v23  ;;  %v13298_v29 = vpop.f32.mrf.mxu2 }
 0x76c   : > { %6459 = vmax.xlane.f32.xlu0 %v13298_v29  ;;  %6065 = vmax.xlane.f32.xlu2 %v13287_v21  ;;  %v13302_v17 = vpop.f32.mrf.mxu0  ;;  %11493 = vpow2.f32 %v5311_v34 }
 0x76d   : > { %5813 = vmatmul.bf16.vlgmr.msra.gmra.mxu3 %v5765_v41  ;;  %11495 = vpow2.f32 %v5313_v42 }
 0x76e   : > { %11497 = vpow2.f32 %v5705_v26 }
 0x76f   : > { %v5660_v52 = vpop.xlane.xlu2 %5659 }
 0x770   : > { %v5688_v18 = vsub.f32 %v13180_v8, %v5660_v52  ;;  %v5268_v11 = vpop.xlane.xlu1 %5267 }
 0x771   : > { %v5295_v3 = vsub.f32 %v13183_v40, %v5268_v11 }
 0x772   : > { %v5707_v61 = vmul.f32 1.442695, %v5688_v18  ;;  %v13305_v36 = vpop.eup %11493 }
 0x773   : > { %v13307_v13 = vpop.f32.mrf.mxu2  ;;  %v13309_v35 = vpop.eup %11495  ;;  %v5315_v51 = vmul.f32 1.442695, %v5295_v3 }
 0x774   : > { %11499 = vpow2.f32 %v5707_v61  ;;  %6461 = vmax.xlane.f32.xlu0 %v13307_v13  ;;  %6067 = vmax.xlane.f32.xlu2 %v13302_v17  ;;  %v13313_v49 = vpop.f32.mrf.mxu0  ;;  %v5372_v54 = vpack.c.bf16 %v13309_v35, %v13305_v36  ;;  %v13317_v50 = vpop.eup %11497 }
 0x775   : > { %11501 = vpow2.f32 %v5315_v51 }
 0x776   : > { %5440 = vmatmul.bf16.gmra.mxu1 %v5372_v54 }
 0x777   : > { %v5662_v8 = vpop.xlane.xlu2 %5661 }
 0x778   : > { %v5689_v37 = vsub.f32 %v13192_v39, %v5662_v8 }
 0x77a   : > { %v13319_v43 = vpop.eup %11499  ;;  %v5709_v45 = vmul.f32 1.442695, %v5689_v37 }
 0x77b   : > { %v13323_v47 = vpop.f32.mrf.mxu2  ;;  %v5766_v60 = vpack.c.bf16 %v13319_v43, %v13317_v50  ;;  %v13339_v34 = vpop.eup %11501 }
 0x77c   : > { %6463 = vmax.xlane.f32.xlu1 %v13323_v47  ;;  %6069 = vmax.xlane.f32.xlu0 %v13313_v49  ;;  %v13329_v56 = vpop.f32.mrf.mxu0  ;;  %11503 = vpow2.f32 %v5709_v45 }
 0x77d   : > { %5818 = vmatmul.bf16.gmra.mxu3 %v5766_v60 }
 0x77f   : > { %v5664_v9 = vpop.xlane.xlu0 %5663  ;;  %v5270_v4 = vpop.xlane.xlu2 %5269 }
 0x780   : > { %v5690_v40 = vsub.f32 %v13197_v62, %v5664_v9  ;;  %v5296_v39 = vsub.f32 %v13195_v24, %v5270_v4 }
 0x782   : > { %v5711_v7 = vmul.f32 1.442695, %v5690_v40  ;;  %v5317_v14 = vmul.f32 1.442695, %v5296_v39  ;;  %v13341_v41 = vpop.eup %11503 }
 0x783   : > { %v13333_v0 = vpop.f32.mrf.mxu2 }
 0x784   : > { %11505 = vpow2.f32 %v5711_v7  ;;  %6465 = vmax.xlane.f32.xlu1 %v13333_v0  ;;  %6071 = vmax.xlane.f32.xlu0 %v13329_v56  ;;  %v13337_v15 = vpop.f32.mrf.mxu0 }
 0x785   : > { %11507 = vpow2.f32 %v5317_v14 }
 0x787   : > { %v5666_v23 = vpop.xlane.xlu0 %5665  ;;  %v5272_v62 = vpop.xlane.xlu2 %5271 }
 0x788   : > { %v5691_v55 = vsub.f32 %v13205_v30, %v5666_v23  ;;  %v5297_v26 = vsub.f32 %v13201_v16, %v5272_v62 }
 0x78a   : > { %v13343_v24 = vpop.eup %11505  ;;  %v5713_v30 = vmul.f32 1.442695, %v5691_v55  ;;  %v5319_v11 = vmul.f32 1.442695, %v5297_v26 }
 0x78b   : > { %v13346_v42 = vpop.eup %11507  ;;  %v13349_v52 = vpop.f32.mrf.mxu2  ;;  %v5767_v18 = vpack.c.bf16 %v13343_v24, %v13341_v41 }
 0x78c   : > { %6467 = vmax.xlane.f32.xlu2 %v13349_v52  ;;  %6073 = vmax.xlane.f32.xlu1 %v13337_v15  ;;  %v5373_v61 = vpack.c.bf16 %v13346_v42, %v13339_v34  ;;  %v13357_v54 = vpop.f32.mrf.mxu0  ;;  %11509 = vpow2.f32 %v5713_v30 }
 0x78d   : > { %5823 = vmatmul.bf16.gmra.mxu3 %v5767_v18  ;;  %11511 = vpow2.f32 %v5319_v11 }
 0x78e   : > { %5445 = vmatmul.bf16.gmra.mxu1 %v5373_v61 }
 0x78f   : > { %v5668_v8 = vpop.xlane.xlu1 %5667  ;;  %v5274_v16 = vpop.xlane.xlu0 %5273 }
 0x790   : > { %v5692_v3 = vsub.f32 %v13211_v19, %v5668_v8  ;;  %v5298_v37 = vsub.f32 %v13209_v31, %v5274_v16 }
 0x792   : > { %v5715_v60 = vmul.f32 1.442695, %v5692_v3  ;;  %v5321_v51 = vmul.f32 1.442695, %v5298_v37  ;;  %v13367_v40 = vpop.eup %11509 }
 0x793   : > { %v13361_v45 = vpop.f32.mrf.mxu2  ;;  %v13369_v39 = vpop.eup %11511 }
 0x794   : > { %11513 = vpow2.f32 %v5715_v60  ;;  %6469 = vmax.xlane.f32.xlu2 %v13361_v45  ;;  %6075 = vmax.xlane.f32.xlu1 %v13357_v54  ;;  %v13365_v9 = vpop.f32.mrf.mxu0 }
 0x795   : > { %11515 = vpow2.f32 %v5321_v51 }
 0x797   : > { %v5670_v4 = vpop.xlane.xlu1 %5669  ;;  %v5276_v19 = vpop.xlane.xlu0 %5275 }
 0x798   : > { %v5693_v7 = vsub.f32 %v13219_v6, %v5670_v4  ;;  %v5299_v23 = vsub.f32 %v13215_v59, %v5276_v19 }
 0x79a   : > { %v13371_v31 = vpop.eup %11513  ;;  %v5717_v6 = vmul.f32 1.442695, %v5693_v7  ;;  %v5323_v59 = vmul.f32 1.442695, %v5299_v23 }
 0x79b   : > { %v13374_v14 = vpop.eup %11515  ;;  %v13377_v62 = vpop.f32.mrf.mxu2  ;;  %v5768_v55 = vpack.c.bf16 %v13371_v31, %v13367_v40 }
 0x79c   : > { %6471 = vmax.xlane.f32.xlu0 %v13377_v62  ;;  %5341 = vadd.xlane.f32.xlu1 %v13279_v38  ;;  %v5374_v26 = vpack.c.bf16 %v13374_v14, %v13369_v39  ;;  %v13386_v18 = vpop.f32.mrf.mxu0  ;;  %11517 = vpow2.f32 %v5717_v6 }
 0x79d   : > { %6077 = vmax.xlane.f32.xlu2 %v13365_v9  ;;  %5828 = vmatmul.bf16.gmra.mxu3 %v5768_v55  ;;  %11519 = vpow2.f32 %v5323_v59 }
 0x79e   : > { %5450 = vmatmul.bf16.gmra.mxu1 %v5374_v26 }
 0x79f   : > { %v5672_v61 = vpop.xlane.xlu2 %5671  ;;  %v5278_v30 = vpop.xlane.xlu1 %5277 }
 0x7a0   : > { %v5694_v11 = vsub.f32 %v13225_v28, %v5672_v61  ;;  %v5300_v8 = vsub.f32 %v13223_v58, %v5278_v30 }
 0x7a2   : > { %v5719_v16 = vmul.f32 1.442695, %v5694_v11  ;;  %v5325_v38 = vmul.f32 1.442695, %v5300_v8  ;;  %v13394_v60 = vpop.eup %11517 }
 0x7a3   : > { %v13390_v3 = vpop.f32.mrf.mxu2  ;;  %v13398_v4 = vpop.eup %11519 }
 0x7a4   : > { %11521 = vpow2.f32 %v5719_v16  ;;  %5339 = vadd.xlane.f32.xlu0 %v13277_v46  ;;  %v13396_v51 = vpop.f32.mrf.mxu0 }
 0x7a5   : > { %11523 = vpow2.f32 %v5325_v38  ;;  %6079 = vmax.xlane.f32.xlu2 %v13386_v18 }
 0x7a7   : > { %v5674_v37 = vpop.xlane.xlu2 %5673  ;;  %v5280_v28 = vpop.xlane.xlu1 %5279 }
 0x7a8   : > { %v5695_v19 = vsub.f32 %v13233_v22, %v5674_v37  ;;  %v5301_v23 = vsub.f32 %v13229_v12, %v5280_v28 }
 0x7aa   : > { %v13400_v58 = vpop.eup %11521  ;;  %v5721_v22 = vmul.f32 1.442695, %v5695_v19  ;;  %v5327_v6 = vmul.f32 1.442695, %v5301_v23 }
 0x7ab   : > { %v13403_v7 = vpop.eup %11523  ;;  %v13406_v46 = vpop.f32.mrf.mxu2  ;;  %v5769_v55 = vpack.c.bf16 %v13400_v58, %v13394_v60 }
 0x7ac   : > { %6473 = vmax.xlane.f32.xlu0 %v13390_v3  ;;  %6475 = vmax.xlane.f32.xlu1 %v13406_v46  ;;  %v5375_v26 = vpack.c.bf16 %v13403_v7, %v13398_v4  ;;  %11525 = vpow2.f32 %v5721_v22  ;;  %v13417_v11 = vpop.f32.mrf.mxu0 }
 0x7ad   : > { %5735 = vadd.xlane.f32.xlu2 %v13293_v1  ;;  %5833 = vmatmul.bf16.gmra.mxu3 %v5769_v55  ;;  %11527 = vpow2.f32 %v5327_v6 }
 0x7ae   : > { %5455 = vmatmul.bf16.gmra.mxu1 %v5375_v26 }
 0x7af   : > { %v5676_v59 = vpop.xlane.xlu0 %5675  ;;  %v5282_v12 = vpop.xlane.xlu2 %5281 }
 0x7b0   : > { %v5696_v61 = vsub.f32 %v13239_v44, %v5676_v59  ;;  %v5302_v30 = vsub.f32 %v13237_v25, %v5282_v12 }
 0x7b2   : > { %v5723_v8 = vmul.f32 1.442695, %v5696_v61  ;;  %v5329_v16 = vmul.f32 1.442695, %v5302_v30  ;;  %v13423_v37 = vpop.eup %11525 }
 0x7b3   : > { %v13419_v38 = vpop.f32.mrf.mxu2  ;;  %v13425_v28 = vpop.eup %11527 }
 0x7b4   : > { %11529 = vpow2.f32 %v5723_v8  ;;  %5733 = vadd.xlane.f32.xlu1 %v13290_v53  ;;  %6081 = vmax.xlane.f32.xlu0 %v13396_v51  ;;  %v13437_v22 = vpop.f32.mrf.mxu0 }
 0x7b5   : > { %11531 = vpow2.f32 %v5329_v16 }
 0x7b7   : > { %v5678_v1 = vpop.xlane.xlu0 %5677  ;;  %v5284_v44 = vpop.xlane.xlu2 %5283 }
 0x7b8   : > { %v5697_v19 = vsub.f32 %v13247_v27, %v5678_v1  ;;  %v5303_v55 = vsub.f32 %v13243_v63, %v5284_v44 }
 0x7ba   : > { %v13427_v25 = vpop.eup %11529  ;;  %v5725_v27 = vmul.f32 1.442695, %v5697_v19  ;;  %v5331_v63 = vmul.f32 1.442695, %v5303_v55 }
 0x7bb   : > { %v13430_v23 = vpop.eup %11531  ;;  %v13433_v26 = vpop.f32.mrf.mxu2  ;;  %v5770_v53 = vpack.c.bf16 %v13427_v25, %v13423_v37 }
 0x7bc   : > { %6477 = vmax.xlane.f32.xlu1 %v13419_v38  ;;  %6479 = vmax.xlane.f32.xlu2 %v13433_v26  ;;  %v5376_v6 = vpack.c.bf16 %v13430_v23, %v13425_v28  ;;  %11533 = vpow2.f32 %v5725_v27  ;;  %v13451_v44 = vpop.f32.mrf.mxu0 }
 0x7bd   : > { %6083 = vmax.xlane.f32.xlu0 %v13417_v11  ;;  %5838 = vmatmul.bf16.gmra.mxu3 %v5770_v53  ;;  %11535 = vpow2.f32 %v5331_v63 }
 0x7be   : > { %5460 = vmatmul.bf16.gmra.mxu1 %v5376_v6 }
 0x7bf   : > { %v5680_v59 = vpop.xlane.xlu1 %5679  ;;  %v5286_v12 = vpop.xlane.xlu0 %5285 }
 0x7c0   : > { %v5698_v61 = vsub.f32 %v13253_v57, %v5680_v59  ;;  %v5304_v30 = vsub.f32 %v13251_v10, %v5286_v12 }
 0x7c2   : > { %v5727_v8 = vmul.f32 1.442695, %v5698_v61  ;;  %v5333_v16 = vmul.f32 1.442695, %v5304_v30  ;;  %v13453_v57 = vpop.eup %11533 }
 0x7c3   : > { %v13446_v1 = vpop.f32.mrf.mxu2  ;;  %v13455_v55 = vpop.eup %11535 }
 0x7c4   : > { %11537 = vpow2.f32 %v5727_v8  ;;  %5343 = vadd.xlane.f32.xlu2 %v13305_v36  ;;  %6085 = vmax.xlane.f32.xlu1 %v13437_v22  ;;  %14315 = vst [vmem:[#allocation18_spill] sm:$0xff] %v13455_v55  ;;  %v13472_v30 = vpop.f32.mrf.mxu0 }
 0x7c5   : > { %11539 = vpow2.f32 %v5333_v16  ;;  %5345 = vadd.xlane.f32.xlu0 %v13309_v35 }
 0x7c7   : > { %v5682_v19 = vpop.xlane.xlu1 %5681  ;;  %v5288_v10 = vpop.xlane.xlu0 %5287 }
 0x7c8   : > { %v5699_v6 = vsub.f32 %v13261_v5, %v5682_v19  ;;  %v5305_v36 = vsub.f32 %v13257_v33, %v5288_v10 }
 0x7ca   : > { %v13457_v53 = vpop.eup %11537  ;;  %v5729_v5 = vmul.f32 1.442695, %v5699_v6  ;;  %v5335_v12 = vmul.f32 1.442695, %v5305_v36 }
 0x7cb   : > { %14316 = vst [vmem:[#allocation73_spill] sm:$0xff] %v13457_v53  ;;  %v13460_v27 = vpop.eup %11539  ;;  %v13463_v63 = vpop.f32.mrf.mxu2  ;;  %v5771_v35 = vpack.c.bf16 %v13457_v53, %v13453_v57 }
 0x7cc   : > { %6481 = vmax.xlane.f32.xlu2 %v13446_v1  ;;  %6087 = vmax.xlane.f32.xlu1 %v13451_v44  ;;  %v5377_v59 = vpack.c.bf16 %v13460_v27, %v13455_v55  ;;  %11541 = vpow2.f32 %v5729_v5  ;;  %v11333_v55 = vld [vmem:[#allocation8 + $0x1ec] sm:$0xf0] }
 0x7cd   : > { %6483 = vmax.xlane.f32.xlu0 %v13463_v63  ;;  %5843 = vmatmul.bf16.gmra.mxu3 %v5771_v35  ;;  %11543 = vpow2.f32 %v5335_v12 }
 0x7ce   : > { %5465 = vmatmul.bf16.gmra.mxu1 %v5377_v59  ;;  %v13487_v59 = vpop.f32.mrf.mxu0 }
 0x7cf   : > { %v5684_v61 = vpop.xlane.xlu2 %5683  ;;  %v5290_v33 = vpop.xlane.xlu1 %5289 }
 0x7d0   : > { %v5700_v8 = vsub.f32 %v13270_v32, %v5684_v61  ;;  %v5306_v16 = vsub.f32 %v13266_v2, %v5290_v33 }
 0x7d2   : > { %v5731_v19 = vmul.f32 1.442695, %v5700_v8  ;;  %v5337_v10 = vmul.f32 1.442695, %v5306_v16  ;;  %v13481_v36 = vpop.eup %11541 }
 0x7d3   : > { %v13476_v53 = vpop.f32.mrf.mxu2  ;;  %14317 = vst [vmem:[#allocation74_spill] sm:$0xff] %v13481_v36  ;;  %v13483_v35 = vpop.eup %11543 }
 0x7d4   : > { %11545 = vpow2.f32 %v5731_v19  ;;  %5739 = vadd.xlane.f32.xlu1 %v13319_v43  ;;  %6089 = vmax.xlane.f32.xlu2 %v13472_v30  ;;  %14318 = vst [vmem:[#allocation71_spill] sm:$0xff] %v13483_v35 }
 0x7d5   : > { %11547 = vpow2.f32 %v5337_v10  ;;  %5737 = vadd.xlane.f32.xlu0 %v13317_v50 }
 0x7d7   : > { %v6458_v6 = vpop.xlane.xlu2 %6457  ;;  %v6064_v32 = vpop.xlane.xlu1 %6063 }
 0x7d8   : > { %v6489_v5 = vsub.f32 %v13281_v20, %v6458_v6  ;;  %v6095_v43 = vsub.f32 %v13274_v48, %v6064_v32 }
 0x7da   : > { %v13485_v2 = vpop.eup %11545  ;;  %v6505_v20 = vmul.f32 1.442695, %v6489_v5  ;;  %v6111_v8 = vmul.f32 1.442695, %v6095_v43 }
 0x7db   : > { %14319 = vst [vmem:[#allocation72_spill] sm:$0xff] %v13485_v2  ;;  %v13490_v12 = vpop.eup %11547  ;;  %v13493_v61 = vpop.f32.mrf.mxu2  ;;  %v5772_v50 = vpack.c.bf16 %v13485_v2, %v13481_v36 }
 0x7dc   : > { %14320 = vst [vmem:[#allocation59_spill] sm:$0xff] %v13490_v12  ;;  %6487 = vmax.xlane.f32.xlu1 %v13493_v61  ;;  %6091 = vmax.xlane.f32.xlu2 %v13487_v59  ;;  %v5378_v33 = vpack.c.bf16 %v13490_v12, %v13483_v35  ;;  %11549 = vpow2.f32 %v6505_v20  ;;  %v13504_v36 = vpop.f32.mrf.mxu0  ;;  %v10579_v35 = vld [vmem:[#allocation8 + $0x1e0] sm:$0xf] }
 0x7dd   : > { %6485 = vmax.xlane.f32.xlu0 %v13476_v53  ;;  %5848 = vmatmul.bf16.gmra.mxu3 %v5772_v50  ;;  %11551 = vpow2.f32 %v6111_v8  ;;  %14321 = vst [vmem:[#allocation70_spill] sm:$0xff] %v13504_v36 }
 0x7de   : > { %5470 = vmatmul.bf16.gmra.mxu1 %v5378_v33 }
 0x7df   : > { %v6460_v16 = vpop.xlane.xlu0 %6459  ;;  %v6066_v48 = vpop.xlane.xlu2 %6065 }
 0x7e0   : > { %v6490_v19 = vsub.f32 %v13298_v29, %v6460_v16  ;;  %v6096_v10 = vsub.f32 %v13287_v21, %v6066_v48  ;;  %v10451_v16 = vld [vmem:[#allocation8 + $0xe0] sm:$0xf]  ;;  %v11301_v48 = vld [vmem:[#allocation8 + $0xec] sm:$0xf0] }
 0x7e2   : > { %v6507_v6 = vmul.f32 1.442695, %v6490_v19  ;;  %v6113_v32 = vmul.f32 1.442695, %v6096_v10  ;;  %v11550_v29 = vpop.eup %11549  ;;  %v11365_v10 = vld [vmem:[#allocation8 + $0x2ec] sm:$0xf0] }
 0x7e3   : > { %v13506_v2 = vpop.f32.mrf.mxu1  ;;  %v13511_v21 = vpop.eup %11551 }
 0x7e4   : > { %11553 = vpow2.f32 %v6507_v6  ;;  %5347 = vadd.xlane.f32.xlu1 %v13339_v34  ;;  %5349 = vadd.xlane.f32.xlu2 %v13346_v42  ;;  %v10452_v6 = vor.u32 %v11301_v48, %v10451_v16  ;;  %v10580_v16 = vor.u32 %v11333_v55, %v10579_v35  ;;  %v10435_v48 = vld [vmem:[#allocation8 + $0xc0] sm:$0xf] }
 0x7e5   : > { %11555 = vpow2.f32 %v6113_v32  ;;  %6093 = vmax.xlane.f32.xlu0 %v13504_v36 }
 0x7e6   : > { %7692 = vmatpush.bf16.msra.mxu0 %v10452_v6  ;;  %7741 = vmatpush.bf16.msra.mxu1 %v10580_v16  ;;  %v10387_v16 = vld [vmem:[#allocation8 + $0x60] sm:$0xf] }
 0x7e7   : > { %v6462_v5 = vpop.xlane.xlu0 %6461  ;;  %v6068_v43 = vpop.xlane.xlu2 %6067 }
 0x7e8   : > { %v6491_v50 = vsub.f32 %v13307_v13, %v6462_v5  ;;  %v6097_v34 = vsub.f32 %v13302_v17, %v6068_v43  ;;  %v10707_v13 = vld [vmem:[#allocation8 + $0x2e0] sm:$0xf]  ;;  %v11397_v43 = vld [vmem:[#allocation8 + $0x3ec] sm:$0xf0] }
 0x7e9   : > { %v10708_v17 = vor.u32 %v11365_v10, %v10707_v13  ;;  %v10835_v5 = vld [vmem:[#allocation8 + $0x3e0] sm:$0xf] }
 0x7ea   : > { %v13514_v33 = vpop.eup %11553  ;;  %v6509_v19 = vmul.f32 1.442695, %v6491_v50  ;;  %v6115_v12 = vmul.f32 1.442695, %v6097_v34 }
 0x7eb   : > { %v13516_v20 = vpop.eup %11555  ;;  %v6569_v8 = vpack.c.bf16 %v13514_v33, %v11550_v29  ;;  %v13525_v32 = vpop.f32.mrf.mxu1  ;;  %7790 = vmatpush.bf16.msra.mxu2 %v10708_v17  ;;  %v10403_v17 = vld [vmem:[#allocation8 + $0x80] sm:$0xf] }
 0x7ec   : > { %v6175_v42 = vpack.c.bf16 %v13516_v20, %v13511_v21  ;;  %5353 = vadd.xlane.f32.xlu1 %v13374_v14  ;;  %5741 = vadd.xlane.f32.xlu2 %v13341_v41  ;;  %v10836_v41 = vor.u32 %v11397_v43, %v10835_v5  ;;  %11557 = vpow2.f32 %v6509_v19  ;;  %v11289_v5 = vld [vmem:[#allocation8 + $0x8c] sm:$0xf0] }
 0x7ed   : > { %5743 = vadd.xlane.f32.xlu0 %v13343_v24  ;;  %6617 = vmatmul.bf16.vlgmr.msrb.gmra.mxu3 %v6569_v8  ;;  %11559 = vpow2.f32 %v6115_v12 }
 0x7ee   : > { %6239 = vmatmul.bf16.vlgmr.msrb.gmra.mxu1 %v6175_v42  ;;  %v11297_v42 = vld [vmem:[#allocation8 + $0xcc] sm:$0xf0]  ;;  %7839 = vmatpush.bf16.msra.mxu3 %v10836_v41 }
 0x7ef   : > { %v6464_v14 = vpop.xlane.xlu1 %6463  ;;  %v6070_v36 = vpop.xlane.xlu0 %6069  ;;  %v10436_v13 = vor.u32 %v11297_v42, %v10435_v48  ;;  %v11285_v48 = vld [vmem:[#allocation8 + $0x6c] sm:$0xf0] }
 0x7f0   : > { %v6492_v50 = vsub.f32 %v13323_v47, %v6464_v14  ;;  %v6098_v24 = vsub.f32 %v13313_v49, %v6070_v36  ;;  %v13529_v8 = vpop.f32.mrf.mxu3  ;;  %v10419_v47 = vld [vmem:[#allocation8 + $0xa0] sm:$0xf]  ;;  %v11293_v49 = vld [vmem:[#allocation8 + $0xac] sm:$0xf0] }
 0x7f1   : > { %7693 = vmatpush.bf16.msra.mxu0 %v10436_v13  ;;  %v10420_v55 = vor.u32 %v11293_v49, %v10419_v47  ;;  %v10371_v47 = vld [vmem:[#allocation8 + $0x40] sm:$0xf]  ;;  %v11281_v49 = vld [vmem:[#allocation8 + $0x4c] sm:$0xf0] }
 0x7f2   : > { %v6511_v10 = vmul.f32 1.442695, %v6492_v50  ;;  %v6117_v34 = vmul.f32 1.442695, %v6098_v24  ;;  %v11558_v35 = vpop.eup %11557 }
 0x7f3   : > { %v13535_v12 = vpop.eup %11559  ;;  %v13537_v43 = vpop.f32.mrf.mxu1 }
 0x7f4   : > { %11561 = vpow2.f32 %v6511_v10  ;;  %5745 = vadd.xlane.f32.xlu1 %v13367_v40  ;;  %6537 = vadd.xlane.f32.xlu2 %v11550_v29  ;;  %v10404_v40 = vor.u32 %v11289_v5, %v10403_v17  ;;  %v10691_v17 = vld [vmem:[#allocation8 + $0x2c0] sm:$0xf]  ;;  %v11361_v5 = vld [vmem:[#allocation8 + $0x2cc] sm:$0xf0] }
 0x7f5   : > { %11563 = vpow2.f32 %v6117_v34  ;;  %5351 = vadd.xlane.f32.xlu0 %v13369_v39  ;;  %7694 = vmatpush.bf16.msra.mxu0 %v10420_v55  ;;  %v10372_v55 = vor.u32 %v11281_v49, %v10371_v47 }
 0x7f7   : > { %v6466_v36 = vpop.xlane.xlu1 %6465  ;;  %v6072_v6 = vpop.xlane.xlu0 %6071 }
 0x7f8   : > { %v13533_v19 = vpop.f32.mrf.mxu3  ;;  %v6493_v14 = vsub.f32 %v13333_v0, %v6466_v36  ;;  %v6099_v39 = vsub.f32 %v13329_v56, %v6072_v6  ;;  %v10388_v0 = vor.u32 %v11285_v48, %v10387_v16  ;;  %v10355_v16 = vld [vmem:[#allocation8 + $0x20] sm:$0xf]  ;;  %v11277_v48 = vld [vmem:[#allocation8 + $0x2c] sm:$0xf0] }
 0x7f9   : > { %7695 = vmatpush.bf16.msra.mxu0 %v10404_v40  ;;  %v10819_v40 = vld [vmem:[#allocation8 + $0x3c0] sm:$0xf] }
 0x7fa   : > { %v13539_v29 = vpop.eup %11561  ;;  %v6513_v42 = vmul.f32 1.442695, %v6493_v14  ;;  %v6119_v13 = vmul.f32 1.442695, %v6099_v39  ;;  %v10563_v14 = vld [vmem:[#allocation8 + $0x1c0] sm:$0xf] }
 0x7fb   : > { %v13542_v41 = vpop.eup %11563  ;;  %v6570_v50 = vpack.c.bf16 %v13539_v29, %v11558_v35  ;;  %v13555_v6 = vpop.f32.mrf.mxu1  ;;  %v11329_v39 = vld [vmem:[#allocation8 + $0x1cc] sm:$0xf0] }
 0x7fc   : > { %6143 = vadd.xlane.f32.xlu1 %v13511_v21  ;;  %6145 = vadd.xlane.f32.xlu2 %v13516_v20  ;;  %v6176_v24 = vpack.c.bf16 %v13542_v41, %v13535_v12  ;;  %11565 = vpow2.f32 %v6513_v42 }
 0x7fd   : > { %6539 = vadd.xlane.f32.xlu0 %v13514_v33  ;;  %6622 = vmatmul.bf16.gmra.mxu3 %v6570_v50  ;;  %11567 = vpow2.f32 %v6119_v13 }
 0x7fe   : > { %6244 = vmatmul.bf16.gmra.mxu1 %v6176_v24  ;;  %7696 = vmatpush.bf16.msra.mxu0 %v10388_v0  ;;  %v10564_v24 = vor.u32 %v11329_v39, %v10563_v14  ;;  %v10356_v0 = vor.u32 %v11277_v48, %v10355_v16  ;;  %v10803_v16 = vld [vmem:[#allocation8 + $0x3a0] sm:$0xf]  ;;  %v11389_v48 = vld [vmem:[#allocation8 + $0x3ac] sm:$0xf0] }
 0x7ff   : > { %v6468_v56 = vpop.xlane.xlu2 %6467  ;;  %v6074_v10 = vpop.xlane.xlu1 %6073 }
 0x800   : > { %v6494_v34 = vsub.f32 %v13349_v52, %v6468_v56  ;;  %v6100_v21 = vsub.f32 %v13337_v15, %v6074_v10  ;;  %v13553_v20 = vpop.f32.mrf.mxu3  ;;  %v10692_v15 = vor.u32 %v11361_v5, %v10691_v17  ;;  %v11393_v52 = vld [vmem:[#allocation8 + $0x3cc] sm:$0xf0]  ;;  %7742 = vmatpush.bf16.msra.mxu1 %v10564_v24 }
 0x801   : > { %v10820_v50 = vor.u32 %v11393_v52, %v10819_v40  ;;  %v11273_v10 = vld [vmem:[#allocation8 + $0xc] sm:$0xf0] }
 0x802   : > { %v6515_v36 = vmul.f32 1.442695, %v6494_v34  ;;  %v6121_v33 = vmul.f32 1.442695, %v6100_v21  ;;  %7697 = vmatpush.bf16.msra.mxu0 %v10372_v55  ;;  %7791 = vmatpush.bf16.msra.mxu2 %v10692_v15  ;;  %v11357_v24 = vld [vmem:[#allocation8 + $0x2ac] sm:$0xf0] }
 0x803   : > { %7840 = vmatpush.bf16.msra.mxu3 %v10820_v50  ;;  %v10675_v50 = vld [vmem:[#allocation8 + $0x2a0] sm:$0xf] }
 0x804   : > { %11569 = vpow2.f32 %v6515_v36  ;;  %6541 = vadd.xlane.f32.xlu1 %v11558_v35  ;;  %5747 = vadd.xlane.f32.xlu2 %v13371_v31  ;;  %v11566_v35 = vpop.eup %11565  ;;  %v10339_v31 = vld [vmem:[#allocation8] sm:$0xf] }
 0x805   : > { %11571 = vpow2.f32 %v6121_v33  ;;  %5357 = vadd.xlane.f32.xlu0 %v13403_v7  ;;  %v11568_v34 = vpop.eup %11567  ;;  %v10340_v47 = vor.u32 %v11273_v10, %v10339_v31 }
 0x806   : > { %7698 = vmatpush.bf16.msra.mxu0 %v10356_v0  ;;  %v10547_v0 = vld [vmem:[#allocation8 + $0x1a0] sm:$0xf] }
 0x807   : > { %v6470_v42 = vpop.xlane.xlu2 %6469  ;;  %v6076_v13 = vpop.xlane.xlu1 %6075 }
 0x808   : > { %v13559_v56 = vpop.f32.mrf.mxu3  ;;  %v6495_v7 = vsub.f32 %v13361_v45, %v6470_v42  ;;  %v6101_v55 = vsub.f32 %v13357_v54, %v6076_v13  ;;  %v11325_v42 = vld [vmem:[#allocation8 + $0x1ac] sm:$0xf0] }
 0x809   : > { %v10548_v31 = vor.u32 %v11325_v42, %v10547_v0  ;;  %v10531_v0 = vld [vmem:[#allocation8 + $0x180] sm:$0xf] }
 0x80a   : > { %v11570_v21 = vpop.eup %11569  ;;  %v6517_v5 = vmul.f32 1.442695, %v6495_v7  ;;  %7699 = vmatpush.bf16.msra.mxu0 %v10340_v47  ;;  %v6123_v40 = vmul.f32 1.442695, %v6101_v55 }
 0x80b   : > { %v11572_v49 = vpop.eup %11571  ;;  %v13563_v36 = vpop.f32.mrf.mxu1  ;;  %v6571_v33 = vpack.c.bf16 %v11570_v21, %v11566_v35  ;;  %7743 = vmatpush.bf16.msra.mxu1 %v10548_v31 }
 0x80c   : > { %6149 = vadd.xlane.f32.xlu1 %v13542_v41  ;;  %5355 = vadd.xlane.f32.xlu2 %v13398_v4  ;;  %v6177_v17 = vpack.c.bf16 %v11572_v49, %v11568_v34 }
 0x80d   : > { %6147 = vadd.xlane.f32.xlu0 %v13535_v12  ;;  %6627 = vmatmul.bf16.gmra.mxu3 %v6571_v33 }
 0x80e   : > { %6249 = vmatmul.bf16.gmra.mxu1 %v6177_v17 }
 0x80f   : > { %v6472_v45 = vpop.xlane.xlu0 %6471  ;;  %v5342_v15 = vpop.xlane.xlu1 %5341 }
 0x810   : > { %v6496_v52 = vsub.f32 %v13377_v62, %v6472_v45  ;;  %11573 = vrcp.f32 %v5342_v15  ;;  %v6078_v54 = vpop.xlane.xlu2 %6077  ;;  %v13569_v14 = vpop.f32.mrf.mxu3  ;;  %v10676_v62 = vor.u32 %v11357_v24, %v10675_v50 }
 0x811   : > { %v6102_v41 = vsub.f32 %v13365_v9, %v6078_v54  ;;  %11575 = vpow2.f32 %v6517_v5  ;;  %v10804_v9 = vor.u32 %v11389_v48, %v10803_v16  ;;  %v10787_v16 = vld [vmem:[#allocation8 + $0x380] sm:$0xf]  ;;  %v11385_v48 = vld [vmem:[#allocation8 + $0x38c] sm:$0xf0] }
 0x812   : > { %v6519_v4 = vmul.f32 1.442695, %v6496_v52  ;;  %11577 = vpow2.f32 %v6123_v40  ;;  %7792 = vmatpush.bf16.msra.mxu2 %v10676_v62  ;;  %v10788_v42 = vor.u32 %v11385_v48, %v10787_v16  ;;  %v10771_v48 = vld [vmem:[#allocation8 + $0x360] sm:$0xf] }
 0x813   : > { %v6125_v39 = vmul.f32 1.442695, %v6102_v41  ;;  %v13572_v12 = vpop.f32.mrf.mxu1  ;;  %7841 = vmatpush.bf16.msra.mxu3 %v10804_v9  ;;  %v11321_v9 = vld [vmem:[#allocation8 + $0x18c] sm:$0xf0] }
 0x814   : > { %11579 = vpow2.f32 %v6519_v4  ;;  %5751 = vadd.xlane.f32.xlu1 %v13400_v58  ;;  %6543 = vadd.xlane.f32.xlu2 %v13539_v29 }
 0x815   : > { %11581 = vpow2.f32 %v6125_v39  ;;  %6545 = vadd.xlane.f32.xlu0 %v11566_v35 }
 0x816   : > { %v11574_v13 = vpop.eup %11573 }
 0x817   : > { %v5493_v10 = vmul.f32 %v11574_v13, %v13525_v32  ;;  %v5340_v7 = vpop.xlane.xlu0 %5339  ;;  %v11576_v47 = vpop.eup %11575  ;;  %v10532_v13 = vor.u32 %v11321_v9, %v10531_v0  ;;  %7842 = vmatpush.bf16.msra.mxu3 %v10788_v42  ;;  %v11381_v9 = vld [vmem:[#allocation8 + $0x36c] sm:$0xf0]  ;;  %v10515_v42 = vld [vmem:[#allocation8 + $0x160] sm:$0xf] }
 0x818   : > { %11583 = vrcp.f32 %v5340_v7  ;;  %v6080_v58 = vpop.xlane.xlu2 %6079  ;;  %v13577_v55 = vpop.f32.mrf.mxu3 }
 0x819   : > { %v13579_v29 = vpop.eup %11577  ;;  %v5509_v33 = vpack.c.bf16 %v5493_v10, %v5493_v10  ;;  %7744 = vmatpush.bf16.msra.mxu1 %v10532_v13  ;;  %v11317_v13 = vld [vmem:[#allocation8 + $0x16c] sm:$0xf0] }
 0x81a   : > { %v13581_v17 = vpop.eup %11579 }
 0x81b   : > { %v11582_v35 = vpop.eup %11581  ;;  %5525 = vst [vmem:[#allocation2 + $0x10] sm:$0xf] %v5509_v33  ;;  %v13583_v5 = vpop.f32.mrf.mxu1  ;;  %v6572_v40 = vpack.c.bf16 %v13581_v17, %v11576_v47 }
 0x81c   : > { %6547 = vadd.xlane.f32.xlu1 %v11570_v21  ;;  %6151 = vadd.xlane.f32.xlu2 %v11568_v34  ;;  %v6178_v32 = vpack.c.bf16 %v11582_v35, %v13579_v29 }
 0x81d   : > { %6153 = vadd.xlane.f32.xlu0 %v11572_v49  ;;  %6632 = vmatmul.bf16.gmra.mxu3 %v6572_v40  ;;  %v6103_v49 = vsub.f32 %v13386_v18, %v6080_v58 }
 0x81e   : > { %v11584_v45 = vpop.eup %11583  ;;  %6254 = vmatmul.bf16.gmra.mxu1 %v6178_v32 }
 0x81f   : > { %v5492_v15 = vmul.f32 %v11584_v45, %v13506_v2  ;;  %v6474_v52 = vpop.xlane.xlu0 %6473  ;;  %v6476_v54 = vpop.xlane.xlu1 %6475  ;;  %v10659_v2 = vld [vmem:[#allocation8 + $0x280] sm:$0xf]  ;;  %v6127_v18 = vmul.f32 1.442695, %v6103_v49 }
 0x820   : > { %v6497_v41 = vsub.f32 %v13390_v3, %v6474_v52  ;;  %v6498_v4 = vsub.f32 %v13406_v46, %v6476_v54  ;;  %v5736_v39 = vpop.xlane.xlu2 %5735  ;;  %v13590_v50 = vpop.f32.mrf.mxu3  ;;  %v11353_v3 = vld [vmem:[#allocation8 + $0x28c] sm:$0xf0] }
 0x821   : > { %v5508_v24 = vpack.c.bf16 %v5492_v15, %v5492_v15  ;;  %11585 = vrcp.f32 %v5736_v39  ;;  %v10660_v46 = vor.u32 %v11353_v3, %v10659_v2 }
 0x822   : > { %v6521_v34 = vmul.f32 1.442695, %v6497_v41  ;;  %v6523_v21 = vmul.f32 1.442695, %v6498_v4  ;;  %v11241_v45 = vld [vmem:[#allocation2 + $0xc] sm:$0xf0] }
 0x823   : > { %5524 = vst [vmem:[#allocation2] sm:$0xf] %v5508_v24  ;;  %v13593_v62 = vpop.f32.mrf.mxu1  ;;  %7793 = vmatpush.bf16.msra.mxu2 %v10660_v46 }
 0x824   : > { %11587 = vpow2.f32 %v6521_v34  ;;  %5359 = vadd.xlane.f32.xlu1 %v13425_v28  ;;  %6549 = vadd.xlane.f32.xlu2 %v11576_v47 }
 0x825   : > { %11589 = vpow2.f32 %v6523_v21  ;;  %5749 = vadd.xlane.f32.xlu0 %v13394_v60 }
 0x827   : > { %v11586_v31 = vpop.eup %11585  ;;  %v5734_v10 = vpop.xlane.xlu1 %5733 }
 0x828   : > { %v6082_v7 = vpop.xlane.xlu0 %6081  ;;  %v5871_v28 = vmul.f32 %v11586_v31, %v13533_v19  ;;  %11591 = vrcp.f32 %v5734_v10  ;;  %v13599_v58 = vpop.f32.mrf.mxu3  ;;  %v10772_v31 = vor.u32 %v11381_v9, %v10771_v48  ;;  %v10499_v48 = vld [vmem:[#allocation8 + $0x140] sm:$0xf] }
 0x829   : > { %v6104_v47 = vsub.f32 %v13396_v51, %v6082_v7  ;;  %11593 = vpow2.f32 %v6127_v18 }
 0x82a   : > { %v11588_v60 = vpop.eup %11587  ;;  %v5887_v33 = vpack.c.bf16 %v5871_v28, %v5871_v28  ;;  %v10211_v32 = vld [vmem:[#allocation2] sm:$0xf]  ;;  %7843 = vmatpush.bf16.msra.mxu3 %v10772_v31 }
 0x82b   : > { %v6129_v40 = vmul.f32 1.442695, %v6104_v47  ;;  %v13601_v15 = vpop.eup %11589  ;;  %v13603_v52 = vpop.f32.mrf.mxu1  ;;  %v13605_v54 = vor.u32 %v11241_v45, %v10211_v32 }
 0x82c   : > { %5903 = vst [vmem:[#allocation2 + $0x14] sm:$0xf] %v5887_v33  ;;  %6155 = vadd.xlane.f32.xlu1 %v13579_v29  ;;  %6157 = vadd.xlane.f32.xlu2 %v11582_v35  ;;  %v6573_v51 = vpack.c.bf16 %v13601_v15, %v11588_v60 }
 0x82d   : > { %11595 = vpow2.f32 %v6129_v40  ;;  %6551 = vadd.xlane.f32.xlu0 %v13581_v17  ;;  %7700 = vmatmul.bf16.vlgmr.msra.gmra.mxu0 %v13605_v54 }
 0x82e   : > { %v11592_v19 = vpop.eup %11591  ;;  %6637 = vmatmul.bf16.gmra.mxu3 %v6573_v51 }
 0x82f   : > { %v5870_v41 = vmul.f32 %v11592_v19, %v13529_v8  ;;  %v6478_v4 = vpop.xlane.xlu1 %6477  ;;  %v6480_v39 = vpop.xlane.xlu2 %6479 }
 0x830   : > { %v6499_v24 = vsub.f32 %v13419_v38, %v6478_v4  ;;  %v6500_v34 = vsub.f32 %v13433_v26, %v6480_v39  ;;  %v6084_v21 = vpop.xlane.xlu0 %6083  ;;  %v13614_v49 = vpop.f32.mrf.mxu3  ;;  %v10643_v38 = vld [vmem:[#allocation8 + $0x260] sm:$0xf]  ;;  %v11349_v26 = vld [vmem:[#allocation8 + $0x26c] sm:$0xf0] }
 0x831   : > { %v11594_v29 = vpop.eup %11593  ;;  %v5886_v35 = vpack.c.bf16 %v5870_v41, %v5870_v41  ;;  %v6105_v16 = vsub.f32 %v13417_v11, %v6084_v21  ;;  %v10644_v0 = vor.u32 %v11349_v26, %v10643_v38  ;;  %v10516_v11 = vor.u32 %v11317_v13, %v10515_v42  ;;  %v10755_v38 = vld [vmem:[#allocation8 + $0x340] sm:$0xf]  ;;  %v11377_v26 = vld [vmem:[#allocation8 + $0x34c] sm:$0xf0] }
 0x832   : > { %v6525_v3 = vmul.f32 1.442695, %v6499_v24  ;;  %v6527_v17 = vmul.f32 1.442695, %v6500_v34 }
 0x833   : > { %v11596_v2 = vpop.eup %11595  ;;  %5902 = vst [vmem:[#allocation2 + $0x4] sm:$0xf] %v5886_v35  ;;  %v13617_v46 = vpop.f32.mrf.mxu1  ;;  %v6131_v18 = vmul.f32 1.442695, %v6105_v16  ;;  %7794 = vmatpush.bf16.msra.mxu2 %v10644_v0  ;;  %7745 = vmatpush.bf16.msra.mxu1 %v10516_v11  ;;  %v10756_v0 = vor.u32 %v11377_v26, %v10755_v38  ;;  %v10611_v38 = vld [vmem:[#allocation8 + $0x220] sm:$0xf] }
 0x834   : > { %v6179_v8 = vpack.c.bf16 %v11596_v2, %v11594_v29  ;;  %11597 = vpow2.f32 %v6525_v3  ;;  %6553 = vadd.xlane.f32.xlu1 %v11588_v60  ;;  %5361 = vadd.xlane.f32.xlu2 %v13430_v23  ;;  %v11341_v26 = vld [vmem:[#allocation8 + $0x22c] sm:$0xf0] }
 0x835   : > { %11599 = vpow2.f32 %v6527_v17  ;;  %5755 = vadd.xlane.f32.xlu0 %v13427_v25  ;;  %7844 = vmatpush.bf16.msra.mxu3 %v10756_v0  ;;  %v10612_v0 = vor.u32 %v11341_v26, %v10611_v38 }
 0x836   : > { %6259 = vmatmul.bf16.gmra.mxu1 %v6179_v8 }
 0x837   : > { %v5344_v10 = vpop.xlane.xlu2 %5343  ;;  %v6086_v7 = vpop.xlane.xlu1 %6085 }
 0x838   : > { %11601 = vrcp.f32 %v5344_v10  ;;  %v5346_v28 = vpop.xlane.xlu0 %5345  ;;  %v6106_v23 = vsub.f32 %v13437_v22, %v6086_v7  ;;  %v13622_v47 = vpop.f32.mrf.mxu3 }
 0x839   : > { %11603 = vrcp.f32 %v5346_v28 }
 0x83a   : > { %v11598_v25 = vpop.eup %11597  ;;  %v6133_v60 = vmul.f32 1.442695, %v6106_v23  ;;  %11605 = vpow2.f32 %v6131_v18 }
 0x83b   : > { %v13624_v33 = vpop.eup %11599  ;;  %v13626_v40 = vpop.f32.mrf.mxu1 }
 0x83c   : > { %11607 = vpow2.f32 %v6133_v60  ;;  %6161 = vadd.xlane.f32.xlu1 %v11596_v2  ;;  %5753 = vadd.xlane.f32.xlu2 %v13423_v37  ;;  %v6574_v32 = vpack.c.bf16 %v13624_v33, %v11598_v25 }
 0x83d   : > { %6159 = vadd.xlane.f32.xlu0 %v11594_v29 }
 0x83e   : > { %v11602_v22 = vpop.eup %11601  ;;  %6642 = vmatmul.bf16.gmra.mxu3 %v6574_v32  ;;  %v10483_v32 = vld [vmem:[#allocation8 + $0x120] sm:$0xf] }
 0x83f   : > { %v11604_v45 = vpop.eup %11603  ;;  %v5494_v51 = vmul.f32 %v11602_v22, %v13537_v43  ;;  %v6482_v19 = vpop.xlane.xlu2 %6481  ;;  %v11309_v22 = vld [vmem:[#allocation8 + $0x12c] sm:$0xf0] }
 0x840   : > { %v6088_v41 = vpop.xlane.xlu1 %6087  ;;  %v5495_v4 = vmul.f32 %v11604_v45, %v13555_v6  ;;  %v6501_v39 = vsub.f32 %v13446_v1, %v6482_v19  ;;  %v6484_v24 = vpop.xlane.xlu0 %6483  ;;  %v10627_v1 = vld [vmem:[#allocation8 + $0x240] sm:$0xf]  ;;  %v11345_v6 = vld [vmem:[#allocation8 + $0x24c] sm:$0xf0] }
 0x841   : > { %v13633_v34 = vpop.f32.mrf.mxu3  ;;  %v11606_v21 = vpop.eup %11605  ;;  %v5510_v35 = vpack.c.bf16 %v5494_v51, %v5494_v51  ;;  %v6502_v37 = vsub.f32 %v13463_v63, %v6484_v24  ;;  %v6107_v43 = vsub.f32 %v13451_v44, %v6088_v41  ;;  %v10628_v63 = vor.u32 %v11345_v6, %v10627_v1  ;;  %v11313_v44 = vld [vmem:[#allocation8 + $0x14c] sm:$0xf0] }
 0x842   : > { %v11608_v2 = vpop.eup %11607  ;;  %v5511_v29 = vpack.c.bf16 %v5495_v4, %v5495_v4  ;;  %v6529_v3 = vmul.f32 1.442695, %v6501_v39  ;;  %v10500_v31 = vor.u32 %v11313_v44, %v10499_v48  ;;  %v10484_v51 = vor.u32 %v11309_v22, %v10483_v32  ;;  %v10739_v48 = vld [vmem:[#allocation8 + $0x320] sm:$0xf]  ;;  %v11373_v44 = vld [vmem:[#allocation8 + $0x32c] sm:$0xf0] }
 0x843   : > { %5526 = vst [vmem:[#allocation2 + $0x20] sm:$0xf] %v5510_v35  ;;  %v6531_v17 = vmul.f32 1.442695, %v6502_v37  ;;  %v13637_v16 = vpop.f32.mrf.mxu1  ;;  %v6180_v8 = vpack.c.bf16 %v11608_v2, %v11606_v21  ;;  %v6135_v9 = vmul.f32 1.442695, %v6107_v43  ;;  %7795 = vmatpush.bf16.msra.mxu2 %v10628_v63 }
 0x844   : > { %5527 = vst [vmem:[#allocation2 + $0x30] sm:$0xf] %v5511_v29  ;;  %11609 = vpow2.f32 %v6529_v3  ;;  %5365 = vadd.xlane.f32.xlu1 %v13460_v27  ;;  %6555 = vadd.xlane.f32.xlu2 %v13601_v15  ;;  %v10467_v3 = vld [vmem:[#allocation8 + $0x100] sm:$0xf] }
 0x845   : > { %11611 = vpow2.f32 %v6531_v17  ;;  %6557 = vadd.xlane.f32.xlu0 %v11598_v25  ;;  %7746 = vmatpush.bf16.msra.mxu1 %v10500_v31  ;;  %v11305_v17 = vld [vmem:[#allocation8 + $0x10c] sm:$0xf0] }
 0x846   : > { %6264 = vmatmul.bf16.gmra.mxu1 %v6180_v8 }
 0x847   : > { %v6090_v13 = vpop.xlane.xlu2 %6089  ;;  %7796 = vmatpush.bf16.msra.mxu2 %v10612_v0 }
 0x848   : > { %v5740_v42 = vpop.xlane.xlu1 %5739  ;;  %v5738_v11 = vpop.xlane.xlu0 %5737  ;;  %v6108_v27 = vsub.f32 %v13472_v30, %v6090_v13  ;;  %v10740_v13 = vor.u32 %v11373_v44, %v10739_v48 }
 0x849   : > { %11613 = vrcp.f32 %v5740_v42  ;;  %v13642_v15 = vpop.f32.mrf.mxu3  ;;  %7747 = vmatpush.bf16.msra.mxu1 %v10484_v51 }
 0x84a   : > { %11615 = vrcp.f32 %v5738_v11  ;;  %v11610_v18 = vpop.eup %11609  ;;  %v6137_v10 = vmul.f32 1.442695, %v6108_v27  ;;  %v10227_v7 = vld [vmem:[#allocation2 + $0x20] sm:$0xf]  ;;  %7845 = vmatpush.bf16.msra.mxu3 %v10740_v13 }
 0x84b   : > { %v13644_v28 = vpop.eup %11611  ;;  %11617 = vpow2.f32 %v6135_v9  ;;  %v13646_v23 = vpop.f32.mrf.mxu1  ;;  %v11245_v25 = vld [vmem:[#allocation2 + $0x2c] sm:$0xf0] }
 0x84c   : > { %11619 = vpow2.f32 %v6137_v10  ;;  %6559 = vadd.xlane.f32.xlu1 %v13624_v33  ;;  %6163 = vadd.xlane.f32.xlu2 %v11606_v21  ;;  %v6575_v30 = vpack.c.bf16 %v13644_v28, %v11610_v18  ;;  %v13650_v60 = vor.u32 %v11245_v25, %v10227_v7 }
 0x84d   : > { %6165 = vadd.xlane.f32.xlu0 %v11608_v2 }
 0x84e   : > { %6647 = vmatmul.bf16.gmra.mxu3 %v6575_v30  ;;  %7705 = vmatmul.bf16.gmra.mxu0 %v13650_v60 }
 0x84f   : > { %v11614_v45 = vpop.eup %11613  ;;  %v6092_v39 = vpop.xlane.xlu2 %6091 }
 0x850   : > { %v11616_v19 = vpop.eup %11615  ;;  %v5873_v41 = vmul.f32 %v11614_v45, %v13559_v56  ;;  %v6488_v4 = vpop.xlane.xlu1 %6487  ;;  %v10468_v56 = vor.u32 %v11305_v17, %v10467_v3  ;;  %v11369_v17 = vld [vmem:[#allocation8 + $0x30c] sm:$0xf0] }
 0x851   : > { %v5872_v33 = vmul.f32 %v11616_v19, %v13553_v20  ;;  %v6486_v24 = vpop.xlane.xlu0 %6485  ;;  %v6504_v21 = vsub.f32 %v13493_v61, %v6488_v4  ;;  %v13656_v35 = vpop.f32.mrf.mxu3  ;;  %v6109_v61 = vsub.f32 %v13487_v59, %v6092_v39 }
 0x852   : > { %v11618_v37 = vpop.eup %11617  ;;  %v5889_v2 = vpack.c.bf16 %v5873_v41, %v5873_v41  ;;  %v6503_v29 = vsub.f32 %v13476_v53, %v6486_v24  ;;  %v14322_v53 = vld [vmem:[#allocation18_spill] sm:$0xff]  ;;  %7748 = vmatpush.bf16.msra.mxu1 %v10468_v56  ;;  %v10595_v24 = vld [vmem:[#allocation8 + $0x200] sm:$0xf] }
 0x853   : > { %v11620_v43 = vpop.eup %11619  ;;  %v5888_v8 = vpack.c.bf16 %v5872_v33, %v5872_v33  ;;  %v6535_v1 = vmul.f32 1.442695, %v6504_v21  ;;  %v13659_v63 = vpop.f32.mrf.mxu1  ;;  %v6139_v31 = vmul.f32 1.442695, %v6109_v61  ;;  %v11337_v21 = vld [vmem:[#allocation8 + $0x20c] sm:$0xf0] }
 0x854   : > { %5905 = vst [vmem:[#allocation2 + $0x34] sm:$0xf] %v5889_v2  ;;  %v6533_v6 = vmul.f32 1.442695, %v6503_v29  ;;  %v6181_v20 = vpack.c.bf16 %v11620_v43, %v11618_v37  ;;  %5757 = vadd.xlane.f32.xlu1 %v13453_v57  ;;  %6561 = vadd.xlane.f32.xlu2 %v11610_v18  ;;  %v14323_v57 = vld [vmem:[#allocation70_spill] sm:$0xff] }
 0x855   : > { %5904 = vst [vmem:[#allocation2 + $0x24] sm:$0xf] %v5888_v8  ;;  %11621 = vpow2.f32 %v6535_v1  ;;  %5363 = vadd.xlane.f32.xlu0 %v14322_v53  ;;  %v14325_v1 = vld [vmem:[#allocation59_spill] sm:$0xff] }
 0x856   : > { %11623 = vpow2.f32 %v6533_v6  ;;  %6269 = vmatmul.bf16.gmra.mxu1 %v6181_v20 }
 0x857   : > { %v5350_v42 = vpop.xlane.xlu2 %5349 }
 0x858   : > { %v5348_v9 = vpop.xlane.xlu1 %5347 }
 0x859   : > { %11625 = vrcp.f32 %v5348_v9  ;;  %v6094_v11 = vpop.xlane.xlu0 %6093  ;;  %v13664_v59 = vpop.f32.mrf.mxu3 }
 0x85a   : > { %11627 = vrcp.f32 %v5350_v42  ;;  %v6110_v27 = vsub.f32 %v14323_v57, %v6094_v11  ;;  %v14326_v57 = vld [vmem:[#allocation71_spill] sm:$0xff] }
 0x85b   : > { %v13667_v18 = vpop.eup %11621  ;;  %v13669_v25 = vpop.f32.mrf.mxu1  ;;  %11629 = vpow2.f32 %v6139_v31 }
 0x85c   : > { %v11624_v10 = vpop.eup %11623  ;;  %v6141_v7 = vmul.f32 1.442695, %v6110_v27  ;;  %6167 = vadd.xlane.f32.xlu1 %v11618_v37  ;;  %6169 = vadd.xlane.f32.xlu2 %v11620_v43 }
 0x85d   : > { %v6576_v30 = vpack.c.bf16 %v13667_v18, %v11624_v10  ;;  %6563 = vadd.xlane.f32.xlu0 %v13644_v28  ;;  %v10596_v28 = vor.u32 %v11337_v21, %v10595_v24 }
 0x85e   : > { %11631 = vpow2.f32 %v6141_v7 }
 0x85f   : > { %v11626_v32 = vpop.eup %11625  ;;  %6652 = vmatmul.bf16.gmra.mxu3 %v6576_v30  ;;  %v5742_v19 = vpop.xlane.xlu2 %5741  ;;  %7797 = vmatpush.bf16.msra.mxu2 %v10596_v28  ;;  %v11363_v28 = vld [vmem:[#allocation8 + $0x2e4] sm:$0xf] }
 0x860   : > { %v11628_v22 = vpop.eup %11627  ;;  %v5496_v45 = vmul.f32 %v11626_v32, %v13563_v36  ;;  %v5354_v51 = vpop.xlane.xlu1 %5353  ;;  %v10723_v36 = vld [vmem:[#allocation8 + $0x300] sm:$0xf] }
 0x861   : > { %v5497_v41 = vmul.f32 %v11628_v22, %v13572_v12  ;;  %11633 = vrcp.f32 %v5354_v51  ;;  %v5744_v4 = vpop.xlane.xlu0 %5743  ;;  %v13675_v39 = vpop.f32.mrf.mxu3  ;;  %v14324_v12 = vld [vmem:[#allocation73_spill] sm:$0xff]  ;;  %v10724_v8 = vor.u32 %v11369_v17, %v10723_v36  ;;  %v11299_v36 = vld [vmem:[#allocation8 + $0xe4] sm:$0xf] }
 0x862   : > { %v5512_v33 = vpack.c.bf16 %v5496_v45, %v5496_v45  ;;  %11635 = vrcp.f32 %v5742_v19  ;;  %v11630_v37 = vpop.eup %11629 }
 0x863   : > { %v5513_v2 = vpack.c.bf16 %v5497_v41, %v5497_v41  ;;  %11637 = vrcp.f32 %v5744_v4  ;;  %v13677_v3 = vpop.f32.mrf.mxu1  ;;  %7846 = vmatpush.bf16.msra.mxu3 %v10724_v8  ;;  %v11239_v4 = vld [vmem:[#allocation2 + $0x4] sm:$0xf] }
 0x864   : > { %v11632_v29 = vpop.eup %11631  ;;  %5528 = vst [vmem:[#allocation2 + $0x40] sm:$0xf] %v5512_v33  ;;  %6565 = vadd.xlane.f32.xlu1 %v11624_v10  ;;  %5759 = vadd.xlane.f32.xlu2 %v14324_v12  ;;  %v10453_v12 = vld [vmem:[#allocation8 + $0xf0] sm:$0xf0] }
 0x865   : > { %5529 = vst [vmem:[#allocation2 + $0x50] sm:$0xf] %v5513_v2  ;;  %v6182_v43 = vpack.c.bf16 %v11632_v29, %v11630_v37  ;;  %5369 = vadd.xlane.f32.xlu0 %v14325_v1  ;;  %v10456_v1 = vor.u32 %v11299_v36, %v10453_v12 }
 0x867   : > { %v11634_v56 = vpop.eup %11633  ;;  %6274 = vmatmul.bf16.gmra.mxu1 %v6182_v43  ;;  %v6538_v53 = vpop.xlane.xlu2 %6537  ;;  %v11395_v43 = vld [vmem:[#allocation8 + $0x3e4] sm:$0xf]  ;;  %7888 = vmatpush.bf16.msrb.mxu0 %v10456_v1 }
 0x868   : > { %v11636_v6 = vpop.eup %11635  ;;  %v5499_v20 = vmul.f32 %v11634_v56, %v13593_v62  ;;  %v5746_v61 = vpop.xlane.xlu1 %5745  ;;  %v10837_v56 = vld [vmem:[#allocation8 + $0x3f0] sm:$0xf0]  ;;  %v11359_v1 = vld [vmem:[#allocation8 + $0x2c4] sm:$0xf] }
 0x869   : > { %v11638_v38 = vpop.eup %11637  ;;  %v5874_v26 = vmul.f32 %v11636_v6, %v13569_v14  ;;  %11639 = vrcp.f32 %v5746_v61  ;;  %v5352_v48 = vpop.xlane.xlu0 %5351 }
 0x86a   : > { %v13683_v0 = vpop.f32.mrf.mxu3  ;;  %v5515_v44 = vpack.c.bf16 %v5499_v20, %v5499_v20  ;;  %v5875_v9 = vmul.f32 %v11638_v38, %v13577_v55  ;;  %11641 = vrcp.f32 %v6538_v53  ;;  %v10840_v38 = vor.u32 %v11395_v43, %v10837_v56  ;;  %v10693_v56 = vld [vmem:[#allocation8 + $0x2d0] sm:$0xf0] }
 0x86b   : > { %v5890_v42 = vpack.c.bf16 %v5874_v26, %v5874_v26  ;;  %11643 = vrcp.f32 %v5352_v48  ;;  %v10243_v13 = vld [vmem:[#allocation2 + $0x40] sm:$0xf]  ;;  %v6240_v11 = vpop.f32.mrf.mxu1  ;;  %v10581_v26 = vld [vmem:[#allocation8 + $0x1f0] sm:$0xf0] }
 0x86c   : > { %5531 = vst [vmem:[#allocation2 + $0x70] sm:$0xf] %v5515_v44  ;;  %v5891_v31 = vpack.c.bf16 %v5875_v9, %v5875_v9  ;;  %v11249_v62 = vld [vmem:[#allocation2 + $0x4c] sm:$0xf0]  ;;  %5367 = vadd.xlane.f32.xlu2 %v14326_v57  ;;  %6173 = vadd.xlane.f32.xlu1 %v11632_v29  ;;  %v10709_v29 = vld [vmem:[#allocation8 + $0x2f0] sm:$0xf0] }
 0x86d   : > { %5906 = vst [vmem:[#allocation2 + $0x44] sm:$0xf] %v5890_v42  ;;  %v13687_v14 = vor.u32 %v11249_v62, %v10243_v13  ;;  %6171 = vadd.xlane.f32.xlu0 %v11630_v37  ;;  %v10213_v37 = vld [vmem:[#allocation2 + $0x10] sm:$0xf0]  ;;  %v10712_v17 = vor.u32 %v11363_v28, %v10709_v29  ;;  %8035 = vmatpush.bf16.msrb.mxu3 %v10840_v38 }
 0x86e   : > { %5907 = vst [vmem:[#allocation2 + $0x54] sm:$0xf] %v5891_v31  ;;  %v13694_v2 = vor.u32 %v11239_v4, %v10213_v37  ;;  %v10229_v37 = vld [vmem:[#allocation2 + $0x30] sm:$0xf0] }
 0x86f   : > { %v11640_v27 = vpop.eup %11639  ;;  %7710 = vmatmul.bf16.gmra.mxu0 %v13687_v14  ;;  %v6146_v30 = vpop.xlane.xlu2 %6145  ;;  %7986 = vmatpush.bf16.msrb.mxu2 %v10712_v17 }
 0x870   : > { %v11642_v55 = vpop.eup %11641  ;;  %v5876_v10 = vmul.f32 %v11640_v27, %v13590_v50  ;;  %v6144_v7 = vpop.xlane.xlu1 %6143  ;;  %v14327_v50 = vld [vmem:[#allocation72_spill] sm:$0xff] }
 0x871   : > { %v11644_v32 = vpop.eup %11643  ;;  %11645 = vrcp.f32 %v6144_v7  ;;  %v6540_v22 = vpop.xlane.xlu0 %6539 }
 0x872   : > { %v6618_v45 = vpop.f32.mrf.mxu3  ;;  %v5892_v51 = vpack.c.bf16 %v5876_v10, %v5876_v10  ;;  %v5498_v19 = vmul.f32 %v11644_v32, %v13583_v5  ;;  %11647 = vrcp.f32 %v6146_v30  ;;  %v14328_v5 = vld [vmem:[#allocation74_spill] sm:$0xff] }
 0x873   : > { %v6674_v41 = vmul.f32 %v11642_v55, %v6618_v45  ;;  %11649 = vrcp.f32 %v6540_v22  ;;  %v6242_v21 = vpop.f32.mrf.mxu1  ;;  %v11253_v10 = vld [vmem:[#allocation2 + $0x6c] sm:$0xf0] }
 0x874   : > { %5908 = vst [vmem:[#allocation2 + $0x64] sm:$0xf] %v5892_v51  ;;  %v5514_v33 = vpack.c.bf16 %v5498_v19, %v5498_v19  ;;  %6567 = vadd.xlane.f32.xlu2 %v13667_v18  ;;  %5763 = vadd.xlane.f32.xlu1 %v14327_v50  ;;  %v11331_v18 = vld [vmem:[#allocation8 + $0x1e4] sm:$0xf] }
 0x875   : > { %v6690_v24 = vpack.c.bf16 %v6674_v41, %v6674_v41  ;;  %5761 = vadd.xlane.f32.xlu0 %v14328_v5  ;;  %v10584_v13 = vor.u32 %v11331_v18, %v10581_v26 }
 0x876   : > { %5530 = vst [vmem:[#allocation2 + $0x60] sm:$0xf] %v5514_v33 }
 0x877   : > { %v11646_v8 = vpop.eup %11645  ;;  %6706 = vst [vmem:[#allocation2 + $0xc] sm:$0xf] %v6690_v24  ;;  %7749 = vmatmul.bf16.vlgmr.msra.gmra.mxu1 %v13694_v2  ;;  %v5748_v53 = vpop.xlane.xlu2 %5747 }
 0x878   : > { %v11648_v6 = vpop.eup %11647  ;;  %v6296_v20 = vmul.f32 %v11646_v8, %v6240_v11  ;;  %v6542_v61 = vpop.xlane.xlu1 %6541  ;;  %7937 = vmatpush.bf16.msrb.mxu1 %v10584_v13  ;;  %v11327_v13 = vld [vmem:[#allocation8 + $0x1c4] sm:$0xf] }
 0x879   : > { %v11650_v48 = vpop.eup %11649  ;;  %v6297_v44 = vmul.f32 %v11648_v6, %v6242_v21  ;;  %11651 = vrcp.f32 %v6542_v61  ;;  %v5358_v9 = vpop.xlane.xlu0 %5357  ;;  %v11243_v21 = vld [vmem:[#allocation2 + $0x24] sm:$0xf]  ;;  %v10696_v6 = vor.u32 %v11359_v1, %v10693_v56  ;;  %v10437_v61 = vld [vmem:[#allocation8 + $0xd0] sm:$0xf0] }
 0x87a   : > { %v6620_v42 = vpop.f32.mrf.mxu3  ;;  %v6312_v31 = vpack.c.bf16 %v6296_v20, %v6296_v20  ;;  %11653 = vrcp.f32 %v5748_v53  ;;  %v13703_v12 = vor.u32 %v11243_v21, %v10229_v37  ;;  %v11295_v20 = vld [vmem:[#allocation8 + $0xc4] sm:$0xf] }
 0x87b   : > { %v6675_v62 = vmul.f32 %v11650_v48, %v6620_v42  ;;  %v6313_v57 = vpack.c.bf16 %v6297_v44, %v6297_v44  ;;  %11655 = vrcp.f32 %v5358_v9  ;;  %v6245_v27 = vpop.f32.mrf.mxu1  ;;  %v10440_v44 = vor.u32 %v11295_v20, %v10437_v61  ;;  %v11391_v9 = vld [vmem:[#allocation8 + $0x3c4] sm:$0xf]  ;;  %v10821_v42 = vld [vmem:[#allocation8 + $0x3d0] sm:$0xf0]  ;;  %7987 = vmatpush.bf16.msrb.mxu2 %v10696_v6 }
 0x87c   : > { %6328 = vst [vmem:[#allocation2 + $0x8] sm:$0xf] %v6312_v31 }
 0x87d   : > { %v6691_v11 = vpack.c.bf16 %v6675_v62, %v6675_v62  ;;  %6329 = vst [vmem:[#allocation2 + $0x18] sm:$0xf] %v6313_v57  ;;  %v10259_v55 = vld [vmem:[#allocation2 + $0x60] sm:$0xf]  ;;  %7889 = vmatpush.bf16.msrb.mxu0 %v10440_v44  ;;  %v11291_v44 = vld [vmem:[#allocation8 + $0xa4] sm:$0xf] }
 0x87e   : > { %v13698_v7 = vor.u32 %v11253_v10, %v10259_v55  ;;  %v11240_v43 = vld [vmem:[#allocation2 + $0xc] sm:$0xf]  ;;  %v10824_v55 = vor.u32 %v11391_v9, %v10821_v42  ;;  %v10565_v10 = vld [vmem:[#allocation8 + $0x1d0] sm:$0xf0]  ;;  %v11387_v42 = vld [vmem:[#allocation8 + $0x3a4] sm:$0xf] }
 0x87f   : > { %6707 = vst [vmem:[#allocation2 + $0x1c] sm:$0xf] %v6691_v11  ;;  %v11652_v30 = vpop.eup %11651  ;;  %v5356_v45 = vpop.xlane.xlu2 %5355  ;;  %v10421_v9 = vld [vmem:[#allocation8 + $0xb0] sm:$0xf0] }
 0x880   : > { %v11654_v32 = vpop.eup %11653  ;;  %7715 = vmatmul.bf16.gmra.mxu0 %v13698_v7  ;;  %v6150_v22 = vpop.xlane.xlu1 %6149  ;;  %8036 = vmatpush.bf16.msrb.mxu3 %v10824_v55  ;;  %v11323_v55 = vld [vmem:[#allocation8 + $0x1a4] sm:$0xf] }
 0x881   : > { %v11656_v51 = vpop.eup %11655  ;;  %v5877_v19 = vmul.f32 %v11654_v32, %v13599_v58  ;;  %11657 = vrcp.f32 %v6150_v22  ;;  %v6148_v41 = vpop.xlane.xlu0 %6147  ;;  %v10568_v22 = vor.u32 %v11327_v13, %v10565_v10  ;;  %v10549_v10 = vld [vmem:[#allocation8 + $0x1b0] sm:$0xf0] }
 0x882   : > { %v6623_v4 = vpop.f32.mrf.mxu3  ;;  %v5501_v33 = vmul.f32 %v11656_v51, %v13617_v46  ;;  %11659 = vrcp.f32 %v5356_v45 }
 0x883   : > { %v6676_v24 = vmul.f32 %v11652_v30, %v6623_v4  ;;  %v5893_v50 = vpack.c.bf16 %v5877_v19, %v5877_v19  ;;  %11661 = vrcp.f32 %v6148_v41  ;;  %v10219_v28 = vld [vmem:[#allocation2 + $0x8] sm:$0xf]  ;;  %v6247_v5 = vpop.f32.mrf.mxu1  ;;  %7938 = vmatpush.bf16.msrb.mxu1 %v10568_v22 }
 0x884   : > { %v5517_v29 = vpack.c.bf16 %v5501_v33, %v5501_v33  ;;  %v11242_v17 = vld [vmem:[#allocation2 + $0x14] sm:$0xf0] }
 0x885   : > { %v6692_v36 = vpack.c.bf16 %v6676_v24, %v6676_v24  ;;  %5909 = vst [vmem:[#allocation2 + $0x74] sm:$0xf] %v5893_v50  ;;  %v13705_v58 = vor.u32 %v11242_v17, %v10219_v28 }
 0x886   : > { %v10221_v8 = vld [vmem:[#allocation2 + $0x18] sm:$0xf0]  ;;  %5533 = vst [vmem:[#allocation2 + $0x90] sm:$0xf] %v5517_v29 }
 0x887   : > { %v13707_v46 = vor.u32 %v11240_v43, %v10221_v8  ;;  %v11658_v18 = vpop.eup %11657  ;;  %6708 = vst [vmem:[#allocation2 + $0x2c] sm:$0xf] %v6692_v36  ;;  %7754 = vmatmul.bf16.gmra.mxu1 %v13703_v12  ;;  %7798 = vmatmul.bf16.vlgmr.msra.gmra.mxu2 %v13705_v58  ;;  %v6544_v48 = vpop.xlane.xlu2 %6543  ;;  %v11247_v36 = vld [vmem:[#allocation2 + $0x44] sm:$0xf] }
 0x888   : > { %v11660_v53 = vpop.eup %11659  ;;  %v6299_v38 = vmul.f32 %v11658_v18, %v6247_v5  ;;  %v5752_v26 = vpop.xlane.xlu1 %5751  ;;  %v10245_v5 = vld [vmem:[#allocation2 + $0x50] sm:$0xf0] }
 0x889   : > { %7847 = vmatmul.bf16.vlgmr.msra.gmra.mxu3 %v13707_v46  ;;  %v11662_v31 = vpop.eup %11661  ;;  %v5500_v62 = vmul.f32 %v11660_v53, %v13603_v52  ;;  %11663 = vrcp.f32 %v5752_v26  ;;  %v6546_v57 = vpop.xlane.xlu0 %6545  ;;  %v13716_v6 = vor.u32 %v11247_v36, %v10245_v5  ;;  %v11355_v53 = vld [vmem:[#allocation8 + $0x2a4] sm:$0xf] }
 0x88a   : > { %v6625_v11 = vpop.f32.mrf.mxu3  ;;  %v6298_v30 = vmul.f32 %v11662_v31, %v6245_v27  ;;  %v6315_v32 = vpack.c.bf16 %v6299_v38, %v6299_v38  ;;  %11665 = vrcp.f32 %v6544_v48  ;;  %v10677_v38 = vld [vmem:[#allocation8 + $0x2b0] sm:$0xf0] }
 0x88b   : > { %v5516_v45 = vpack.c.bf16 %v5500_v62, %v5500_v62  ;;  %11667 = vrcp.f32 %v6546_v57  ;;  %v6250_v19 = vpop.f32.mrf.mxu1  ;;  %v10680_v48 = vor.u32 %v11355_v53, %v10677_v38  ;;  %v10424_v57 = vor.u32 %v11291_v44, %v10421_v9 }
 0x88c   : > { %v6314_v51 = vpack.c.bf16 %v6298_v30, %v6298_v30  ;;  %6331 = vst [vmem:[#allocation2 + $0x38] sm:$0xf] %v6315_v32  ;;  %v10261_v53 = vld [vmem:[#allocation2 + $0x70] sm:$0xf0] }
 0x88d   : > { %5532 = vst [vmem:[#allocation2 + $0x80] sm:$0xf] %v5516_v45  ;;  %7988 = vmatpush.bf16.msrb.mxu2 %v10680_v48  ;;  %7890 = vmatpush.bf16.msrb.mxu0 %v10424_v57  ;;  %v11251_v48 = vld [vmem:[#allocation2 + $0x64] sm:$0xf] }
 0x88e   : > { %6330 = vst [vmem:[#allocation2 + $0x28] sm:$0xf] %v6314_v51  ;;  %v13728_v9 = vor.u32 %v11251_v48, %v10261_v53  ;;  %v11287_v57 = vld [vmem:[#allocation8 + $0x84] sm:$0xf] }
 0x88f   : > { %v11664_v52 = vpop.eup %11663  ;;  %v6152_v24 = vpop.xlane.xlu2 %6151 }
 0x890   : > { %v11666_v41 = vpop.eup %11665  ;;  %v5879_v4 = vmul.f32 %v11664_v52, %v13622_v47  ;;  %v6548_v33 = vpop.xlane.xlu1 %6547  ;;  %v11257_v47 = vld [vmem:[#allocation2 + $0x8c] sm:$0xf0]  ;;  %v10552_v52 = vor.u32 %v11323_v55, %v10549_v10  ;;  %v10405_v55 = vld [vmem:[#allocation8 + $0x90] sm:$0xf0]  ;;  %v11383_v10 = vld [vmem:[#allocation8 + $0x384] sm:$0xf] }
 0x891   : > { %v11668_v27 = vpop.eup %11667  ;;  %v6677_v21 = vmul.f32 %v11666_v41, %v6625_v11  ;;  %11669 = vrcp.f32 %v6548_v33  ;;  %v6154_v37 = vpop.xlane.xlu0 %6153  ;;  %v10805_v11 = vld [vmem:[#allocation8 + $0x3b0] sm:$0xf0] }
 0x892   : > { %v6628_v50 = vpop.f32.mrf.mxu3  ;;  %v5895_v28 = vpack.c.bf16 %v5879_v4, %v5879_v4  ;;  %11671 = vrcp.f32 %v6152_v24  ;;  %v10808_v51 = vor.u32 %v11387_v42, %v10805_v11  ;;  %7939 = vmatpush.bf16.msrb.mxu1 %v10552_v52  ;;  %v11351_v42 = vld [vmem:[#allocation8 + $0x284] sm:$0xf]  ;;  %v10789_v52 = vld [vmem:[#allocation8 + $0x390] sm:$0xf0] }
 0x893   : > { %v6678_v29 = vmul.f32 %v11668_v27, %v6628_v50  ;;  %v6693_v17 = vpack.c.bf16 %v6677_v21, %v6677_v21  ;;  %11673 = vrcp.f32 %v6154_v37  ;;  %v11246_v43 = vld [vmem:[#allocation2 + $0x34] sm:$0xf0]  ;;  %v6252_v1 = vpop.f32.mrf.mxu1  ;;  %v11244_v21 = vld [vmem:[#allocation2 + $0x2c] sm:$0xf] }
 0x894   : > { %5911 = vst [vmem:[#allocation2 + $0x94] sm:$0xf] %v5895_v28  ;;  %v10275_v56 = vld [vmem:[#allocation2 + $0x80] sm:$0xf]  ;;  %8037 = vmatpush.bf16.msrb.mxu3 %v10808_v51  ;;  %v10408_v51 = vor.u32 %v11287_v57, %v10405_v55 }
 0x895   : > { %v6694_v8 = vpack.c.bf16 %v6678_v29, %v6678_v29  ;;  %6709 = vst [vmem:[#allocation2 + $0x3c] sm:$0xf] %v6693_v17  ;;  %v13714_v18 = vor.u32 %v11257_v47, %v10275_v56  ;;  %v10235_v20 = vld [vmem:[#allocation2 + $0x28] sm:$0xf] }
 0x896   : > { %v13718_v61 = vor.u32 %v11246_v43, %v10235_v20  ;;  %7891 = vmatpush.bf16.msrb.mxu0 %v10408_v51  ;;  %v10389_v51 = vld [vmem:[#allocation8 + $0x70] sm:$0xf0] }
 0x897   : > { %6710 = vst [vmem:[#allocation2 + $0x4c] sm:$0xf] %v6694_v8  ;;  %v11670_v26 = vpop.eup %11669  ;;  %7720 = vmatmul.bf16.gmra.mxu0 %v13714_v18  ;;  %7759 = vmatmul.bf16.gmra.mxu1 %v13716_v6  ;;  %v6550_v62 = vpop.xlane.xlu2 %6549 }
 0x898   : > { %v11672_v13 = vpop.eup %11671  ;;  %7803 = vmatmul.bf16.gmra.mxu2 %v13718_v61  ;;  %v5360_v31 = vpop.xlane.xlu1 %5359 }
 0x899   : > { %v11674_v30 = vpop.eup %11673  ;;  %v6300_v32 = vmul.f32 %v11672_v13, %v6250_v19  ;;  %11675 = vrcp.f32 %v5360_v31  ;;  %v5750_v22 = vpop.xlane.xlu0 %5749  ;;  %v10661_v13 = vld [vmem:[#allocation8 + $0x290] sm:$0xf0] }
 0x89a   : > { %v6630_v45 = vpop.f32.mrf.mxu3  ;;  %v6301_v41 = vmul.f32 %v11674_v30, %v6252_v1  ;;  %11677 = vrcp.f32 %v6550_v62  ;;  %v10664_v62 = vor.u32 %v11351_v42, %v10661_v13 }
 0x89b   : > { %v6679_v4 = vmul.f32 %v11670_v26, %v6630_v45  ;;  %v6316_v33 = vpack.c.bf16 %v6300_v32, %v6300_v32  ;;  %11679 = vrcp.f32 %v5750_v22  ;;  %v6255_v19 = vpop.f32.mrf.mxu1 }
 0x89c   : > { %v6317_v24 = vpack.c.bf16 %v6301_v41, %v6301_v41  ;;  %v10237_v37 = vld [vmem:[#allocation2 + $0x38] sm:$0xf0]  ;;  %v11319_v41 = vld [vmem:[#allocation8 + $0x184] sm:$0xf]  ;;  %7989 = vmatpush.bf16.msrb.mxu2 %v10664_v62 }
 0x89d   : > { %v6695_v27 = vpack.c.bf16 %v6679_v4, %v6679_v4  ;;  %6332 = vst [vmem:[#allocation2 + $0x48] sm:$0xf] %v6316_v33  ;;  %v13723_v50 = vor.u32 %v11244_v21, %v10237_v37  ;;  %v10533_v4 = vld [vmem:[#allocation8 + $0x190] sm:$0xf0]  ;;  %v10792_v37 = vor.u32 %v11383_v10, %v10789_v52 }
 0x89e   : > { %6333 = vst [vmem:[#allocation2 + $0x58] sm:$0xf] %v6317_v24 }
 0x89f   : > { %v11676_v28 = vpop.eup %11675  ;;  %6711 = vst [vmem:[#allocation2 + $0x5c] sm:$0xf] %v6695_v27  ;;  %7852 = vmatmul.bf16.gmra.mxu3 %v13723_v50  ;;  %v6158_v17 = vpop.xlane.xlu2 %6157 }
 0x8a0   : > { %v11678_v29 = vpop.eup %11677  ;;  %v5502_v36 = vmul.f32 %v11676_v28, %v13626_v40  ;;  %v6156_v5 = vpop.xlane.xlu1 %6155  ;;  %v10536_v28 = vor.u32 %v11319_v41, %v10533_v4  ;;  %8038 = vmatpush.bf16.msrb.mxu3 %v10792_v37 }
 0x8a1   : > { %v11680_v43 = vpop.eup %11679  ;;  %11681 = vrcp.f32 %v6156_v5  ;;  %v6552_v8 = vpop.xlane.xlu0 %6551 }
 0x8a2   : > { %v6633_v1 = vpop.f32.mrf.mxu3  ;;  %v5518_v56 = vpack.c.bf16 %v5502_v36, %v5502_v36  ;;  %v5878_v47 = vmul.f32 %v11680_v43, %v13614_v49  ;;  %11683 = vrcp.f32 %v6158_v17  ;;  %7940 = vmatpush.bf16.msrb.mxu1 %v10536_v28  ;;  %v11248_v43 = vld [vmem:[#allocation2 + $0x4c] sm:$0xf] }
 0x8a3   : > { %v6680_v20 = vmul.f32 %v11678_v29, %v6633_v1  ;;  %11685 = vrcp.f32 %v6552_v8  ;;  %v6257_v11 = vpop.f32.mrf.mxu1 }
 0x8a4   : > { %5534 = vst [vmem:[#allocation2 + $0xa0] sm:$0xf] %v5518_v56  ;;  %v5894_v38 = vpack.c.bf16 %v5878_v47, %v5878_v47  ;;  %v10251_v44 = vld [vmem:[#allocation2 + $0x48] sm:$0xf] }
 0x8a5   : > { %v6696_v26 = vpack.c.bf16 %v6680_v20, %v6680_v20  ;;  %v11250_v40 = vld [vmem:[#allocation2 + $0x54] sm:$0xf0] }
 0x8a6   : > { %5910 = vst [vmem:[#allocation2 + $0x84] sm:$0xf] %v5894_v38  ;;  %v13730_v31 = vor.u32 %v11250_v40, %v10251_v44  ;;  %v10253_v5 = vld [vmem:[#allocation2 + $0x58] sm:$0xf0] }
 0x8a7   : > { %v11682_v49 = vpop.eup %11681  ;;  %6712 = vst [vmem:[#allocation2 + $0x6c] sm:$0xf] %v6696_v26  ;;  %7764 = vmatmul.bf16.gmra.mxu1 %v13728_v9  ;;  %v5362_v45 = vpop.xlane.xlu2 %5361  ;;  %v13734_v8 = vor.u32 %v11248_v43, %v10253_v5  ;;  %v10517_v5 = vld [vmem:[#allocation8 + $0x170] sm:$0xf0] }
 0x8a8   : > { %v11684_v30 = vpop.eup %11683  ;;  %v6302_v32 = vmul.f32 %v11682_v49, %v6255_v19  ;;  %7808 = vmatmul.bf16.gmra.mxu2 %v13730_v31  ;;  %v6554_v22 = vpop.xlane.xlu1 %6553  ;;  %11687 = vrcp.f32 %v5362_v45  ;;  %v11283_v45 = vld [vmem:[#allocation8 + $0x64] sm:$0xf] }
 0x8a9   : > { %v11686_v33 = vpop.eup %11685  ;;  %v6303_v24 = vmul.f32 %v11684_v30, %v6257_v11  ;;  %v5756_v27 = vpop.xlane.xlu0 %5755  ;;  %v10277_v11 = vld [vmem:[#allocation2 + $0x90] sm:$0xf0] }
 0x8aa   : > { %v6635_v21 = vpop.f32.mrf.mxu3  ;;  %v6318_v29 = vpack.c.bf16 %v6302_v32, %v6302_v32  ;;  %11689 = vrcp.f32 %v5756_v27  ;;  %v10645_v32 = vld [vmem:[#allocation8 + $0x270] sm:$0xf0] }
 0x8ab   : > { %v6681_v36 = vmul.f32 %v11686_v33, %v6635_v21  ;;  %v6319_v19 = vpack.c.bf16 %v6303_v24, %v6303_v24  ;;  %11691 = vrcp.f32 %v6554_v22  ;;  %v10392_v33 = vor.u32 %v11283_v45, %v10389_v51  ;;  %v11379_v24 = vld [vmem:[#allocation8 + $0x364] sm:$0xf]  ;;  %v10773_v27 = vld [vmem:[#allocation8 + $0x370] sm:$0xf0] }
 0x8ac   : > { %6334 = vst [vmem:[#allocation2 + $0x68] sm:$0xf] %v6318_v29  ;;  %v11315_v21 = vld [vmem:[#allocation8 + $0x164] sm:$0xf] }
 0x8ad   : > { %v6697_v17 = vpack.c.bf16 %v6681_v36, %v6681_v36  ;;  %6335 = vst [vmem:[#allocation2 + $0x78] sm:$0xf] %v6319_v19  ;;  %v11255_v40 = vld [vmem:[#allocation2 + $0x84] sm:$0xf]  ;;  %v10776_v36 = vor.u32 %v11379_v24, %v10773_v27  ;;  %7892 = vmatpush.bf16.msrb.mxu0 %v10392_v33 }
 0x8ae   : > { %v11688_v1 = vpop.eup %11687  ;;  %v13739_v30 = vor.u32 %v11255_v40, %v10277_v11  ;;  %v11343_v27 = vld [vmem:[#allocation8 + $0x244] sm:$0xf] }
 0x8af   : > { %6713 = vst [vmem:[#allocation2 + $0x7c] sm:$0xf] %v6697_v17  ;;  %7857 = vmatmul.bf16.gmra.mxu3 %v13734_v8  ;;  %v5754_v47 = vpop.xlane.xlu2 %5753  ;;  %v5503_v53 = vmul.f32 %v11688_v1, %v13637_v16  ;;  %v10520_v1 = vor.u32 %v11315_v21, %v10517_v5  ;;  %v10629_v21 = vld [vmem:[#allocation8 + $0x250] sm:$0xf0] }
 0x8b0   : > { %v6162_v56 = vpop.xlane.xlu1 %6161  ;;  %v11690_v20 = vpop.eup %11689  ;;  %11693 = vrcp.f32 %v5754_v47  ;;  %8039 = vmatpush.bf16.msrb.mxu3 %v10776_v36  ;;  %v10373_v36 = vld [vmem:[#allocation8 + $0x50] sm:$0xf0] }
 0x8b1   : > { %v6160_v38 = vpop.xlane.xlu0 %6159  ;;  %v11692_v26 = vpop.eup %11691  ;;  %v5881_v48 = vmul.f32 %v11690_v20, %v13642_v15  ;;  %v5519_v42 = vpack.c.bf16 %v5503_v53, %v5503_v53  ;;  %v11347_v15 = vld [vmem:[#allocation8 + $0x264] sm:$0xf]  ;;  %7941 = vmatpush.bf16.msrb.mxu1 %v10520_v1 }
 0x8b2   : > { %v6638_v44 = vpop.f32.mrf.mxu3  ;;  %11695 = vrcp.f32 %v6160_v38  ;;  %v10648_v22 = vor.u32 %v11347_v15, %v10645_v32 }
 0x8b3   : > { %v6682_v13 = vmul.f32 %v11692_v26, %v6638_v44  ;;  %v6260_v62 = vpop.f32.mrf.mxu1  ;;  %v10267_v57 = vld [vmem:[#allocation2 + $0x68] sm:$0xf]  ;;  %v5897_v49 = vpack.c.bf16 %v5881_v48, %v5881_v48  ;;  %5535 = vst [vmem:[#allocation2 + $0xb0] sm:$0xf] %v5519_v42  ;;  %11697 = vrcp.f32 %v6162_v56  ;;  %v10291_v26 = vld [vmem:[#allocation2 + $0xa0] sm:$0xf] }
 0x8b4   : > { %v11254_v55 = vld [vmem:[#allocation2 + $0x74] sm:$0xf0]  ;;  %7990 = vmatpush.bf16.msrb.mxu2 %v10648_v22  ;;  %v11252_v48 = vld [vmem:[#allocation2 + $0x6c] sm:$0xf] }
 0x8b5   : > { %v6698_v10 = vpack.c.bf16 %v6682_v13, %v6682_v13  ;;  %v13741_v16 = vor.u32 %v11254_v55, %v10267_v57  ;;  %5913 = vst [vmem:[#allocation2 + $0xb4] sm:$0xf] %v5897_v49 }
 0x8b6   : > { %v11694_v52 = vpop.eup %11693  ;;  %v10269_v43 = vld [vmem:[#allocation2 + $0x78] sm:$0xf0] }
 0x8b7   : > { %6714 = vst [vmem:[#allocation2 + $0x8c] sm:$0xf] %v6698_v10  ;;  %7769 = vmatmul.bf16.gmra.mxu1 %v13739_v30  ;;  %v6556_v4 = vpop.xlane.xlu2 %6555  ;;  %v5880_v28 = vmul.f32 %v11694_v52, %v13633_v34  ;;  %v13748_v40 = vor.u32 %v11252_v48, %v10269_v43 }
 0x8b8   : > { %7813 = vmatmul.bf16.gmra.mxu2 %v13741_v16  ;;  %v5366_v41 = vpop.xlane.xlu1 %5365  ;;  %v11696_v37 = vpop.eup %11695 }
 0x8b9   : > { %11699 = vrcp.f32 %v5366_v41  ;;  %v6558_v29 = vpop.xlane.xlu0 %6557  ;;  %v6304_v19 = vmul.f32 %v11696_v37, %v6260_v62  ;;  %v11698_v56 = vpop.eup %11697  ;;  %v5896_v47 = vpack.c.bf16 %v5880_v28, %v5880_v28  ;;  %v11279_v37 = vld [vmem:[#allocation8 + $0x44] sm:$0xf] }
 0x8ba   : > { %11701 = vrcp.f32 %v6556_v4  ;;  %v6640_v17 = vpop.f32.mrf.mxu3  ;;  %v11261_v34 = vld [vmem:[#allocation2 + $0xac] sm:$0xf0]  ;;  %v10376_v1 = vor.u32 %v11279_v37, %v10373_v36 }
 0x8bb   : > { %v6262_v20 = vpop.f32.mrf.mxu1  ;;  %v6320_v53 = vpack.c.bf16 %v6304_v19, %v6304_v19  ;;  %11703 = vrcp.f32 %v6558_v29  ;;  %5912 = vst [vmem:[#allocation2 + $0xa4] sm:$0xf] %v5896_v47  ;;  %v13746_v44 = vor.u32 %v11261_v34, %v10291_v26  ;;  %v10632_v29 = vor.u32 %v11343_v27, %v10629_v21  ;;  %v10757_v47 = vld [vmem:[#allocation8 + $0x350] sm:$0xf0] }
 0x8bc   : > { %v6305_v38 = vmul.f32 %v11698_v56, %v6262_v20  ;;  %v10293_v4 = vld [vmem:[#allocation2 + $0xb0] sm:$0xf0]  ;;  %v11375_v56 = vld [vmem:[#allocation8 + $0x344] sm:$0xf]  ;;  %7893 = vmatpush.bf16.msrb.mxu0 %v10376_v1 }
 0x8bd   : > { %6336 = vst [vmem:[#allocation2 + $0x88] sm:$0xf] %v6320_v53  ;;  %7725 = vmatmul.bf16.gmra.mxu0 %v13746_v44  ;;  %v11311_v20 = vld [vmem:[#allocation8 + $0x144] sm:$0xf]  ;;  %7991 = vmatpush.bf16.msrb.mxu2 %v10632_v29  ;;  %v10760_v26 = vor.u32 %v11375_v56, %v10757_v47  ;;  %v10501_v34 = vld [vmem:[#allocation8 + $0x150] sm:$0xf0] }
 0x8be   : > { %v6321_v42 = vpack.c.bf16 %v6305_v38, %v6305_v38  ;;  %v10613_v47 = vld [vmem:[#allocation8 + $0x230] sm:$0xf0] }
 0x8bf   : > { %v11700_v13 = vpop.eup %11699  ;;  %7862 = vmatmul.bf16.gmra.mxu3 %v13748_v40  ;;  %v6164_v11 = vpop.xlane.xlu2 %6163 }
 0x8c0   : > { %v11702_v62 = vpop.eup %11701  ;;  %v5505_v57 = vmul.f32 %v11700_v13, %v13659_v63  ;;  %6337 = vst [vmem:[#allocation2 + $0x98] sm:$0xf] %v6321_v42  ;;  %v6560_v49 = vpop.xlane.xlu1 %6559  ;;  %11705 = vrcp.f32 %v6164_v11  ;;  %v10504_v13 = vor.u32 %v11311_v20, %v10501_v34  ;;  %8040 = vmatpush.bf16.msrb.mxu3 %v10760_v26  ;;  %v11275_v34 = vld [vmem:[#allocation8 + $0x24] sm:$0xf] }
 0x8c1   : > { %v6683_v55 = vmul.f32 %v11702_v62, %v6640_v17  ;;  %v6166_v10 = vpop.xlane.xlu0 %6165  ;;  %v11704_v15 = vpop.eup %11703  ;;  %11707 = vrcp.f32 %v6560_v49 }
 0x8c2   : > { %v5521_v32 = vpack.c.bf16 %v5505_v57, %v5505_v57  ;;  %v6643_v22 = vpop.f32.mrf.mxu3  ;;  %v11259_v41 = vld [vmem:[#allocation2 + $0xa4] sm:$0xf]  ;;  %11709 = vrcp.f32 %v6166_v10  ;;  %v11256_v10 = vld [vmem:[#allocation2 + $0x8c] sm:$0xf]  ;;  %7942 = vmatpush.bf16.msrb.mxu1 %v10504_v13 }
 0x8c3   : > { %v6699_v45 = vpack.c.bf16 %v6683_v55, %v6683_v55  ;;  %v6684_v51 = vmul.f32 %v11704_v15, %v6643_v22  ;;  %v6265_v52 = vpop.f32.mrf.mxu1  ;;  %v13753_v63 = vor.u32 %v11259_v41, %v10293_v4 }
 0x8c4   : > { %5537 = vst [vmem:[#allocation2 + $0xd0] sm:$0xf] %v5521_v32  ;;  %v10283_v24 = vld [vmem:[#allocation2 + $0x88] sm:$0xf] }
 0x8c5   : > { %6715 = vst [vmem:[#allocation2 + $0x9c] sm:$0xf] %v6699_v45  ;;  %v6700_v33 = vpack.c.bf16 %v6684_v51, %v6684_v51 }
 0x8c6   : > { %v11706_v5 = vpop.eup %11705 }
 0x8c7   : > { %6716 = vst [vmem:[#allocation2 + $0xac] sm:$0xf] %v6700_v33  ;;  %7774 = vmatmul.bf16.gmra.mxu1 %v13753_v63  ;;  %v11258_v28 = vld [vmem:[#allocation2 + $0x94] sm:$0xf0]  ;;  %v6562_v17 = vpop.xlane.xlu2 %6561  ;;  %v6306_v53 = vmul.f32 %v11706_v5, %v6265_v52  ;;  %v11708_v48 = vpop.eup %11707 }
 0x8c8   : > { %v5758_v19 = vpop.xlane.xlu1 %5757  ;;  %v13756_v43 = vor.u32 %v11258_v28, %v10283_v24  ;;  %v11710_v62 = vpop.eup %11709 }
 0x8c9   : > { %11711 = vrcp.f32 %v5758_v19  ;;  %v5364_v38 = vpop.xlane.xlu0 %5363  ;;  %v6322_v57 = vpack.c.bf16 %v6306_v53, %v6306_v53 }
 0x8ca   : > { %v6645_v42 = vpop.f32.mrf.mxu3  ;;  %7818 = vmatmul.bf16.gmra.mxu2 %v13756_v43  ;;  %11713 = vrcp.f32 %v5364_v38 }
 0x8cb   : > { %v6685_v49 = vmul.f32 %v11708_v48, %v6645_v42  ;;  %v6267_v11 = vpop.f32.mrf.mxu1  ;;  %11715 = vrcp.f32 %v6562_v17  ;;  %6338 = vst [vmem:[#allocation2 + $0xa8] sm:$0xf] %v6322_v57  ;;  %v11339_v17 = vld [vmem:[#allocation8 + $0x224] sm:$0xf]  ;;  %v10357_v48 = vld [vmem:[#allocation8 + $0x30] sm:$0xf0] }
 0x8cc   : > { %v6307_v55 = vmul.f32 %v11710_v62, %v6267_v11  ;;  %v10285_v15 = vld [vmem:[#allocation2 + $0x98] sm:$0xf0]  ;;  %v11371_v42 = vld [vmem:[#allocation8 + $0x324] sm:$0xf]  ;;  %v10360_v62 = vor.u32 %v11275_v34, %v10357_v48  ;;  %v10741_v57 = vld [vmem:[#allocation8 + $0x330] sm:$0xf0] }
 0x8cd   : > { %v6701_v32 = vpack.c.bf16 %v6685_v49, %v6685_v49  ;;  %v13759_v22 = vor.u32 %v11256_v10, %v10285_v15  ;;  %v11307_v49 = vld [vmem:[#allocation8 + $0x124] sm:$0xf]  ;;  %v10485_v11 = vld [vmem:[#allocation8 + $0x130] sm:$0xf0] }
 0x8ce   : > { %v6323_v45 = vpack.c.bf16 %v6307_v55, %v6307_v55  ;;  %7894 = vmatpush.bf16.msrb.mxu0 %v10360_v62  ;;  %v11367_v48 = vld [vmem:[#allocation8 + $0x304] sm:$0xf] }
 0x8cf   : > { %v11712_v51 = vpop.eup %11711  ;;  %6717 = vst [vmem:[#allocation2 + $0xbc] sm:$0xf] %v6701_v32  ;;  %7867 = vmatmul.bf16.gmra.mxu3 %v13759_v22  ;;  %v6170_v4 = vpop.xlane.xlu2 %6169 }
 0x8d0   : > { %v5882_v52 = vmul.f32 %v11712_v51, %v13656_v35  ;;  %6339 = vst [vmem:[#allocation2 + $0xb8] sm:$0xf] %v6323_v45  ;;  %v6168_v41 = vpop.xlane.xlu1 %6167  ;;  %v11714_v33 = vpop.eup %11713  ;;  %v10744_v45 = vor.u32 %v11371_v42, %v10741_v57  ;;  %v10488_v51 = vor.u32 %v11307_v49, %v10485_v11  ;;  %v10725_v42 = vld [vmem:[#allocation8 + $0x310] sm:$0xf0] }
 0x8d1   : > { %11717 = vrcp.f32 %v6168_v41  ;;  %v6564_v24 = vpop.xlane.xlu0 %6563  ;;  %v11716_v27 = vpop.eup %11715  ;;  %v5504_v37 = vmul.f32 %v11714_v33, %v13646_v23  ;;  %v10616_v23 = vor.u32 %v11339_v17, %v10613_v47  ;;  %v11271_v47 = vld [vmem:[#allocation8 + $0x4] sm:$0xf]  ;;  %v10728_v11 = vor.u32 %v11367_v48, %v10725_v42  ;;  %v10715_v42 = vld [vmem:[#allocation8 + $0x2e8] sm:$0xf] }
 0x8d2   : > { %v5898_v21 = vpack.c.bf16 %v5882_v52, %v5882_v52  ;;  %v6648_v28 = vpop.f32.mrf.mxu3  ;;  %11719 = vrcp.f32 %v6564_v24  ;;  %v10299_v35 = vld [vmem:[#allocation2 + $0xa8] sm:$0xf]  ;;  %v11260_v24 = vld [vmem:[#allocation2 + $0xac] sm:$0xf]  ;;  %8041 = vmatpush.bf16.msrb.mxu3 %v10744_v45  ;;  %7943 = vmatpush.bf16.msrb.mxu1 %v10488_v51 }
 0x8d3   : > { %v6686_v29 = vmul.f32 %v11716_v27, %v6648_v28  ;;  %v6270_v36 = vpop.f32.mrf.mxu1  ;;  %v5520_v5 = vpack.c.bf16 %v5504_v37, %v5504_v37  ;;  %11721 = vrcp.f32 %v6170_v4  ;;  %7992 = vmatpush.bf16.msrb.mxu2 %v10616_v23  ;;  %v11265_v37 = vld [vmem:[#allocation2 + $0xcc] sm:$0xf0] }
 0x8d4   : > { %5914 = vst [vmem:[#allocation2 + $0xc4] sm:$0xf] %v5898_v21 }
 0x8d5   : > { %v6702_v19 = vpack.c.bf16 %v6686_v29, %v6686_v29  ;;  %5536 = vst [vmem:[#allocation2 + $0xc0] sm:$0xf] %v5520_v5  ;;  %v11335_v5 = vld [vmem:[#allocation8 + $0x204] sm:$0xf] }
 0x8d6   : > { %v10301_v32 = vld [vmem:[#allocation2 + $0xb8] sm:$0xf0]  ;;  %8042 = vmatpush.bf16.msrb.mxu3 %v10728_v11  ;;  %v10459_v11 = vld [vmem:[#allocation8 + $0xe8] sm:$0xf] }
 0x8d7   : > { %v11718_v1 = vpop.eup %11717  ;;  %6718 = vst [vmem:[#allocation2 + $0xcc] sm:$0xf] %v6702_v19  ;;  %v11262_v56 = vld [vmem:[#allocation2 + $0xb4] sm:$0xf0]  ;;  %v5760_v38 = vpop.xlane.xlu2 %5759  ;;  %v13767_v28 = vor.u32 %v11260_v24, %v10301_v32  ;;  %v10597_v19 = vld [vmem:[#allocation8 + $0x210] sm:$0xf0] }
 0x8d8   : > { %v6308_v20 = vmul.f32 %v11718_v1, %v6270_v36  ;;  %v6566_v53 = vpop.xlane.xlu1 %6565  ;;  %v13764_v26 = vor.u32 %v11262_v56, %v10299_v35  ;;  %v11720_v55 = vpop.eup %11719  ;;  %11723 = vrcp.f32 %v5760_v38  ;;  %v10600_v35 = vor.u32 %v11335_v5, %v10597_v19 }
 0x8d9   : > { %v5370_v13 = vpop.xlane.xlu0 %5369  ;;  %v11722_v52 = vpop.eup %11721 }
 0x8da   : > { %v6324_v10 = vpack.c.bf16 %v6308_v20, %v6308_v20  ;;  %v6650_v15 = vpop.f32.mrf.mxu3  ;;  %7823 = vmatmul.bf16.gmra.mxu2 %v13764_v26  ;;  %11725 = vrcp.f32 %v5370_v13  ;;  %v10341_v20 = vld [vmem:[#allocation8 + $0x10] sm:$0xf0]  ;;  %v11303_v13 = vld [vmem:[#allocation8 + $0x104] sm:$0xf] }
 0x8db   : > { %v6687_v41 = vmul.f32 %v11720_v55, %v6650_v15  ;;  %v6272_v4 = vpop.f32.mrf.mxu1  ;;  %11727 = vrcp.f32 %v6566_v53  ;;  %7993 = vmatpush.bf16.msrb.mxu2 %v10600_v35  ;;  %v10344_v34 = vor.u32 %v11271_v47, %v10341_v20  ;;  %v10469_v55 = vld [vmem:[#allocation8 + $0x110] sm:$0xf0]  ;;  %v11263_v35 = vld [vmem:[#allocation2 + $0xc4] sm:$0xf] }
 0x8dc   : > { %6340 = vst [vmem:[#allocation2 + $0xc8] sm:$0xf] %v6324_v10  ;;  %v6309_v33 = vmul.f32 %v11722_v52, %v6272_v4  ;;  %v10307_v21 = vld [vmem:[#allocation2 + $0xc0] sm:$0xf]  ;;  %v10472_v32 = vor.u32 %v11303_v13, %v10469_v55  ;;  %v11366_v13 = vld [vmem:[#allocation8 + $0x2f4] sm:$0xf0] }
 0x8dd   : > { %v6703_v27 = vpack.c.bf16 %v6687_v41, %v6687_v41  ;;  %v13769_v36 = vor.u32 %v11265_v37, %v10307_v21  ;;  %7895 = vmatpush.bf16.msrb.mxu0 %v10344_v34  ;;  %v11302_v55 = vld [vmem:[#allocation8 + $0xf4] sm:$0xf0] }
 0x8de   : > { %v6325_v29 = vpack.c.bf16 %v6309_v33, %v6309_v33  ;;  %v11724_v17 = vpop.eup %11723  ;;  %7944 = vmatpush.bf16.msrb.mxu1 %v10472_v32  ;;  %v11264_v47 = vld [vmem:[#allocation2 + $0xcc] sm:$0xf] }
 0x8df   : > { %6719 = vst [vmem:[#allocation2 + $0xdc] sm:$0xf] %v6703_v27  ;;  %7872 = vmatmul.bf16.gmra.mxu3 %v13767_v28  ;;  %7730 = vmatmul.bf16.gmra.mxu0 %v13769_v36  ;;  %v5368_v1 = vpop.xlane.xlu2 %5367  ;;  %v5883_v38 = vmul.f32 %v11724_v17, %v13664_v59 }
 0x8e0   : > { %6341 = vst [vmem:[#allocation2 + $0xd8] sm:$0xf] %v6325_v29  ;;  %v6174_v56 = vpop.xlane.xlu1 %6173  ;;  %v11726_v53 = vpop.eup %11725  ;;  %11729 = vrcp.f32 %v5368_v1 }
 0x8e1   : > { %v6172_v23 = vpop.xlane.xlu0 %6171  ;;  %v11728_v62 = vpop.eup %11727  ;;  %v5507_v57 = vmul.f32 %v11726_v53, %v13677_v3  ;;  %v5899_v10 = vpack.c.bf16 %v5883_v38, %v5883_v38 }
 0x8e2   : > { %v6653_v49 = vpop.f32.mrf.mxu3  ;;  %11731 = vrcp.f32 %v6172_v23 }
 0x8e3   : > { %v6688_v15 = vmul.f32 %v11728_v62, %v6653_v49  ;;  %v5523_v45 = vpack.c.bf16 %v5507_v57, %v5507_v57  ;;  %5915 = vst [vmem:[#allocation2 + $0xd4] sm:$0xf] %v5899_v10  ;;  %11733 = vrcp.f32 %v6174_v56  ;;  %v10315_v41 = vld [vmem:[#allocation2 + $0xc8] sm:$0xf]  ;;  %v10716_v49 = vor.u32 %v11366_v13, %v10715_v42 }
 0x8e4   : > { %v6275_v59 = vpop.f32.mrf.mxu1  ;;  %v10843_v10 = vld [vmem:[#allocation8 + $0x3e8] sm:$0xf] }
 0x8e5   : > { %v6704_v51 = vpack.c.bf16 %v6688_v15, %v6688_v15  ;;  %5539 = vst [vmem:[#allocation2 + $0xf0] sm:$0xf] %v5523_v45  ;;  %v10460_v45 = vor.u32 %v11302_v55, %v10459_v11  ;;  %8182 = vmatpush.bf16.msra.mxu2 %v10716_v49  ;;  %v10443_v49 = vld [vmem:[#allocation8 + $0xc8] sm:$0xf]  ;;  %v11298_v11 = vld [vmem:[#allocation8 + $0xd4] sm:$0xf0] }
 0x8e6   : > { %v11730_v52 = vpop.eup %11729  ;;  %v10317_v19 = vld [vmem:[#allocation2 + $0xd8] sm:$0xf0]  ;;  %v10827_v55 = vld [vmem:[#allocation8 + $0x3c8] sm:$0xf] }
 0x8e7   : > { %6720 = vst [vmem:[#allocation2 + $0xec] sm:$0xf] %v6704_v51  ;;  %v11266_v3 = vld [vmem:[#allocation2 + $0xd4] sm:$0xf0]  ;;  %v5506_v4 = vmul.f32 %v11730_v52, %v13669_v25  ;;  %v6568_v33 = vpop.xlane.xlu2 %6567  ;;  %v13781_v38 = vor.u32 %v11264_v47, %v10317_v19  ;;  %v10587_v51 = vld [vmem:[#allocation8 + $0x1e8] sm:$0xf]  ;;  %8084 = vmatpush.bf16.msra.mxu0 %v10460_v45 }
 0x8e8   : > { %v5764_v24 = vpop.xlane.xlu1 %5763  ;;  %v13776_v27 = vor.u32 %v11266_v3, %v10315_v41  ;;  %v11732_v21 = vpop.eup %11731  ;;  %11735 = vrcp.f32 %v6568_v33  ;;  %v11330_v45 = vld [vmem:[#allocation8 + $0x1d4] sm:$0xf0] }
 0x8e9   : > { %v5762_v37 = vpop.xlane.xlu0 %5761  ;;  %v5522_v29 = vpack.c.bf16 %v5506_v4, %v5506_v4  ;;  %v6310_v5 = vmul.f32 %v11732_v21, %v6275_v59  ;;  %11737 = vrcp.f32 %v5764_v24  ;;  %v11734_v17 = vpop.eup %11733  ;;  %v11398_v59 = vld [vmem:[#allocation8 + $0x3f4] sm:$0xf0] }
 0x8ea   : > { %7828 = vmatmul.bf16.gmra.mxu2 %v13776_v27  ;;  %11739 = vrcp.f32 %v5762_v37  ;;  %v10309_v25 = vld [vmem:[#allocation2 + $0xd0] sm:$0xf0]  ;;  %v6655_v34 = vpop.f32.mrf.mxu3  ;;  %v10844_v3 = vor.u32 %v11398_v59, %v10843_v10  ;;  %v11334_v4 = vld [vmem:[#allocation8 + $0x1f4] sm:$0xf0]  ;;  %v7701_v33 = vpop.f32.mrf.mxu0  ;;  %v10444_v10 = vor.u32 %v11298_v11, %v10443_v49  ;;  %v10555_v49 = vld [vmem:[#allocation8 + $0x1a8] sm:$0xf] }
 0x8eb   : > { %5538 = vst [vmem:[#allocation2 + $0xe0] sm:$0xf] %v5522_v29  ;;  %v6326_v1 = vpack.c.bf16 %v6310_v5, %v6310_v5  ;;  %v13779_v53 = vor.u32 %v11263_v35, %v10309_v25  ;;  %v10588_v29 = vor.u32 %v11334_v4, %v10587_v51 }
 0x8ec   : > { %v6277_v56 = vpop.f32.mrf.mxu1  ;;  %v11269_v37 = vld [vmem:[#allocation2 + $0xec] sm:$0xf0]  ;;  %8231 = vmatpush.bf16.msra.mxu3 %v10844_v3  ;;  %8085 = vmatpush.bf16.msra.mxu0 %v10444_v10 }
 0x8ed   : > { %v6311_v20 = vmul.f32 %v11734_v17, %v6277_v56  ;;  %6342 = vst [vmem:[#allocation2 + $0xe8] sm:$0xf] %v6326_v1  ;;  %7779 = vmatmul.bf16.gmra.mxu1 %v13779_v53 }
 0x8ee   : > { %v11736_v23 = vpop.eup %11735  ;;  %8133 = vmatpush.bf16.msra.mxu1 %v10588_v29  ;;  %v11268_v1 = vld [vmem:[#allocation2 + $0xec] sm:$0xf] }
 0x8ef   : > { %v6327_v48 = vpack.c.bf16 %v6311_v20, %v6311_v20  ;;  %7877 = vmatmul.bf16.gmra.mxu3 %v13781_v38  ;;  %v11738_v62 = vpop.eup %11737  ;;  %v6689_v57 = vmul.f32 %v11736_v23, %v6655_v34  ;;  %v10699_v34 = vld [vmem:[#allocation8 + $0x2c8] sm:$0xf] }
 0x8f0   : > { %v11740_v15 = vpop.eup %11739  ;;  %v5885_v32 = vmul.f32 %v11738_v62, %v13683_v0  ;;  %v13797_v62 = vld [vmem:[#allocation9] sm:$0xf] }
 0x8f1   : > { %6343 = vst [vmem:[#allocation2 + $0xf8] sm:$0xf] %v6327_v48  ;;  %v5884_v52 = vmul.f32 %v11740_v15, %v13675_v39  ;;  %v6705_v41 = vpack.c.bf16 %v6689_v57, %v6689_v57  ;;  %v11362_v48 = vld [vmem:[#allocation8 + $0x2d4] sm:$0xf0] }
 0x8f2   : > { %v5901_v24 = vpack.c.bf16 %v5885_v32, %v5885_v32  ;;  %v10323_v21 = vld [vmem:[#allocation2 + $0xe0] sm:$0xf]  ;;  %v7703_v20 = vpop.f32.mrf.mxu0  ;;  %v10700_v13 = vor.u32 %v11362_v48, %v10699_v34  ;;  %v11394_v15 = vld [vmem:[#allocation8 + $0x3d4] sm:$0xf0]  ;;  %v10571_v32 = vld [vmem:[#allocation8 + $0x1c8] sm:$0xf] }
 0x8f3   : > { %v5900_v5 = vpack.c.bf16 %v5884_v52, %v5884_v52  ;;  %6721 = vst [vmem:[#allocation2 + $0xfc] sm:$0xf] %v6705_v41  ;;  %v13787_v19 = vor.u32 %v11269_v37, %v10323_v21  ;;  %v10828_v59 = vor.u32 %v11394_v15, %v10827_v55  ;;  %v10572_v51 = vor.u32 %v11330_v45, %v10571_v32 }
 0x8f4   : > { %5917 = vst [vmem:[#allocation2 + $0xf4] sm:$0xf] %v5901_v24  ;;  %v7750_v0 = vpop.f32.mrf.mxu1  ;;  %v10331_v39 = vld [vmem:[#allocation2 + $0xe8] sm:$0xf]  ;;  %8183 = vmatpush.bf16.msra.mxu2 %v10700_v13  ;;  %v13802_v52 = vperm.slane %v13797_v62, 0 }
 0x8f5   : > { %5916 = vst [vmem:[#allocation2 + $0xe4] sm:$0xf] %v5900_v5  ;;  %7735 = vmatmul.bf16.gmra.mxu0 %v13787_v19  ;;  %8232 = vmatpush.bf16.msra.mxu3 %v10828_v59  ;;  %v11390_v13 = vld [vmem:[#allocation8 + $0x3b4] sm:$0xf0] }
 0x8f6   : > { %8134 = vmatpush.bf16.msra.mxu1 %v10572_v51  ;;  %v7702_v3 = vadd.f32 %v7701_v33, %v13802_v52  ;;  %v10427_v33 = vld [vmem:[#allocation8 + $0xa8] sm:$0xf] }
 0x8f8   : > { %v11270_v35 = vld [vmem:[#allocation2 + $0xf4] sm:$0xf0]  ;;  %v7751_v4 = vadd.f32 %v7750_v0, %v7702_v3 }
 0x8f9   : > { %v13790_v17 = vor.u32 %v11270_v35, %v10331_v39  ;;  %v10683_v39 = vld [vmem:[#allocation8 + $0x2a8] sm:$0xf]  ;;  %v11358_v35 = vld [vmem:[#allocation8 + $0x2b4] sm:$0xf0] }
 0x8fa   : > { %v10333_v56 = vld [vmem:[#allocation2 + $0xf8] sm:$0xf0]  ;;  %v7706_v41 = vpop.f32.mrf.mxu0  ;;  %v11294_v0 = vld [vmem:[#allocation8 + $0xb4] sm:$0xf0] }
 0x8fb   : > { %7833 = vmatmul.bf16.gmra.mxu2 %v13790_v17  ;;  %v10325_v25 = vld [vmem:[#allocation2 + $0xf0] sm:$0xf0]  ;;  %v13793_v47 = vor.u32 %v11268_v1, %v10333_v56  ;;  %v10684_v1 = vor.u32 %v11358_v35, %v10683_v39  ;;  %v7704_v56 = vadd.f32 %v7703_v20, %v13802_v52  ;;  %v10428_v48 = vor.u32 %v11294_v0, %v10427_v33  ;;  %v11326_v20 = vld [vmem:[#allocation8 + $0x1b4] sm:$0xf0]  ;;  %v10411_v39 = vld [vmem:[#allocation8 + $0x88] sm:$0xf] }
 0x8fc   : > { %v11267_v23 = vld [vmem:[#allocation2 + $0xe4] sm:$0xf]  ;;  %v7752_v57 = vpop.f32.mrf.mxu1  ;;  %v10556_v10 = vor.u32 %v11326_v20, %v10555_v49  ;;  %v7707_v3 = vadd.f32 %v7706_v41, %v13802_v52  ;;  %v11290_v35 = vld [vmem:[#allocation8 + $0x94] sm:$0xf0] }
 0x8fd   : > { %v13795_v42 = vor.u32 %v11267_v23, %v10325_v25  ;;  %8184 = vmatpush.bf16.msra.mxu2 %v10684_v1  ;;  %v10811_v23 = vld [vmem:[#allocation8 + $0x3a8] sm:$0xf]  ;;  %v7753_v34 = vadd.f32 %v7752_v57, %v7704_v56  ;;  %8086 = vmatpush.bf16.msra.mxu0 %v10428_v48  ;;  %v10412_v0 = vor.u32 %v11290_v35, %v10411_v39  ;;  %v11322_v41 = vld [vmem:[#allocation8 + $0x194] sm:$0xf0] }
 0x8fe   : > { %v10812_v55 = vor.u32 %v11390_v13, %v10811_v23  ;;  %8135 = vmatpush.bf16.msra.mxu1 %v10556_v10  ;;  %v10795_v1 = vld [vmem:[#allocation8 + $0x388] sm:$0xf]  ;;  %v11386_v23 = vld [vmem:[#allocation8 + $0x394] sm:$0xf0] }
 0x8ff   : > { %7882 = vmatmul.bf16.gmra.mxu3 %v13793_v47  ;;  %7784 = vmatmul.bf16.gmra.mxu1 %v13795_v42  ;;  %v10796_v13 = vor.u32 %v11386_v23, %v10795_v1  ;;  %v10779_v35 = vld [vmem:[#allocation8 + $0x368] sm:$0xf] }
 0x900   : > { %8233 = vmatpush.bf16.msra.mxu3 %v10812_v55  ;;  %v10523_v23 = vld [vmem:[#allocation8 + $0x168] sm:$0xf] }
 0x901   : > { %8087 = vmatpush.bf16.msra.mxu0 %v10412_v0  ;;  %v11382_v0 = vld [vmem:[#allocation8 + $0x374] sm:$0xf0] }
 0x902   : > { %v7708_v25 = vpop.f32.mrf.mxu0 }
 0x904   : > { %v7755_v24 = vpop.f32.mrf.mxu1  ;;  %8234 = vmatpush.bf16.msra.mxu3 %v10796_v13 }
 0x905   : > { %7896 = vmatmul.bf16.vlgmr.msrb.gmra.mxu0 %v13605_v54 }
 0x90a   : > { %v7799_v21 = vpop.f32.mrf.mxu2  ;;  %v7711_v51 = vpop.f32.mrf.mxu0 }
 0x90b   : > { %v7800_v37 = vadd.f32 %v7799_v21, %v7751_v4  ;;  %7994 = vmatmul.bf16.vlgmr.msrb.gmra.mxu2 %v13705_v58  ;;  %v10667_v4 = vld [vmem:[#allocation8 + $0x288] sm:$0xf]  ;;  %v11354_v21 = vld [vmem:[#allocation8 + $0x294] sm:$0xf0] }
 0x90c   : > { %v7848_v29 = vpop.f32.mrf.mxu3  ;;  %v7757_v45 = vpop.f32.mrf.mxu1 }
 0x90d   : > { %v7849_v5 = vadd.f32 %v7848_v29, %v7800_v37  ;;  %v10668_v29 = vor.u32 %v11354_v21, %v10667_v4  ;;  %v7712_v4 = vadd.f32 %v7711_v51, %v13802_v52  ;;  %v10651_v21 = vld [vmem:[#allocation8 + $0x268] sm:$0xf] }
 0x90f   : > { %8476 = vst [vmem:[%s13810_s21] sm:$0xff] %v7849_v5  ;;  %8043 = vmatmul.bf16.vlgmr.msrb.gmra.mxu3 %v13707_v46  ;;  %7945 = vmatmul.bf16.vlgmr.msrb.gmra.mxu1 %v13694_v2  ;;  %v7756_v5 = vadd.f32 %v7755_v24, %v7707_v3 }
 0x910   : > { %8185 = vmatpush.bf16.msra.mxu2 %v10668_v29  ;;  %v11350_v29 = vld [vmem:[#allocation8 + $0x274] sm:$0xf0] }
 0x912   : > { %v7801_v11 = vpop.f32.mrf.mxu2  ;;  %v7713_v56 = vpop.f32.mrf.mxu0 }
 0x913   : > { %v7802_v15 = vadd.f32 %v7801_v11, %v7753_v34  ;;  %v10539_v34 = vld [vmem:[#allocation8 + $0x188] sm:$0xf]  ;;  %v7709_v11 = vadd.f32 %v7708_v25, %v13802_v52 }
 0x914   : > { %v7850_v32 = vpop.f32.mrf.mxu3  ;;  %v7760_v37 = vpop.f32.mrf.mxu1  ;;  %v10540_v49 = vor.u32 %v11322_v41, %v10539_v34  ;;  %v10395_v25 = vld [vmem:[#allocation8 + $0x68] sm:$0xf]  ;;  %v11318_v34 = vld [vmem:[#allocation8 + $0x174] sm:$0xf0] }
 0x915   : > { %v7851_v59 = vadd.f32 %v7850_v32, %v7802_v15  ;;  %7901 = vmatmul.bf16.gmra.mxu0 %v13650_v60  ;;  %v7758_v55 = vadd.f32 %v7757_v45, %v7709_v11  ;;  %v7761_v39 = vadd.f32 %v7760_v37, %v7712_v4  ;;  %v11286_v45 = vld [vmem:[#allocation8 + $0x74] sm:$0xf0]  ;;  %v10524_v13 = vor.u32 %v11318_v34, %v10523_v23 }
 0x916   : > { %8136 = vmatpush.bf16.msra.mxu1 %v10540_v49 }
 0x917   : > { %8480 = vst [vmem:[%s13810_s21 + $0x20] sm:$0xff] %v7851_v59 }
 0x91a   : > { %v7716_v59 = vpop.f32.mrf.mxu0  ;;  %8137 = vmatpush.bf16.msra.mxu1 %v10524_v13 }
 0x91b   : > { %v7804_v57 = vpop.f32.mrf.mxu2  ;;  %7999 = vmatmul.bf16.gmra.mxu2 %v13718_v61  ;;  %v7717_v4 = vadd.f32 %v7716_v59, %v13802_v52  ;;  %v11314_v59 = vld [vmem:[#allocation8 + $0x154] sm:$0xf0] }
 0x91c   : > { %v7805_v33 = vadd.f32 %v7804_v57, %v7756_v5  ;;  %v7762_v10 = vpop.f32.mrf.mxu1  ;;  %v10652_v5 = vor.u32 %v11350_v29, %v10651_v21  ;;  %v10635_v29 = vld [vmem:[#allocation8 + $0x248] sm:$0xf] }
 0x91e   : > { %8186 = vmatpush.bf16.msra.mxu2 %v10652_v5  ;;  %v11346_v5 = vld [vmem:[#allocation8 + $0x254] sm:$0xf0] }
 0x91f   : > { %8048 = vmatmul.bf16.gmra.mxu3 %v13723_v50  ;;  %7950 = vmatmul.bf16.gmra.mxu1 %v13703_v12 }
 0x922   : > { %v7853_v48 = vpop.f32.mrf.mxu3 }
 0x923   : > { %v7806_v20 = vpop.f32.mrf.mxu2  ;;  %v7854_v24 = vadd.f32 %v7853_v48, %v7805_v33  ;;  %v10396_v33 = vor.u32 %v11286_v45, %v10395_v25  ;;  %v10780_v48 = vor.u32 %v11382_v0, %v10779_v35  ;;  %v11282_v25 = vld [vmem:[#allocation8 + $0x54] sm:$0xf0]  ;;  %v10763_v45 = vld [vmem:[#allocation8 + $0x348] sm:$0xf] }
 0x924   : > { %v7807_v15 = vadd.f32 %v7806_v20, %v7758_v55  ;;  %v7765_v51 = vpop.f32.mrf.mxu1  ;;  %v7714_v20 = vadd.f32 %v7713_v56, %v13802_v52  ;;  %v10636_v56 = vor.u32 %v11346_v5, %v10635_v29  ;;  %v10507_v0 = vld [vmem:[#allocation8 + $0x148] sm:$0xf]  ;;  %v11342_v29 = vld [vmem:[#allocation8 + $0x234] sm:$0xf0] }
 0x925   : > { %8484 = vst [vmem:[%s13810_s21 + $0x40] sm:$0xff] %v7854_v24  ;;  %7906 = vmatmul.bf16.gmra.mxu0 %v13687_v14  ;;  %8235 = vmatpush.bf16.msra.mxu3 %v10780_v48  ;;  %v7718_v24 = vpop.f32.mrf.mxu0 }
 0x926   : > { %8088 = vmatpush.bf16.msra.mxu0 %v10396_v33  ;;  %v7763_v11 = vadd.f32 %v7762_v10, %v7714_v20  ;;  %v10379_v10 = vld [vmem:[#allocation8 + $0x48] sm:$0xf]  ;;  %8187 = vmatpush.bf16.msra.mxu2 %v10636_v56  ;;  %v11378_v33 = vld [vmem:[#allocation8 + $0x354] sm:$0xf0] }
 0x927   : > { %v10764_v34 = vor.u32 %v11378_v33, %v10763_v45  ;;  %v11310_v33 = vld [vmem:[#allocation8 + $0x134] sm:$0xf0] }
 0x929   : > { %8236 = vmatpush.bf16.msra.mxu3 %v10764_v34 }
 0x92a   : > { %v7855_v32 = vpop.f32.mrf.mxu3 }
 0x92b   : > { %v7809_v57 = vpop.f32.mrf.mxu2  ;;  %v7856_v3 = vadd.f32 %v7855_v32, %v7807_v15  ;;  %8004 = vmatmul.bf16.gmra.mxu2 %v13730_v31 }
 0x92c   : > { %v7810_v1 = vadd.f32 %v7809_v57, %v7761_v39  ;;  %v7766_v39 = vadd.f32 %v7765_v51, %v7717_v4  ;;  %v7719_v51 = vadd.f32 %v7718_v24, %v13802_v52  ;;  %v10619_v4 = vld [vmem:[#allocation8 + $0x228] sm:$0xf] }
 0x92d   : > { %8488 = vst [vmem:[%s13810_s21 + $0x60] sm:$0xff] %v7856_v3  ;;  %v7767_v3 = vpop.f32.mrf.mxu1  ;;  %v7721_v21 = vpop.f32.mrf.mxu0  ;;  %v10620_v5 = vor.u32 %v11342_v29, %v10619_v4  ;;  %v11338_v4 = vld [vmem:[#allocation8 + $0x214] sm:$0xf0] }
 0x92e   : > { %v7768_v20 = vadd.f32 %v7767_v3, %v7719_v51  ;;  %v10363_v3 = vld [vmem:[#allocation8 + $0x28] sm:$0xf] }
 0x92f   : > { %8053 = vmatmul.bf16.gmra.mxu3 %v13734_v8  ;;  %7955 = vmatmul.bf16.gmra.mxu1 %v13716_v6 }
 0x930   : > { %8188 = vmatpush.bf16.msra.mxu2 %v10620_v5  ;;  %v10347_v5 = vld [vmem:[#allocation8 + $0x8] sm:$0xf] }
 0x932   : > { %v7858_v41 = vpop.f32.mrf.mxu3 }
 0x933   : > { %v7811_v49 = vpop.f32.mrf.mxu2  ;;  %v7859_v37 = vadd.f32 %v7858_v41, %v7810_v1  ;;  %v10380_v1 = vor.u32 %v11282_v25, %v10379_v10  ;;  %v10508_v41 = vor.u32 %v11314_v59, %v10507_v0  ;;  %v11278_v10 = vld [vmem:[#allocation8 + $0x34] sm:$0xf0]  ;;  %v10747_v25 = vld [vmem:[#allocation8 + $0x328] sm:$0xf] }
 0x934   : > { %v7812_v55 = vadd.f32 %v7811_v49, %v7763_v11 }
 0x935   : > { %8492 = vst [vmem:[%s13810_s21 + $0x80] sm:$0xff] %v7859_v37  ;;  %7911 = vmatmul.bf16.gmra.mxu0 %v13698_v7  ;;  %8138 = vmatpush.bf16.msra.mxu1 %v10508_v41  ;;  %v7770_v49 = vpop.f32.mrf.mxu1  ;;  %v7723_v37 = vpop.f32.mrf.mxu0 }
 0x936   : > { %8089 = vmatpush.bf16.msra.mxu0 %v10380_v1  ;;  %v10491_v1 = vld [vmem:[#allocation8 + $0x128] sm:$0xf]  ;;  %v7724_v41 = vadd.f32 %v7723_v37, %v13802_v52 }
 0x93a   : > { %v7860_v15 = vpop.f32.mrf.mxu3 }
 0x93b   : > { %v7814_v32 = vpop.f32.mrf.mxu2  ;;  %v7861_v57 = vadd.f32 %v7860_v15, %v7812_v55  ;;  %8009 = vmatmul.bf16.gmra.mxu2 %v13741_v16 }
 0x93c   : > { %v7815_v35 = vadd.f32 %v7814_v32, %v7766_v39  ;;  %v7722_v32 = vadd.f32 %v7721_v21, %v13802_v52  ;;  %v11374_v21 = vld [vmem:[#allocation8 + $0x334] sm:$0xf0] }
 0x93d   : > { %8496 = vst [vmem:[%s13810_s21 + $0xa0] sm:$0xff] %v7861_v57  ;;  %v7726_v39 = vpop.f32.mrf.mxu0  ;;  %v7772_v56 = vpop.f32.mrf.mxu1  ;;  %v10748_v59 = vor.u32 %v11374_v21, %v10747_v25 }
 0x93e   : > { %v7771_v24 = vadd.f32 %v7770_v49, %v7722_v32  ;;  %v7773_v51 = vadd.f32 %v7772_v56, %v7724_v41  ;;  %v10731_v56 = vld [vmem:[#allocation8 + $0x308] sm:$0xf] }
 0x93f   : > { %8058 = vmatmul.bf16.gmra.mxu3 %v13748_v40  ;;  %7960 = vmatmul.bf16.gmra.mxu1 %v13728_v9 }
 0x940   : > { %8237 = vmatpush.bf16.msra.mxu3 %v10748_v59 }
 0x942   : > { %v7863_v23 = vpop.f32.mrf.mxu3 }
 0x943   : > { %v7864_v48 = vadd.f32 %v7863_v23, %v7815_v35  ;;  %v7816_v13 = vpop.f32.mrf.mxu2  ;;  %v10364_v35 = vor.u32 %v11278_v10, %v10363_v3  ;;  %v10492_v23 = vor.u32 %v11310_v33, %v10491_v1 }
 0x944   : > { %v7817_v11 = vadd.f32 %v7816_v13, %v7768_v20 }
 0x945   : > { %8500 = vst [vmem:[%s13810_s21 + $0xc0] sm:$0xff] %v7864_v48  ;;  %7916 = vmatmul.bf16.gmra.mxu0 %v13714_v18  ;;  %8139 = vmatpush.bf16.msra.mxu1 %v10492_v23  ;;  %v7728_v13 = vpop.f32.mrf.mxu0  ;;  %v7775_v20 = vpop.f32.mrf.mxu1 }
 0x946   : > { %8090 = vmatpush.bf16.msra.mxu0 %v10364_v35  ;;  %v11306_v35 = vld [vmem:[#allocation8 + $0x114] sm:$0xf0]  ;;  %v7729_v23 = vadd.f32 %v7728_v13, %v13802_v52 }
 0x94a   : > { %v7865_v55 = vpop.f32.mrf.mxu3 }
 0x94b   : > { %v7866_v15 = vadd.f32 %v7865_v55, %v7817_v11  ;;  %8014 = vmatmul.bf16.gmra.mxu2 %v13756_v43 }
 0x94d   : > { %8504 = vst [vmem:[%s13810_s21 + $0xe0] sm:$0xff] %v7866_v15  ;;  %v7819_v57 = vpop.f32.mrf.mxu2  ;;  %v7727_v15 = vadd.f32 %v7726_v39, %v13802_v52  ;;  %v10475_v39 = vld [vmem:[#allocation8 + $0x108] sm:$0xf]  ;;  %v7777_v59 = vpop.f32.mrf.mxu1 }
 0x94e   : > { %v7820_v45 = vadd.f32 %v7819_v57, %v7771_v24  ;;  %v10603_v57 = vld [vmem:[#allocation8 + $0x208] sm:$0xf]  ;;  %v11274_v24 = vld [vmem:[#allocation8 + $0x14] sm:$0xf0]  ;;  %v10476_v33 = vor.u32 %v11306_v35, %v10475_v39  ;;  %v7778_v41 = vadd.f32 %v7777_v59, %v7729_v23 }
 0x94f   : > { %8063 = vmatmul.bf16.gmra.mxu3 %v13759_v22  ;;  %7965 = vmatmul.bf16.gmra.mxu1 %v13739_v30  ;;  %v7776_v29 = vadd.f32 %v7775_v20, %v7727_v15  ;;  %v10604_v37 = vor.u32 %v11338_v4, %v10603_v57  ;;  %v10348_v25 = vor.u32 %v11274_v24, %v10347_v5  ;;  %v11364_v57 = vld [vmem:[#allocation8 + $0x2ec] sm:$0xf]  ;;  %v10717_v4 = vld [vmem:[#allocation8 + $0x2f8] sm:$0xf0] }
 0x950   : > { %8140 = vmatpush.bf16.msra.mxu1 %v10476_v33  ;;  %v10720_v13 = vor.u32 %v11364_v57, %v10717_v4  ;;  %v11396_v5 = vld [vmem:[#allocation8 + $0x3ec] sm:$0xf] }
 0x951   : > { %8189 = vmatpush.bf16.msra.mxu2 %v10604_v37  ;;  %8091 = vmatpush.bf16.msra.mxu0 %v10348_v25  ;;  %v10461_v37 = vld [vmem:[#allocation8 + $0xf8] sm:$0xf0]  ;;  %v11296_v4 = vld [vmem:[#allocation8 + $0xcc] sm:$0xf] }
 0x952   : > { %v7868_v0 = vpop.f32.mrf.mxu3  ;;  %v10589_v25 = vld [vmem:[#allocation8 + $0x1f8] sm:$0xf0] }
 0x953   : > { %v7869_v34 = vadd.f32 %v7868_v0, %v7820_v45  ;;  %v11370_v45 = vld [vmem:[#allocation8 + $0x314] sm:$0xf0] }
 0x954   : > { %v10732_v1 = vor.u32 %v11370_v45, %v10731_v56 }
 0x955   : > { %8508 = vst [vmem:[%s13810_s21 + $0x100] sm:$0xff] %v7869_v34  ;;  %v7821_v48 = vpop.f32.mrf.mxu2  ;;  %7921 = vmatmul.bf16.gmra.mxu0 %v13746_v44  ;;  %8378 = vmatpush.bf16.msrb.mxu2 %v10720_v13  ;;  %v10445_v13 = vld [vmem:[#allocation8 + $0xd8] sm:$0xf0] }
 0x956   : > { %v7822_v49 = vadd.f32 %v7821_v48, %v7773_v51  ;;  %8238 = vmatpush.bf16.msra.mxu3 %v10732_v1 }
 0x95a   : > { %v7870_v11 = vpop.f32.mrf.mxu3 }
 0x95b   : > { %v7871_v55 = vadd.f32 %v7870_v11, %v7822_v49  ;;  %8019 = vmatmul.bf16.gmra.mxu2 %v13764_v26 }
 0x95c   : > { %v7731_v3 = vpop.f32.mrf.mxu0 }
 0x95d   : > { %8512 = vst [vmem:[%s13810_s21 + $0x120] sm:$0xff] %v7871_v55  ;;  %v7824_v32 = vpop.f32.mrf.mxu2  ;;  %v7732_v49 = vadd.f32 %v7731_v3, %v13802_v52  ;;  %v10845_v3 = vld [vmem:[#allocation8 + $0x3f8] sm:$0xf0] }
 0x95e   : > { %v7825_v10 = vadd.f32 %v7824_v32, %v7776_v29  ;;  %v11300_v29 = vld [vmem:[#allocation8 + $0xec] sm:$0xf]  ;;  %v10848_v39 = vor.u32 %v11396_v5, %v10845_v3  ;;  %v10448_v5 = vor.u32 %v11296_v4, %v10445_v13  ;;  %v10573_v3 = vld [vmem:[#allocation8 + $0x1d8] sm:$0xf0] }
 0x95f   : > { %8068 = vmatmul.bf16.gmra.mxu3 %v13767_v28  ;;  %7970 = vmatmul.bf16.gmra.mxu1 %v13753_v63  ;;  %v10464_v56 = vor.u32 %v11300_v29, %v10461_v37  ;;  %v11392_v29 = vld [vmem:[#allocation8 + $0x3cc] sm:$0xf] }
 0x960   : > { %8427 = vmatpush.bf16.msrb.mxu3 %v10848_v39 }
 0x961   : > { %8280 = vmatpush.bf16.msrb.mxu0 %v10464_v56  ;;  %v11328_v56 = vld [vmem:[#allocation8 + $0x1cc] sm:$0xf] }
 0x962   : > { %v7873_v21 = vpop.f32.mrf.mxu3 }
 0x963   : > { %v7874_v0 = vadd.f32 %v7873_v21, %v7825_v10  ;;  %v11332_v10 = vld [vmem:[#allocation8 + $0x1ec] sm:$0xf] }
 0x964   : > { %v7733_v20 = vpop.f32.mrf.mxu0  ;;  %v10592_v35 = vor.u32 %v11332_v10, %v10589_v25 }
 0x965   : > { %8516 = vst [vmem:[%s13810_s21 + $0x140] sm:$0xff] %v7874_v0  ;;  %v7826_v34 = vpop.f32.mrf.mxu2  ;;  %7926 = vmatmul.bf16.gmra.mxu0 %v13769_v36  ;;  %v7734_v21 = vadd.f32 %v7733_v20, %v13802_v52 }
 0x966   : > { %v7827_v48 = vadd.f32 %v7826_v34, %v7778_v41  ;;  %8329 = vmatpush.bf16.msrb.mxu1 %v10592_v35  ;;  %8281 = vmatpush.bf16.msrb.mxu0 %v10448_v5  ;;  %v10557_v5 = vld [vmem:[#allocation8 + $0x1b8] sm:$0xf0] }
 0x96a   : > { %v7875_v51 = vpop.f32.mrf.mxu3  ;;  %v7780_v55 = vpop.f32.mrf.mxu1 }
 0x96b   : > { %v7876_v11 = vadd.f32 %v7875_v51, %v7827_v48  ;;  %8024 = vmatmul.bf16.gmra.mxu2 %v13776_v27  ;;  %v7781_v15 = vadd.f32 %v7780_v55, %v7732_v49 }
 0x96d   : > { %8520 = vst [vmem:[%s13810_s21 + $0x160] sm:$0xff] %v7876_v11  ;;  %v7829_v32 = vpop.f32.mrf.mxu2 }
 0x96e   : > { %v7830_v24 = vadd.f32 %v7829_v32, %v7781_v15  ;;  %v11360_v15 = vld [vmem:[#allocation8 + $0x2cc] sm:$0xf]  ;;  %v10701_v32 = vld [vmem:[#allocation8 + $0x2d8] sm:$0xf0] }
 0x96f   : > { %8073 = vmatmul.bf16.gmra.mxu3 %v13781_v38  ;;  %7975 = vmatmul.bf16.gmra.mxu1 %v13779_v53  ;;  %v10704_v57 = vor.u32 %v11360_v15, %v10701_v32  ;;  %v10429_v32 = vld [vmem:[#allocation8 + $0xb8] sm:$0xf0] }
 0x971   : > { %8379 = vmatpush.bf16.msrb.mxu2 %v10704_v57  ;;  %v11388_v57 = vld [vmem:[#allocation8 + $0x3ac] sm:$0xf] }
 0x972   : > { %v7878_v45 = vpop.f32.mrf.mxu3  ;;  %v7736_v33 = vpop.f32.mrf.mxu0 }
 0x973   : > { %v7879_v1 = vadd.f32 %v7878_v45, %v7830_v24  ;;  %v7782_v0 = vpop.f32.mrf.mxu1  ;;  %v7737_v49 = vadd.f32 %v7736_v33, %v13802_v52  ;;  %v10829_v24 = vld [vmem:[#allocation8 + $0x3d8] sm:$0xf0]  ;;  %v10576_v45 = vor.u32 %v11328_v56, %v10573_v3 }
 0x974   : > { %v7783_v59 = vadd.f32 %v7782_v0, %v7734_v21  ;;  %v10832_v25 = vor.u32 %v11392_v29, %v10829_v24  ;;  %v10813_v29 = vld [vmem:[#allocation8 + $0x3b8] sm:$0xf0] }
 0x975   : > { %8524 = vst [vmem:[%s13810_s21 + $0x180] sm:$0xff] %v7879_v1  ;;  %v7831_v23 = vpop.f32.mrf.mxu2  ;;  %7931 = vmatmul.bf16.gmra.mxu0 %v13787_v19  ;;  %8330 = vmatpush.bf16.msrb.mxu1 %v10576_v45  ;;  %v10816_v56 = vor.u32 %v11388_v57, %v10813_v29  ;;  %v10797_v57 = vld [vmem:[#allocation8 + $0x398] sm:$0xf0] }
 0x976   : > { %v7832_v34 = vadd.f32 %v7831_v23, %v7783_v59  ;;  %8428 = vmatpush.bf16.msrb.mxu3 %v10832_v25  ;;  %v13873_v59 = vperm.slane %v13797_v62, 1  ;;  %v11292_v62 = vld [vmem:[#allocation8 + $0xac] sm:$0xf] }
 0x977   : > { %v10432_v13 = vor.u32 %v11292_v62, %v10429_v32 }
 0x979   : > { %8282 = vmatpush.bf16.msrb.mxu0 %v10432_v13  ;;  %v10541_v13 = vld [vmem:[#allocation8 + $0x198] sm:$0xf0] }
 0x97a   : > { %v7880_v41 = vpop.f32.mrf.mxu3  ;;  %v7738_v51 = vpop.f32.mrf.mxu0  ;;  %8429 = vmatpush.bf16.msrb.mxu3 %v10816_v56 }
 0x97b   : > { %v7881_v48 = vadd.f32 %v7880_v41, %v7832_v34  ;;  %8029 = vmatmul.bf16.gmra.mxu2 %v13790_v17  ;;  %v7739_v21 = vadd.f32 %v7738_v51, %v13802_v52 }
 0x97c   : > { %v7785_v20 = vpop.f32.mrf.mxu1 }
 0x97d   : > { %8528 = vst [vmem:[%s13810_s21 + $0x1a0] sm:$0xff] %v7881_v48  ;;  %v7786_v11 = vadd.f32 %v7785_v20, %v7737_v49 }
 0x97e   : > { %v7834_v55 = vpop.f32.mrf.mxu2 }
 0x97f   : > { %8078 = vmatmul.bf16.gmra.mxu3 %v13793_v47  ;;  %7980 = vmatmul.bf16.gmra.mxu1 %v13795_v42  ;;  %v7835_v37 = vadd.f32 %v7834_v55, %v7786_v11  ;;  %v11356_v11 = vld [vmem:[#allocation8 + $0x2ac] sm:$0xf]  ;;  %v10685_v55 = vld [vmem:[#allocation8 + $0x2b8] sm:$0xf0] }
 0x980   : > { %v10688_v15 = vor.u32 %v11356_v11, %v10685_v55  ;;  %v11288_v11 = vld [vmem:[#allocation8 + $0x8c] sm:$0xf]  ;;  %v10413_v55 = vld [vmem:[#allocation8 + $0x98] sm:$0xf0] }
 0x981   : > { %v10416_v32 = vor.u32 %v11288_v11, %v10413_v55 }
 0x982   : > { %v7883_v10 = vpop.f32.mrf.mxu3  ;;  %v7897_v35 = vpop.f32.mrf.mxu0  ;;  %8380 = vmatpush.bf16.msrb.mxu2 %v10688_v15  ;;  %v11384_v15 = vld [vmem:[#allocation8 + $0x38c] sm:$0xf] }
 0x983   : > { %v7884_v39 = vadd.f32 %v7883_v10, %v7835_v37  ;;  %v7898_v49 = vadd.f32 %v7897_v35, %v13873_v59  ;;  %v11324_v37 = vld [vmem:[#allocation8 + $0x1ac] sm:$0xf]  ;;  %8283 = vmatpush.bf16.msrb.mxu0 %v10416_v32  ;;  %v10525_v32 = vld [vmem:[#allocation8 + $0x178] sm:$0xf0] }
 0x984   : > { %v7787_v1 = vpop.f32.mrf.mxu1  ;;  %v10560_v3 = vor.u32 %v11324_v37, %v10557_v5  ;;  %v10800_v37 = vor.u32 %v11384_v15, %v10797_v57  ;;  %v10781_v15 = vld [vmem:[#allocation8 + $0x378] sm:$0xf0] }
 0x985   : > { %8532 = vst [vmem:[%s13810_s21 + $0x1c0] sm:$0xff] %v7884_v39  ;;  %v7788_v33 = vadd.f32 %v7787_v1, %v7739_v21  ;;  %8092 = vmatmul.bf16.vlgmr.msra.gmra.mxu0 %v13605_v54 }
 0x986   : > { %v7836_v0 = vpop.f32.mrf.mxu2  ;;  %8331 = vmatpush.bf16.msrb.mxu1 %v10560_v3  ;;  %8430 = vmatpush.bf16.msrb.mxu3 %v10800_v37 }
 0x987   : > { %v7837_v23 = vadd.f32 %v7836_v0, %v7788_v33 }
 0x98a   : > { %v7885_v34 = vpop.f32.mrf.mxu3  ;;  %v7899_v48 = vpop.f32.mrf.mxu0 }
 0x98b   : > { %v7886_v41 = vadd.f32 %v7885_v34, %v7837_v23  ;;  %8190 = vmatmul.bf16.vlgmr.msra.gmra.mxu2 %v13705_v58  ;;  %v7900_v45 = vadd.f32 %v7899_v48, %v13873_v59 }
 0x98c   : > { %v7946_v52 = vpop.f32.mrf.mxu1 }
 0x98d   : > { %8536 = vst [vmem:[%s13810_s21 + $0x1e0] sm:$0xff] %v7886_v41  ;;  %v7947_v51 = vadd.f32 %v7946_v52, %v7898_v49  ;;  %v11352_v52 = vld [vmem:[#allocation8 + $0x28c] sm:$0xf] }
 0x98e   : > { %v7995_v20 = vpop.f32.mrf.mxu2 }
 0x98f   : > { %8239 = vmatmul.bf16.vlgmr.msra.gmra.mxu3 %v13707_v46  ;;  %8141 = vmatmul.bf16.vlgmr.msra.gmra.mxu1 %v13694_v2  ;;  %v7996_v4 = vadd.f32 %v7995_v20, %v7947_v51  ;;  %v10669_v51 = vld [vmem:[#allocation8 + $0x298] sm:$0xf0] }
 0x990   : > { %v10672_v20 = vor.u32 %v11352_v52, %v10669_v51  ;;  %v11284_v52 = vld [vmem:[#allocation8 + $0x6c] sm:$0xf]  ;;  %v10397_v51 = vld [vmem:[#allocation8 + $0x78] sm:$0xf0] }
 0x991   : > { %v10400_v55 = vor.u32 %v11284_v52, %v10397_v51 }
 0x992   : > { %v8044_v24 = vpop.f32.mrf.mxu3  ;;  %v7902_v25 = vpop.f32.mrf.mxu0  ;;  %8381 = vmatpush.bf16.msrb.mxu2 %v10672_v20  ;;  %v11380_v20 = vld [vmem:[#allocation8 + $0x36c] sm:$0xf] }
 0x993   : > { %v8045_v10 = vadd.f32 %v8044_v24, %v7996_v4  ;;  %v7903_v34 = vadd.f32 %v7902_v25, %v13873_v59  ;;  %v11320_v4 = vld [vmem:[#allocation8 + $0x18c] sm:$0xf]  ;;  %8284 = vmatpush.bf16.msrb.mxu0 %v10400_v55  ;;  %v10509_v55 = vld [vmem:[#allocation8 + $0x158] sm:$0xf0] }
 0x994   : > { %v7948_v39 = vpop.f32.mrf.mxu1  ;;  %v10544_v5 = vor.u32 %v11320_v4, %v10541_v13  ;;  %v10784_v4 = vor.u32 %v11380_v20, %v10781_v15  ;;  %v10765_v20 = vld [vmem:[#allocation8 + $0x358] sm:$0xf0] }
 0x995   : > { %8477 = vst [vmem:[%s13810_s21 + $0x8] sm:$0xff] %v8045_v10  ;;  %v7949_v35 = vadd.f32 %v7948_v39, %v7900_v45  ;;  %8097 = vmatmul.bf16.gmra.mxu0 %v13650_v60 }
 0x996   : > { %v7997_v21 = vpop.f32.mrf.mxu2  ;;  %8332 = vmatpush.bf16.msrb.mxu1 %v10544_v5  ;;  %8431 = vmatpush.bf16.msrb.mxu3 %v10784_v4 }
 0x997   : > { %v7998_v1 = vadd.f32 %v7997_v21, %v7949_v35 }
 0x99a   : > { %v8046_v33 = vpop.f32.mrf.mxu3  ;;  %v7904_v23 = vpop.f32.mrf.mxu0 }
 0x99b   : > { %v8047_v0 = vadd.f32 %v8046_v33, %v7998_v1  ;;  %8195 = vmatmul.bf16.gmra.mxu2 %v13718_v61  ;;  %v7905_v3 = vadd.f32 %v7904_v23, %v13873_v59 }
 0x99c   : > { %v7951_v41 = vpop.f32.mrf.mxu1 }
 0x99d   : > { %8481 = vst [vmem:[%s13810_s21 + $0x28] sm:$0xff] %v8047_v0  ;;  %v7952_v49 = vadd.f32 %v7951_v41, %v7903_v34  ;;  %v11348_v41 = vld [vmem:[#allocation8 + $0x26c] sm:$0xf] }
 0x99e   : > { %v8000_v48 = vpop.f32.mrf.mxu2 }
 0x99f   : > { %8244 = vmatmul.bf16.gmra.mxu3 %v13723_v50  ;;  %8146 = vmatmul.bf16.gmra.mxu1 %v13703_v12  ;;  %v8001_v62 = vadd.f32 %v8000_v48, %v7952_v49  ;;  %v10653_v49 = vld [vmem:[#allocation8 + $0x278] sm:$0xf0] }
 0x9a0   : > { %v10656_v48 = vor.u32 %v11348_v41, %v10653_v49  ;;  %v11280_v41 = vld [vmem:[#allocation8 + $0x4c] sm:$0xf]  ;;  %v10381_v49 = vld [vmem:[#allocation8 + $0x58] sm:$0xf0] }
 0x9a1   : > { %v10384_v51 = vor.u32 %v11280_v41, %v10381_v49 }
 0x9a2   : > { %v8049_v29 = vpop.f32.mrf.mxu3  ;;  %v7907_v56 = vpop.f32.mrf.mxu0  ;;  %8382 = vmatpush.bf16.msrb.mxu2 %v10656_v48  ;;  %v11376_v48 = vld [vmem:[#allocation8 + $0x34c] sm:$0xf] }
 0x9a3   : > { %v8050_v24 = vadd.f32 %v8049_v29, %v8001_v62  ;;  %v7908_v33 = vadd.f32 %v7907_v56, %v13873_v59  ;;  %v11316_v62 = vld [vmem:[#allocation8 + $0x16c] sm:$0xf]  ;;  %8285 = vmatpush.bf16.msrb.mxu0 %v10384_v51  ;;  %v10493_v51 = vld [vmem:[#allocation8 + $0x138] sm:$0xf0] }
 0x9a4   : > { %v7953_v10 = vpop.f32.mrf.mxu1  ;;  %v10528_v13 = vor.u32 %v11316_v62, %v10525_v32  ;;  %v10768_v62 = vor.u32 %v11376_v48, %v10765_v20  ;;  %v10749_v48 = vld [vmem:[#allocation8 + $0x338] sm:$0xf0] }
 0x9a5   : > { %8485 = vst [vmem:[%s13810_s21 + $0x48] sm:$0xff] %v8050_v24  ;;  %v7954_v25 = vadd.f32 %v7953_v10, %v7905_v3  ;;  %8102 = vmatmul.bf16.gmra.mxu0 %v13687_v14 }
 0x9a6   : > { %v8002_v45 = vpop.f32.mrf.mxu2  ;;  %8333 = vmatpush.bf16.msrb.mxu1 %v10528_v13  ;;  %8432 = vmatpush.bf16.msrb.mxu3 %v10768_v62 }
 0x9a7   : > { %v8003_v39 = vadd.f32 %v8002_v45, %v7954_v25 }
 0x9aa   : > { %v8051_v35 = vpop.f32.mrf.mxu3  ;;  %v7909_v1 = vpop.f32.mrf.mxu0 }
 0x9ab   : > { %v8052_v21 = vadd.f32 %v8051_v35, %v8003_v39  ;;  %8200 = vmatmul.bf16.gmra.mxu2 %v13730_v31  ;;  %v7910_v5 = vadd.f32 %v7909_v1, %v13873_v59 }
 0x9ac   : > { %v7956_v0 = vpop.f32.mrf.mxu1 }
 0x9ad   : > { %8489 = vst [vmem:[%s13810_s21 + $0x68] sm:$0xff] %v8052_v21  ;;  %v7957_v34 = vadd.f32 %v7956_v0, %v7908_v33  ;;  %v11344_v0 = vld [vmem:[#allocation8 + $0x24c] sm:$0xf] }
 0x9ae   : > { %v8005_v23 = vpop.f32.mrf.mxu2 }
 0x9af   : > { %8249 = vmatmul.bf16.gmra.mxu3 %v13734_v8  ;;  %8151 = vmatmul.bf16.gmra.mxu1 %v13716_v6  ;;  %v8006_v11 = vadd.f32 %v8005_v23, %v7957_v34  ;;  %v10637_v34 = vld [vmem:[#allocation8 + $0x258] sm:$0xf0] }
 0x9b0   : > { %v10640_v23 = vor.u32 %v11344_v0, %v10637_v34  ;;  %v11276_v0 = vld [vmem:[#allocation8 + $0x2c] sm:$0xf]  ;;  %v10365_v34 = vld [vmem:[#allocation8 + $0x38] sm:$0xf0] }
 0x9b1   : > { %v10368_v49 = vor.u32 %v11276_v0, %v10365_v34 }
 0x9b2   : > { %v8054_v57 = vpop.f32.mrf.mxu3  ;;  %v7912_v37 = vpop.f32.mrf.mxu0  ;;  %8383 = vmatpush.bf16.msrb.mxu2 %v10640_v23  ;;  %v11372_v23 = vld [vmem:[#allocation8 + $0x32c] sm:$0xf] }
 0x9b3   : > { %v8055_v29 = vadd.f32 %v8054_v57, %v8006_v11  ;;  %v7913_v35 = vadd.f32 %v7912_v37, %v13873_v59  ;;  %v11312_v11 = vld [vmem:[#allocation8 + $0x14c] sm:$0xf]  ;;  %8286 = vmatpush.bf16.msrb.mxu0 %v10368_v49  ;;  %v10477_v49 = vld [vmem:[#allocation8 + $0x118] sm:$0xf0] }
 0x9b4   : > { %v7958_v24 = vpop.f32.mrf.mxu1  ;;  %v10512_v32 = vor.u32 %v11312_v11, %v10509_v55  ;;  %v10752_v11 = vor.u32 %v11372_v23, %v10749_v48  ;;  %v10733_v23 = vld [vmem:[#allocation8 + $0x318] sm:$0xf0] }
 0x9b5   : > { %8493 = vst [vmem:[%s13810_s21 + $0x88] sm:$0xff] %v8055_v29  ;;  %v7959_v56 = vadd.f32 %v7958_v24, %v7910_v5  ;;  %8107 = vmatmul.bf16.gmra.mxu0 %v13698_v7 }
 0x9b6   : > { %v8007_v3 = vpop.f32.mrf.mxu2  ;;  %8334 = vmatpush.bf16.msrb.mxu1 %v10512_v32  ;;  %8433 = vmatpush.bf16.msrb.mxu3 %v10752_v11 }
 0x9b7   : > { %v8008_v10 = vadd.f32 %v8007_v3, %v7959_v56 }
 0x9ba   : > { %v8056_v25 = vpop.f32.mrf.mxu3  ;;  %v7914_v39 = vpop.f32.mrf.mxu0 }
 0x9bb   : > { %v8057_v45 = vadd.f32 %v8056_v25, %v8008_v10  ;;  %8205 = vmatmul.bf16.gmra.mxu2 %v13741_v16  ;;  %v7915_v13 = vadd.f32 %v7914_v39, %v13873_v59 }
 0x9bc   : > { %v7961_v21 = vpop.f32.mrf.mxu1 }
 0x9bd   : > { %8497 = vst [vmem:[%s13810_s21 + $0xa8] sm:$0xff] %v8057_v45  ;;  %v7962_v33 = vadd.f32 %v7961_v21, %v7913_v35  ;;  %v11340_v21 = vld [vmem:[#allocation8 + $0x22c] sm:$0xf] }
 0x9be   : > { %v8010_v1 = vpop.f32.mrf.mxu2 }
 0x9bf   : > { %8254 = vmatmul.bf16.gmra.mxu3 %v13748_v40  ;;  %8156 = vmatmul.bf16.gmra.mxu1 %v13728_v9  ;;  %v8011_v52 = vadd.f32 %v8010_v1, %v7962_v33  ;;  %v10621_v33 = vld [vmem:[#allocation8 + $0x238] sm:$0xf0] }
 0x9c0   : > { %v10624_v1 = vor.u32 %v11340_v21, %v10621_v33  ;;  %v11272_v21 = vld [vmem:[#allocation8 + $0xc] sm:$0xf]  ;;  %v10349_v33 = vld [vmem:[#allocation8 + $0x18] sm:$0xf0] }
 0x9c1   : > { %v10352_v34 = vor.u32 %v11272_v21, %v10349_v33 }
 0x9c2   : > { %v8059_v15 = vpop.f32.mrf.mxu3  ;;  %v7917_v4 = vpop.f32.mrf.mxu0  ;;  %8384 = vmatpush.bf16.msrb.mxu2 %v10624_v1  ;;  %v11368_v1 = vld [vmem:[#allocation8 + $0x30c] sm:$0xf] }
 0x9c3   : > { %v8060_v57 = vadd.f32 %v8059_v15, %v8011_v52  ;;  %v7918_v25 = vadd.f32 %v7917_v4, %v13873_v59  ;;  %v11308_v52 = vld [vmem:[#allocation8 + $0x12c] sm:$0xf]  ;;  %8287 = vmatpush.bf16.msrb.mxu0 %v10352_v34 }
 0x9c4   : > { %v7963_v29 = vpop.f32.mrf.mxu1  ;;  %v10496_v55 = vor.u32 %v11308_v52, %v10493_v51  ;;  %v10736_v52 = vor.u32 %v11368_v1, %v10733_v23 }
 0x9c5   : > { %8501 = vst [vmem:[%s13810_s21 + $0xc8] sm:$0xff] %v8060_v57  ;;  %v7964_v37 = vadd.f32 %v7963_v29, %v7915_v13  ;;  %8112 = vmatmul.bf16.gmra.mxu0 %v13714_v18 }
 0x9c6   : > { %v8012_v5 = vpop.f32.mrf.mxu2  ;;  %8335 = vmatpush.bf16.msrb.mxu1 %v10496_v55  ;;  %8434 = vmatpush.bf16.msrb.mxu3 %v10736_v52 }
 0x9c7   : > { %v8013_v24 = vadd.f32 %v8012_v5, %v7964_v37 }
 0x9ca   : > { %v8061_v56 = vpop.f32.mrf.mxu3  ;;  %v7919_v10 = vpop.f32.mrf.mxu0 }
 0x9cb   : > { %v8062_v3 = vadd.f32 %v8061_v56, %v8013_v24  ;;  %8210 = vmatmul.bf16.gmra.mxu2 %v13756_v43  ;;  %v7920_v32 = vadd.f32 %v7919_v10, %v13873_v59 }
 0x9cc   : > { %v7966_v45 = vpop.f32.mrf.mxu1 }
 0x9cd   : > { %8505 = vst [vmem:[%s13810_s21 + $0xe8] sm:$0xff] %v8062_v3  ;;  %v7967_v35 = vadd.f32 %v7966_v45, %v7918_v25  ;;  %v11336_v45 = vld [vmem:[#allocation8 + $0x20c] sm:$0xf] }
 0x9ce   : > { %v8015_v39 = vpop.f32.mrf.mxu2 }
 0x9cf   : > { %8259 = vmatmul.bf16.gmra.mxu3 %v13759_v22  ;;  %8161 = vmatmul.bf16.gmra.mxu1 %v13739_v30  ;;  %v8016_v41 = vadd.f32 %v8015_v39, %v7967_v35  ;;  %v10605_v35 = vld [vmem:[#allocation8 + $0x218] sm:$0xf0] }
 0x9d0   : > { %v10608_v39 = vor.u32 %v11336_v45, %v10605_v35 }
 0x9d2   : > { %v8064_v20 = vpop.f32.mrf.mxu3  ;;  %v7922_v62 = vpop.f32.mrf.mxu0  ;;  %8385 = vmatpush.bf16.msrb.mxu2 %v10608_v39 }
 0x9d3   : > { %v8065_v15 = vadd.f32 %v8064_v20, %v8016_v41  ;;  %v7923_v56 = vadd.f32 %v7922_v62, %v13873_v59  ;;  %v11304_v41 = vld [vmem:[#allocation8 + $0x10c] sm:$0xf] }
 0x9d4   : > { %v7968_v57 = vpop.f32.mrf.mxu1  ;;  %v10480_v51 = vor.u32 %v11304_v41, %v10477_v49 }
 0x9d5   : > { %8509 = vst [vmem:[%s13810_s21 + $0x108] sm:$0xff] %v8065_v15  ;;  %v7969_v4 = vadd.f32 %v7968_v57, %v7920_v32  ;;  %8117 = vmatmul.bf16.gmra.mxu0 %v13746_v44 }
 0x9d6   : > { %v8017_v13 = vpop.f32.mrf.mxu2  ;;  %8336 = vmatpush.bf16.msrb.mxu1 %v10480_v51 }
 0x9d7   : > { %v8018_v29 = vadd.f32 %v8017_v13, %v7969_v4 }
 0x9da   : > { %v8066_v37 = vpop.f32.mrf.mxu3  ;;  %v7924_v24 = vpop.f32.mrf.mxu0 }
 0x9db   : > { %v8067_v5 = vadd.f32 %v8066_v37, %v8018_v29  ;;  %8215 = vmatmul.bf16.gmra.mxu2 %v13764_v26  ;;  %v7925_v55 = vadd.f32 %v7924_v24, %v13873_v59 }
 0x9dc   : > { %v7971_v3 = vpop.f32.mrf.mxu1 }
 0x9dd   : > { %8513 = vst [vmem:[%s13810_s21 + $0x128] sm:$0xff] %v8067_v5  ;;  %v7972_v25 = vadd.f32 %v7971_v3, %v7923_v56 }
 0x9de   : > { %v8020_v10 = vpop.f32.mrf.mxu2 }
 0x9df   : > { %8264 = vmatmul.bf16.gmra.mxu3 %v13767_v28  ;;  %8166 = vmatmul.bf16.gmra.mxu1 %v13753_v63  ;;  %v8021_v0 = vadd.f32 %v8020_v10, %v7972_v25 }
 0x9e2   : > { %v8069_v48 = vpop.f32.mrf.mxu3  ;;  %v7927_v11 = vpop.f32.mrf.mxu0 }
 0x9e3   : > { %v8070_v20 = vadd.f32 %v8069_v48, %v8021_v0  ;;  %v7928_v37 = vadd.f32 %v7927_v11, %v13873_v59 }
 0x9e4   : > { %v7973_v15 = vpop.f32.mrf.mxu1 }
 0x9e5   : > { %8517 = vst [vmem:[%s13810_s21 + $0x148] sm:$0xff] %v8070_v20  ;;  %v7974_v62 = vadd.f32 %v7973_v15, %v7925_v55  ;;  %8122 = vmatmul.bf16.gmra.mxu0 %v13769_v36 }
 0x9e6   : > { %v8022_v32 = vpop.f32.mrf.mxu2 }
 0x9e7   : > { %v8023_v57 = vadd.f32 %v8022_v32, %v7974_v62 }
 0x9ea   : > { %v8071_v4 = vpop.f32.mrf.mxu3  ;;  %v7929_v29 = vpop.f32.mrf.mxu0 }
 0x9eb   : > { %v8072_v13 = vadd.f32 %v8071_v4, %v8023_v57  ;;  %8220 = vmatmul.bf16.gmra.mxu2 %v13776_v27  ;;  %v7930_v35 = vadd.f32 %v7929_v29, %v13873_v59  ;;  %v13939_v4 = vld [vmem:[#allocation9] sm:$0xf] }
 0x9ec   : > { %v7976_v5 = vpop.f32.mrf.mxu1 }
 0x9ed   : > { %8521 = vst [vmem:[%s13810_s21 + $0x168] sm:$0xff] %v8072_v13  ;;  %v7977_v24 = vadd.f32 %v7976_v5, %v7928_v37  ;;  %v13942_v13 = vperm.slane %v13939_v4, 2 }
 0x9ee   : > { %v8025_v56 = vpop.f32.mrf.mxu2 }
 0x9ef   : > { %8269 = vmatmul.bf16.gmra.mxu3 %v13781_v38  ;;  %8171 = vmatmul.bf16.gmra.mxu1 %v13779_v53  ;;  %v8026_v3 = vadd.f32 %v8025_v56, %v7977_v24 }
 0x9f2   : > { %v8074_v25 = vpop.f32.mrf.mxu3  ;;  %v7932_v45 = vpop.f32.mrf.mxu0 }
 0x9f3   : > { %v8075_v10 = vadd.f32 %v8074_v25, %v8026_v3  ;;  %v7933_v41 = vadd.f32 %v7932_v45, %v13873_v59 }
 0x9f4   : > { %v7978_v39 = vpop.f32.mrf.mxu1 }
 0x9f5   : > { %8525 = vst [vmem:[%s13810_s21 + $0x188] sm:$0xff] %v8075_v10  ;;  %v7979_v21 = vadd.f32 %v7978_v39, %v7930_v35  ;;  %8127 = vmatmul.bf16.gmra.mxu0 %v13787_v19 }
 0x9f6   : > { %v8027_v33 = vpop.f32.mrf.mxu2 }
 0x9f7   : > { %v8028_v1 = vadd.f32 %v8027_v33, %v7979_v21 }
 0x9fa   : > { %v8076_v0 = vpop.f32.mrf.mxu3  ;;  %v7934_v23 = vpop.f32.mrf.mxu0 }
 0x9fb   : > { %v8077_v34 = vadd.f32 %v8076_v0, %v8028_v1  ;;  %8225 = vmatmul.bf16.gmra.mxu2 %v13790_v17  ;;  %v7935_v15 = vadd.f32 %v7934_v23, %v13873_v59 }
 0x9fc   : > { %v7981_v49 = vpop.f32.mrf.mxu1 }
 0x9fd   : > { %8529 = vst [vmem:[%s13810_s21 + $0x1a8] sm:$0xff] %v8077_v34  ;;  %v7982_v48 = vadd.f32 %v7981_v49, %v7933_v41 }
 0x9fe   : > { %v8030_v52 = vpop.f32.mrf.mxu2 }
 0x9ff   : > { %8274 = vmatmul.bf16.gmra.mxu3 %v13793_v47  ;;  %8176 = vmatmul.bf16.gmra.mxu1 %v13795_v42  ;;  %v8031_v51 = vadd.f32 %v8030_v52, %v7982_v48 }
 0xa02   : > { %v8079_v20 = vpop.f32.mrf.mxu3  ;;  %v8093_v55 = vpop.f32.mrf.mxu0 }
 0xa03   : > { %v8080_v11 = vadd.f32 %v8079_v20, %v8031_v51  ;;  %v8094_v59 = vadd.f32 %v8093_v55, %v13942_v13 }
 0xa04   : > { %v7983_v62 = vpop.f32.mrf.mxu1 }
 0xa05   : > { %8533 = vst [vmem:[%s13810_s21 + $0x1c8] sm:$0xff] %v8080_v11  ;;  %v7984_v32 = vadd.f32 %v7983_v62, %v7935_v15  ;;  %8288 = vmatmul.bf16.vlgmr.msrb.gmra.mxu0 %v13605_v54 }
 0xa06   : > { %v8032_v57 = vpop.f32.mrf.mxu2 }
 0xa07   : > { %v8033_v29 = vadd.f32 %v8032_v57, %v7984_v32 }
 0xa0a   : > { %v8081_v37 = vpop.f32.mrf.mxu3  ;;  %v8095_v24 = vpop.f32.mrf.mxu0 }
 0xa0b   : > { %v8082_v5 = vadd.f32 %v8081_v37, %v8033_v29  ;;  %8386 = vmatmul.bf16.vlgmr.msrb.gmra.mxu2 %v13705_v58  ;;  %v8096_v39 = vadd.f32 %v8095_v24, %v13942_v13 }
 0xa0c   : > { %v8142_v56 = vpop.f32.mrf.mxu1 }
 0xa0d   : > { %8537 = vst [vmem:[%s13810_s21 + $0x1e8] sm:$0xff] %v8082_v5  ;;  %v8143_v3 = vadd.f32 %v8142_v56, %v8094_v59 }
 0xa0e   : > { %v8191_v25 = vpop.f32.mrf.mxu2 }
 0xa0f   : > { %8435 = vmatmul.bf16.vlgmr.msrb.gmra.mxu3 %v13707_v46  ;;  %8337 = vmatmul.bf16.vlgmr.msrb.gmra.mxu1 %v13694_v2  ;;  %v8192_v54 = vadd.f32 %v8191_v25, %v8143_v3 }
 0xa12   : > { %v8240_v10 = vpop.f32.mrf.mxu3  ;;  %v8098_v35 = vpop.f32.mrf.mxu0 }
 0xa13   : > { %v8241_v45 = vadd.f32 %v8240_v10, %v8192_v54  ;;  %v8099_v46 = vadd.f32 %v8098_v35, %v13942_v13 }
 0xa14   : > { %v8144_v58 = vpop.f32.mrf.mxu1 }
 0xa15   : > { %8478 = vst [vmem:[%s13810_s21 + $0x10] sm:$0xff] %v8241_v45  ;;  %v8145_v21 = vadd.f32 %v8144_v58, %v8096_v39  ;;  %8293 = vmatmul.bf16.gmra.mxu0 %v13650_v60 }
 0xa16   : > { %v8193_v33 = vpop.f32.mrf.mxu2 }
 0xa17   : > { %v8194_v1 = vadd.f32 %v8193_v33, %v8145_v21 }
 0xa1a   : > { %v8242_v0 = vpop.f32.mrf.mxu3  ;;  %v8100_v2 = vpop.f32.mrf.mxu0 }
 0xa1b   : > { %v8243_v34 = vadd.f32 %v8242_v0, %v8194_v1  ;;  %8391 = vmatmul.bf16.gmra.mxu2 %v13718_v61  ;;  %v8101_v20 = vadd.f32 %v8100_v2, %v13942_v13 }
 0xa1c   : > { %v8147_v23 = vpop.f32.mrf.mxu1 }
 0xa1d   : > { %8482 = vst [vmem:[%s13810_s21 + $0x30] sm:$0xff] %v8243_v34  ;;  %v8148_v41 = vadd.f32 %v8147_v23, %v8099_v46 }
 0xa1e   : > { %v8196_v49 = vpop.f32.mrf.mxu2 }
 0xa1f   : > { %8440 = vmatmul.bf16.gmra.mxu3 %v13723_v50  ;;  %8342 = vmatmul.bf16.gmra.mxu1 %v13703_v12  ;;  %v8197_v48 = vadd.f32 %v8196_v49, %v8148_v41 }
 0xa22   : > { %v8245_v60 = vpop.f32.mrf.mxu3  ;;  %v8103_v51 = vpop.f32.mrf.mxu0 }
 0xa23   : > { %v8246_v52 = vadd.f32 %v8245_v60, %v8197_v48  ;;  %v8104_v50 = vadd.f32 %v8103_v51, %v13942_v13 }
 0xa24   : > { %v8149_v61 = vpop.f32.mrf.mxu1 }
 0xa25   : > { %8486 = vst [vmem:[%s13810_s21 + $0x50] sm:$0xff] %v8246_v52  ;;  %v8150_v11 = vadd.f32 %v8149_v61, %v8101_v20  ;;  %8298 = vmatmul.bf16.gmra.mxu0 %v13687_v14 }
 0xa26   : > { %v8198_v55 = vpop.f32.mrf.mxu2 }
 0xa27   : > { %v8199_v15 = vadd.f32 %v8198_v55, %v8150_v11 }
 0xa2a   : > { %v8247_v62 = vpop.f32.mrf.mxu3  ;;  %v8105_v12 = vpop.f32.mrf.mxu0 }
 0xa2b   : > { %v8248_v32 = vadd.f32 %v8247_v62, %v8199_v15  ;;  %8396 = vmatmul.bf16.gmra.mxu2 %v13730_v31  ;;  %v8106_v56 = vadd.f32 %v8105_v12, %v13942_v13 }
 0xa2c   : > { %v8152_v57 = vpop.f32.mrf.mxu1 }
 0xa2d   : > { %8490 = vst [vmem:[%s13810_s21 + $0x70] sm:$0xff] %v8248_v32  ;;  %v8153_v29 = vadd.f32 %v8152_v57, %v8104_v50 }
 0xa2e   : > { %v8201_v37 = vpop.f32.mrf.mxu2 }
 0xa2f   : > { %8445 = vmatmul.bf16.gmra.mxu3 %v13734_v8  ;;  %8347 = vmatmul.bf16.gmra.mxu1 %v13716_v6  ;;  %v8202_v5 = vadd.f32 %v8201_v37, %v8153_v29 }
 0xa32   : > { %v8250_v14 = vpop.f32.mrf.mxu3  ;;  %v8108_v59 = vpop.f32.mrf.mxu0 }
 0xa33   : > { %v8251_v24 = vadd.f32 %v8250_v14, %v8202_v5  ;;  %v8109_v8 = vadd.f32 %v8108_v59, %v13942_v13 }
 0xa34   : > { %v8154_v31 = vpop.f32.mrf.mxu1 }
 0xa35   : > { %8494 = vst [vmem:[%s13810_s21 + $0x90] sm:$0xff] %v8251_v24  ;;  %v8155_v3 = vadd.f32 %v8154_v31, %v8106_v56  ;;  %8303 = vmatmul.bf16.gmra.mxu0 %v13698_v7 }
 0xa36   : > { %v8203_v25 = vpop.f32.mrf.mxu2 }
 0xa37   : > { %v8204_v54 = vadd.f32 %v8203_v25, %v8155_v3 }
 0xa3a   : > { %v8252_v10 = vpop.f32.mrf.mxu3  ;;  %v8110_v6 = vpop.f32.mrf.mxu0 }
 0xa3b   : > { %v8253_v45 = vadd.f32 %v8252_v10, %v8204_v54  ;;  %8401 = vmatmul.bf16.gmra.mxu2 %v13741_v16  ;;  %v8111_v0 = vadd.f32 %v8110_v6, %v13942_v13 }
 0xa3c   : > { %v8157_v35 = vpop.f32.mrf.mxu1 }
 0xa3d   : > { %8498 = vst [vmem:[%s13810_s21 + $0xb0] sm:$0xff] %v8253_v45  ;;  %v8158_v39 = vadd.f32 %v8157_v35, %v8109_v8 }
 0xa3e   : > { %v8206_v58 = vpop.f32.mrf.mxu2 }
 0xa3f   : > { %8450 = vmatmul.bf16.gmra.mxu3 %v13748_v40  ;;  %8352 = vmatmul.bf16.gmra.mxu1 %v13728_v9  ;;  %v8207_v21 = vadd.f32 %v8206_v58, %v8158_v39 }
 0xa42   : > { %v8255_v7 = vpop.f32.mrf.mxu3  ;;  %v8113_v1 = vpop.f32.mrf.mxu0 }
 0xa43   : > { %v8256_v33 = vadd.f32 %v8255_v7, %v8207_v21  ;;  %v8114_v40 = vadd.f32 %v8113_v1, %v13942_v13 }
 0xa44   : > { %v8159_v16 = vpop.f32.mrf.mxu1 }
 0xa45   : > { %8502 = vst [vmem:[%s13810_s21 + $0xd0] sm:$0xff] %v8256_v33  ;;  %v8160_v34 = vadd.f32 %v8159_v16, %v8111_v0  ;;  %8308 = vmatmul.bf16.gmra.mxu0 %v13714_v18 }
 0xa46   : > { %v8208_v2 = vpop.f32.mrf.mxu2 }
 0xa47   : > { %v8209_v46 = vadd.f32 %v8208_v2, %v8160_v34 }
 0xa4a   : > { %v8257_v23 = vpop.f32.mrf.mxu3  ;;  %v8115_v9 = vpop.f32.mrf.mxu0 }
 0xa4b   : > { %v8258_v41 = vadd.f32 %v8257_v23, %v8209_v46  ;;  %8406 = vmatmul.bf16.gmra.mxu2 %v13756_v43  ;;  %v8116_v61 = vadd.f32 %v8115_v9, %v13942_v13 }
 0xa4c   : > { %v8162_v49 = vpop.f32.mrf.mxu1 }
 0xa4d   : > { %8506 = vst [vmem:[%s13810_s21 + $0xf0] sm:$0xff] %v8258_v41  ;;  %v8163_v48 = vadd.f32 %v8162_v49, %v8114_v40  ;;  %v14008_v40 = vperm.slane %v13939_v4, 3 }
 0xa4e   : > { %v8211_v60 = vpop.f32.mrf.mxu2 }
 0xa4f   : > { %8455 = vmatmul.bf16.gmra.mxu3 %v13759_v22  ;;  %8357 = vmatmul.bf16.gmra.mxu1 %v13739_v30  ;;  %v8212_v52 = vadd.f32 %v8211_v60, %v8163_v48 }
 0xa52   : > { %v8260_v18 = vpop.f32.mrf.mxu3  ;;  %v8118_v20 = vpop.f32.mrf.mxu0 }
 0xa53   : > { %v8261_v51 = vadd.f32 %v8260_v18, %v8212_v52  ;;  %v8119_v22 = vadd.f32 %v8118_v20, %v13942_v13 }
 0xa54   : > { %v8164_v43 = vpop.f32.mrf.mxu1 }
 0xa55   : > { %8510 = vst [vmem:[%s13810_s21 + $0x110] sm:$0xff] %v8261_v51  ;;  %v8165_v11 = vadd.f32 %v8164_v43, %v8116_v61  ;;  %8313 = vmatmul.bf16.gmra.mxu0 %v13746_v44 }
 0xa56   : > { %v8213_v55 = vpop.f32.mrf.mxu2 }
 0xa57   : > { %v8214_v15 = vadd.f32 %v8213_v55, %v8165_v11 }
 0xa5a   : > { %v8262_v62 = vpop.f32.mrf.mxu3  ;;  %v8120_v30 = vpop.f32.mrf.mxu0 }
 0xa5b   : > { %v8263_v32 = vadd.f32 %v8262_v62, %v8214_v15  ;;  %8411 = vmatmul.bf16.gmra.mxu2 %v13764_v26  ;;  %v8121_v14 = vadd.f32 %v8120_v30, %v13942_v13 }
 0xa5c   : > { %v8167_v12 = vpop.f32.mrf.mxu1 }
 0xa5d   : > { %8514 = vst [vmem:[%s13810_s21 + $0x130] sm:$0xff] %v8263_v32  ;;  %v8168_v50 = vadd.f32 %v8167_v12, %v8119_v22 }
 0xa5e   : > { %v8216_v57 = vpop.f32.mrf.mxu2 }
 0xa5f   : > { %8460 = vmatmul.bf16.gmra.mxu3 %v13767_v28  ;;  %8362 = vmatmul.bf16.gmra.mxu1 %v13753_v63  ;;  %v8217_v29 = vadd.f32 %v8216_v57, %v8168_v50 }
 0xa62   : > { %v8265_v44 = vpop.f32.mrf.mxu3  ;;  %v8123_v5 = vpop.f32.mrf.mxu0 }
 0xa63   : > { %v8266_v37 = vadd.f32 %v8265_v44, %v8217_v29  ;;  %v8124_v28 = vadd.f32 %v8123_v5, %v13942_v13 }
 0xa64   : > { %v8169_v26 = vpop.f32.mrf.mxu1 }
 0xa65   : > { %8518 = vst [vmem:[%s13810_s21 + $0x150] sm:$0xff] %v8266_v37  ;;  %v8170_v24 = vadd.f32 %v8169_v26, %v8121_v14  ;;  %8318 = vmatmul.bf16.gmra.mxu0 %v13769_v36 }
 0xa66   : > { %v8218_v59 = vpop.f32.mrf.mxu2 }
 0xa67   : > { %v8219_v56 = vadd.f32 %v8218_v59, %v8170_v24 }
 0xa6a   : > { %v8267_v31 = vpop.f32.mrf.mxu3  ;;  %v8125_v63 = vpop.f32.mrf.mxu0 }
 0xa6b   : > { %v8268_v3 = vadd.f32 %v8267_v31, %v8219_v56  ;;  %8416 = vmatmul.bf16.gmra.mxu2 %v13776_v27  ;;  %v8126_v35 = vadd.f32 %v8125_v63, %v13942_v13 }
 0xa6c   : > { %v8172_v25 = vpop.f32.mrf.mxu1 }
 0xa6d   : > { %8522 = vst [vmem:[%s13810_s21 + $0x170] sm:$0xff] %v8268_v3  ;;  %v8173_v54 = vadd.f32 %v8172_v25, %v8124_v28 }
 0xa6e   : > { %v8221_v10 = vpop.f32.mrf.mxu2 }
 0xa6f   : > { %8465 = vmatmul.bf16.gmra.mxu3 %v13781_v38  ;;  %8367 = vmatmul.bf16.gmra.mxu1 %v13779_v53  ;;  %v8222_v45 = vadd.f32 %v8221_v10, %v8173_v54 }
 0xa72   : > { %v8270_v36 = vpop.f32.mrf.mxu3  ;;  %v8128_v8 = vpop.f32.mrf.mxu0 }
 0xa73   : > { %v8271_v6 = vadd.f32 %v8270_v36, %v8222_v45  ;;  %v8129_v38 = vadd.f32 %v8128_v8, %v13942_v13 }
 0xa74   : > { %v8174_v27 = vpop.f32.mrf.mxu1 }
 0xa75   : > { %8526 = vst [vmem:[%s13810_s21 + $0x190] sm:$0xff] %v8271_v6  ;;  %v8175_v39 = vadd.f32 %v8174_v27, %v8126_v35  ;;  %8323 = vmatmul.bf16.gmra.mxu0 %v13787_v19 }
 0xa76   : > { %v8223_v58 = vpop.f32.mrf.mxu2 }
 0xa77   : > { %v8224_v21 = vadd.f32 %v8223_v58, %v8175_v39 }
 0xa7a   : > { %v8272_v7 = vpop.f32.mrf.mxu3  ;;  %v8130_v53 = vpop.f32.mrf.mxu0 }
 0xa7b   : > { %v8273_v33 = vadd.f32 %v8272_v7, %v8224_v21  ;;  %8421 = vmatmul.bf16.gmra.mxu2 %v13790_v17  ;;  %v8131_v23 = vadd.f32 %v8130_v53, %v13942_v13 }
 0xa7c   : > { %v8177_v1 = vpop.f32.mrf.mxu1 }
 0xa7d   : > { %8530 = vst [vmem:[%s13810_s21 + $0x1b0] sm:$0xff] %v8273_v33  ;;  %v8178_v0 = vadd.f32 %v8177_v1, %v8129_v38 }
 0xa7e   : > { %v8226_v16 = vpop.f32.mrf.mxu2 }
 0xa7f   : > { %8470 = vmatmul.bf16.gmra.mxu3 %v13793_v47  ;;  %8372 = vmatmul.bf16.gmra.mxu1 %v13795_v42  ;;  %v8227_v34 = vadd.f32 %v8226_v16, %v8178_v0 }
 0xa82   : > { %v8275_v19 = vpop.f32.mrf.mxu3  ;;  %v8289_v46 = vpop.f32.mrf.mxu0 }
 0xa83   : > { %v8276_v2 = vadd.f32 %v8275_v19, %v8227_v34  ;;  %v8290_v42 = vadd.f32 %v8289_v46, %v14008_v40 }
 0xa84   : > { %v8179_v17 = vpop.f32.mrf.mxu1 }
 0xa85   : > { %8534 = vst [vmem:[%s13810_s21 + $0x1d0] sm:$0xff] %v8276_v2  ;;  %v8180_v41 = vadd.f32 %v8179_v17, %v8131_v23 }
 0xa86   : > { %v8228_v9 = vpop.f32.mrf.mxu2 }
 0xa87   : > { %v8229_v49 = vadd.f32 %v8228_v9, %v8180_v41 }
 0xa8a   : > { %v8277_v48 = vpop.f32.mrf.mxu3  ;;  %v8291_v60 = vpop.f32.mrf.mxu0 }
 0xa8b   : > { %v8278_v47 = vadd.f32 %v8277_v48, %v8229_v49  ;;  %v8292_v11 = vadd.f32 %v8291_v60, %v14008_v40 }
 0xa8c   : > { %v8338_v52 = vpop.f32.mrf.mxu1 }
 0xa8d   : > { %8538 = vst [vmem:[%s13810_s21 + $0x1f0] sm:$0xff] %v8278_v47  ;;  %v8339_v18 = vadd.f32 %v8338_v52, %v8290_v42 }
 0xa8e   : > { %v8387_v51 = vpop.f32.mrf.mxu2 }
 0xa8f   : > { %v8388_v13 = vadd.f32 %v8387_v51, %v8339_v18 }
 0xa92   : > { %v8436_v20 = vpop.f32.mrf.mxu3  ;;  %v8294_v43 = vpop.f32.mrf.mxu0 }
 0xa93   : > { %v8437_v61 = vadd.f32 %v8436_v20, %v8388_v13  ;;  %v8295_v12 = vadd.f32 %v8294_v43, %v14008_v40 }
 0xa94   : > { %v8340_v4 = vpop.f32.mrf.mxu1 }
 0xa95   : > { %8479 = vst [vmem:[%s13810_s21 + $0x18] sm:$0xff] %v8437_v61  ;;  %v8341_v55 = vadd.f32 %v8340_v4, %v8292_v11 }
 0xa96   : > { %v8389_v15 = vpop.f32.mrf.mxu2 }
 0xa97   : > { %v8390_v62 = vadd.f32 %v8389_v15, %v8341_v55 }
 0xa9a   : > { %v8438_v32 = vpop.f32.mrf.mxu3  ;;  %v8296_v22 = vpop.f32.mrf.mxu0 }
 0xa9b   : > { %v8439_v30 = vadd.f32 %v8438_v32, %v8390_v62  ;;  %v8297_v26 = vadd.f32 %v8296_v22, %v14008_v40 }
 0xa9c   : > { %v8343_v50 = vpop.f32.mrf.mxu1 }
 0xa9d   : > { %8483 = vst [vmem:[%s13810_s21 + $0x38] sm:$0xff] %v8439_v30  ;;  %v8344_v57 = vadd.f32 %v8343_v50, %v8295_v12 }
 0xa9e   : > { %v8392_v29 = vpop.f32.mrf.mxu2 }
 0xa9f   : > { %v8393_v44 = vadd.f32 %v8392_v29, %v8344_v57 }
 0xaa2   : > { %v8441_v37 = vpop.f32.mrf.mxu3  ;;  %v8299_v14 = vpop.f32.mrf.mxu0 }
 0xaa3   : > { %v8442_v5 = vadd.f32 %v8441_v37, %v8393_v44  ;;  %v8300_v25 = vadd.f32 %v8299_v14, %v14008_v40 }
 0xaa4   : > { %v8345_v24 = vpop.f32.mrf.mxu1 }
 0xaa5   : > { %8487 = vst [vmem:[%s13810_s21 + $0x58] sm:$0xff] %v8442_v5  ;;  %v8346_v59 = vadd.f32 %v8345_v24, %v8297_v26 }
 0xaa6   : > { %v8394_v56 = vpop.f32.mrf.mxu2 }
 0xaa7   : > { %v8395_v31 = vadd.f32 %v8394_v56, %v8346_v59 }
 0xaaa   : > { %v8443_v3 = vpop.f32.mrf.mxu3  ;;  %v8301_v28 = vpop.f32.mrf.mxu0 }
 0xaab   : > { %v8444_v63 = vadd.f32 %v8443_v3, %v8395_v31  ;;  %v8302_v27 = vadd.f32 %v8301_v28, %v14008_v40 }
 0xaac   : > { %v8348_v54 = vpop.f32.mrf.mxu1 }
 0xaad   : > { %8491 = vst [vmem:[%s13810_s21 + $0x78] sm:$0xff] %v8444_v63  ;;  %v8349_v10 = vadd.f32 %v8348_v54, %v8300_v25 }
 0xaae   : > { %v8397_v45 = vpop.f32.mrf.mxu2 }
 0xaaf   : > { %v8398_v36 = vadd.f32 %v8397_v45, %v8349_v10 }
 0xab2   : > { %v8446_v6 = vpop.f32.mrf.mxu3  ;;  %v8304_v35 = vpop.f32.mrf.mxu0 }
 0xab3   : > { %v8447_v8 = vadd.f32 %v8446_v6, %v8398_v36  ;;  %v8305_v1 = vadd.f32 %v8304_v35, %v14008_v40 }
 0xab4   : > { %v8350_v39 = vpop.f32.mrf.mxu1 }
 0xab5   : > { %8495 = vst [vmem:[%s13810_s21 + $0x98] sm:$0xff] %v8447_v8  ;;  %v8351_v58 = vadd.f32 %v8350_v39, %v8302_v27 }
 0xab6   : > { %v8399_v21 = vpop.f32.mrf.mxu2 }
 0xab7   : > { %v8400_v7 = vadd.f32 %v8399_v21, %v8351_v58 }
 0xaba   : > { %v8448_v33 = vpop.f32.mrf.mxu3  ;;  %v8306_v38 = vpop.f32.mrf.mxu0 }
 0xabb   : > { %v8449_v53 = vadd.f32 %v8448_v33, %v8400_v7  ;;  %v8307_v17 = vadd.f32 %v8306_v38, %v14008_v40 }
 0xabc   : > { %v8353_v0 = vpop.f32.mrf.mxu1 }
 0xabd   : > { %8499 = vst [vmem:[%s13810_s21 + $0xb8] sm:$0xff] %v8449_v53  ;;  %v8354_v16 = vadd.f32 %v8353_v0, %v8305_v1 }
 0xabe   : > { %v8402_v34 = vpop.f32.mrf.mxu2 }
 0xabf   : > { %v8403_v19 = vadd.f32 %v8402_v34, %v8354_v16 }
 0xac2   : > { %v8451_v2 = vpop.f32.mrf.mxu3  ;;  %v8309_v23 = vpop.f32.mrf.mxu0 }
 0xac3   : > { %v8452_v46 = vadd.f32 %v8451_v2, %v8403_v19  ;;  %v8310_v52 = vadd.f32 %v8309_v23, %v14008_v40 }
 0xac4   : > { %v8355_v41 = vpop.f32.mrf.mxu1 }
 0xac5   : > { %8503 = vst [vmem:[%s13810_s21 + $0xd8] sm:$0xff] %v8452_v46  ;;  %v8356_v9 = vadd.f32 %v8355_v41, %v8307_v17 }
 0xac6   : > { %v8404_v49 = vpop.f32.mrf.mxu2 }
 0xac7   : > { %v8405_v48 = vadd.f32 %v8404_v49, %v8356_v9 }
 0xaca   : > { %v8453_v47 = vpop.f32.mrf.mxu3  ;;  %v8311_v42 = vpop.f32.mrf.mxu0 }
 0xacb   : > { %v8454_v60 = vadd.f32 %v8453_v47, %v8405_v48  ;;  %v8312_v4 = vadd.f32 %v8311_v42, %v14008_v40 }
 0xacc   : > { %v8358_v18 = vpop.f32.mrf.mxu1 }
 0xacd   : > { %8507 = vst [vmem:[%s13810_s21 + $0xf8] sm:$0xff] %v8454_v60  ;;  %v8359_v51 = vadd.f32 %v8358_v18, %v8310_v52 }
 0xace   : > { %v8407_v13 = vpop.f32.mrf.mxu2 }
 0xacf   : > { %v8408_v20 = vadd.f32 %v8407_v13, %v8359_v51 }
 0xad2   : > { %v8456_v61 = vpop.f32.mrf.mxu3  ;;  %v8314_v11 = vpop.f32.mrf.mxu0 }
 0xad3   : > { %v8457_v43 = vadd.f32 %v8456_v61, %v8408_v20  ;;  %v8315_v50 = vadd.f32 %v8314_v11, %v14008_v40 }
 0xad4   : > { %v8360_v55 = vpop.f32.mrf.mxu1 }
 0xad5   : > { %8511 = vst [vmem:[%s13810_s21 + $0x118] sm:$0xff] %v8457_v43  ;;  %v8361_v15 = vadd.f32 %v8360_v55, %v8312_v4 }
 0xad6   : > { %v8409_v62 = vpop.f32.mrf.mxu2 }
 0xad7   : > { %v8410_v32 = vadd.f32 %v8409_v62, %v8361_v15 }
 0xada   : > { %v8458_v30 = vpop.f32.mrf.mxu3  ;;  %v8316_v12 = vpop.f32.mrf.mxu0 }
 0xadb   : > { %v8459_v22 = vadd.f32 %v8458_v30, %v8410_v32  ;;  %v8317_v24 = vadd.f32 %v8316_v12, %v14008_v40 }
 0xadc   : > { %v8363_v57 = vpop.f32.mrf.mxu1 }
 0xadd   : > { %8515 = vst [vmem:[%s13810_s21 + $0x138] sm:$0xff] %v8459_v22  ;;  %v8364_v29 = vadd.f32 %v8363_v57, %v8315_v50 }
 0xade   : > { %v8412_v44 = vpop.f32.mrf.mxu2 }
 0xadf   : > { %v8413_v37 = vadd.f32 %v8412_v44, %v8364_v29 }
 0xae2   : > { %v8461_v5 = vpop.f32.mrf.mxu3  ;;  %v8319_v26 = vpop.f32.mrf.mxu0 }
 0xae3   : > { %v8462_v14 = vadd.f32 %v8461_v5, %v8413_v37  ;;  %v8320_v25 = vadd.f32 %v8319_v26, %v14008_v40 }
 0xae4   : > { %v8365_v59 = vpop.f32.mrf.mxu1 }
 0xae5   : > { %8519 = vst [vmem:[%s13810_s21 + $0x158] sm:$0xff] %v8462_v14  ;;  %v8366_v56 = vadd.f32 %v8365_v59, %v8317_v24 }
 0xae6   : > { %v8414_v31 = vpop.f32.mrf.mxu2 }
 0xae7   : > { %v8415_v3 = vadd.f32 %v8414_v31, %v8366_v56 }
 0xaea   : > { %v8463_v63 = vpop.f32.mrf.mxu3  ;;  %v8321_v54 = vpop.f32.mrf.mxu0 }
 0xaeb   : > { %v8464_v28 = vadd.f32 %v8463_v63, %v8415_v3  ;;  %v8322_v27 = vadd.f32 %v8321_v54, %v14008_v40 }
 0xaec   : > { %v8368_v10 = vpop.f32.mrf.mxu1 }
 0xaed   : > { %8523 = vst [vmem:[%s13810_s21 + $0x178] sm:$0xff] %v8464_v28  ;;  %v8369_v45 = vadd.f32 %v8368_v10, %v8320_v25 }
 0xaee   : > { %v8417_v36 = vpop.f32.mrf.mxu2 }
 0xaef   : > { %v8418_v6 = vadd.f32 %v8417_v36, %v8369_v45 }
 0xaf2   : > { %v8466_v8 = vpop.f32.mrf.mxu3  ;;  %v8324_v7 = vpop.f32.mrf.mxu0 }
 0xaf3   : > { %v8467_v35 = vadd.f32 %v8466_v8, %v8418_v6  ;;  %v8325_v1 = vadd.f32 %v8324_v7, %v14008_v40 }
 0xaf4   : > { %v8370_v39 = vpop.f32.mrf.mxu1 }
 0xaf5   : > { %8527 = vst [vmem:[%s13810_s21 + $0x198] sm:$0xff] %v8467_v35  ;;  %v8371_v58 = vadd.f32 %v8370_v39, %v8322_v27 }
 0xaf6   : > { %v8419_v21 = vpop.f32.mrf.mxu2 }
 0xaf7   : > { %v8420_v33 = vadd.f32 %v8419_v21, %v8371_v58 }
 0xafa   : > { %v8468_v53 = vpop.f32.mrf.mxu3  ;;  %v8326_v19 = vpop.f32.mrf.mxu0 }
 0xafb   : > { %v8469_v38 = vadd.f32 %v8468_v53, %v8420_v33  ;;  %v8327_v17 = vadd.f32 %v8326_v19, %v14008_v40 }
 0xafc   : > { %v8373_v0 = vpop.f32.mrf.mxu1 }
 0xafd   : > { %8531 = vst [vmem:[%s13810_s21 + $0x1b8] sm:$0xff] %v8469_v38  ;;  %v8374_v16 = vadd.f32 %v8373_v0, %v8325_v1 }
 0xafe   : > { %v8422_v34 = vpop.f32.mrf.mxu2 }
 0xaff   : > { %v8423_v2 = vadd.f32 %v8422_v34, %v8374_v16 }
 0xb02   : > { %v8471_v46 = vpop.f32.mrf.mxu3 }
 0xb03   : > { %v8472_v23 = vadd.f32 %v8471_v46, %v8423_v2 }
 0xb04   : > { %v8375_v41 = vpop.f32.mrf.mxu1 }
 0xb05   : > { %8535 = vst [vmem:[%s13810_s21 + $0x1d8] sm:$0xff] %v8472_v23  ;;  %v8376_v9 = vadd.f32 %v8375_v41, %v8327_v17 }
 0xb06   : > { %v8424_v49 = vpop.f32.mrf.mxu2 }
 0xb07   : > { %v8425_v48 = vadd.f32 %v8424_v49, %v8376_v9 }
 0xb0a   : > { %v8473_v47 = vpop.f32.mrf.mxu3 }
 0xb0b   : > { %v8474_v60 = vadd.f32 %v8473_v47, %v8425_v48 }
 0xb0d   : > { %8539 = vst [vmem:[%s13810_s21 + $0x1f8] sm:$0xff] %v8474_v60 }
 0xb0e   : > { %11889 = shalt.err (!%p11886_p10)
}
 0xb0f   : > { %s11947_s10 = smov 512   ;;  %s11948_s23 = smov 32  }
 0xb10   : > { %11414 = dma.vmem_to_hbm [thread:$0]  (%p12057_p7), %s8554_s20, 8192, %s8556_s27, %s8541_s19, %s11947_s10, %s11947_s10, %s11948_s23  }
 0xb11 PF: > { %s8570_s24 = sand.u32 1, %s11924_s15   ;;  %p14329_p12 = scmp.ge.s32.totalorder %s11936_s18, 2 }
 0xb12   : > { %s8571_s21 = scalar_lea.sflag [#allocation5], %s8570_s24 }
 0xb13   : > { %p11431_p13 = pnand %p14329_p12, %p12009_p6 }
 0xb15   : > { %p11432_p0 = pneg %p11431_p13 }
 0xb17   : > { %11919 = dma.done.wait (%p11432_p0), %s8571_s21, 8192  }
 0xb18   : > { %11921 = vsyncadd (%p11432_p0), %s8571_s21, 4294959104  ;;  %p19_p3 = scmp.ge.s32.totalorder %s12043_s25, 4   ;;  %s14330_s15 = smov %s11928_s16 }
 0xb19   : > { %s14331_s16 = smov %s11932_s17  ;;  %s14332_s17 = smov %s12053_s30 }
 0xb1a   : > { %s14333_s18 = smov %s12043_s25  ;;  %21 = sbr.rel (!%p19_p3) target bundleno = 7 (0x7), region = 93 }
 0xb1f   :  { %8577 = vsyncpa [#allocation4], 1 }
 0xb20   :  { %8579 = vsyncpa [#allocation4 + $0x1], 1 }
 0xb21   :  { %8580 = vsyncpa [#allocation7], 1 }
 0xb22   :  { %8581 = vsyncpa [#allocation10], 1 }
 0xb23   :  { %8582 = vsyncpa [#allocation5], 1 }
 0xb24   :  { %8584 = vsyncpa [#allocation5 + $0x1], 1 }

</bundles_post_ra>
